<compile_context>
chip_gen: v5e
topology: v5e:2x2
jax: 0.10.0
libtpu: 0.0.40
codegen_flags: <defaults>
</compile_context>

<pallas_src>
import math

import jax
import jax.numpy as jnp
from jax.experimental import pallas as pl
from jax.experimental.pallas import tpu as pltpu

# ----------------------------- configuration --------------------------------
IMG = 16                      # input image H = W
IN_CH = 3                     # RGB
PATCH = 4                     # ViT patch size
GRID = IMG // PATCH           # 4
T_IMG = GRID * GRID           # 16 image tokens
D = 32                        # shared embed dim (encoder out == decoder dim)
NH = 2                        # attention heads
DH = D // NH                  # 16
MLP_H = 64                    # transformer MLP hidden
C1 = 16                       # upscale stage-1 channels
C2 = 8                        # upscale stage-2 channels (mask feature dim)
NUM_MASK_TOKENS = 4           # 3 multimask + 1
N_OUT_TOK = 1 + NUM_MASK_TOKENS + 1   # iou + mask tokens + hq token = 6
N_SPARSE = 2                  # 1 point + 1 padding point
T_TOK = N_OUT_TOK + N_SPARSE  # 8 decoder tokens (multiple of 8 -> clean tiles)
HQ_IDX = 1 + NUM_MASK_TOKENS  # hq token index in the token sequence

# attention module ids (packed weights)
A_ENC, A_SELF, A_T2I, A_I2T, A_FINAL = range(5)
N_ATTN = 5
# layernorm ids (packed)
L_ENC1, L_ENC2, L_NECK, L_TW1, L_TW2, L_TW3, L_TW4, L_TWF = range(8)
N_LN = 8
# transformer MLP ids (packed)
M_ENC, M_TW = range(2)
N_MLP = 2

NEG_INF = -1e30


# ------------------------------ the megakernel -------------------------------
def _sam_megakernel(
    patches_ref, tokens_ref, enc_pos_ref, img_pe_ref,
    patch_w_ref, patch_b_ref,
    awq_ref, awk_ref, awv_ref, abq_ref, abk_ref, abv_ref, awo_ref, abo_ref,
    lng_ref, lnb_ref,
    mw1_ref, mb1_ref, mw2_ref, mb2_ref,
    neck_w_ref, neck_b_ref, no_mask_ref,
    up1w_ref, up1b_ref, up1g_ref, up1bta_ref, a1avg_ref,
    w2big_ref, b2big_ref, vitw_ref, vitb_ref,
    hyp_w1_ref, hyp_b1_ref, hyp_w2_ref, hyp_b2_ref,
    sel_ref, tilemat_ref, ssum_ref,
    mask_enc_ref, mask_self_ref, mask_t2i_ref, mask_i2t_ref,
    out_ref,
):
    f32 = jnp.float32
    scale = 1.0 / math.sqrt(DH)

    def ln(x, g, b, eps=1e-6):
        mu = jnp.mean(x, axis=-1, keepdims=True)
        var = jnp.mean(jnp.square(x - mu), axis=-1, keepdims=True)
        return (x - mu) * jax.lax.rsqrt(var + eps) * g + b

    def ln_i(i, x):
        return ln(x, lng_ref[i], lnb_ref[i])

    def gelu(x):
        return jax.nn.gelu(x, approximate=True)

    def mlp_i(i, x):
        h = jnp.dot(x, mw1_ref[i], preferred_element_type=f32) + mb1_ref[i]
        h = gelu(h)
        return jnp.dot(h, mw2_ref[i], preferred_element_type=f32) + mb2_ref[i]

    def softmax(s):
        s = s - jnp.max(s, axis=-1, keepdims=True)
        e = jnp.exp(s)
        return e * pl.reciprocal(jnp.sum(e, axis=-1, keepdims=True), approx=True)

    def attn(a, q_in, k_in, v_in, mask):
        # q_in: (Mq, D), k_in/v_in: (Mk, D).  `mask` is a block-diagonal bias
        # (-1e30 across batches) so one 2-D matmul does all batches at once.
        acc = None
        for h in range(NH):
            i = a * NH + h
            qh = jnp.dot(q_in, awq_ref[i], preferred_element_type=f32) + abq_ref[i]
            kh = jnp.dot(k_in, awk_ref[i], preferred_element_type=f32) + abk_ref[i]
            vh = jnp.dot(v_in, awv_ref[i], preferred_element_type=f32) + abv_ref[i]
            s = jax.lax.dot_general(qh, kh, (((1,), (1,)), ((), ())),
                                    preferred_element_type=f32) * scale + mask
            p = softmax(s)
            oh = jnp.dot(p, vh, preferred_element_type=f32)
            c = jnp.dot(oh, awo_ref[i], preferred_element_type=f32)
            acc = c if acc is None else acc + c
        return acc + abo_ref[a]

    # ---------------- image encoder (pixel norm folded into patch weights) ----
    tok = (jnp.dot(patches_ref[...], patch_w_ref[...], preferred_element_type=f32)
           + patch_b_ref[...] + enc_pos_ref[...])                    # (B*T_IMG, D)
    # TODO(synk): real ImageEncoderViT has many blocks with windowed attention
    # and relative position bias; a single global-attention block is used here.
    h = ln_i(L_ENC1, tok)
    tok = tok + attn(A_ENC, h, h, h, mask_enc_ref[...])
    h = ln_i(L_ENC2, tok)
    tok = tok + mlp_i(M_ENC, h)
    interm = tok                                   # intermediate ViT feature (HQ path)
    neck = jnp.dot(tok, neck_w_ref[...], preferred_element_type=f32) + neck_b_ref[...]
    img_emb = ln_i(L_NECK, neck)                   # (B*T_IMG, D)

    # ---------------- two-way transformer decoder -----------------------------
    src = img_emb + no_mask_ref[...]               # dense prompt = no-mask embedding
    pos = img_pe_ref[...]
    q0 = tokens_ref[...]                           # initial tokens double as query_pe

    # TODO(synk): real TwoWayTransformer has depth=2 and cross-attn downsample.
    q = attn(A_SELF, q0, q0, q0, mask_self_ref[...])     # skip_first_layer_pe
    q = ln_i(L_TW1, q)
    a = attn(A_T2I, q + q0, src + pos, src, mask_t2i_ref[...])
    q = ln_i(L_TW2, q + a)
    m = mlp_i(M_TW, q)
    q = ln_i(L_TW3, q + m)
    a = attn(A_I2T, src + pos, q + q0, q, mask_i2t_ref[...])
    src = ln_i(L_TW4, src + a)
    a = attn(A_FINAL, q + q0, src + pos, src, mask_t2i_ref[...])
    q = ln_i(L_TWF, q + a)                          # (B*T_TOK, D)

    # ---------------- hypernetwork on the HQ token ----------------------------
    # Run the tiny MLP on all tokens; pick the HQ-token row per batch with a
    # constant selector matmul (no gathers / row stacking needed).
    hh = jnp.dot(q, hyp_w1_ref[...], preferred_element_type=f32) + hyp_b1_ref[...]
    hh = gelu(hh)
    hyper_all = jnp.dot(hh, hyp_w2_ref[...], preferred_element_type=f32) + hyp_b2_ref[...]
    hyper_rows = jnp.dot(sel_ref[...], hyper_all, preferred_element_type=f32)  # (B*T_IMG, C2)
    hyper_tiled = jnp.dot(hyper_rows, tilemat_ref[...],
                          preferred_element_type=f32)                # (B*T_IMG, 16*C2)

    # ---------------- upscale (k=2,s=2 conv-transposes) + HQ + mask head ------
    # Stage 1: all 4 coarse sub-pixels at once (lane-dense 64-wide).
    a1 = jnp.dot(src, up1w_ref[...], preferred_element_type=f32) + up1b_ref[...]
    mu = jnp.dot(a1, a1avg_ref[...], preferred_element_type=f32)     # per-block mean
    d = a1 - mu
    var = jnp.dot(d * d, a1avg_ref[...], preferred_element_type=f32)
    a1 = gelu(d * jax.lax.rsqrt(var + 1e-6) * up1g_ref[...] + up1bta_ref[...])

    # Stage 2 + HQ ViT feature: all 16 fine sub-pixels at once (128-wide).
    h2 = gelu(jnp.dot(a1, w2big_ref[...], preferred_element_type=f32) + b2big_ref[...])
    hq = jnp.dot(interm, vitw_ref[...], preferred_element_type=f32) + vitb_ref[...]
    u = h2 + hq                                                       # (B*T_IMG, 16*C2)

    # mask[row, f] = sum_c u[row, f*C2+c] * hyper[row, c]  (single matmul)
    out_ref[...] = jnp.dot(u * hyper_tiled, ssum_ref[...],
                           preferred_element_type=f32)                # (B*T_IMG, 16)


# ------------------------------- JAX wrapper ----------------------------------
def _pe_encoding(coords01, gauss):
    c = 2.0 * coords01 - 1.0
    proj = (c @ gauss) * (2.0 * jnp.pi)
    return jnp.concatenate([jnp.sin(proj), jnp.cos(proj)], axis=-1)


def _block_bias(tq, tk, batch):
    qb = jnp.arange(batch * tq) // tq
    kb = jnp.arange(batch * tk) // tk
    return jnp.where(qb[:, None] == kb[None, :], 0.0, NEG_INF).astype(jnp.float32)


@jax.jit
def scratch_sam_forward(p, images, point_coords, point_labels):
    """images: (B, 3, IMG, IMG) NCHW float32; returns masks (B, 1, 4*GRID, 4*GRID)."""
    B = images.shape[0]

    # fold (x - mean)/std into the patch-embed linear (affine followed by linear)
    mean_r = jnp.repeat(p["pixel_mean"], PATCH * PATCH)            # (48,)
    std_r = jnp.repeat(p["pixel_std"], PATCH * PATCH)
    patch_w = p["patch_w"] / std_r[:, None]
    patch_b = (p["patch_b"] - (mean_r / std_r) @ p["patch_w"]).reshape(1, D)
    # TODO(synk): the noise-injection branch of ScratchSam.preprocess (noise != None)
    # is a training-time perturbation path and is not implemented (noise is None).

    # patch extraction (pure layout plumbing -> wrapper/XLA side)
    xp = images.reshape(B, IN_CH, GRID, PATCH, GRID, PATCH)
    xp = xp.transpose(0, 2, 4, 1, 3, 5).reshape(B * T_IMG, IN_CH * PATCH * PATCH)

    # prompt encoder (points only; 2 tokens per image -> plain JAX, negligible)
    pad_c = jnp.zeros((B, 1, 2), jnp.float32)
    pad_l = -jnp.ones((B, 1), jnp.int32)
    coords = jnp.concatenate([point_coords, pad_c], axis=1) + 0.5   # pixel-center shift
    labels = jnp.concatenate([point_labels, pad_l], axis=1)
    pe = _pe_encoding(coords / IMG, p["pe_gauss"])                  # (B, 2, D)
    is_pad = (labels == -1)[..., None]
    is_pos = (labels == 1)[..., None]
    pe = jnp.where(is_pad, 0.0, pe)
    add = jnp.where(is_pad, p["not_a_point"],
                    jnp.where(is_pos, p["point_embed_pos"], p["point_embed_neg"]))
    sparse = pe + add                                               # (B, 2, D)

    # dense positional encoding over the image grid
    xs = (jnp.arange(GRID, dtype=jnp.float32) + 0.5) / GRID
    gx, gy = jnp.meshgrid(xs, xs, indexing="xy")
    grid01 = jnp.stack([gx, gy], axis=-1).reshape(T_IMG, 2)
    img_pe = _pe_encoding(grid01, p["pe_gauss"])                    # (T_IMG, D)
    img_pe_t = jnp.tile(img_pe, (B, 1))                             # (B*T_IMG, D)
    enc_pos_t = jnp.tile(p["pos_embed"], (B, 1))                    # (B*T_IMG, D)

    # decoder tokens: [iou, mask tokens, hq token] + sparse prompt tokens
    out_tok = jnp.concatenate([p["iou_token"], p["mask_tokens"], p["hf_token"]], axis=0)
    tokens = jnp.concatenate(
        [jnp.broadcast_to(out_tok[None], (B, N_OUT_TOK, D)), sparse], axis=1
    ).reshape(B * T_TOK, D)

    # ---- constant matrices: HQ-token selector, block-LN averaging, tiling/sum
    rb = jnp.arange(B * T_IMG) // T_IMG
    cb = jnp.arange(B * T_TOK) // T_TOK
    ct = jnp.arange(B * T_TOK) % T_TOK
    sel = ((rb[:, None] == cb[None, :]) & (ct[None, :] == HQ_IDX)).astype(jnp.float32)

    blk = jnp.arange(4 * C1) // C1
    a1_avg = (blk[:, None] == blk[None, :]).astype(jnp.float32) / C1        # (64, 64)
    tile_mat = jnp.tile(jnp.eye(C2, dtype=jnp.float32), (1, 16))            # (C2, 128)
    s_sum = jnp.repeat(jnp.eye(16, dtype=jnp.float32), C2, axis=0)          # (128, 16)

    # ---- pack conv-transpose / HQ weights into lane-dense block matrices ----
    up1w_cat = p["up1_w"].transpose(1, 0, 2).reshape(D, 4 * C1)             # (D, 64)
    up1b_cat = p["up1_b"].reshape(1, 4 * C1)
    up1g_cat = jnp.tile(p["up1_lng"], (1, 4))                               # (1, 64)
    up1bta_cat = jnp.tile(p["up1_lnb"], (1, 4))

    w2_big = jnp.zeros((4 * C1, 16 * C2), jnp.float32)                      # (64, 128)
    for s in range(4):
        for s2 in range(4):
            f = s * 4 + s2
            w2_big = w2_big.at[s * C1:(s + 1) * C1, f * C2:(f + 1) * C2].set(
                p["up2_w"][s2])
    b2_big = jnp.concatenate([p["up2_b"][f % 4] for f in range(16)], axis=-1)  # (1, 128)

    vitw_cat = p["vit_w"].transpose(1, 0, 2).reshape(D, 16 * C2)            # (D, 128)
    vitb_cat = p["vit_b"].reshape(1, 16 * C2)

    # block-diagonal attention biases (constant-folded by XLA)
    mask_enc = _block_bias(T_IMG, T_IMG, B)
    mask_self = _block_bias(T_TOK, T_TOK, B)
    mask_t2i = _block_bias(T_TOK, T_IMG, B)
    mask_i2t = _block_bias(T_IMG, T_TOK, B)

    inputs = [
        xp, tokens, enc_pos_t, img_pe_t,
        patch_w, patch_b,
        p["awq"], p["awk"], p["awv"], p["abq"], p["abk"], p["abv"], p["awo"], p["abo"],
        p["lng"], p["lnb"],
        p["mw1"], p["mb1"], p["mw2"], p["mb2"],
        p["neck_w"], p["neck_b"], p["no_mask_embed"],
        up1w_cat, up1b_cat, up1g_cat, up1bta_cat, a1_avg,
        w2_big, b2_big, vitw_cat, vitb_cat,
        p["hyper_w1"], p["hyper_b1"], p["hyper_w2"], p["hyper_b2"],
        sel, tile_mat, s_sum,
        mask_enc, mask_self, mask_t2i, mask_i2t,
    ]
    vmem = pltpu.MemorySpace.VMEM
    out = pl.pallas_call(
        _sam_megakernel,
        out_shape=jax.ShapeDtypeStruct((B * T_IMG, 16), jnp.float32),
        in_specs=[pl.BlockSpec(memory_space=vmem) for _ in inputs],
        out_specs=pl.BlockSpec(memory_space=vmem),
    )(*inputs)

    # (b, gy, gx, dy1, dx1, dy2, dx2) -> standard NCHW raster (tiny, wrapper side)
    out = out.reshape(B, GRID, GRID, 2, 2, 2, 2).transpose(0, 1, 3, 5, 2, 4, 6)
    return out.reshape(B, 1, 4 * GRID, 4 * GRID)
    # TODO(synk): postprocess_masks (bilinear F.interpolate) is not part of forward().


# ------------------------------- parameters ----------------------------------
def _init(key, shape, scale=0.02):
    return scale * jax.random.normal(key, shape, dtype=jnp.float32)


def init_params(key):
    keys = iter(jax.random.split(key, 48))
    p = {}
    p["pixel_mean"] = jnp.array([0.485, 0.456, 0.406], jnp.float32)
    p["pixel_std"] = jnp.array([0.229, 0.224, 0.225], jnp.float32)
    # image encoder
    p["patch_w"] = _init(next(keys), (IN_CH * PATCH * PATCH, D))
    p["patch_b"] = jnp.zeros((D,), jnp.float32)
    p["pos_embed"] = _init(next(keys), (T_IMG, D))
    p["neck_w"] = _init(next(keys), (D, D))
    p["neck_b"] = jnp.zeros((1, D), jnp.float32)
    # packed per-head attention weights: modules [enc, self, t2i, i2t, final] x heads
    p["awq"] = _init(next(keys), (N_ATTN * NH, D, DH))
    p["awk"] = _init(next(keys), (N_ATTN * NH, D, DH))
    p["awv"] = _init(next(keys), (N_ATTN * NH, D, DH))
    p["abq"] = jnp.zeros((N_ATTN * NH, 1, DH), jnp.float32)
    p["abk"] = jnp.zeros((N_ATTN * NH, 1, DH), jnp.float32)
    p["abv"] = jnp.zeros((N_ATTN * NH, 1, DH), jnp.float32)
    p["awo"] = _init(next(keys), (N_ATTN * NH, DH, D))
    p["abo"] = jnp.zeros((N_ATTN, 1, D), jnp.float32)
    # packed layernorms (all D-wide LNs)
    p["lng"] = jnp.ones((N_LN, 1, D), jnp.float32)
    p["lnb"] = jnp.zeros((N_LN, 1, D), jnp.float32)
    # packed transformer MLPs: [encoder, two-way]
    p["mw1"] = _init(next(keys), (N_MLP, D, MLP_H))
    p["mb1"] = jnp.zeros((N_MLP, 1, MLP_H), jnp.float32)
    p["mw2"] = _init(next(keys), (N_MLP, MLP_H, D))
    p["mb2"] = jnp.zeros((N_MLP, 1, D), jnp.float32)
    # prompt encoder
    p["pe_gauss"] = jax.random.normal(next(keys), (2, D // 2), jnp.float32)
    p["point_embed_pos"] = _init(next(keys), (D,))
    p["point_embed_neg"] = _init(next(keys), (D,))
    p["not_a_point"] = _init(next(keys), (D,))
    p["no_mask_embed"] = _init(next(keys), (1, D))
    # mask decoder tokens
    p["iou_token"] = _init(next(keys), (1, D))
    p["mask_tokens"] = _init(next(keys), (NUM_MASK_TOKENS, D))
    p["hf_token"] = _init(next(keys), (1, D))
    # upscale path: ConvTranspose2d(k=2, s=2) stored per output sub-pixel
    p["up1_w"] = _init(next(keys), (4, D, C1))
    p["up1_b"] = jnp.zeros((4, 1, C1), jnp.float32)
    p["up1_lng"] = jnp.ones((1, C1), jnp.float32)
    p["up1_lnb"] = jnp.zeros((1, C1), jnp.float32)
    p["up2_w"] = _init(next(keys), (4, C1, C2))
    p["up2_b"] = jnp.zeros((4, 1, C2), jnp.float32)
    # HQ feature 4x upsample from the intermediate ViT embedding, per fine sub-pixel
    p["vit_w"] = _init(next(keys), (16, D, C2))
    p["vit_b"] = jnp.zeros((16, 1, C2), jnp.float32)
    # hypernetwork MLP on the HQ token
    p["hyper_w1"] = _init(next(keys), (D, D))
    p["hyper_b1"] = jnp.zeros((1, D), jnp.float32)
    p["hyper_w2"] = _init(next(keys), (D, C2))
    p["hyper_b2"] = jnp.zeros((1, C2), jnp.float32)
    return p


# ---------------------------------- main --------------------------------------
if __name__ == "__main__":
    key = jax.random.PRNGKey(0)
    k_img, k_pts, k_par = jax.random.split(key, 3)
    params = init_params(k_par)

    B = 2
    images = jax.random.uniform(k_img, (B, IN_CH, IMG, IMG), jnp.float32)        # NCHW
    point_coords = jax.random.uniform(k_pts, (B, 1, 2), jnp.float32, 0.0, float(IMG))
    point_labels = jnp.ones((B, 1), jnp.int32)

    out = scratch_sam_forward(params, images, point_coords, point_labels)
    out = jax.block_until_ready(out)
    assert out.shape == (B, 1, 4 * GRID, 4 * GRID), out.shape
    assert bool(jnp.all(jnp.isfinite(out)))
    print("KERNEL_OK")
</pallas_src>

<mosaic_0001>
module attributes {stable_mosaic.version = 11 : i64} {
  func.func @_sam_megakernel(%arg0: memref<32x48xf32, #tpu.memory_space<vmem>>, %arg1: memref<16x32xf32, #tpu.memory_space<vmem>>, %arg2: memref<32x32xf32, #tpu.memory_space<vmem>>, %arg3: memref<32x32xf32, #tpu.memory_space<vmem>>, %arg4: memref<48x32xf32, #tpu.memory_space<vmem>>, %arg5: memref<1x32xf32, #tpu.memory_space<vmem>>, %arg6: memref<10x32x16xf32, #tpu.memory_space<vmem>>, %arg7: memref<10x32x16xf32, #tpu.memory_space<vmem>>, %arg8: memref<10x32x16xf32, #tpu.memory_space<vmem>>, %arg9: memref<10x1x16xf32, #tpu.memory_space<vmem>>, %arg10: memref<10x1x16xf32, #tpu.memory_space<vmem>>, %arg11: memref<10x1x16xf32, #tpu.memory_space<vmem>>, %arg12: memref<10x16x32xf32, #tpu.memory_space<vmem>>, %arg13: memref<5x1x32xf32, #tpu.memory_space<vmem>>, %arg14: memref<8x1x32xf32, #tpu.memory_space<vmem>>, %arg15: memref<8x1x32xf32, #tpu.memory_space<vmem>>, %arg16: memref<2x32x64xf32, #tpu.memory_space<vmem>>, %arg17: memref<2x1x64xf32, #tpu.memory_space<vmem>>, %arg18: memref<2x64x32xf32, #tpu.memory_space<vmem>>, %arg19: memref<2x1x32xf32, #tpu.memory_space<vmem>>, %arg20: memref<32x32xf32, #tpu.memory_space<vmem>>, %arg21: memref<1x32xf32, #tpu.memory_space<vmem>>, %arg22: memref<1x32xf32, #tpu.memory_space<vmem>>, %arg23: memref<32x64xf32, #tpu.memory_space<vmem>>, %arg24: memref<1x64xf32, #tpu.memory_space<vmem>>, %arg25: memref<1x64xf32, #tpu.memory_space<vmem>>, %arg26: memref<1x64xf32, #tpu.memory_space<vmem>>, %arg27: memref<64x64xf32, #tpu.memory_space<vmem>>, %arg28: memref<64x128xf32, #tpu.memory_space<vmem>>, %arg29: memref<1x128xf32, #tpu.memory_space<vmem>>, %arg30: memref<32x128xf32, #tpu.memory_space<vmem>>, %arg31: memref<1x128xf32, #tpu.memory_space<vmem>>, %arg32: memref<32x32xf32, #tpu.memory_space<vmem>>, %arg33: memref<1x32xf32, #tpu.memory_space<vmem>>, %arg34: memref<32x8xf32, #tpu.memory_space<vmem>>, %arg35: memref<1x8xf32, #tpu.memory_space<vmem>>, %arg36: memref<32x16xf32, #tpu.memory_space<vmem>>, %arg37: memref<8x128xf32, #tpu.memory_space<vmem>>, %arg38: memref<128x16xf32, #tpu.memory_space<vmem>>, %arg39: memref<32x32xf32, #tpu.memory_space<vmem>>, %arg40: memref<16x16xf32, #tpu.memory_space<vmem>>, %arg41: memref<16x32xf32, #tpu.memory_space<vmem>>, %arg42: memref<32x16xf32, #tpu.memory_space<vmem>>, %arg43: memref<32x16xf32, #tpu.memory_space<vmem>>) attributes {dimension_semantics = [], scalar_prefetch = 0 : i64, scratch_operands = 0 : i64, tpu.core_type = #tpu.core_type<tc>} {
    %c0 = arith.constant 0 : index
    %c0_0 = arith.constant 0 : index
    %0 = vector.load %arg0[%c0, %c0_0] : memref<32x48xf32, #tpu.memory_space<vmem>>, vector<32x48xf32>
    %c0_1 = arith.constant 0 : index
    %c0_2 = arith.constant 0 : index
    %1 = vector.load %arg4[%c0_1, %c0_2] : memref<48x32xf32, #tpu.memory_space<vmem>>, vector<48x32xf32>
    %cst = arith.constant dense<0.000000e+00> : vector<32x32xf32>
    %2 = tpu.matmul %0, %1, %cst {dimension_numbers = #tpu.dot_dimension_numbers<[1], [0], [0], [1], [0, 0, 1, 1], [], []>} : vector<32x48xf32>, vector<48x32xf32>, vector<32x32xf32> -> vector<32x32xf32>
    %c0_3 = arith.constant 0 : index
    %c0_4 = arith.constant 0 : index
    %3 = vector.load %arg5[%c0_3, %c0_4] : memref<1x32xf32, #tpu.memory_space<vmem>>, vector<1x32xf32>
    %4 = vector.broadcast %3 : vector<1x32xf32> to vector<32x32xf32>
    %5 = arith.addf %2, %4 : vector<32x32xf32>
    %c0_5 = arith.constant 0 : index
    %c0_6 = arith.constant 0 : index
    %6 = vector.load %arg2[%c0_5, %c0_6] : memref<32x32xf32, #tpu.memory_space<vmem>>, vector<32x32xf32>
    %7 = arith.addf %5, %6 : vector<32x32xf32>
    %c0_7 = arith.constant 0 : index
    %c0_8 = arith.constant 0 : index
    %c0_9 = arith.constant 0 : index
    %8 = vector.load %arg14[%c0_7, %c0_8, %c0_9] : memref<8x1x32xf32, #tpu.memory_space<vmem>>, vector<1x1x32xf32>
    %9 = vector.shape_cast %8 : vector<1x1x32xf32> to vector<1x32xf32>
    %c0_10 = arith.constant 0 : index
    %c0_11 = arith.constant 0 : index
    %c0_12 = arith.constant 0 : index
    %10 = vector.load %arg15[%c0_10, %c0_11, %c0_12] : memref<8x1x32xf32, #tpu.memory_space<vmem>>, vector<1x1x32xf32>
    %11 = vector.shape_cast %10 : vector<1x1x32xf32> to vector<1x32xf32>
    %cst_13 = arith.constant dense<0.000000e+00> : vector<32xf32>
    %12 = vector.multi_reduction <add>, %7, %cst_13 [1] : vector<32x32xf32> to vector<32xf32>
    %13 = vector.shape_cast %12 : vector<32xf32> to vector<32x1xf32>
    %cst_14 = arith.constant 3.200000e+01 : f32
    %14 = vector.broadcast %cst_14 : f32 to vector<32x1xf32>
    %15 = arith.divf %13, %14 : vector<32x1xf32>
    %16 = vector.broadcast %15 : vector<32x1xf32> to vector<32x32xf32>
    %17 = arith.subf %7, %16 : vector<32x32xf32>
    %18 = arith.mulf %17, %17 : vector<32x32xf32>
    %cst_15 = arith.constant dense<0.000000e+00> : vector<32xf32>
    %19 = vector.multi_reduction <add>, %18, %cst_15 [1] : vector<32x32xf32> to vector<32xf32>
    %20 = vector.shape_cast %19 : vector<32xf32> to vector<32x1xf32>
    %cst_16 = arith.constant 3.200000e+01 : f32
    %21 = vector.broadcast %cst_16 : f32 to vector<32x1xf32>
    %22 = arith.divf %20, %21 : vector<32x1xf32>
    %23 = vector.broadcast %15 : vector<32x1xf32> to vector<32x32xf32>
    %24 = arith.subf %7, %23 : vector<32x32xf32>
    %cst_17 = arith.constant 9.99999997E-7 : f32
    %25 = vector.broadcast %cst_17 : f32 to vector<32x1xf32>
    %26 = arith.addf %22, %25 : vector<32x1xf32>
    %27 = math.rsqrt %26 : vector<32x1xf32>
    %28 = vector.broadcast %27 : vector<32x1xf32> to vector<32x32xf32>
    %29 = arith.mulf %24, %28 : vector<32x32xf32>
    %30 = vector.broadcast %9 : vector<1x32xf32> to vector<32x32xf32>
    %31 = arith.mulf %29, %30 : vector<32x32xf32>
    %32 = vector.broadcast %11 : vector<1x32xf32> to vector<32x32xf32>
    %33 = arith.addf %31, %32 : vector<32x32xf32>
    %c0_18 = arith.constant 0 : index
    %c0_19 = arith.constant 0 : index
    %34 = vector.load %arg39[%c0_18, %c0_19] : memref<32x32xf32, #tpu.memory_space<vmem>>, vector<32x32xf32>
    %c0_20 = arith.constant 0 : index
    %c0_21 = arith.constant 0 : index
    %c0_22 = arith.constant 0 : index
    %35 = vector.load %arg6[%c0_20, %c0_21, %c0_22] : memref<10x32x16xf32, #tpu.memory_space<vmem>>, vector<1x32x16xf32>
    %36 = vector.shape_cast %35 : vector<1x32x16xf32> to vector<32x16xf32>
    %cst_23 = arith.constant dense<0.000000e+00> : vector<32x16xf32>
    %37 = tpu.matmul %33, %36, %cst_23 {dimension_numbers = #tpu.dot_dimension_numbers<[1], [0], [0], [1], [0, 0, 1, 1], [], []>} : vector<32x32xf32>, vector<32x16xf32>, vector<32x16xf32> -> vector<32x16xf32>
    %c0_24 = arith.constant 0 : index
    %c0_25 = arith.constant 0 : index
    %c0_26 = arith.constant 0 : index
    %38 = vector.load %arg9[%c0_24, %c0_25, %c0_26] : memref<10x1x16xf32, #tpu.memory_space<vmem>>, vector<1x1x16xf32>
    %39 = vector.shape_cast %38 : vector<1x1x16xf32> to vector<1x16xf32>
    %40 = vector.broadcast %39 : vector<1x16xf32> to vector<32x16xf32>
    %41 = arith.addf %37, %40 : vector<32x16xf32>
    %c0_27 = arith.constant 0 : index
    %c0_28 = arith.constant 0 : index
    %c0_29 = arith.constant 0 : index
    %42 = vector.load %arg7[%c0_27, %c0_28, %c0_29] : memref<10x32x16xf32, #tpu.memory_space<vmem>>, vector<1x32x16xf32>
    %43 = vector.shape_cast %42 : vector<1x32x16xf32> to vector<32x16xf32>
    %cst_30 = arith.constant dense<0.000000e+00> : vector<32x16xf32>
    %44 = tpu.matmul %33, %43, %cst_30 {dimension_numbers = #tpu.dot_dimension_numbers<[1], [0], [0], [1], [0, 0, 1, 1], [], []>} : vector<32x32xf32>, vector<32x16xf32>, vector<32x16xf32> -> vector<32x16xf32>
    %c0_31 = arith.constant 0 : index
    %c0_32 = arith.constant 0 : index
    %c0_33 = arith.constant 0 : index
    %45 = vector.load %arg10[%c0_31, %c0_32, %c0_33] : memref<10x1x16xf32, #tpu.memory_space<vmem>>, vector<1x1x16xf32>
    %46 = vector.shape_cast %45 : vector<1x1x16xf32> to vector<1x16xf32>
    %47 = vector.broadcast %46 : vector<1x16xf32> to vector<32x16xf32>
    %48 = arith.addf %44, %47 : vector<32x16xf32>
    %c0_34 = arith.constant 0 : index
    %c0_35 = arith.constant 0 : index
    %c0_36 = arith.constant 0 : index
    %49 = vector.load %arg8[%c0_34, %c0_35, %c0_36] : memref<10x32x16xf32, #tpu.memory_space<vmem>>, vector<1x32x16xf32>
    %50 = vector.shape_cast %49 : vector<1x32x16xf32> to vector<32x16xf32>
    %cst_37 = arith.constant dense<0.000000e+00> : vector<32x16xf32>
    %51 = tpu.matmul %33, %50, %cst_37 {dimension_numbers = #tpu.dot_dimension_numbers<[1], [0], [0], [1], [0, 0, 1, 1], [], []>} : vector<32x32xf32>, vector<32x16xf32>, vector<32x16xf32> -> vector<32x16xf32>
    %c0_38 = arith.constant 0 : index
    %c0_39 = arith.constant 0 : index
    %c0_40 = arith.constant 0 : index
    %52 = vector.load %arg11[%c0_38, %c0_39, %c0_40] : memref<10x1x16xf32, #tpu.memory_space<vmem>>, vector<1x1x16xf32>
    %53 = vector.shape_cast %52 : vector<1x1x16xf32> to vector<1x16xf32>
    %54 = vector.broadcast %53 : vector<1x16xf32> to vector<32x16xf32>
    %55 = arith.addf %51, %54 : vector<32x16xf32>
    %cst_41 = arith.constant dense<0.000000e+00> : vector<32x32xf32>
    %56 = tpu.matmul %41, %48, %cst_41 {dimension_numbers = #tpu.dot_dimension_numbers<[1], [1], [0], [0], [0, 0, 1, 0], [], []>} : vector<32x16xf32>, vector<32x16xf32>, vector<32x32xf32> -> vector<32x32xf32>
    %cst_42 = arith.constant 2.500000e-01 : f32
    %57 = vector.broadcast %cst_42 : f32 to vector<32x32xf32>
    %58 = arith.mulf %56, %57 : vector<32x32xf32>
    %59 = arith.addf %58, %34 : vector<32x32xf32>
    %cst_43 = arith.constant dense<0xFF800000> : vector<32xf32>
    %60 = vector.multi_reduction <maximumf>, %59, %cst_43 [1] : vector<32x32xf32> to vector<32xf32>
    %61 = vector.shape_cast %60 : vector<32xf32> to vector<32x1xf32>
    %62 = vector.broadcast %61 : vector<32x1xf32> to vector<32x32xf32>
    %63 = arith.subf %59, %62 : vector<32x32xf32>
    %64 = math.exp %63 : vector<32x32xf32>
    %cst_44 = arith.constant dense<0.000000e+00> : vector<32xf32>
    %65 = vector.multi_reduction <add>, %64, %cst_44 [1] : vector<32x32xf32> to vector<32xf32>
    %66 = vector.shape_cast %65 : vector<32xf32> to vector<32x1xf32>
    %67 = tpu.reciprocal %66 {approx = true} : vector<32x1xf32> -> vector<32x1xf32>
    %68 = vector.broadcast %67 : vector<32x1xf32> to vector<32x32xf32>
    %69 = arith.mulf %64, %68 : vector<32x32xf32>
    %cst_45 = arith.constant dense<0.000000e+00> : vector<32x16xf32>
    %70 = tpu.matmul %69, %55, %cst_45 {dimension_numbers = #tpu.dot_dimension_numbers<[1], [0], [0], [1], [0, 0, 1, 1], [], []>} : vector<32x32xf32>, vector<32x16xf32>, vector<32x16xf32> -> vector<32x16xf32>
    %c0_46 = arith.constant 0 : index
    %c0_47 = arith.constant 0 : index
    %c0_48 = arith.constant 0 : index
    %71 = vector.load %arg12[%c0_46, %c0_47, %c0_48] : memref<10x16x32xf32, #tpu.memory_space<vmem>>, vector<1x16x32xf32>
    %72 = vector.shape_cast %71 : vector<1x16x32xf32> to vector<16x32xf32>
    %cst_49 = arith.constant dense<0.000000e+00> : vector<32x32xf32>
    %73 = tpu.matmul %70, %72, %cst_49 {dimension_numbers = #tpu.dot_dimension_numbers<[1], [0], [0], [1], [0, 0, 1, 1], [], []>} : vector<32x16xf32>, vector<16x32xf32>, vector<32x32xf32> -> vector<32x32xf32>
    %c1 = arith.constant 1 : index
    %c0_50 = arith.constant 0 : index
    %c0_51 = arith.constant 0 : index
    %74 = vector.load %arg6[%c1, %c0_50, %c0_51] : memref<10x32x16xf32, #tpu.memory_space<vmem>>, vector<1x32x16xf32>
    %75 = vector.shape_cast %74 : vector<1x32x16xf32> to vector<32x16xf32>
    %cst_52 = arith.constant dense<0.000000e+00> : vector<32x16xf32>
    %76 = tpu.matmul %33, %75, %cst_52 {dimension_numbers = #tpu.dot_dimension_numbers<[1], [0], [0], [1], [0, 0, 1, 1], [], []>} : vector<32x32xf32>, vector<32x16xf32>, vector<32x16xf32> -> vector<32x16xf32>
    %c1_53 = arith.constant 1 : index
    %c0_54 = arith.constant 0 : index
    %c0_55 = arith.constant 0 : index
    %77 = vector.load %arg9[%c1_53, %c0_54, %c0_55] : memref<10x1x16xf32, #tpu.memory_space<vmem>>, vector<1x1x16xf32>
    %78 = vector.shape_cast %77 : vector<1x1x16xf32> to vector<1x16xf32>
    %79 = vector.broadcast %78 : vector<1x16xf32> to vector<32x16xf32>
    %80 = arith.addf %76, %79 : vector<32x16xf32>
    %c1_56 = arith.constant 1 : index
    %c0_57 = arith.constant 0 : index
    %c0_58 = arith.constant 0 : index
    %81 = vector.load %arg7[%c1_56, %c0_57, %c0_58] : memref<10x32x16xf32, #tpu.memory_space<vmem>>, vector<1x32x16xf32>
    %82 = vector.shape_cast %81 : vector<1x32x16xf32> to vector<32x16xf32>
    %cst_59 = arith.constant dense<0.000000e+00> : vector<32x16xf32>
    %83 = tpu.matmul %33, %82, %cst_59 {dimension_numbers = #tpu.dot_dimension_numbers<[1], [0], [0], [1], [0, 0, 1, 1], [], []>} : vector<32x32xf32>, vector<32x16xf32>, vector<32x16xf32> -> vector<32x16xf32>
    %c1_60 = arith.constant 1 : index
    %c0_61 = arith.constant 0 : index
    %c0_62 = arith.constant 0 : index
    %84 = vector.load %arg10[%c1_60, %c0_61, %c0_62] : memref<10x1x16xf32, #tpu.memory_space<vmem>>, vector<1x1x16xf32>
    %85 = vector.shape_cast %84 : vector<1x1x16xf32> to vector<1x16xf32>
    %86 = vector.broadcast %85 : vector<1x16xf32> to vector<32x16xf32>
    %87 = arith.addf %83, %86 : vector<32x16xf32>
    %c1_63 = arith.constant 1 : index
    %c0_64 = arith.constant 0 : index
    %c0_65 = arith.constant 0 : index
    %88 = vector.load %arg8[%c1_63, %c0_64, %c0_65] : memref<10x32x16xf32, #tpu.memory_space<vmem>>, vector<1x32x16xf32>
    %89 = vector.shape_cast %88 : vector<1x32x16xf32> to vector<32x16xf32>
    %cst_66 = arith.constant dense<0.000000e+00> : vector<32x16xf32>
    %90 = tpu.matmul %33, %89, %cst_66 {dimension_numbers = #tpu.dot_dimension_numbers<[1], [0], [0], [1], [0, 0, 1, 1], [], []>} : vector<32x32xf32>, vector<32x16xf32>, vector<32x16xf32> -> vector<32x16xf32>
    %c1_67 = arith.constant 1 : index
    %c0_68 = arith.constant 0 : index
    %c0_69 = arith.constant 0 : index
    %91 = vector.load %arg11[%c1_67, %c0_68, %c0_69] : memref<10x1x16xf32, #tpu.memory_space<vmem>>, vector<1x1x16xf32>
    %92 = vector.shape_cast %91 : vector<1x1x16xf32> to vector<1x16xf32>
    %93 = vector.broadcast %92 : vector<1x16xf32> to vector<32x16xf32>
    %94 = arith.addf %90, %93 : vector<32x16xf32>
    %cst_70 = arith.constant dense<0.000000e+00> : vector<32x32xf32>
    %95 = tpu.matmul %80, %87, %cst_70 {dimension_numbers = #tpu.dot_dimension_numbers<[1], [1], [0], [0], [0, 0, 1, 0], [], []>} : vector<32x16xf32>, vector<32x16xf32>, vector<32x32xf32> -> vector<32x32xf32>
    %cst_71 = arith.constant 2.500000e-01 : f32
    %96 = vector.broadcast %cst_71 : f32 to vector<32x32xf32>
    %97 = arith.mulf %95, %96 : vector<32x32xf32>
    %98 = arith.addf %97, %34 : vector<32x32xf32>
    %cst_72 = arith.constant dense<0xFF800000> : vector<32xf32>
    %99 = vector.multi_reduction <maximumf>, %98, %cst_72 [1] : vector<32x32xf32> to vector<32xf32>
    %100 = vector.shape_cast %99 : vector<32xf32> to vector<32x1xf32>
    %101 = vector.broadcast %100 : vector<32x1xf32> to vector<32x32xf32>
    %102 = arith.subf %98, %101 : vector<32x32xf32>
    %103 = math.exp %102 : vector<32x32xf32>
    %cst_73 = arith.constant dense<0.000000e+00> : vector<32xf32>
    %104 = vector.multi_reduction <add>, %103, %cst_73 [1] : vector<32x32xf32> to vector<32xf32>
    %105 = vector.shape_cast %104 : vector<32xf32> to vector<32x1xf32>
    %106 = tpu.reciprocal %105 {approx = true} : vector<32x1xf32> -> vector<32x1xf32>
    %107 = vector.broadcast %106 : vector<32x1xf32> to vector<32x32xf32>
    %108 = arith.mulf %103, %107 : vector<32x32xf32>
    %cst_74 = arith.constant dense<0.000000e+00> : vector<32x16xf32>
    %109 = tpu.matmul %108, %94, %cst_74 {dimension_numbers = #tpu.dot_dimension_numbers<[1], [0], [0], [1], [0, 0, 1, 1], [], []>} : vector<32x32xf32>, vector<32x16xf32>, vector<32x16xf32> -> vector<32x16xf32>
    %c1_75 = arith.constant 1 : index
    %c0_76 = arith.constant 0 : index
    %c0_77 = arith.constant 0 : index
    %110 = vector.load %arg12[%c1_75, %c0_76, %c0_77] : memref<10x16x32xf32, #tpu.memory_space<vmem>>, vector<1x16x32xf32>
    %111 = vector.shape_cast %110 : vector<1x16x32xf32> to vector<16x32xf32>
    %cst_78 = arith.constant dense<0.000000e+00> : vector<32x32xf32>
    %112 = tpu.matmul %109, %111, %cst_78 {dimension_numbers = #tpu.dot_dimension_numbers<[1], [0], [0], [1], [0, 0, 1, 1], [], []>} : vector<32x16xf32>, vector<16x32xf32>, vector<32x32xf32> -> vector<32x32xf32>
    %113 = arith.addf %73, %112 : vector<32x32xf32>
    %c0_79 = arith.constant 0 : index
    %c0_80 = arith.constant 0 : index
    %c0_81 = arith.constant 0 : index
    %114 = vector.load %arg13[%c0_79, %c0_80, %c0_81] : memref<5x1x32xf32, #tpu.memory_space<vmem>>, vector<1x1x32xf32>
    %115 = vector.shape_cast %114 : vector<1x1x32xf32> to vector<1x32xf32>
    %116 = vector.broadcast %115 : vector<1x32xf32> to vector<32x32xf32>
    %117 = arith.addf %113, %116 : vector<32x32xf32>
    %118 = arith.addf %7, %117 : vector<32x32xf32>
    %c1_82 = arith.constant 1 : index
    %c0_83 = arith.constant 0 : index
    %c0_84 = arith.constant 0 : index
    %119 = vector.load %arg14[%c1_82, %c0_83, %c0_84] : memref<8x1x32xf32, #tpu.memory_space<vmem>>, vector<1x1x32xf32>
    %120 = vector.shape_cast %119 : vector<1x1x32xf32> to vector<1x32xf32>
    %c1_85 = arith.constant 1 : index
    %c0_86 = arith.constant 0 : index
    %c0_87 = arith.constant 0 : index
    %121 = vector.load %arg15[%c1_85, %c0_86, %c0_87] : memref<8x1x32xf32, #tpu.memory_space<vmem>>, vector<1x1x32xf32>
    %122 = vector.shape_cast %121 : vector<1x1x32xf32> to vector<1x32xf32>
    %cst_88 = arith.constant dense<0.000000e+00> : vector<32xf32>
    %123 = vector.multi_reduction <add>, %118, %cst_88 [1] : vector<32x32xf32> to vector<32xf32>
    %124 = vector.shape_cast %123 : vector<32xf32> to vector<32x1xf32>
    %cst_89 = arith.constant 3.200000e+01 : f32
    %125 = vector.broadcast %cst_89 : f32 to vector<32x1xf32>
    %126 = arith.divf %124, %125 : vector<32x1xf32>
    %127 = vector.broadcast %126 : vector<32x1xf32> to vector<32x32xf32>
    %128 = arith.subf %118, %127 : vector<32x32xf32>
    %129 = arith.mulf %128, %128 : vector<32x32xf32>
    %cst_90 = arith.constant dense<0.000000e+00> : vector<32xf32>
    %130 = vector.multi_reduction <add>, %129, %cst_90 [1] : vector<32x32xf32> to vector<32xf32>
    %131 = vector.shape_cast %130 : vector<32xf32> to vector<32x1xf32>
    %cst_91 = arith.constant 3.200000e+01 : f32
    %132 = vector.broadcast %cst_91 : f32 to vector<32x1xf32>
    %133 = arith.divf %131, %132 : vector<32x1xf32>
    %134 = vector.broadcast %126 : vector<32x1xf32> to vector<32x32xf32>
    %135 = arith.subf %118, %134 : vector<32x32xf32>
    %cst_92 = arith.constant 9.99999997E-7 : f32
    %136 = vector.broadcast %cst_92 : f32 to vector<32x1xf32>
    %137 = arith.addf %133, %136 : vector<32x1xf32>
    %138 = math.rsqrt %137 : vector<32x1xf32>
    %139 = vector.broadcast %138 : vector<32x1xf32> to vector<32x32xf32>
    %140 = arith.mulf %135, %139 : vector<32x32xf32>
    %141 = vector.broadcast %120 : vector<1x32xf32> to vector<32x32xf32>
    %142 = arith.mulf %140, %141 : vector<32x32xf32>
    %143 = vector.broadcast %122 : vector<1x32xf32> to vector<32x32xf32>
    %144 = arith.addf %142, %143 : vector<32x32xf32>
    %c0_93 = arith.constant 0 : index
    %c0_94 = arith.constant 0 : index
    %c0_95 = arith.constant 0 : index
    %145 = vector.load %arg16[%c0_93, %c0_94, %c0_95] : memref<2x32x64xf32, #tpu.memory_space<vmem>>, vector<1x32x64xf32>
    %146 = vector.shape_cast %145 : vector<1x32x64xf32> to vector<32x64xf32>
    %cst_96 = arith.constant dense<0.000000e+00> : vector<32x64xf32>
    %147 = tpu.matmul %144, %146, %cst_96 {dimension_numbers = #tpu.dot_dimension_numbers<[1], [0], [0], [1], [0, 0, 1, 1], [], []>} : vector<32x32xf32>, vector<32x64xf32>, vector<32x64xf32> -> vector<32x64xf32>
    %c0_97 = arith.constant 0 : index
    %c0_98 = arith.constant 0 : index
    %c0_99 = arith.constant 0 : index
    %148 = vector.load %arg17[%c0_97, %c0_98, %c0_99] : memref<2x1x64xf32, #tpu.memory_space<vmem>>, vector<1x1x64xf32>
    %149 = vector.shape_cast %148 : vector<1x1x64xf32> to vector<1x64xf32>
    %150 = vector.broadcast %149 : vector<1x64xf32> to vector<32x64xf32>
    %151 = arith.addf %147, %150 : vector<32x64xf32>
    %152 = arith.mulf %151, %151 : vector<32x64xf32>
    %153 = arith.mulf %151, %152 : vector<32x64xf32>
    %cst_100 = arith.constant 4.471500e-02 : f32
    %154 = vector.broadcast %cst_100 : f32 to vector<32x64xf32>
    %155 = arith.mulf %154, %153 : vector<32x64xf32>
    %156 = arith.addf %151, %155 : vector<32x64xf32>
    %cst_101 = arith.constant 0.797884583 : f32
    %157 = vector.broadcast %cst_101 : f32 to vector<32x64xf32>
    %158 = arith.mulf %157, %156 : vector<32x64xf32>
    %159 = math.tanh %158 : vector<32x64xf32>
    %cst_102 = arith.constant 1.000000e+00 : f32
    %160 = vector.broadcast %cst_102 : f32 to vector<32x64xf32>
    %161 = arith.addf %160, %159 : vector<32x64xf32>
    %cst_103 = arith.constant 5.000000e-01 : f32
    %162 = vector.broadcast %cst_103 : f32 to vector<32x64xf32>
    %163 = arith.mulf %162, %161 : vector<32x64xf32>
    %164 = arith.mulf %151, %163 : vector<32x64xf32>
    %c0_104 = arith.constant 0 : index
    %c0_105 = arith.constant 0 : index
    %c0_106 = arith.constant 0 : index
    %165 = vector.load %arg18[%c0_104, %c0_105, %c0_106] : memref<2x64x32xf32, #tpu.memory_space<vmem>>, vector<1x64x32xf32>
    %166 = vector.shape_cast %165 : vector<1x64x32xf32> to vector<64x32xf32>
    %cst_107 = arith.constant dense<0.000000e+00> : vector<32x32xf32>
    %167 = tpu.matmul %164, %166, %cst_107 {dimension_numbers = #tpu.dot_dimension_numbers<[1], [0], [0], [1], [0, 0, 1, 1], [], []>} : vector<32x64xf32>, vector<64x32xf32>, vector<32x32xf32> -> vector<32x32xf32>
    %c0_108 = arith.constant 0 : index
    %c0_109 = arith.constant 0 : index
    %c0_110 = arith.constant 0 : index
    %168 = vector.load %arg19[%c0_108, %c0_109, %c0_110] : memref<2x1x32xf32, #tpu.memory_space<vmem>>, vector<1x1x32xf32>
    %169 = vector.shape_cast %168 : vector<1x1x32xf32> to vector<1x32xf32>
    %170 = vector.broadcast %169 : vector<1x32xf32> to vector<32x32xf32>
    %171 = arith.addf %167, %170 : vector<32x32xf32>
    %172 = arith.addf %118, %171 : vector<32x32xf32>
    %c0_111 = arith.constant 0 : index
    %c0_112 = arith.constant 0 : index
    %173 = vector.load %arg20[%c0_111, %c0_112] : memref<32x32xf32, #tpu.memory_space<vmem>>, vector<32x32xf32>
    %cst_113 = arith.constant dense<0.000000e+00> : vector<32x32xf32>
    %174 = tpu.matmul %172, %173, %cst_113 {dimension_numbers = #tpu.dot_dimension_numbers<[1], [0], [0], [1], [0, 0, 1, 1], [], []>} : vector<32x32xf32>, vector<32x32xf32>, vector<32x32xf32> -> vector<32x32xf32>
    %c0_114 = arith.constant 0 : index
    %c0_115 = arith.constant 0 : index
    %175 = vector.load %arg21[%c0_114, %c0_115] : memref<1x32xf32, #tpu.memory_space<vmem>>, vector<1x32xf32>
    %176 = vector.broadcast %175 : vector<1x32xf32> to vector<32x32xf32>
    %177 = arith.addf %174, %176 : vector<32x32xf32>
    %c2 = arith.constant 2 : index
    %c0_116 = arith.constant 0 : index
    %c0_117 = arith.constant 0 : index
    %178 = vector.load %arg14[%c2, %c0_116, %c0_117] : memref<8x1x32xf32, #tpu.memory_space<vmem>>, vector<1x1x32xf32>
    %179 = vector.shape_cast %178 : vector<1x1x32xf32> to vector<1x32xf32>
    %c2_118 = arith.constant 2 : index
    %c0_119 = arith.constant 0 : index
    %c0_120 = arith.constant 0 : index
    %180 = vector.load %arg15[%c2_118, %c0_119, %c0_120] : memref<8x1x32xf32, #tpu.memory_space<vmem>>, vector<1x1x32xf32>
    %181 = vector.shape_cast %180 : vector<1x1x32xf32> to vector<1x32xf32>
    %cst_121 = arith.constant dense<0.000000e+00> : vector<32xf32>
    %182 = vector.multi_reduction <add>, %177, %cst_121 [1] : vector<32x32xf32> to vector<32xf32>
    %183 = vector.shape_cast %182 : vector<32xf32> to vector<32x1xf32>
    %cst_122 = arith.constant 3.200000e+01 : f32
    %184 = vector.broadcast %cst_122 : f32 to vector<32x1xf32>
    %185 = arith.divf %183, %184 : vector<32x1xf32>
    %186 = vector.broadcast %185 : vector<32x1xf32> to vector<32x32xf32>
    %187 = arith.subf %177, %186 : vector<32x32xf32>
    %188 = arith.mulf %187, %187 : vector<32x32xf32>
    %cst_123 = arith.constant dense<0.000000e+00> : vector<32xf32>
    %189 = vector.multi_reduction <add>, %188, %cst_123 [1] : vector<32x32xf32> to vector<32xf32>
    %190 = vector.shape_cast %189 : vector<32xf32> to vector<32x1xf32>
    %cst_124 = arith.constant 3.200000e+01 : f32
    %191 = vector.broadcast %cst_124 : f32 to vector<32x1xf32>
    %192 = arith.divf %190, %191 : vector<32x1xf32>
    %193 = vector.broadcast %185 : vector<32x1xf32> to vector<32x32xf32>
    %194 = arith.subf %177, %193 : vector<32x32xf32>
    %cst_125 = arith.constant 9.99999997E-7 : f32
    %195 = vector.broadcast %cst_125 : f32 to vector<32x1xf32>
    %196 = arith.addf %192, %195 : vector<32x1xf32>
    %197 = math.rsqrt %196 : vector<32x1xf32>
    %198 = vector.broadcast %197 : vector<32x1xf32> to vector<32x32xf32>
    %199 = arith.mulf %194, %198 : vector<32x32xf32>
    %200 = vector.broadcast %179 : vector<1x32xf32> to vector<32x32xf32>
    %201 = arith.mulf %199, %200 : vector<32x32xf32>
    %202 = vector.broadcast %181 : vector<1x32xf32> to vector<32x32xf32>
    %203 = arith.addf %201, %202 : vector<32x32xf32>
    %c0_126 = arith.constant 0 : index
    %c0_127 = arith.constant 0 : index
    %204 = vector.load %arg22[%c0_126, %c0_127] : memref<1x32xf32, #tpu.memory_space<vmem>>, vector<1x32xf32>
    %205 = vector.broadcast %204 : vector<1x32xf32> to vector<32x32xf32>
    %206 = arith.addf %203, %205 : vector<32x32xf32>
    %c0_128 = arith.constant 0 : index
    %c0_129 = arith.constant 0 : index
    %207 = vector.load %arg3[%c0_128, %c0_129] : memref<32x32xf32, #tpu.memory_space<vmem>>, vector<32x32xf32>
    %c0_130 = arith.constant 0 : index
    %c0_131 = arith.constant 0 : index
    %208 = vector.load %arg1[%c0_130, %c0_131] : memref<16x32xf32, #tpu.memory_space<vmem>>, vector<16x32xf32>
    %c0_132 = arith.constant 0 : index
    %c0_133 = arith.constant 0 : index
    %209 = vector.load %arg40[%c0_132, %c0_133] : memref<16x16xf32, #tpu.memory_space<vmem>>, vector<16x16xf32>
    %c2_134 = arith.constant 2 : index
    %c0_135 = arith.constant 0 : index
    %c0_136 = arith.constant 0 : index
    %210 = vector.load %arg6[%c2_134, %c0_135, %c0_136] : memref<10x32x16xf32, #tpu.memory_space<vmem>>, vector<1x32x16xf32>
    %211 = vector.shape_cast %210 : vector<1x32x16xf32> to vector<32x16xf32>
    %cst_137 = arith.constant dense<0.000000e+00> : vector<16x16xf32>
    %212 = tpu.matmul %208, %211, %cst_137 {dimension_numbers = #tpu.dot_dimension_numbers<[1], [0], [0], [1], [0, 0, 1, 1], [], []>} : vector<16x32xf32>, vector<32x16xf32>, vector<16x16xf32> -> vector<16x16xf32>
    %c2_138 = arith.constant 2 : index
    %c0_139 = arith.constant 0 : index
    %c0_140 = arith.constant 0 : index
    %213 = vector.load %arg9[%c2_138, %c0_139, %c0_140] : memref<10x1x16xf32, #tpu.memory_space<vmem>>, vector<1x1x16xf32>
    %214 = vector.shape_cast %213 : vector<1x1x16xf32> to vector<1x16xf32>
    %215 = vector.broadcast %214 : vector<1x16xf32> to vector<16x16xf32>
    %216 = arith.addf %212, %215 : vector<16x16xf32>
    %c2_141 = arith.constant 2 : index
    %c0_142 = arith.constant 0 : index
    %c0_143 = arith.constant 0 : index
    %217 = vector.load %arg7[%c2_141, %c0_142, %c0_143] : memref<10x32x16xf32, #tpu.memory_space<vmem>>, vector<1x32x16xf32>
    %218 = vector.shape_cast %217 : vector<1x32x16xf32> to vector<32x16xf32>
    %cst_144 = arith.constant dense<0.000000e+00> : vector<16x16xf32>
    %219 = tpu.matmul %208, %218, %cst_144 {dimension_numbers = #tpu.dot_dimension_numbers<[1], [0], [0], [1], [0, 0, 1, 1], [], []>} : vector<16x32xf32>, vector<32x16xf32>, vector<16x16xf32> -> vector<16x16xf32>
    %c2_145 = arith.constant 2 : index
    %c0_146 = arith.constant 0 : index
    %c0_147 = arith.constant 0 : index
    %220 = vector.load %arg10[%c2_145, %c0_146, %c0_147] : memref<10x1x16xf32, #tpu.memory_space<vmem>>, vector<1x1x16xf32>
    %221 = vector.shape_cast %220 : vector<1x1x16xf32> to vector<1x16xf32>
    %222 = vector.broadcast %221 : vector<1x16xf32> to vector<16x16xf32>
    %223 = arith.addf %219, %222 : vector<16x16xf32>
    %c2_148 = arith.constant 2 : index
    %c0_149 = arith.constant 0 : index
    %c0_150 = arith.constant 0 : index
    %224 = vector.load %arg8[%c2_148, %c0_149, %c0_150] : memref<10x32x16xf32, #tpu.memory_space<vmem>>, vector<1x32x16xf32>
    %225 = vector.shape_cast %224 : vector<1x32x16xf32> to vector<32x16xf32>
    %cst_151 = arith.constant dense<0.000000e+00> : vector<16x16xf32>
    %226 = tpu.matmul %208, %225, %cst_151 {dimension_numbers = #tpu.dot_dimension_numbers<[1], [0], [0], [1], [0, 0, 1, 1], [], []>} : vector<16x32xf32>, vector<32x16xf32>, vector<16x16xf32> -> vector<16x16xf32>
    %c2_152 = arith.constant 2 : index
    %c0_153 = arith.constant 0 : index
    %c0_154 = arith.constant 0 : index
    %227 = vector.load %arg11[%c2_152, %c0_153, %c0_154] : memref<10x1x16xf32, #tpu.memory_space<vmem>>, vector<1x1x16xf32>
    %228 = vector.shape_cast %227 : vector<1x1x16xf32> to vector<1x16xf32>
    %229 = vector.broadcast %228 : vector<1x16xf32> to vector<16x16xf32>
    %230 = arith.addf %226, %229 : vector<16x16xf32>
    %cst_155 = arith.constant dense<0.000000e+00> : vector<16x16xf32>
    %231 = tpu.matmul %216, %223, %cst_155 {dimension_numbers = #tpu.dot_dimension_numbers<[1], [1], [0], [0], [0, 0, 1, 0], [], []>} : vector<16x16xf32>, vector<16x16xf32>, vector<16x16xf32> -> vector<16x16xf32>
    %cst_156 = arith.constant 2.500000e-01 : f32
    %232 = vector.broadcast %cst_156 : f32 to vector<16x16xf32>
    %233 = arith.mulf %231, %232 : vector<16x16xf32>
    %234 = arith.addf %233, %209 : vector<16x16xf32>
    %cst_157 = arith.constant dense<0xFF800000> : vector<16xf32>
    %235 = vector.multi_reduction <maximumf>, %234, %cst_157 [1] : vector<16x16xf32> to vector<16xf32>
    %236 = vector.shape_cast %235 : vector<16xf32> to vector<16x1xf32>
    %237 = vector.broadcast %236 : vector<16x1xf32> to vector<16x16xf32>
    %238 = arith.subf %234, %237 : vector<16x16xf32>
    %239 = math.exp %238 : vector<16x16xf32>
    %cst_158 = arith.constant dense<0.000000e+00> : vector<16xf32>
    %240 = vector.multi_reduction <add>, %239, %cst_158 [1] : vector<16x16xf32> to vector<16xf32>
    %241 = vector.shape_cast %240 : vector<16xf32> to vector<16x1xf32>
    %242 = tpu.reciprocal %241 {approx = true} : vector<16x1xf32> -> vector<16x1xf32>
    %243 = vector.broadcast %242 : vector<16x1xf32> to vector<16x16xf32>
    %244 = arith.mulf %239, %243 : vector<16x16xf32>
    %cst_159 = arith.constant dense<0.000000e+00> : vector<16x16xf32>
    %245 = tpu.matmul %244, %230, %cst_159 {dimension_numbers = #tpu.dot_dimension_numbers<[1], [0], [0], [1], [0, 0, 1, 1], [], []>} : vector<16x16xf32>, vector<16x16xf32>, vector<16x16xf32> -> vector<16x16xf32>
    %c2_160 = arith.constant 2 : index
    %c0_161 = arith.constant 0 : index
    %c0_162 = arith.constant 0 : index
    %246 = vector.load %arg12[%c2_160, %c0_161, %c0_162] : memref<10x16x32xf32, #tpu.memory_space<vmem>>, vector<1x16x32xf32>
    %247 = vector.shape_cast %246 : vector<1x16x32xf32> to vector<16x32xf32>
    %cst_163 = arith.constant dense<0.000000e+00> : vector<16x32xf32>
    %248 = tpu.matmul %245, %247, %cst_163 {dimension_numbers = #tpu.dot_dimension_numbers<[1], [0], [0], [1], [0, 0, 1, 1], [], []>} : vector<16x16xf32>, vector<16x32xf32>, vector<16x32xf32> -> vector<16x32xf32>
    %c3 = arith.constant 3 : index
    %c0_164 = arith.constant 0 : index
    %c0_165 = arith.constant 0 : index
    %249 = vector.load %arg6[%c3, %c0_164, %c0_165] : memref<10x32x16xf32, #tpu.memory_space<vmem>>, vector<1x32x16xf32>
    %250 = vector.shape_cast %249 : vector<1x32x16xf32> to vector<32x16xf32>
    %cst_166 = arith.constant dense<0.000000e+00> : vector<16x16xf32>
    %251 = tpu.matmul %208, %250, %cst_166 {dimension_numbers = #tpu.dot_dimension_numbers<[1], [0], [0], [1], [0, 0, 1, 1], [], []>} : vector<16x32xf32>, vector<32x16xf32>, vector<16x16xf32> -> vector<16x16xf32>
    %c3_167 = arith.constant 3 : index
    %c0_168 = arith.constant 0 : index
    %c0_169 = arith.constant 0 : index
    %252 = vector.load %arg9[%c3_167, %c0_168, %c0_169] : memref<10x1x16xf32, #tpu.memory_space<vmem>>, vector<1x1x16xf32>
    %253 = vector.shape_cast %252 : vector<1x1x16xf32> to vector<1x16xf32>
    %254 = vector.broadcast %253 : vector<1x16xf32> to vector<16x16xf32>
    %255 = arith.addf %251, %254 : vector<16x16xf32>
    %c3_170 = arith.constant 3 : index
    %c0_171 = arith.constant 0 : index
    %c0_172 = arith.constant 0 : index
    %256 = vector.load %arg7[%c3_170, %c0_171, %c0_172] : memref<10x32x16xf32, #tpu.memory_space<vmem>>, vector<1x32x16xf32>
    %257 = vector.shape_cast %256 : vector<1x32x16xf32> to vector<32x16xf32>
    %cst_173 = arith.constant dense<0.000000e+00> : vector<16x16xf32>
    %258 = tpu.matmul %208, %257, %cst_173 {dimension_numbers = #tpu.dot_dimension_numbers<[1], [0], [0], [1], [0, 0, 1, 1], [], []>} : vector<16x32xf32>, vector<32x16xf32>, vector<16x16xf32> -> vector<16x16xf32>
    %c3_174 = arith.constant 3 : index
    %c0_175 = arith.constant 0 : index
    %c0_176 = arith.constant 0 : index
    %259 = vector.load %arg10[%c3_174, %c0_175, %c0_176] : memref<10x1x16xf32, #tpu.memory_space<vmem>>, vector<1x1x16xf32>
    %260 = vector.shape_cast %259 : vector<1x1x16xf32> to vector<1x16xf32>
    %261 = vector.broadcast %260 : vector<1x16xf32> to vector<16x16xf32>
    %262 = arith.addf %258, %261 : vector<16x16xf32>
    %c3_177 = arith.constant 3 : index
    %c0_178 = arith.constant 0 : index
    %c0_179 = arith.constant 0 : index
    %263 = vector.load %arg8[%c3_177, %c0_178, %c0_179] : memref<10x32x16xf32, #tpu.memory_space<vmem>>, vector<1x32x16xf32>
    %264 = vector.shape_cast %263 : vector<1x32x16xf32> to vector<32x16xf32>
    %cst_180 = arith.constant dense<0.000000e+00> : vector<16x16xf32>
    %265 = tpu.matmul %208, %264, %cst_180 {dimension_numbers = #tpu.dot_dimension_numbers<[1], [0], [0], [1], [0, 0, 1, 1], [], []>} : vector<16x32xf32>, vector<32x16xf32>, vector<16x16xf32> -> vector<16x16xf32>
    %c3_181 = arith.constant 3 : index
    %c0_182 = arith.constant 0 : index
    %c0_183 = arith.constant 0 : index
    %266 = vector.load %arg11[%c3_181, %c0_182, %c0_183] : memref<10x1x16xf32, #tpu.memory_space<vmem>>, vector<1x1x16xf32>
    %267 = vector.shape_cast %266 : vector<1x1x16xf32> to vector<1x16xf32>
    %268 = vector.broadcast %267 : vector<1x16xf32> to vector<16x16xf32>
    %269 = arith.addf %265, %268 : vector<16x16xf32>
    %cst_184 = arith.constant dense<0.000000e+00> : vector<16x16xf32>
    %270 = tpu.matmul %255, %262, %cst_184 {dimension_numbers = #tpu.dot_dimension_numbers<[1], [1], [0], [0], [0, 0, 1, 0], [], []>} : vector<16x16xf32>, vector<16x16xf32>, vector<16x16xf32> -> vector<16x16xf32>
    %cst_185 = arith.constant 2.500000e-01 : f32
    %271 = vector.broadcast %cst_185 : f32 to vector<16x16xf32>
    %272 = arith.mulf %270, %271 : vector<16x16xf32>
    %273 = arith.addf %272, %209 : vector<16x16xf32>
    %cst_186 = arith.constant dense<0xFF800000> : vector<16xf32>
    %274 = vector.multi_reduction <maximumf>, %273, %cst_186 [1] : vector<16x16xf32> to vector<16xf32>
    %275 = vector.shape_cast %274 : vector<16xf32> to vector<16x1xf32>
    %276 = vector.broadcast %275 : vector<16x1xf32> to vector<16x16xf32>
    %277 = arith.subf %273, %276 : vector<16x16xf32>
    %278 = math.exp %277 : vector<16x16xf32>
    %cst_187 = arith.constant dense<0.000000e+00> : vector<16xf32>
    %279 = vector.multi_reduction <add>, %278, %cst_187 [1] : vector<16x16xf32> to vector<16xf32>
    %280 = vector.shape_cast %279 : vector<16xf32> to vector<16x1xf32>
    %281 = tpu.reciprocal %280 {approx = true} : vector<16x1xf32> -> vector<16x1xf32>
    %282 = vector.broadcast %281 : vector<16x1xf32> to vector<16x16xf32>
    %283 = arith.mulf %278, %282 : vector<16x16xf32>
    %cst_188 = arith.constant dense<0.000000e+00> : vector<16x16xf32>
    %284 = tpu.matmul %283, %269, %cst_188 {dimension_numbers = #tpu.dot_dimension_numbers<[1], [0], [0], [1], [0, 0, 1, 1], [], []>} : vector<16x16xf32>, vector<16x16xf32>, vector<16x16xf32> -> vector<16x16xf32>
    %c3_189 = arith.constant 3 : index
    %c0_190 = arith.constant 0 : index
    %c0_191 = arith.constant 0 : index
    %285 = vector.load %arg12[%c3_189, %c0_190, %c0_191] : memref<10x16x32xf32, #tpu.memory_space<vmem>>, vector<1x16x32xf32>
    %286 = vector.shape_cast %285 : vector<1x16x32xf32> to vector<16x32xf32>
    %cst_192 = arith.constant dense<0.000000e+00> : vector<16x32xf32>
    %287 = tpu.matmul %284, %286, %cst_192 {dimension_numbers = #tpu.dot_dimension_numbers<[1], [0], [0], [1], [0, 0, 1, 1], [], []>} : vector<16x16xf32>, vector<16x32xf32>, vector<16x32xf32> -> vector<16x32xf32>
    %288 = arith.addf %248, %287 : vector<16x32xf32>
    %c1_193 = arith.constant 1 : index
    %c0_194 = arith.constant 0 : index
    %c0_195 = arith.constant 0 : index
    %289 = vector.load %arg13[%c1_193, %c0_194, %c0_195] : memref<5x1x32xf32, #tpu.memory_space<vmem>>, vector<1x1x32xf32>
    %290 = vector.shape_cast %289 : vector<1x1x32xf32> to vector<1x32xf32>
    %291 = vector.broadcast %290 : vector<1x32xf32> to vector<16x32xf32>
    %292 = arith.addf %288, %291 : vector<16x32xf32>
    %c3_196 = arith.constant 3 : index
    %c0_197 = arith.constant 0 : index
    %c0_198 = arith.constant 0 : index
    %293 = vector.load %arg14[%c3_196, %c0_197, %c0_198] : memref<8x1x32xf32, #tpu.memory_space<vmem>>, vector<1x1x32xf32>
    %294 = vector.shape_cast %293 : vector<1x1x32xf32> to vector<1x32xf32>
    %c3_199 = arith.constant 3 : index
    %c0_200 = arith.constant 0 : index
    %c0_201 = arith.constant 0 : index
    %295 = vector.load %arg15[%c3_199, %c0_200, %c0_201] : memref<8x1x32xf32, #tpu.memory_space<vmem>>, vector<1x1x32xf32>
    %296 = vector.shape_cast %295 : vector<1x1x32xf32> to vector<1x32xf32>
    %cst_202 = arith.constant dense<0.000000e+00> : vector<16xf32>
    %297 = vector.multi_reduction <add>, %292, %cst_202 [1] : vector<16x32xf32> to vector<16xf32>
    %298 = vector.shape_cast %297 : vector<16xf32> to vector<16x1xf32>
    %cst_203 = arith.constant 3.200000e+01 : f32
    %299 = vector.broadcast %cst_203 : f32 to vector<16x1xf32>
    %300 = arith.divf %298, %299 : vector<16x1xf32>
    %301 = vector.broadcast %300 : vector<16x1xf32> to vector<16x32xf32>
    %302 = arith.subf %292, %301 : vector<16x32xf32>
    %303 = arith.mulf %302, %302 : vector<16x32xf32>
    %cst_204 = arith.constant dense<0.000000e+00> : vector<16xf32>
    %304 = vector.multi_reduction <add>, %303, %cst_204 [1] : vector<16x32xf32> to vector<16xf32>
    %305 = vector.shape_cast %304 : vector<16xf32> to vector<16x1xf32>
    %cst_205 = arith.constant 3.200000e+01 : f32
    %306 = vector.broadcast %cst_205 : f32 to vector<16x1xf32>
    %307 = arith.divf %305, %306 : vector<16x1xf32>
    %308 = vector.broadcast %300 : vector<16x1xf32> to vector<16x32xf32>
    %309 = arith.subf %292, %308 : vector<16x32xf32>
    %cst_206 = arith.constant 9.99999997E-7 : f32
    %310 = vector.broadcast %cst_206 : f32 to vector<16x1xf32>
    %311 = arith.addf %307, %310 : vector<16x1xf32>
    %312 = math.rsqrt %311 : vector<16x1xf32>
    %313 = vector.broadcast %312 : vector<16x1xf32> to vector<16x32xf32>
    %314 = arith.mulf %309, %313 : vector<16x32xf32>
    %315 = vector.broadcast %294 : vector<1x32xf32> to vector<16x32xf32>
    %316 = arith.mulf %314, %315 : vector<16x32xf32>
    %317 = vector.broadcast %296 : vector<1x32xf32> to vector<16x32xf32>
    %318 = arith.addf %316, %317 : vector<16x32xf32>
    %319 = arith.addf %318, %208 : vector<16x32xf32>
    %320 = arith.addf %206, %207 : vector<32x32xf32>
    %c0_207 = arith.constant 0 : index
    %c0_208 = arith.constant 0 : index
    %321 = vector.load %arg41[%c0_207, %c0_208] : memref<16x32xf32, #tpu.memory_space<vmem>>, vector<16x32xf32>
    %c4 = arith.constant 4 : index
    %c0_209 = arith.constant 0 : index
    %c0_210 = arith.constant 0 : index
    %322 = vector.load %arg6[%c4, %c0_209, %c0_210] : memref<10x32x16xf32, #tpu.memory_space<vmem>>, vector<1x32x16xf32>
    %323 = vector.shape_cast %322 : vector<1x32x16xf32> to vector<32x16xf32>
    %cst_211 = arith.constant dense<0.000000e+00> : vector<16x16xf32>
    %324 = tpu.matmul %319, %323, %cst_211 {dimension_numbers = #tpu.dot_dimension_numbers<[1], [0], [0], [1], [0, 0, 1, 1], [], []>} : vector<16x32xf32>, vector<32x16xf32>, vector<16x16xf32> -> vector<16x16xf32>
    %c4_212 = arith.constant 4 : index
    %c0_213 = arith.constant 0 : index
    %c0_214 = arith.constant 0 : index
    %325 = vector.load %arg9[%c4_212, %c0_213, %c0_214] : memref<10x1x16xf32, #tpu.memory_space<vmem>>, vector<1x1x16xf32>
    %326 = vector.shape_cast %325 : vector<1x1x16xf32> to vector<1x16xf32>
    %327 = vector.broadcast %326 : vector<1x16xf32> to vector<16x16xf32>
    %328 = arith.addf %324, %327 : vector<16x16xf32>
    %c4_215 = arith.constant 4 : index
    %c0_216 = arith.constant 0 : index
    %c0_217 = arith.constant 0 : index
    %329 = vector.load %arg7[%c4_215, %c0_216, %c0_217] : memref<10x32x16xf32, #tpu.memory_space<vmem>>, vector<1x32x16xf32>
    %330 = vector.shape_cast %329 : vector<1x32x16xf32> to vector<32x16xf32>
    %cst_218 = arith.constant dense<0.000000e+00> : vector<32x16xf32>
    %331 = tpu.matmul %320, %330, %cst_218 {dimension_numbers = #tpu.dot_dimension_numbers<[1], [0], [0], [1], [0, 0, 1, 1], [], []>} : vector<32x32xf32>, vector<32x16xf32>, vector<32x16xf32> -> vector<32x16xf32>
    %c4_219 = arith.constant 4 : index
    %c0_220 = arith.constant 0 : index
    %c0_221 = arith.constant 0 : index
    %332 = vector.load %arg10[%c4_219, %c0_220, %c0_221] : memref<10x1x16xf32, #tpu.memory_space<vmem>>, vector<1x1x16xf32>
    %333 = vector.shape_cast %332 : vector<1x1x16xf32> to vector<1x16xf32>
    %334 = vector.broadcast %333 : vector<1x16xf32> to vector<32x16xf32>
    %335 = arith.addf %331, %334 : vector<32x16xf32>
    %c4_222 = arith.constant 4 : index
    %c0_223 = arith.constant 0 : index
    %c0_224 = arith.constant 0 : index
    %336 = vector.load %arg8[%c4_222, %c0_223, %c0_224] : memref<10x32x16xf32, #tpu.memory_space<vmem>>, vector<1x32x16xf32>
    %337 = vector.shape_cast %336 : vector<1x32x16xf32> to vector<32x16xf32>
    %cst_225 = arith.constant dense<0.000000e+00> : vector<32x16xf32>
    %338 = tpu.matmul %206, %337, %cst_225 {dimension_numbers = #tpu.dot_dimension_numbers<[1], [0], [0], [1], [0, 0, 1, 1], [], []>} : vector<32x32xf32>, vector<32x16xf32>, vector<32x16xf32> -> vector<32x16xf32>
    %c4_226 = arith.constant 4 : index
    %c0_227 = arith.constant 0 : index
    %c0_228 = arith.constant 0 : index
    %339 = vector.load %arg11[%c4_226, %c0_227, %c0_228] : memref<10x1x16xf32, #tpu.memory_space<vmem>>, vector<1x1x16xf32>
    %340 = vector.shape_cast %339 : vector<1x1x16xf32> to vector<1x16xf32>
    %341 = vector.broadcast %340 : vector<1x16xf32> to vector<32x16xf32>
    %342 = arith.addf %338, %341 : vector<32x16xf32>
    %cst_229 = arith.constant dense<0.000000e+00> : vector<16x32xf32>
    %343 = tpu.matmul %328, %335, %cst_229 {dimension_numbers = #tpu.dot_dimension_numbers<[1], [1], [0], [0], [0, 0, 1, 0], [], []>} : vector<16x16xf32>, vector<32x16xf32>, vector<16x32xf32> -> vector<16x32xf32>
    %cst_230 = arith.constant 2.500000e-01 : f32
    %344 = vector.broadcast %cst_230 : f32 to vector<16x32xf32>
    %345 = arith.mulf %343, %344 : vector<16x32xf32>
    %346 = arith.addf %345, %321 : vector<16x32xf32>
    %cst_231 = arith.constant dense<0xFF800000> : vector<16xf32>
    %347 = vector.multi_reduction <maximumf>, %346, %cst_231 [1] : vector<16x32xf32> to vector<16xf32>
    %348 = vector.shape_cast %347 : vector<16xf32> to vector<16x1xf32>
    %349 = vector.broadcast %348 : vector<16x1xf32> to vector<16x32xf32>
    %350 = arith.subf %346, %349 : vector<16x32xf32>
    %351 = math.exp %350 : vector<16x32xf32>
    %cst_232 = arith.constant dense<0.000000e+00> : vector<16xf32>
    %352 = vector.multi_reduction <add>, %351, %cst_232 [1] : vector<16x32xf32> to vector<16xf32>
    %353 = vector.shape_cast %352 : vector<16xf32> to vector<16x1xf32>
    %354 = tpu.reciprocal %353 {approx = true} : vector<16x1xf32> -> vector<16x1xf32>
    %355 = vector.broadcast %354 : vector<16x1xf32> to vector<16x32xf32>
    %356 = arith.mulf %351, %355 : vector<16x32xf32>
    %cst_233 = arith.constant dense<0.000000e+00> : vector<16x16xf32>
    %357 = tpu.matmul %356, %342, %cst_233 {dimension_numbers = #tpu.dot_dimension_numbers<[1], [0], [0], [1], [0, 0, 1, 1], [], []>} : vector<16x32xf32>, vector<32x16xf32>, vector<16x16xf32> -> vector<16x16xf32>
    %c4_234 = arith.constant 4 : index
    %c0_235 = arith.constant 0 : index
    %c0_236 = arith.constant 0 : index
    %358 = vector.load %arg12[%c4_234, %c0_235, %c0_236] : memref<10x16x32xf32, #tpu.memory_space<vmem>>, vector<1x16x32xf32>
    %359 = vector.shape_cast %358 : vector<1x16x32xf32> to vector<16x32xf32>
    %cst_237 = arith.constant dense<0.000000e+00> : vector<16x32xf32>
    %360 = tpu.matmul %357, %359, %cst_237 {dimension_numbers = #tpu.dot_dimension_numbers<[1], [0], [0], [1], [0, 0, 1, 1], [], []>} : vector<16x16xf32>, vector<16x32xf32>, vector<16x32xf32> -> vector<16x32xf32>
    %c5 = arith.constant 5 : index
    %c0_238 = arith.constant 0 : index
    %c0_239 = arith.constant 0 : index
    %361 = vector.load %arg6[%c5, %c0_238, %c0_239] : memref<10x32x16xf32, #tpu.memory_space<vmem>>, vector<1x32x16xf32>
    %362 = vector.shape_cast %361 : vector<1x32x16xf32> to vector<32x16xf32>
    %cst_240 = arith.constant dense<0.000000e+00> : vector<16x16xf32>
    %363 = tpu.matmul %319, %362, %cst_240 {dimension_numbers = #tpu.dot_dimension_numbers<[1], [0], [0], [1], [0, 0, 1, 1], [], []>} : vector<16x32xf32>, vector<32x16xf32>, vector<16x16xf32> -> vector<16x16xf32>
    %c5_241 = arith.constant 5 : index
    %c0_242 = arith.constant 0 : index
    %c0_243 = arith.constant 0 : index
    %364 = vector.load %arg9[%c5_241, %c0_242, %c0_243] : memref<10x1x16xf32, #tpu.memory_space<vmem>>, vector<1x1x16xf32>
    %365 = vector.shape_cast %364 : vector<1x1x16xf32> to vector<1x16xf32>
    %366 = vector.broadcast %365 : vector<1x16xf32> to vector<16x16xf32>
    %367 = arith.addf %363, %366 : vector<16x16xf32>
    %c5_244 = arith.constant 5 : index
    %c0_245 = arith.constant 0 : index
    %c0_246 = arith.constant 0 : index
    %368 = vector.load %arg7[%c5_244, %c0_245, %c0_246] : memref<10x32x16xf32, #tpu.memory_space<vmem>>, vector<1x32x16xf32>
    %369 = vector.shape_cast %368 : vector<1x32x16xf32> to vector<32x16xf32>
    %cst_247 = arith.constant dense<0.000000e+00> : vector<32x16xf32>
    %370 = tpu.matmul %320, %369, %cst_247 {dimension_numbers = #tpu.dot_dimension_numbers<[1], [0], [0], [1], [0, 0, 1, 1], [], []>} : vector<32x32xf32>, vector<32x16xf32>, vector<32x16xf32> -> vector<32x16xf32>
    %c5_248 = arith.constant 5 : index
    %c0_249 = arith.constant 0 : index
    %c0_250 = arith.constant 0 : index
    %371 = vector.load %arg10[%c5_248, %c0_249, %c0_250] : memref<10x1x16xf32, #tpu.memory_space<vmem>>, vector<1x1x16xf32>
    %372 = vector.shape_cast %371 : vector<1x1x16xf32> to vector<1x16xf32>
    %373 = vector.broadcast %372 : vector<1x16xf32> to vector<32x16xf32>
    %374 = arith.addf %370, %373 : vector<32x16xf32>
    %c5_251 = arith.constant 5 : index
    %c0_252 = arith.constant 0 : index
    %c0_253 = arith.constant 0 : index
    %375 = vector.load %arg8[%c5_251, %c0_252, %c0_253] : memref<10x32x16xf32, #tpu.memory_space<vmem>>, vector<1x32x16xf32>
    %376 = vector.shape_cast %375 : vector<1x32x16xf32> to vector<32x16xf32>
    %cst_254 = arith.constant dense<0.000000e+00> : vector<32x16xf32>
    %377 = tpu.matmul %206, %376, %cst_254 {dimension_numbers = #tpu.dot_dimension_numbers<[1], [0], [0], [1], [0, 0, 1, 1], [], []>} : vector<32x32xf32>, vector<32x16xf32>, vector<32x16xf32> -> vector<32x16xf32>
    %c5_255 = arith.constant 5 : index
    %c0_256 = arith.constant 0 : index
    %c0_257 = arith.constant 0 : index
    %378 = vector.load %arg11[%c5_255, %c0_256, %c0_257] : memref<10x1x16xf32, #tpu.memory_space<vmem>>, vector<1x1x16xf32>
    %379 = vector.shape_cast %378 : vector<1x1x16xf32> to vector<1x16xf32>
    %380 = vector.broadcast %379 : vector<1x16xf32> to vector<32x16xf32>
    %381 = arith.addf %377, %380 : vector<32x16xf32>
    %cst_258 = arith.constant dense<0.000000e+00> : vector<16x32xf32>
    %382 = tpu.matmul %367, %374, %cst_258 {dimension_numbers = #tpu.dot_dimension_numbers<[1], [1], [0], [0], [0, 0, 1, 0], [], []>} : vector<16x16xf32>, vector<32x16xf32>, vector<16x32xf32> -> vector<16x32xf32>
    %cst_259 = arith.constant 2.500000e-01 : f32
    %383 = vector.broadcast %cst_259 : f32 to vector<16x32xf32>
    %384 = arith.mulf %382, %383 : vector<16x32xf32>
    %385 = arith.addf %384, %321 : vector<16x32xf32>
    %cst_260 = arith.constant dense<0xFF800000> : vector<16xf32>
    %386 = vector.multi_reduction <maximumf>, %385, %cst_260 [1] : vector<16x32xf32> to vector<16xf32>
    %387 = vector.shape_cast %386 : vector<16xf32> to vector<16x1xf32>
    %388 = vector.broadcast %387 : vector<16x1xf32> to vector<16x32xf32>
    %389 = arith.subf %385, %388 : vector<16x32xf32>
    %390 = math.exp %389 : vector<16x32xf32>
    %cst_261 = arith.constant dense<0.000000e+00> : vector<16xf32>
    %391 = vector.multi_reduction <add>, %390, %cst_261 [1] : vector<16x32xf32> to vector<16xf32>
    %392 = vector.shape_cast %391 : vector<16xf32> to vector<16x1xf32>
    %393 = tpu.reciprocal %392 {approx = true} : vector<16x1xf32> -> vector<16x1xf32>
    %394 = vector.broadcast %393 : vector<16x1xf32> to vector<16x32xf32>
    %395 = arith.mulf %390, %394 : vector<16x32xf32>
    %cst_262 = arith.constant dense<0.000000e+00> : vector<16x16xf32>
    %396 = tpu.matmul %395, %381, %cst_262 {dimension_numbers = #tpu.dot_dimension_numbers<[1], [0], [0], [1], [0, 0, 1, 1], [], []>} : vector<16x32xf32>, vector<32x16xf32>, vector<16x16xf32> -> vector<16x16xf32>
    %c5_263 = arith.constant 5 : index
    %c0_264 = arith.constant 0 : index
    %c0_265 = arith.constant 0 : index
    %397 = vector.load %arg12[%c5_263, %c0_264, %c0_265] : memref<10x16x32xf32, #tpu.memory_space<vmem>>, vector<1x16x32xf32>
    %398 = vector.shape_cast %397 : vector<1x16x32xf32> to vector<16x32xf32>
    %cst_266 = arith.constant dense<0.000000e+00> : vector<16x32xf32>
    %399 = tpu.matmul %396, %398, %cst_266 {dimension_numbers = #tpu.dot_dimension_numbers<[1], [0], [0], [1], [0, 0, 1, 1], [], []>} : vector<16x16xf32>, vector<16x32xf32>, vector<16x32xf32> -> vector<16x32xf32>
    %400 = arith.addf %360, %399 : vector<16x32xf32>
    %c2_267 = arith.constant 2 : index
    %c0_268 = arith.constant 0 : index
    %c0_269 = arith.constant 0 : index
    %401 = vector.load %arg13[%c2_267, %c0_268, %c0_269] : memref<5x1x32xf32, #tpu.memory_space<vmem>>, vector<1x1x32xf32>
    %402 = vector.shape_cast %401 : vector<1x1x32xf32> to vector<1x32xf32>
    %403 = vector.broadcast %402 : vector<1x32xf32> to vector<16x32xf32>
    %404 = arith.addf %400, %403 : vector<16x32xf32>
    %405 = arith.addf %318, %404 : vector<16x32xf32>
    %c4_270 = arith.constant 4 : index
    %c0_271 = arith.constant 0 : index
    %c0_272 = arith.constant 0 : index
    %406 = vector.load %arg14[%c4_270, %c0_271, %c0_272] : memref<8x1x32xf32, #tpu.memory_space<vmem>>, vector<1x1x32xf32>
    %407 = vector.shape_cast %406 : vector<1x1x32xf32> to vector<1x32xf32>
    %c4_273 = arith.constant 4 : index
    %c0_274 = arith.constant 0 : index
    %c0_275 = arith.constant 0 : index
    %408 = vector.load %arg15[%c4_273, %c0_274, %c0_275] : memref<8x1x32xf32, #tpu.memory_space<vmem>>, vector<1x1x32xf32>
    %409 = vector.shape_cast %408 : vector<1x1x32xf32> to vector<1x32xf32>
    %cst_276 = arith.constant dense<0.000000e+00> : vector<16xf32>
    %410 = vector.multi_reduction <add>, %405, %cst_276 [1] : vector<16x32xf32> to vector<16xf32>
    %411 = vector.shape_cast %410 : vector<16xf32> to vector<16x1xf32>
    %cst_277 = arith.constant 3.200000e+01 : f32
    %412 = vector.broadcast %cst_277 : f32 to vector<16x1xf32>
    %413 = arith.divf %411, %412 : vector<16x1xf32>
    %414 = vector.broadcast %413 : vector<16x1xf32> to vector<16x32xf32>
    %415 = arith.subf %405, %414 : vector<16x32xf32>
    %416 = arith.mulf %415, %415 : vector<16x32xf32>
    %cst_278 = arith.constant dense<0.000000e+00> : vector<16xf32>
    %417 = vector.multi_reduction <add>, %416, %cst_278 [1] : vector<16x32xf32> to vector<16xf32>
    %418 = vector.shape_cast %417 : vector<16xf32> to vector<16x1xf32>
    %cst_279 = arith.constant 3.200000e+01 : f32
    %419 = vector.broadcast %cst_279 : f32 to vector<16x1xf32>
    %420 = arith.divf %418, %419 : vector<16x1xf32>
    %421 = vector.broadcast %413 : vector<16x1xf32> to vector<16x32xf32>
    %422 = arith.subf %405, %421 : vector<16x32xf32>
    %cst_280 = arith.constant 9.99999997E-7 : f32
    %423 = vector.broadcast %cst_280 : f32 to vector<16x1xf32>
    %424 = arith.addf %420, %423 : vector<16x1xf32>
    %425 = math.rsqrt %424 : vector<16x1xf32>
    %426 = vector.broadcast %425 : vector<16x1xf32> to vector<16x32xf32>
    %427 = arith.mulf %422, %426 : vector<16x32xf32>
    %428 = vector.broadcast %407 : vector<1x32xf32> to vector<16x32xf32>
    %429 = arith.mulf %427, %428 : vector<16x32xf32>
    %430 = vector.broadcast %409 : vector<1x32xf32> to vector<16x32xf32>
    %431 = arith.addf %429, %430 : vector<16x32xf32>
    %c1_281 = arith.constant 1 : index
    %c0_282 = arith.constant 0 : index
    %c0_283 = arith.constant 0 : index
    %432 = vector.load %arg16[%c1_281, %c0_282, %c0_283] : memref<2x32x64xf32, #tpu.memory_space<vmem>>, vector<1x32x64xf32>
    %433 = vector.shape_cast %432 : vector<1x32x64xf32> to vector<32x64xf32>
    %cst_284 = arith.constant dense<0.000000e+00> : vector<16x64xf32>
    %434 = tpu.matmul %431, %433, %cst_284 {dimension_numbers = #tpu.dot_dimension_numbers<[1], [0], [0], [1], [0, 0, 1, 1], [], []>} : vector<16x32xf32>, vector<32x64xf32>, vector<16x64xf32> -> vector<16x64xf32>
    %c1_285 = arith.constant 1 : index
    %c0_286 = arith.constant 0 : index
    %c0_287 = arith.constant 0 : index
    %435 = vector.load %arg17[%c1_285, %c0_286, %c0_287] : memref<2x1x64xf32, #tpu.memory_space<vmem>>, vector<1x1x64xf32>
    %436 = vector.shape_cast %435 : vector<1x1x64xf32> to vector<1x64xf32>
    %437 = vector.broadcast %436 : vector<1x64xf32> to vector<16x64xf32>
    %438 = arith.addf %434, %437 : vector<16x64xf32>
    %439 = arith.mulf %438, %438 : vector<16x64xf32>
    %440 = arith.mulf %438, %439 : vector<16x64xf32>
    %cst_288 = arith.constant 4.471500e-02 : f32
    %441 = vector.broadcast %cst_288 : f32 to vector<16x64xf32>
    %442 = arith.mulf %441, %440 : vector<16x64xf32>
    %443 = arith.addf %438, %442 : vector<16x64xf32>
    %cst_289 = arith.constant 0.797884583 : f32
    %444 = vector.broadcast %cst_289 : f32 to vector<16x64xf32>
    %445 = arith.mulf %444, %443 : vector<16x64xf32>
    %446 = math.tanh %445 : vector<16x64xf32>
    %cst_290 = arith.constant 1.000000e+00 : f32
    %447 = vector.broadcast %cst_290 : f32 to vector<16x64xf32>
    %448 = arith.addf %447, %446 : vector<16x64xf32>
    %cst_291 = arith.constant 5.000000e-01 : f32
    %449 = vector.broadcast %cst_291 : f32 to vector<16x64xf32>
    %450 = arith.mulf %449, %448 : vector<16x64xf32>
    %451 = arith.mulf %438, %450 : vector<16x64xf32>
    %c1_292 = arith.constant 1 : index
    %c0_293 = arith.constant 0 : index
    %c0_294 = arith.constant 0 : index
    %452 = vector.load %arg18[%c1_292, %c0_293, %c0_294] : memref<2x64x32xf32, #tpu.memory_space<vmem>>, vector<1x64x32xf32>
    %453 = vector.shape_cast %452 : vector<1x64x32xf32> to vector<64x32xf32>
    %cst_295 = arith.constant dense<0.000000e+00> : vector<16x32xf32>
    %454 = tpu.matmul %451, %453, %cst_295 {dimension_numbers = #tpu.dot_dimension_numbers<[1], [0], [0], [1], [0, 0, 1, 1], [], []>} : vector<16x64xf32>, vector<64x32xf32>, vector<16x32xf32> -> vector<16x32xf32>
    %c1_296 = arith.constant 1 : index
    %c0_297 = arith.constant 0 : index
    %c0_298 = arith.constant 0 : index
    %455 = vector.load %arg19[%c1_296, %c0_297, %c0_298] : memref<2x1x32xf32, #tpu.memory_space<vmem>>, vector<1x1x32xf32>
    %456 = vector.shape_cast %455 : vector<1x1x32xf32> to vector<1x32xf32>
    %457 = vector.broadcast %456 : vector<1x32xf32> to vector<16x32xf32>
    %458 = arith.addf %454, %457 : vector<16x32xf32>
    %459 = arith.addf %431, %458 : vector<16x32xf32>
    %c5_299 = arith.constant 5 : index
    %c0_300 = arith.constant 0 : index
    %c0_301 = arith.constant 0 : index
    %460 = vector.load %arg14[%c5_299, %c0_300, %c0_301] : memref<8x1x32xf32, #tpu.memory_space<vmem>>, vector<1x1x32xf32>
    %461 = vector.shape_cast %460 : vector<1x1x32xf32> to vector<1x32xf32>
    %c5_302 = arith.constant 5 : index
    %c0_303 = arith.constant 0 : index
    %c0_304 = arith.constant 0 : index
    %462 = vector.load %arg15[%c5_302, %c0_303, %c0_304] : memref<8x1x32xf32, #tpu.memory_space<vmem>>, vector<1x1x32xf32>
    %463 = vector.shape_cast %462 : vector<1x1x32xf32> to vector<1x32xf32>
    %cst_305 = arith.constant dense<0.000000e+00> : vector<16xf32>
    %464 = vector.multi_reduction <add>, %459, %cst_305 [1] : vector<16x32xf32> to vector<16xf32>
    %465 = vector.shape_cast %464 : vector<16xf32> to vector<16x1xf32>
    %cst_306 = arith.constant 3.200000e+01 : f32
    %466 = vector.broadcast %cst_306 : f32 to vector<16x1xf32>
    %467 = arith.divf %465, %466 : vector<16x1xf32>
    %468 = vector.broadcast %467 : vector<16x1xf32> to vector<16x32xf32>
    %469 = arith.subf %459, %468 : vector<16x32xf32>
    %470 = arith.mulf %469, %469 : vector<16x32xf32>
    %cst_307 = arith.constant dense<0.000000e+00> : vector<16xf32>
    %471 = vector.multi_reduction <add>, %470, %cst_307 [1] : vector<16x32xf32> to vector<16xf32>
    %472 = vector.shape_cast %471 : vector<16xf32> to vector<16x1xf32>
    %cst_308 = arith.constant 3.200000e+01 : f32
    %473 = vector.broadcast %cst_308 : f32 to vector<16x1xf32>
    %474 = arith.divf %472, %473 : vector<16x1xf32>
    %475 = vector.broadcast %467 : vector<16x1xf32> to vector<16x32xf32>
    %476 = arith.subf %459, %475 : vector<16x32xf32>
    %cst_309 = arith.constant 9.99999997E-7 : f32
    %477 = vector.broadcast %cst_309 : f32 to vector<16x1xf32>
    %478 = arith.addf %474, %477 : vector<16x1xf32>
    %479 = math.rsqrt %478 : vector<16x1xf32>
    %480 = vector.broadcast %479 : vector<16x1xf32> to vector<16x32xf32>
    %481 = arith.mulf %476, %480 : vector<16x32xf32>
    %482 = vector.broadcast %461 : vector<1x32xf32> to vector<16x32xf32>
    %483 = arith.mulf %481, %482 : vector<16x32xf32>
    %484 = vector.broadcast %463 : vector<1x32xf32> to vector<16x32xf32>
    %485 = arith.addf %483, %484 : vector<16x32xf32>
    %486 = arith.addf %206, %207 : vector<32x32xf32>
    %487 = arith.addf %485, %208 : vector<16x32xf32>
    %c0_310 = arith.constant 0 : index
    %c0_311 = arith.constant 0 : index
    %488 = vector.load %arg42[%c0_310, %c0_311] : memref<32x16xf32, #tpu.memory_space<vmem>>, vector<32x16xf32>
    %c6 = arith.constant 6 : index
    %c0_312 = arith.constant 0 : index
    %c0_313 = arith.constant 0 : index
    %489 = vector.load %arg6[%c6, %c0_312, %c0_313] : memref<10x32x16xf32, #tpu.memory_space<vmem>>, vector<1x32x16xf32>
    %490 = vector.shape_cast %489 : vector<1x32x16xf32> to vector<32x16xf32>
    %cst_314 = arith.constant dense<0.000000e+00> : vector<32x16xf32>
    %491 = tpu.matmul %486, %490, %cst_314 {dimension_numbers = #tpu.dot_dimension_numbers<[1], [0], [0], [1], [0, 0, 1, 1], [], []>} : vector<32x32xf32>, vector<32x16xf32>, vector<32x16xf32> -> vector<32x16xf32>
    %c6_315 = arith.constant 6 : index
    %c0_316 = arith.constant 0 : index
    %c0_317 = arith.constant 0 : index
    %492 = vector.load %arg9[%c6_315, %c0_316, %c0_317] : memref<10x1x16xf32, #tpu.memory_space<vmem>>, vector<1x1x16xf32>
    %493 = vector.shape_cast %492 : vector<1x1x16xf32> to vector<1x16xf32>
    %494 = vector.broadcast %493 : vector<1x16xf32> to vector<32x16xf32>
    %495 = arith.addf %491, %494 : vector<32x16xf32>
    %c6_318 = arith.constant 6 : index
    %c0_319 = arith.constant 0 : index
    %c0_320 = arith.constant 0 : index
    %496 = vector.load %arg7[%c6_318, %c0_319, %c0_320] : memref<10x32x16xf32, #tpu.memory_space<vmem>>, vector<1x32x16xf32>
    %497 = vector.shape_cast %496 : vector<1x32x16xf32> to vector<32x16xf32>
    %cst_321 = arith.constant dense<0.000000e+00> : vector<16x16xf32>
    %498 = tpu.matmul %487, %497, %cst_321 {dimension_numbers = #tpu.dot_dimension_numbers<[1], [0], [0], [1], [0, 0, 1, 1], [], []>} : vector<16x32xf32>, vector<32x16xf32>, vector<16x16xf32> -> vector<16x16xf32>
    %c6_322 = arith.constant 6 : index
    %c0_323 = arith.constant 0 : index
    %c0_324 = arith.constant 0 : index
    %499 = vector.load %arg10[%c6_322, %c0_323, %c0_324] : memref<10x1x16xf32, #tpu.memory_space<vmem>>, vector<1x1x16xf32>
    %500 = vector.shape_cast %499 : vector<1x1x16xf32> to vector<1x16xf32>
    %501 = vector.broadcast %500 : vector<1x16xf32> to vector<16x16xf32>
    %502 = arith.addf %498, %501 : vector<16x16xf32>
    %c6_325 = arith.constant 6 : index
    %c0_326 = arith.constant 0 : index
    %c0_327 = arith.constant 0 : index
    %503 = vector.load %arg8[%c6_325, %c0_326, %c0_327] : memref<10x32x16xf32, #tpu.memory_space<vmem>>, vector<1x32x16xf32>
    %504 = vector.shape_cast %503 : vector<1x32x16xf32> to vector<32x16xf32>
    %cst_328 = arith.constant dense<0.000000e+00> : vector<16x16xf32>
    %505 = tpu.matmul %485, %504, %cst_328 {dimension_numbers = #tpu.dot_dimension_numbers<[1], [0], [0], [1], [0, 0, 1, 1], [], []>} : vector<16x32xf32>, vector<32x16xf32>, vector<16x16xf32> -> vector<16x16xf32>
    %c6_329 = arith.constant 6 : index
    %c0_330 = arith.constant 0 : index
    %c0_331 = arith.constant 0 : index
    %506 = vector.load %arg11[%c6_329, %c0_330, %c0_331] : memref<10x1x16xf32, #tpu.memory_space<vmem>>, vector<1x1x16xf32>
    %507 = vector.shape_cast %506 : vector<1x1x16xf32> to vector<1x16xf32>
    %508 = vector.broadcast %507 : vector<1x16xf32> to vector<16x16xf32>
    %509 = arith.addf %505, %508 : vector<16x16xf32>
    %cst_332 = arith.constant dense<0.000000e+00> : vector<32x16xf32>
    %510 = tpu.matmul %495, %502, %cst_332 {dimension_numbers = #tpu.dot_dimension_numbers<[1], [1], [0], [0], [0, 0, 1, 0], [], []>} : vector<32x16xf32>, vector<16x16xf32>, vector<32x16xf32> -> vector<32x16xf32>
    %cst_333 = arith.constant 2.500000e-01 : f32
    %511 = vector.broadcast %cst_333 : f32 to vector<32x16xf32>
    %512 = arith.mulf %510, %511 : vector<32x16xf32>
    %513 = arith.addf %512, %488 : vector<32x16xf32>
    %cst_334 = arith.constant dense<0xFF800000> : vector<32xf32>
    %514 = vector.multi_reduction <maximumf>, %513, %cst_334 [1] : vector<32x16xf32> to vector<32xf32>
    %515 = vector.shape_cast %514 : vector<32xf32> to vector<32x1xf32>
    %516 = vector.broadcast %515 : vector<32x1xf32> to vector<32x16xf32>
    %517 = arith.subf %513, %516 : vector<32x16xf32>
    %518 = math.exp %517 : vector<32x16xf32>
    %cst_335 = arith.constant dense<0.000000e+00> : vector<32xf32>
    %519 = vector.multi_reduction <add>, %518, %cst_335 [1] : vector<32x16xf32> to vector<32xf32>
    %520 = vector.shape_cast %519 : vector<32xf32> to vector<32x1xf32>
    %521 = tpu.reciprocal %520 {approx = true} : vector<32x1xf32> -> vector<32x1xf32>
    %522 = vector.broadcast %521 : vector<32x1xf32> to vector<32x16xf32>
    %523 = arith.mulf %518, %522 : vector<32x16xf32>
    %cst_336 = arith.constant dense<0.000000e+00> : vector<32x16xf32>
    %524 = tpu.matmul %523, %509, %cst_336 {dimension_numbers = #tpu.dot_dimension_numbers<[1], [0], [0], [1], [0, 0, 1, 1], [], []>} : vector<32x16xf32>, vector<16x16xf32>, vector<32x16xf32> -> vector<32x16xf32>
    %c6_337 = arith.constant 6 : index
    %c0_338 = arith.constant 0 : index
    %c0_339 = arith.constant 0 : index
    %525 = vector.load %arg12[%c6_337, %c0_338, %c0_339] : memref<10x16x32xf32, #tpu.memory_space<vmem>>, vector<1x16x32xf32>
    %526 = vector.shape_cast %525 : vector<1x16x32xf32> to vector<16x32xf32>
    %cst_340 = arith.constant dense<0.000000e+00> : vector<32x32xf32>
    %527 = tpu.matmul %524, %526, %cst_340 {dimension_numbers = #tpu.dot_dimension_numbers<[1], [0], [0], [1], [0, 0, 1, 1], [], []>} : vector<32x16xf32>, vector<16x32xf32>, vector<32x32xf32> -> vector<32x32xf32>
    %c7 = arith.constant 7 : index
    %c0_341 = arith.constant 0 : index
    %c0_342 = arith.constant 0 : index
    %528 = vector.load %arg6[%c7, %c0_341, %c0_342] : memref<10x32x16xf32, #tpu.memory_space<vmem>>, vector<1x32x16xf32>
    %529 = vector.shape_cast %528 : vector<1x32x16xf32> to vector<32x16xf32>
    %cst_343 = arith.constant dense<0.000000e+00> : vector<32x16xf32>
    %530 = tpu.matmul %486, %529, %cst_343 {dimension_numbers = #tpu.dot_dimension_numbers<[1], [0], [0], [1], [0, 0, 1, 1], [], []>} : vector<32x32xf32>, vector<32x16xf32>, vector<32x16xf32> -> vector<32x16xf32>
    %c7_344 = arith.constant 7 : index
    %c0_345 = arith.constant 0 : index
    %c0_346 = arith.constant 0 : index
    %531 = vector.load %arg9[%c7_344, %c0_345, %c0_346] : memref<10x1x16xf32, #tpu.memory_space<vmem>>, vector<1x1x16xf32>
    %532 = vector.shape_cast %531 : vector<1x1x16xf32> to vector<1x16xf32>
    %533 = vector.broadcast %532 : vector<1x16xf32> to vector<32x16xf32>
    %534 = arith.addf %530, %533 : vector<32x16xf32>
    %c7_347 = arith.constant 7 : index
    %c0_348 = arith.constant 0 : index
    %c0_349 = arith.constant 0 : index
    %535 = vector.load %arg7[%c7_347, %c0_348, %c0_349] : memref<10x32x16xf32, #tpu.memory_space<vmem>>, vector<1x32x16xf32>
    %536 = vector.shape_cast %535 : vector<1x32x16xf32> to vector<32x16xf32>
    %cst_350 = arith.constant dense<0.000000e+00> : vector<16x16xf32>
    %537 = tpu.matmul %487, %536, %cst_350 {dimension_numbers = #tpu.dot_dimension_numbers<[1], [0], [0], [1], [0, 0, 1, 1], [], []>} : vector<16x32xf32>, vector<32x16xf32>, vector<16x16xf32> -> vector<16x16xf32>
    %c7_351 = arith.constant 7 : index
    %c0_352 = arith.constant 0 : index
    %c0_353 = arith.constant 0 : index
    %538 = vector.load %arg10[%c7_351, %c0_352, %c0_353] : memref<10x1x16xf32, #tpu.memory_space<vmem>>, vector<1x1x16xf32>
    %539 = vector.shape_cast %538 : vector<1x1x16xf32> to vector<1x16xf32>
    %540 = vector.broadcast %539 : vector<1x16xf32> to vector<16x16xf32>
    %541 = arith.addf %537, %540 : vector<16x16xf32>
    %c7_354 = arith.constant 7 : index
    %c0_355 = arith.constant 0 : index
    %c0_356 = arith.constant 0 : index
    %542 = vector.load %arg8[%c7_354, %c0_355, %c0_356] : memref<10x32x16xf32, #tpu.memory_space<vmem>>, vector<1x32x16xf32>
    %543 = vector.shape_cast %542 : vector<1x32x16xf32> to vector<32x16xf32>
    %cst_357 = arith.constant dense<0.000000e+00> : vector<16x16xf32>
    %544 = tpu.matmul %485, %543, %cst_357 {dimension_numbers = #tpu.dot_dimension_numbers<[1], [0], [0], [1], [0, 0, 1, 1], [], []>} : vector<16x32xf32>, vector<32x16xf32>, vector<16x16xf32> -> vector<16x16xf32>
    %c7_358 = arith.constant 7 : index
    %c0_359 = arith.constant 0 : index
    %c0_360 = arith.constant 0 : index
    %545 = vector.load %arg11[%c7_358, %c0_359, %c0_360] : memref<10x1x16xf32, #tpu.memory_space<vmem>>, vector<1x1x16xf32>
    %546 = vector.shape_cast %545 : vector<1x1x16xf32> to vector<1x16xf32>
    %547 = vector.broadcast %546 : vector<1x16xf32> to vector<16x16xf32>
    %548 = arith.addf %544, %547 : vector<16x16xf32>
    %cst_361 = arith.constant dense<0.000000e+00> : vector<32x16xf32>
    %549 = tpu.matmul %534, %541, %cst_361 {dimension_numbers = #tpu.dot_dimension_numbers<[1], [1], [0], [0], [0, 0, 1, 0], [], []>} : vector<32x16xf32>, vector<16x16xf32>, vector<32x16xf32> -> vector<32x16xf32>
    %cst_362 = arith.constant 2.500000e-01 : f32
    %550 = vector.broadcast %cst_362 : f32 to vector<32x16xf32>
    %551 = arith.mulf %549, %550 : vector<32x16xf32>
    %552 = arith.addf %551, %488 : vector<32x16xf32>
    %cst_363 = arith.constant dense<0xFF800000> : vector<32xf32>
    %553 = vector.multi_reduction <maximumf>, %552, %cst_363 [1] : vector<32x16xf32> to vector<32xf32>
    %554 = vector.shape_cast %553 : vector<32xf32> to vector<32x1xf32>
    %555 = vector.broadcast %554 : vector<32x1xf32> to vector<32x16xf32>
    %556 = arith.subf %552, %555 : vector<32x16xf32>
    %557 = math.exp %556 : vector<32x16xf32>
    %cst_364 = arith.constant dense<0.000000e+00> : vector<32xf32>
    %558 = vector.multi_reduction <add>, %557, %cst_364 [1] : vector<32x16xf32> to vector<32xf32>
    %559 = vector.shape_cast %558 : vector<32xf32> to vector<32x1xf32>
    %560 = tpu.reciprocal %559 {approx = true} : vector<32x1xf32> -> vector<32x1xf32>
    %561 = vector.broadcast %560 : vector<32x1xf32> to vector<32x16xf32>
    %562 = arith.mulf %557, %561 : vector<32x16xf32>
    %cst_365 = arith.constant dense<0.000000e+00> : vector<32x16xf32>
    %563 = tpu.matmul %562, %548, %cst_365 {dimension_numbers = #tpu.dot_dimension_numbers<[1], [0], [0], [1], [0, 0, 1, 1], [], []>} : vector<32x16xf32>, vector<16x16xf32>, vector<32x16xf32> -> vector<32x16xf32>
    %c7_366 = arith.constant 7 : index
    %c0_367 = arith.constant 0 : index
    %c0_368 = arith.constant 0 : index
    %564 = vector.load %arg12[%c7_366, %c0_367, %c0_368] : memref<10x16x32xf32, #tpu.memory_space<vmem>>, vector<1x16x32xf32>
    %565 = vector.shape_cast %564 : vector<1x16x32xf32> to vector<16x32xf32>
    %cst_369 = arith.constant dense<0.000000e+00> : vector<32x32xf32>
    %566 = tpu.matmul %563, %565, %cst_369 {dimension_numbers = #tpu.dot_dimension_numbers<[1], [0], [0], [1], [0, 0, 1, 1], [], []>} : vector<32x16xf32>, vector<16x32xf32>, vector<32x32xf32> -> vector<32x32xf32>
    %567 = arith.addf %527, %566 : vector<32x32xf32>
    %c3_370 = arith.constant 3 : index
    %c0_371 = arith.constant 0 : index
    %c0_372 = arith.constant 0 : index
    %568 = vector.load %arg13[%c3_370, %c0_371, %c0_372] : memref<5x1x32xf32, #tpu.memory_space<vmem>>, vector<1x1x32xf32>
    %569 = vector.shape_cast %568 : vector<1x1x32xf32> to vector<1x32xf32>
    %570 = vector.broadcast %569 : vector<1x32xf32> to vector<32x32xf32>
    %571 = arith.addf %567, %570 : vector<32x32xf32>
    %572 = arith.addf %206, %571 : vector<32x32xf32>
    %c6_373 = arith.constant 6 : index
    %c0_374 = arith.constant 0 : index
    %c0_375 = arith.constant 0 : index
    %573 = vector.load %arg14[%c6_373, %c0_374, %c0_375] : memref<8x1x32xf32, #tpu.memory_space<vmem>>, vector<1x1x32xf32>
    %574 = vector.shape_cast %573 : vector<1x1x32xf32> to vector<1x32xf32>
    %c6_376 = arith.constant 6 : index
    %c0_377 = arith.constant 0 : index
    %c0_378 = arith.constant 0 : index
    %575 = vector.load %arg15[%c6_376, %c0_377, %c0_378] : memref<8x1x32xf32, #tpu.memory_space<vmem>>, vector<1x1x32xf32>
    %576 = vector.shape_cast %575 : vector<1x1x32xf32> to vector<1x32xf32>
    %cst_379 = arith.constant dense<0.000000e+00> : vector<32xf32>
    %577 = vector.multi_reduction <add>, %572, %cst_379 [1] : vector<32x32xf32> to vector<32xf32>
    %578 = vector.shape_cast %577 : vector<32xf32> to vector<32x1xf32>
    %cst_380 = arith.constant 3.200000e+01 : f32
    %579 = vector.broadcast %cst_380 : f32 to vector<32x1xf32>
    %580 = arith.divf %578, %579 : vector<32x1xf32>
    %581 = vector.broadcast %580 : vector<32x1xf32> to vector<32x32xf32>
    %582 = arith.subf %572, %581 : vector<32x32xf32>
    %583 = arith.mulf %582, %582 : vector<32x32xf32>
    %cst_381 = arith.constant dense<0.000000e+00> : vector<32xf32>
    %584 = vector.multi_reduction <add>, %583, %cst_381 [1] : vector<32x32xf32> to vector<32xf32>
    %585 = vector.shape_cast %584 : vector<32xf32> to vector<32x1xf32>
    %cst_382 = arith.constant 3.200000e+01 : f32
    %586 = vector.broadcast %cst_382 : f32 to vector<32x1xf32>
    %587 = arith.divf %585, %586 : vector<32x1xf32>
    %588 = vector.broadcast %580 : vector<32x1xf32> to vector<32x32xf32>
    %589 = arith.subf %572, %588 : vector<32x32xf32>
    %cst_383 = arith.constant 9.99999997E-7 : f32
    %590 = vector.broadcast %cst_383 : f32 to vector<32x1xf32>
    %591 = arith.addf %587, %590 : vector<32x1xf32>
    %592 = math.rsqrt %591 : vector<32x1xf32>
    %593 = vector.broadcast %592 : vector<32x1xf32> to vector<32x32xf32>
    %594 = arith.mulf %589, %593 : vector<32x32xf32>
    %595 = vector.broadcast %574 : vector<1x32xf32> to vector<32x32xf32>
    %596 = arith.mulf %594, %595 : vector<32x32xf32>
    %597 = vector.broadcast %576 : vector<1x32xf32> to vector<32x32xf32>
    %598 = arith.addf %596, %597 : vector<32x32xf32>
    %599 = arith.addf %485, %208 : vector<16x32xf32>
    %600 = arith.addf %598, %207 : vector<32x32xf32>
    %c0_384 = arith.constant 0 : index
    %c0_385 = arith.constant 0 : index
    %601 = vector.load %arg41[%c0_384, %c0_385] : memref<16x32xf32, #tpu.memory_space<vmem>>, vector<16x32xf32>
    %c8 = arith.constant 8 : index
    %c0_386 = arith.constant 0 : index
    %c0_387 = arith.constant 0 : index
    %602 = vector.load %arg6[%c8, %c0_386, %c0_387] : memref<10x32x16xf32, #tpu.memory_space<vmem>>, vector<1x32x16xf32>
    %603 = vector.shape_cast %602 : vector<1x32x16xf32> to vector<32x16xf32>
    %cst_388 = arith.constant dense<0.000000e+00> : vector<16x16xf32>
    %604 = tpu.matmul %599, %603, %cst_388 {dimension_numbers = #tpu.dot_dimension_numbers<[1], [0], [0], [1], [0, 0, 1, 1], [], []>} : vector<16x32xf32>, vector<32x16xf32>, vector<16x16xf32> -> vector<16x16xf32>
    %c8_389 = arith.constant 8 : index
    %c0_390 = arith.constant 0 : index
    %c0_391 = arith.constant 0 : index
    %605 = vector.load %arg9[%c8_389, %c0_390, %c0_391] : memref<10x1x16xf32, #tpu.memory_space<vmem>>, vector<1x1x16xf32>
    %606 = vector.shape_cast %605 : vector<1x1x16xf32> to vector<1x16xf32>
    %607 = vector.broadcast %606 : vector<1x16xf32> to vector<16x16xf32>
    %608 = arith.addf %604, %607 : vector<16x16xf32>
    %c8_392 = arith.constant 8 : index
    %c0_393 = arith.constant 0 : index
    %c0_394 = arith.constant 0 : index
    %609 = vector.load %arg7[%c8_392, %c0_393, %c0_394] : memref<10x32x16xf32, #tpu.memory_space<vmem>>, vector<1x32x16xf32>
    %610 = vector.shape_cast %609 : vector<1x32x16xf32> to vector<32x16xf32>
    %cst_395 = arith.constant dense<0.000000e+00> : vector<32x16xf32>
    %611 = tpu.matmul %600, %610, %cst_395 {dimension_numbers = #tpu.dot_dimension_numbers<[1], [0], [0], [1], [0, 0, 1, 1], [], []>} : vector<32x32xf32>, vector<32x16xf32>, vector<32x16xf32> -> vector<32x16xf32>
    %c8_396 = arith.constant 8 : index
    %c0_397 = arith.constant 0 : index
    %c0_398 = arith.constant 0 : index
    %612 = vector.load %arg10[%c8_396, %c0_397, %c0_398] : memref<10x1x16xf32, #tpu.memory_space<vmem>>, vector<1x1x16xf32>
    %613 = vector.shape_cast %612 : vector<1x1x16xf32> to vector<1x16xf32>
    %614 = vector.broadcast %613 : vector<1x16xf32> to vector<32x16xf32>
    %615 = arith.addf %611, %614 : vector<32x16xf32>
    %c8_399 = arith.constant 8 : index
    %c0_400 = arith.constant 0 : index
    %c0_401 = arith.constant 0 : index
    %616 = vector.load %arg8[%c8_399, %c0_400, %c0_401] : memref<10x32x16xf32, #tpu.memory_space<vmem>>, vector<1x32x16xf32>
    %617 = vector.shape_cast %616 : vector<1x32x16xf32> to vector<32x16xf32>
    %cst_402 = arith.constant dense<0.000000e+00> : vector<32x16xf32>
    %618 = tpu.matmul %598, %617, %cst_402 {dimension_numbers = #tpu.dot_dimension_numbers<[1], [0], [0], [1], [0, 0, 1, 1], [], []>} : vector<32x32xf32>, vector<32x16xf32>, vector<32x16xf32> -> vector<32x16xf32>
    %c8_403 = arith.constant 8 : index
    %c0_404 = arith.constant 0 : index
    %c0_405 = arith.constant 0 : index
    %619 = vector.load %arg11[%c8_403, %c0_404, %c0_405] : memref<10x1x16xf32, #tpu.memory_space<vmem>>, vector<1x1x16xf32>
    %620 = vector.shape_cast %619 : vector<1x1x16xf32> to vector<1x16xf32>
    %621 = vector.broadcast %620 : vector<1x16xf32> to vector<32x16xf32>
    %622 = arith.addf %618, %621 : vector<32x16xf32>
    %cst_406 = arith.constant dense<0.000000e+00> : vector<16x32xf32>
    %623 = tpu.matmul %608, %615, %cst_406 {dimension_numbers = #tpu.dot_dimension_numbers<[1], [1], [0], [0], [0, 0, 1, 0], [], []>} : vector<16x16xf32>, vector<32x16xf32>, vector<16x32xf32> -> vector<16x32xf32>
    %cst_407 = arith.constant 2.500000e-01 : f32
    %624 = vector.broadcast %cst_407 : f32 to vector<16x32xf32>
    %625 = arith.mulf %623, %624 : vector<16x32xf32>
    %626 = arith.addf %625, %601 : vector<16x32xf32>
    %cst_408 = arith.constant dense<0xFF800000> : vector<16xf32>
    %627 = vector.multi_reduction <maximumf>, %626, %cst_408 [1] : vector<16x32xf32> to vector<16xf32>
    %628 = vector.shape_cast %627 : vector<16xf32> to vector<16x1xf32>
    %629 = vector.broadcast %628 : vector<16x1xf32> to vector<16x32xf32>
    %630 = arith.subf %626, %629 : vector<16x32xf32>
    %631 = math.exp %630 : vector<16x32xf32>
    %cst_409 = arith.constant dense<0.000000e+00> : vector<16xf32>
    %632 = vector.multi_reduction <add>, %631, %cst_409 [1] : vector<16x32xf32> to vector<16xf32>
    %633 = vector.shape_cast %632 : vector<16xf32> to vector<16x1xf32>
    %634 = tpu.reciprocal %633 {approx = true} : vector<16x1xf32> -> vector<16x1xf32>
    %635 = vector.broadcast %634 : vector<16x1xf32> to vector<16x32xf32>
    %636 = arith.mulf %631, %635 : vector<16x32xf32>
    %cst_410 = arith.constant dense<0.000000e+00> : vector<16x16xf32>
    %637 = tpu.matmul %636, %622, %cst_410 {dimension_numbers = #tpu.dot_dimension_numbers<[1], [0], [0], [1], [0, 0, 1, 1], [], []>} : vector<16x32xf32>, vector<32x16xf32>, vector<16x16xf32> -> vector<16x16xf32>
    %c8_411 = arith.constant 8 : index
    %c0_412 = arith.constant 0 : index
    %c0_413 = arith.constant 0 : index
    %638 = vector.load %arg12[%c8_411, %c0_412, %c0_413] : memref<10x16x32xf32, #tpu.memory_space<vmem>>, vector<1x16x32xf32>
    %639 = vector.shape_cast %638 : vector<1x16x32xf32> to vector<16x32xf32>
    %cst_414 = arith.constant dense<0.000000e+00> : vector<16x32xf32>
    %640 = tpu.matmul %637, %639, %cst_414 {dimension_numbers = #tpu.dot_dimension_numbers<[1], [0], [0], [1], [0, 0, 1, 1], [], []>} : vector<16x16xf32>, vector<16x32xf32>, vector<16x32xf32> -> vector<16x32xf32>
    %c9 = arith.constant 9 : index
    %c0_415 = arith.constant 0 : index
    %c0_416 = arith.constant 0 : index
    %641 = vector.load %arg6[%c9, %c0_415, %c0_416] : memref<10x32x16xf32, #tpu.memory_space<vmem>>, vector<1x32x16xf32>
    %642 = vector.shape_cast %641 : vector<1x32x16xf32> to vector<32x16xf32>
    %cst_417 = arith.constant dense<0.000000e+00> : vector<16x16xf32>
    %643 = tpu.matmul %599, %642, %cst_417 {dimension_numbers = #tpu.dot_dimension_numbers<[1], [0], [0], [1], [0, 0, 1, 1], [], []>} : vector<16x32xf32>, vector<32x16xf32>, vector<16x16xf32> -> vector<16x16xf32>
    %c9_418 = arith.constant 9 : index
    %c0_419 = arith.constant 0 : index
    %c0_420 = arith.constant 0 : index
    %644 = vector.load %arg9[%c9_418, %c0_419, %c0_420] : memref<10x1x16xf32, #tpu.memory_space<vmem>>, vector<1x1x16xf32>
    %645 = vector.shape_cast %644 : vector<1x1x16xf32> to vector<1x16xf32>
    %646 = vector.broadcast %645 : vector<1x16xf32> to vector<16x16xf32>
    %647 = arith.addf %643, %646 : vector<16x16xf32>
    %c9_421 = arith.constant 9 : index
    %c0_422 = arith.constant 0 : index
    %c0_423 = arith.constant 0 : index
    %648 = vector.load %arg7[%c9_421, %c0_422, %c0_423] : memref<10x32x16xf32, #tpu.memory_space<vmem>>, vector<1x32x16xf32>
    %649 = vector.shape_cast %648 : vector<1x32x16xf32> to vector<32x16xf32>
    %cst_424 = arith.constant dense<0.000000e+00> : vector<32x16xf32>
    %650 = tpu.matmul %600, %649, %cst_424 {dimension_numbers = #tpu.dot_dimension_numbers<[1], [0], [0], [1], [0, 0, 1, 1], [], []>} : vector<32x32xf32>, vector<32x16xf32>, vector<32x16xf32> -> vector<32x16xf32>
    %c9_425 = arith.constant 9 : index
    %c0_426 = arith.constant 0 : index
    %c0_427 = arith.constant 0 : index
    %651 = vector.load %arg10[%c9_425, %c0_426, %c0_427] : memref<10x1x16xf32, #tpu.memory_space<vmem>>, vector<1x1x16xf32>
    %652 = vector.shape_cast %651 : vector<1x1x16xf32> to vector<1x16xf32>
    %653 = vector.broadcast %652 : vector<1x16xf32> to vector<32x16xf32>
    %654 = arith.addf %650, %653 : vector<32x16xf32>
    %c9_428 = arith.constant 9 : index
    %c0_429 = arith.constant 0 : index
    %c0_430 = arith.constant 0 : index
    %655 = vector.load %arg8[%c9_428, %c0_429, %c0_430] : memref<10x32x16xf32, #tpu.memory_space<vmem>>, vector<1x32x16xf32>
    %656 = vector.shape_cast %655 : vector<1x32x16xf32> to vector<32x16xf32>
    %cst_431 = arith.constant dense<0.000000e+00> : vector<32x16xf32>
    %657 = tpu.matmul %598, %656, %cst_431 {dimension_numbers = #tpu.dot_dimension_numbers<[1], [0], [0], [1], [0, 0, 1, 1], [], []>} : vector<32x32xf32>, vector<32x16xf32>, vector<32x16xf32> -> vector<32x16xf32>
    %c9_432 = arith.constant 9 : index
    %c0_433 = arith.constant 0 : index
    %c0_434 = arith.constant 0 : index
    %658 = vector.load %arg11[%c9_432, %c0_433, %c0_434] : memref<10x1x16xf32, #tpu.memory_space<vmem>>, vector<1x1x16xf32>
    %659 = vector.shape_cast %658 : vector<1x1x16xf32> to vector<1x16xf32>
    %660 = vector.broadcast %659 : vector<1x16xf32> to vector<32x16xf32>
    %661 = arith.addf %657, %660 : vector<32x16xf32>
    %cst_435 = arith.constant dense<0.000000e+00> : vector<16x32xf32>
    %662 = tpu.matmul %647, %654, %cst_435 {dimension_numbers = #tpu.dot_dimension_numbers<[1], [1], [0], [0], [0, 0, 1, 0], [], []>} : vector<16x16xf32>, vector<32x16xf32>, vector<16x32xf32> -> vector<16x32xf32>
    %cst_436 = arith.constant 2.500000e-01 : f32
    %663 = vector.broadcast %cst_436 : f32 to vector<16x32xf32>
    %664 = arith.mulf %662, %663 : vector<16x32xf32>
    %665 = arith.addf %664, %601 : vector<16x32xf32>
    %cst_437 = arith.constant dense<0xFF800000> : vector<16xf32>
    %666 = vector.multi_reduction <maximumf>, %665, %cst_437 [1] : vector<16x32xf32> to vector<16xf32>
    %667 = vector.shape_cast %666 : vector<16xf32> to vector<16x1xf32>
    %668 = vector.broadcast %667 : vector<16x1xf32> to vector<16x32xf32>
    %669 = arith.subf %665, %668 : vector<16x32xf32>
    %670 = math.exp %669 : vector<16x32xf32>
    %cst_438 = arith.constant dense<0.000000e+00> : vector<16xf32>
    %671 = vector.multi_reduction <add>, %670, %cst_438 [1] : vector<16x32xf32> to vector<16xf32>
    %672 = vector.shape_cast %671 : vector<16xf32> to vector<16x1xf32>
    %673 = tpu.reciprocal %672 {approx = true} : vector<16x1xf32> -> vector<16x1xf32>
    %674 = vector.broadcast %673 : vector<16x1xf32> to vector<16x32xf32>
    %675 = arith.mulf %670, %674 : vector<16x32xf32>
    %cst_439 = arith.constant dense<0.000000e+00> : vector<16x16xf32>
    %676 = tpu.matmul %675, %661, %cst_439 {dimension_numbers = #tpu.dot_dimension_numbers<[1], [0], [0], [1], [0, 0, 1, 1], [], []>} : vector<16x32xf32>, vector<32x16xf32>, vector<16x16xf32> -> vector<16x16xf32>
    %c9_440 = arith.constant 9 : index
    %c0_441 = arith.constant 0 : index
    %c0_442 = arith.constant 0 : index
    %677 = vector.load %arg12[%c9_440, %c0_441, %c0_442] : memref<10x16x32xf32, #tpu.memory_space<vmem>>, vector<1x16x32xf32>
    %678 = vector.shape_cast %677 : vector<1x16x32xf32> to vector<16x32xf32>
    %cst_443 = arith.constant dense<0.000000e+00> : vector<16x32xf32>
    %679 = tpu.matmul %676, %678, %cst_443 {dimension_numbers = #tpu.dot_dimension_numbers<[1], [0], [0], [1], [0, 0, 1, 1], [], []>} : vector<16x16xf32>, vector<16x32xf32>, vector<16x32xf32> -> vector<16x32xf32>
    %680 = arith.addf %640, %679 : vector<16x32xf32>
    %c4_444 = arith.constant 4 : index
    %c0_445 = arith.constant 0 : index
    %c0_446 = arith.constant 0 : index
    %681 = vector.load %arg13[%c4_444, %c0_445, %c0_446] : memref<5x1x32xf32, #tpu.memory_space<vmem>>, vector<1x1x32xf32>
    %682 = vector.shape_cast %681 : vector<1x1x32xf32> to vector<1x32xf32>
    %683 = vector.broadcast %682 : vector<1x32xf32> to vector<16x32xf32>
    %684 = arith.addf %680, %683 : vector<16x32xf32>
    %685 = arith.addf %485, %684 : vector<16x32xf32>
    %c7_447 = arith.constant 7 : index
    %c0_448 = arith.constant 0 : index
    %c0_449 = arith.constant 0 : index
    %686 = vector.load %arg14[%c7_447, %c0_448, %c0_449] : memref<8x1x32xf32, #tpu.memory_space<vmem>>, vector<1x1x32xf32>
    %687 = vector.shape_cast %686 : vector<1x1x32xf32> to vector<1x32xf32>
    %c7_450 = arith.constant 7 : index
    %c0_451 = arith.constant 0 : index
    %c0_452 = arith.constant 0 : index
    %688 = vector.load %arg15[%c7_450, %c0_451, %c0_452] : memref<8x1x32xf32, #tpu.memory_space<vmem>>, vector<1x1x32xf32>
    %689 = vector.shape_cast %688 : vector<1x1x32xf32> to vector<1x32xf32>
    %cst_453 = arith.constant dense<0.000000e+00> : vector<16xf32>
    %690 = vector.multi_reduction <add>, %685, %cst_453 [1] : vector<16x32xf32> to vector<16xf32>
    %691 = vector.shape_cast %690 : vector<16xf32> to vector<16x1xf32>
    %cst_454 = arith.constant 3.200000e+01 : f32
    %692 = vector.broadcast %cst_454 : f32 to vector<16x1xf32>
    %693 = arith.divf %691, %692 : vector<16x1xf32>
    %694 = vector.broadcast %693 : vector<16x1xf32> to vector<16x32xf32>
    %695 = arith.subf %685, %694 : vector<16x32xf32>
    %696 = arith.mulf %695, %695 : vector<16x32xf32>
    %cst_455 = arith.constant dense<0.000000e+00> : vector<16xf32>
    %697 = vector.multi_reduction <add>, %696, %cst_455 [1] : vector<16x32xf32> to vector<16xf32>
    %698 = vector.shape_cast %697 : vector<16xf32> to vector<16x1xf32>
    %cst_456 = arith.constant 3.200000e+01 : f32
    %699 = vector.broadcast %cst_456 : f32 to vector<16x1xf32>
    %700 = arith.divf %698, %699 : vector<16x1xf32>
    %701 = vector.broadcast %693 : vector<16x1xf32> to vector<16x32xf32>
    %702 = arith.subf %685, %701 : vector<16x32xf32>
    %cst_457 = arith.constant 9.99999997E-7 : f32
    %703 = vector.broadcast %cst_457 : f32 to vector<16x1xf32>
    %704 = arith.addf %700, %703 : vector<16x1xf32>
    %705 = math.rsqrt %704 : vector<16x1xf32>
    %706 = vector.broadcast %705 : vector<16x1xf32> to vector<16x32xf32>
    %707 = arith.mulf %702, %706 : vector<16x32xf32>
    %708 = vector.broadcast %687 : vector<1x32xf32> to vector<16x32xf32>
    %709 = arith.mulf %707, %708 : vector<16x32xf32>
    %710 = vector.broadcast %689 : vector<1x32xf32> to vector<16x32xf32>
    %711 = arith.addf %709, %710 : vector<16x32xf32>
    %c0_458 = arith.constant 0 : index
    %c0_459 = arith.constant 0 : index
    %712 = vector.load %arg32[%c0_458, %c0_459] : memref<32x32xf32, #tpu.memory_space<vmem>>, vector<32x32xf32>
    %cst_460 = arith.constant dense<0.000000e+00> : vector<16x32xf32>
    %713 = tpu.matmul %711, %712, %cst_460 {dimension_numbers = #tpu.dot_dimension_numbers<[1], [0], [0], [1], [0, 0, 1, 1], [], []>} : vector<16x32xf32>, vector<32x32xf32>, vector<16x32xf32> -> vector<16x32xf32>
    %c0_461 = arith.constant 0 : index
    %c0_462 = arith.constant 0 : index
    %714 = vector.load %arg33[%c0_461, %c0_462] : memref<1x32xf32, #tpu.memory_space<vmem>>, vector<1x32xf32>
    %715 = vector.broadcast %714 : vector<1x32xf32> to vector<16x32xf32>
    %716 = arith.addf %713, %715 : vector<16x32xf32>
    %717 = arith.mulf %716, %716 : vector<16x32xf32>
    %718 = arith.mulf %716, %717 : vector<16x32xf32>
    %cst_463 = arith.constant 4.471500e-02 : f32
    %719 = vector.broadcast %cst_463 : f32 to vector<16x32xf32>
    %720 = arith.mulf %719, %718 : vector<16x32xf32>
    %721 = arith.addf %716, %720 : vector<16x32xf32>
    %cst_464 = arith.constant 0.797884583 : f32
    %722 = vector.broadcast %cst_464 : f32 to vector<16x32xf32>
    %723 = arith.mulf %722, %721 : vector<16x32xf32>
    %724 = math.tanh %723 : vector<16x32xf32>
    %cst_465 = arith.constant 1.000000e+00 : f32
    %725 = vector.broadcast %cst_465 : f32 to vector<16x32xf32>
    %726 = arith.addf %725, %724 : vector<16x32xf32>
    %cst_466 = arith.constant 5.000000e-01 : f32
    %727 = vector.broadcast %cst_466 : f32 to vector<16x32xf32>
    %728 = arith.mulf %727, %726 : vector<16x32xf32>
    %729 = arith.mulf %716, %728 : vector<16x32xf32>
    %c0_467 = arith.constant 0 : index
    %c0_468 = arith.constant 0 : index
    %730 = vector.load %arg34[%c0_467, %c0_468] : memref<32x8xf32, #tpu.memory_space<vmem>>, vector<32x8xf32>
    %cst_469 = arith.constant dense<0.000000e+00> : vector<16x8xf32>
    %731 = tpu.matmul %729, %730, %cst_469 {dimension_numbers = #tpu.dot_dimension_numbers<[1], [0], [0], [1], [0, 0, 1, 1], [], []>} : vector<16x32xf32>, vector<32x8xf32>, vector<16x8xf32> -> vector<16x8xf32>
    %c0_470 = arith.constant 0 : index
    %c0_471 = arith.constant 0 : index
    %732 = vector.load %arg35[%c0_470, %c0_471] : memref<1x8xf32, #tpu.memory_space<vmem>>, vector<1x8xf32>
    %733 = vector.broadcast %732 : vector<1x8xf32> to vector<16x8xf32>
    %734 = arith.addf %731, %733 : vector<16x8xf32>
    %c0_472 = arith.constant 0 : index
    %c0_473 = arith.constant 0 : index
    %735 = vector.load %arg36[%c0_472, %c0_473] : memref<32x16xf32, #tpu.memory_space<vmem>>, vector<32x16xf32>
    %cst_474 = arith.constant dense<0.000000e+00> : vector<32x8xf32>
    %736 = tpu.matmul %735, %734, %cst_474 {dimension_numbers = #tpu.dot_dimension_numbers<[1], [0], [0], [1], [0, 0, 1, 1], [], []>} : vector<32x16xf32>, vector<16x8xf32>, vector<32x8xf32> -> vector<32x8xf32>
    %c0_475 = arith.constant 0 : index
    %c0_476 = arith.constant 0 : index
    %737 = vector.load %arg37[%c0_475, %c0_476] : memref<8x128xf32, #tpu.memory_space<vmem>>, vector<8x128xf32>
    %cst_477 = arith.constant dense<0.000000e+00> : vector<32x128xf32>
    %738 = tpu.matmul %736, %737, %cst_477 {dimension_numbers = #tpu.dot_dimension_numbers<[1], [0], [0], [1], [0, 0, 1, 1], [], []>} : vector<32x8xf32>, vector<8x128xf32>, vector<32x128xf32> -> vector<32x128xf32>
    %c0_478 = arith.constant 0 : index
    %c0_479 = arith.constant 0 : index
    %739 = vector.load %arg23[%c0_478, %c0_479] : memref<32x64xf32, #tpu.memory_space<vmem>>, vector<32x64xf32>
    %cst_480 = arith.constant dense<0.000000e+00> : vector<32x64xf32>
    %740 = tpu.matmul %598, %739, %cst_480 {dimension_numbers = #tpu.dot_dimension_numbers<[1], [0], [0], [1], [0, 0, 1, 1], [], []>} : vector<32x32xf32>, vector<32x64xf32>, vector<32x64xf32> -> vector<32x64xf32>
    %c0_481 = arith.constant 0 : index
    %c0_482 = arith.constant 0 : index
    %741 = vector.load %arg24[%c0_481, %c0_482] : memref<1x64xf32, #tpu.memory_space<vmem>>, vector<1x64xf32>
    %742 = vector.broadcast %741 : vector<1x64xf32> to vector<32x64xf32>
    %743 = arith.addf %740, %742 : vector<32x64xf32>
    %c0_483 = arith.constant 0 : index
    %c0_484 = arith.constant 0 : index
    %744 = vector.load %arg27[%c0_483, %c0_484] : memref<64x64xf32, #tpu.memory_space<vmem>>, vector<64x64xf32>
    %cst_485 = arith.constant dense<0.000000e+00> : vector<32x64xf32>
    %745 = tpu.matmul %743, %744, %cst_485 {dimension_numbers = #tpu.dot_dimension_numbers<[1], [0], [0], [1], [0, 0, 1, 1], [], []>} : vector<32x64xf32>, vector<64x64xf32>, vector<32x64xf32> -> vector<32x64xf32>
    %746 = arith.subf %743, %745 : vector<32x64xf32>
    %747 = arith.mulf %746, %746 : vector<32x64xf32>
    %c0_486 = arith.constant 0 : index
    %c0_487 = arith.constant 0 : index
    %748 = vector.load %arg27[%c0_486, %c0_487] : memref<64x64xf32, #tpu.memory_space<vmem>>, vector<64x64xf32>
    %cst_488 = arith.constant dense<0.000000e+00> : vector<32x64xf32>
    %749 = tpu.matmul %747, %748, %cst_488 {dimension_numbers = #tpu.dot_dimension_numbers<[1], [0], [0], [1], [0, 0, 1, 1], [], []>} : vector<32x64xf32>, vector<64x64xf32>, vector<32x64xf32> -> vector<32x64xf32>
    %cst_489 = arith.constant 9.99999997E-7 : f32
    %750 = vector.broadcast %cst_489 : f32 to vector<32x64xf32>
    %751 = arith.addf %749, %750 : vector<32x64xf32>
    %752 = math.rsqrt %751 : vector<32x64xf32>
    %753 = arith.mulf %746, %752 : vector<32x64xf32>
    %c0_490 = arith.constant 0 : index
    %c0_491 = arith.constant 0 : index
    %754 = vector.load %arg25[%c0_490, %c0_491] : memref<1x64xf32, #tpu.memory_space<vmem>>, vector<1x64xf32>
    %755 = vector.broadcast %754 : vector<1x64xf32> to vector<32x64xf32>
    %756 = arith.mulf %753, %755 : vector<32x64xf32>
    %c0_492 = arith.constant 0 : index
    %c0_493 = arith.constant 0 : index
    %757 = vector.load %arg26[%c0_492, %c0_493] : memref<1x64xf32, #tpu.memory_space<vmem>>, vector<1x64xf32>
    %758 = vector.broadcast %757 : vector<1x64xf32> to vector<32x64xf32>
    %759 = arith.addf %756, %758 : vector<32x64xf32>
    %760 = arith.mulf %759, %759 : vector<32x64xf32>
    %761 = arith.mulf %759, %760 : vector<32x64xf32>
    %cst_494 = arith.constant 4.471500e-02 : f32
    %762 = vector.broadcast %cst_494 : f32 to vector<32x64xf32>
    %763 = arith.mulf %762, %761 : vector<32x64xf32>
    %764 = arith.addf %759, %763 : vector<32x64xf32>
    %cst_495 = arith.constant 0.797884583 : f32
    %765 = vector.broadcast %cst_495 : f32 to vector<32x64xf32>
    %766 = arith.mulf %765, %764 : vector<32x64xf32>
    %767 = math.tanh %766 : vector<32x64xf32>
    %cst_496 = arith.constant 1.000000e+00 : f32
    %768 = vector.broadcast %cst_496 : f32 to vector<32x64xf32>
    %769 = arith.addf %768, %767 : vector<32x64xf32>
    %cst_497 = arith.constant 5.000000e-01 : f32
    %770 = vector.broadcast %cst_497 : f32 to vector<32x64xf32>
    %771 = arith.mulf %770, %769 : vector<32x64xf32>
    %772 = arith.mulf %759, %771 : vector<32x64xf32>
    %c0_498 = arith.constant 0 : index
    %c0_499 = arith.constant 0 : index
    %773 = vector.load %arg28[%c0_498, %c0_499] : memref<64x128xf32, #tpu.memory_space<vmem>>, vector<64x128xf32>
    %cst_500 = arith.constant dense<0.000000e+00> : vector<32x128xf32>
    %774 = tpu.matmul %772, %773, %cst_500 {dimension_numbers = #tpu.dot_dimension_numbers<[1], [0], [0], [1], [0, 0, 1, 1], [], []>} : vector<32x64xf32>, vector<64x128xf32>, vector<32x128xf32> -> vector<32x128xf32>
    %c0_501 = arith.constant 0 : index
    %c0_502 = arith.constant 0 : index
    %775 = vector.load %arg29[%c0_501, %c0_502] : memref<1x128xf32, #tpu.memory_space<vmem>>, vector<1x128xf32>
    %776 = vector.broadcast %775 : vector<1x128xf32> to vector<32x128xf32>
    %777 = arith.addf %774, %776 : vector<32x128xf32>
    %778 = arith.mulf %777, %777 : vector<32x128xf32>
    %779 = arith.mulf %777, %778 : vector<32x128xf32>
    %cst_503 = arith.constant 4.471500e-02 : f32
    %780 = vector.broadcast %cst_503 : f32 to vector<32x128xf32>
    %781 = arith.mulf %780, %779 : vector<32x128xf32>
    %782 = arith.addf %777, %781 : vector<32x128xf32>
    %cst_504 = arith.constant 0.797884583 : f32
    %783 = vector.broadcast %cst_504 : f32 to vector<32x128xf32>
    %784 = arith.mulf %783, %782 : vector<32x128xf32>
    %785 = math.tanh %784 : vector<32x128xf32>
    %cst_505 = arith.constant 1.000000e+00 : f32
    %786 = vector.broadcast %cst_505 : f32 to vector<32x128xf32>
    %787 = arith.addf %786, %785 : vector<32x128xf32>
    %cst_506 = arith.constant 5.000000e-01 : f32
    %788 = vector.broadcast %cst_506 : f32 to vector<32x128xf32>
    %789 = arith.mulf %788, %787 : vector<32x128xf32>
    %790 = arith.mulf %777, %789 : vector<32x128xf32>
    %c0_507 = arith.constant 0 : index
    %c0_508 = arith.constant 0 : index
    %791 = vector.load %arg30[%c0_507, %c0_508] : memref<32x128xf32, #tpu.memory_space<vmem>>, vector<32x128xf32>
    %cst_509 = arith.constant dense<0.000000e+00> : vector<32x128xf32>
    %792 = tpu.matmul %172, %791, %cst_509 {dimension_numbers = #tpu.dot_dimension_numbers<[1], [0], [0], [1], [0, 0, 1, 1], [], []>} : vector<32x32xf32>, vector<32x128xf32>, vector<32x128xf32> -> vector<32x128xf32>
    %c0_510 = arith.constant 0 : index
    %c0_511 = arith.constant 0 : index
    %793 = vector.load %arg31[%c0_510, %c0_511] : memref<1x128xf32, #tpu.memory_space<vmem>>, vector<1x128xf32>
    %794 = vector.broadcast %793 : vector<1x128xf32> to vector<32x128xf32>
    %795 = arith.addf %792, %794 : vector<32x128xf32>
    %796 = arith.addf %790, %795 : vector<32x128xf32>
    %797 = arith.mulf %796, %738 : vector<32x128xf32>
    %c0_512 = arith.constant 0 : index
    %c0_513 = arith.constant 0 : index
    %798 = vector.load %arg38[%c0_512, %c0_513] : memref<128x16xf32, #tpu.memory_space<vmem>>, vector<128x16xf32>
    %cst_514 = arith.constant dense<0.000000e+00> : vector<32x16xf32>
    %799 = tpu.matmul %797, %798, %cst_514 {dimension_numbers = #tpu.dot_dimension_numbers<[1], [0], [0], [1], [0, 0, 1, 1], [], []>} : vector<32x128xf32>, vector<128x16xf32>, vector<32x16xf32> -> vector<32x16xf32>
    %c0_515 = arith.constant 0 : index
    %c0_516 = arith.constant 0 : index
    %800 = vector.load %arg43[%c0_515, %c0_516] : memref<32x16xf32, #tpu.memory_space<vmem>>, vector<32x16xf32>
    tpu.vector_store %arg43[%c0_515, %c0_516], %799 {strides = array<i32>} : memref<32x16xf32, #tpu.memory_space<vmem>>, vector<32x16xf32>,
    return
  }
}

</mosaic_0001>

<bundles_post_ra>
// kernel: div.23
= control target key start
LH: loop header
LB: loop body
LE: loop exit
PB: predicated region body
PF: predicated region fallthrough
CT: control target
= control target key end

     0   :  { %s30_s8 = smov 16   ;;  %vm7_vm0 = vcmask 130048   ;;  %vm13_vm1 = vcmask 392448   ;;  %vm19_vm2 = vcmask 261248   ;;  %s47_s0 = inlined_call_operand.vmem [shape: f32[3,16], index: 0, kind: input, shape index: {}]   ;;  %s48_s1 = inlined_call_operand.vmem [shape: f32[48], index: 1, kind: output, shape index: {}]  }
   0x1   :  { %v4_v0 = vld [vmem:[%s47_s0] sm:$0xf]  ;;  %s29_s0 = smov 32  }
   0x2   :  { %5 = vst [vmem:[#allocation1] sm:$0xf] %v4_v0 }
   0x9   :  { %v10_v1 = vld [vmem:[#allocation1 + $0x2] sm:$0x1]   ;;  %v16_v2 = vld [vmem:[#allocation1 + $0x1] sm:$0x1]   ;;  %v6_v3 = vld [vmem:[#allocation1] sm:$0x1]  }
   0xa   :  { %11 = vrot.lane.b32.xlu0 %v10_v1, %s29_s0  ;;  %8 = vst.msk [vmem:[#allocation0] sm:$0x1] %vm7_vm0, %v6_v3  }
  0x12   :  { %17 = vrot.lane.b32.xlu0 %v16_v2, %s30_s8 }
  0x7c   :  { %v12_v4 = vpop.permute.xlu0 %11  }
  0x7d   :  { %14 = vst.msk [vmem:[#allocation0] sm:$0x1] %vm13_vm1, %v12_v4  }
  0x84   :  { %v18_v5 = vpop.permute.xlu0 %17  }
  0x85   :  { %20 = vst.msk [vmem:[#allocation0] sm:$0x1] %vm19_vm2, %v18_v5  }
  0x8c   :  { %v23_v6 = vld [vmem:[#allocation0] sm:$0x1] }
  0x8d   :  { %26 = vst [vmem:[%s48_s1] sm:$0x1] %v23_v6 }

// kernel: div.26
= control target key start
LH: loop header
LB: loop body
LE: loop exit
PB: predicated region body
PF: predicated region fallthrough
CT: control target
= control target key end

     0   :  { %s50_s0 = inlined_call_operand.vmem [shape: f32[48], index: 0, kind: input, shape index: {}]   ;;  %s51_s1 = inlined_call_operand.vmem [shape: f32[48], index: 1, kind: input, shape index: {}]   ;;  %s52_s2 = inlined_call_operand.vmem [shape: f32[48], index: 2, kind: output, shape index: {}]  }
   0x1   :  { %v4_v0 = vld [vmem:[%s51_s1] sm:$0x1] }
   0x2   :  { %24 = vrcp.f32 %v4_v0  ;;  %v18_v3 = vand.u32 2147483648, %v4_v0  ;;  %vm12_vm0 = vweird.f32 %v4_v0  ;;  %v16_v5 = vand.u32 2147483647, %v4_v0  ;;  %v3_v9 = vld [vmem:[%s50_s0] sm:$0x1] }
   0x4   :  { %v19_v7 = vor.u32 1.1754944e-38, %v18_v3  ;;  %vm17_vm3 = vcmp.eq.f32.partialorder %v16_v5, 8.507059e+37 }
   0x8   :  { %v25_v1 = vpop.eup %24 }
   0x9   :  { %v8_v2 = vmul.f32 %v25_v1, %v4_v0  ;;  %vm13_vm1 = vweird.f32 %v25_v1 }
   0xa   :  { %vm14_vm2 = vmor %vm12_vm0, %vm13_vm1 }
   0xb   :  { %v9_v4 = vsub.f32 1.0, %v8_v2 }
   0xd   :  { %v10_v6 = vmul.f32 %v25_v1, %v9_v4 }
   0xf   :  { %v11_v8 = vadd.f32 %v25_v1, %v10_v6 }
  0x11   :  { %v15_v10 = vsel %vm14_vm2, %v25_v1, %v11_v8 }
  0x12   :  { %v20_v11 = vsel %vm17_vm3, %v19_v7, %v15_v10 }
  0x13   :  { %v21_v12 = vmul.f32 %v20_v11, %v3_v9 }
  0x15   :  { %23 = vst [vmem:[%s52_s2] sm:$0x1] %v21_v12 }

// kernel: tile.39
= control target key start
LH: loop header
LB: loop body
LE: loop exit
PB: predicated region body
PF: predicated region fallthrough
CT: control target
= control target key end

     0   :  { %vm6_vm0 = vcmask 1043458   ;;  %vm10_vm1 = vcmask 1045508   ;;  %vm14_vm2 = vcmask 1047558   ;;  %s19_s6 = smov 3  ;;  %s22_s7 = smov 12  ;;  %vm16_vm3 = vcmask 64512   ;;  %s736_s0 = inlined_call_operand.vmem [shape: f32[8,16,8], index: 0, kind: input, shape index: {}]   ;;  %s737_s1 = inlined_call_operand.vmem [shape: f32[8,128], index: 1, kind: output, shape index: {}]  }
   0x1   :  { %v348_v0 = vld [vmem:[%s736_s0 + $0xf] ss:$16 sm:%s19_s6]   ;;  %s27_s12 = smov 48  ;;  %s32_s13 = smov 192  ;;  %vm38_vm4 = vcmask 1048512   ;;  %vm60_vm5 = vcmask 982912  }
   0x2   :  { %v349_v1 = vld [vmem:[%s736_s0 + $0xf] ss:$16 sm:%s22_s7]   ;;  %s63_s18 = smov 3  ;;  %s66_s21 = smov 12  ;;  %vm82_vm6 = vcmask 917312   ;;  %vm104_vm7 = vcmask 851712  }
   0x3   :  { %v25_v2 = vsel %vm6_vm0, %v349_v1, %v348_v0  ;;  %v350_v3 = vld [vmem:[%s736_s0 + $0xf] ss:$16 sm:%s27_s12]   ;;  %v356_v6 = vld [vmem:[%s736_s0 + $0xd] ss:$16 sm:%s63_s18]   ;;  %s71_s22 = smov 48  ;;  %s76_s27 = smov 192 }
   0x4   :  { %v351_v4 = vld [vmem:[%s736_s0 + $0xf] ss:$16 sm:%s32_s13]   ;;  %v30_v5 = vsel %vm10_vm1, %v350_v3, %v25_v2  ;;  %v357_v8 = vld [vmem:[%s736_s0 + $0xd] ss:$16 sm:%s66_s21]   ;;  %s423_s28 = smov 120   ;;  %s41_s2 = smov 3 }
   0x5   :  { %v35_v7 = vsel %vm14_vm2, %v351_v4, %v30_v5  ;;  %v358_v9 = vld [vmem:[%s736_s0 + $0xd] ss:$16 sm:%s71_s22]   ;;  %v69_v10 = vsel %vm6_vm0, %v357_v8, %v356_v6  ;;  %s44_s3 = smov 12  ;;  %v352_v13 = vld [vmem:[%s736_s0 + $0xe] ss:$16 sm:%s41_s2]   ;;  %s49_s8 = smov 48 }
   0x6   :  { %36 = vrot.lane.b32.xlu0 %v35_v7, %s423_s28  ;;  %v359_v11 = vld [vmem:[%s736_s0 + $0xd] ss:$16 sm:%s76_s27]   ;;  %v74_v12 = vsel %vm10_vm1, %v358_v9, %v69_v10  ;;  %s54_s9 = smov 192  ;;  %s85_s14 = smov 3  ;;  %vm126_vm8 = vcmask 786112   ;;  %vm148_vm9 = vcmask 720512  }
   0x7   :  { %v353_v14 = vld [vmem:[%s736_s0 + $0xe] ss:$16 sm:%s44_s3]   ;;  %v79_v15 = vsel %vm14_vm2, %v359_v11, %v74_v12  ;;  %s424_s15 = smov 104   ;;  %v360_v20 = vld [vmem:[%s736_s0 + $0xc] ss:$16 sm:%s85_s14]   ;;  %s88_s18 = smov 12 }
   0x8   :  { %v47_v16 = vsel %vm6_vm0, %v353_v14, %v352_v13  ;;  %v354_v17 = vld [vmem:[%s736_s0 + $0xe] ss:$16 sm:%s49_s8]   ;;  %80 = vrot.lane.b32.xlu1 %v79_v15, %s424_s15  ;;  %s93_s19 = smov 48  ;;  %s98_s24 = smov 192  ;;  %vm170_vm10 = vcmask 654912   ;;  %vm192_vm11 = vcmask 589312  }
   0x9   :  { %v355_v18 = vld [vmem:[%s736_s0 + $0xe] ss:$16 sm:%s54_s9]   ;;  %v52_v19 = vsel %vm10_vm1, %v354_v17, %v47_v16  ;;  %v361_v21 = vld [vmem:[%s736_s0 + $0xc] ss:$16 sm:%s88_s18]   ;;  %s151_s27 = smov 3  ;;  %s154_s28 = smov 12 }
   0xa   :  { %v362_v22 = vld [vmem:[%s736_s0 + $0xc] ss:$16 sm:%s93_s19]   ;;  %v57_v23 = vsel %vm14_vm2, %v355_v18, %v52_v19  ;;  %v91_v24 = vsel %vm6_vm0, %v361_v21, %v360_v20  ;;  %v372_v27 = vld [vmem:[%s736_s0 + $0x9] ss:$16 sm:%s151_s27]   ;;  %s159_s4 = smov 48  ;;  %s164_s7 = smov 192 }
   0xb   :  { %v363_v25 = vld [vmem:[%s736_s0 + $0xc] ss:$16 sm:%s98_s24]   ;;  %v96_v26 = vsel %vm10_vm1, %v362_v22, %v91_v24  ;;  %v373_v28 = vld [vmem:[%s736_s0 + $0x9] ss:$16 sm:%s154_s28]   ;;  %s173_s8 = smov 3  ;;  %s425_s9 = smov 112  }
   0xc   :  { %v157_v29 = vsel %vm6_vm0, %v373_v28, %v372_v27  ;;  %v374_v30 = vld [vmem:[%s736_s0 + $0x9] ss:$16 sm:%s159_s4]   ;;  %v101_v31 = vsel %vm14_vm2, %v363_v25, %v96_v26  ;;  %v376_v32 = vld [vmem:[%s736_s0 + $0x8] ss:$16 sm:%s173_s8]   ;;  %s176_s12 = smov 12  ;;  %s181_s13 = smov 48 }
   0xd   :  { %v377_v33 = vld [vmem:[%s736_s0 + $0x8] ss:$16 sm:%s176_s12]   ;;  %s186_s16 = smov 192  ;;  %v162_v34 = vsel %vm10_vm1, %v374_v30, %v157_v29  ;;  %v375_v35 = vld [vmem:[%s736_s0 + $0x9] ss:$16 sm:%s164_s7]   ;;  %s217_s21 = smov 3 }
   0xe   :  { %58 = vrot.lane.b32.xlu0 %v57_v23, %s425_s9  ;;  %v179_v36 = vsel %vm6_vm0, %v377_v33, %v376_v32  ;;  %v378_v37 = vld [vmem:[%s736_s0 + $0x8] ss:$16 sm:%s181_s13]   ;;  %s220_s22 = smov 12  ;;  %s426_s23 = smov 96   ;;  %v167_v40 = vsel %vm14_vm2, %v375_v35, %v162_v34  ;;  %vm214_vm12 = vcmask 523712   ;;  %vm236_vm13 = vcmask 458112  }
   0xf   :  { %s225_s24 = smov 48  ;;  %v384_v38 = vld [vmem:[%s736_s0 + $0x6] ss:$16 sm:%s217_s21]   ;;  %s239_s29 = smov 3  ;;  %v184_v41 = vsel %vm10_vm1, %v378_v37, %v179_v36  ;;  %v379_v42 = vld [vmem:[%s736_s0 + $0x8] ss:$16 sm:%s186_s16]  }
  0x10   :  { %102 = vrot.lane.b32.xlu1 %v101_v31, %s426_s23  ;;  %v385_v39 = vld [vmem:[%s736_s0 + $0x6] ss:$16 sm:%s220_s22]   ;;  %s230_s3 = smov 192  ;;  %s242_s4 = smov 12  ;;  %v189_v47 = vsel %vm14_vm2, %v379_v42, %v184_v41  ;;  %vm258_vm14 = vcmask 392512   ;;  %vm280_vm15 = vcmask 326912  }
  0x11   :  { %v386_v43 = vld [vmem:[%s736_s0 + $0x6] ss:$16 sm:%s225_s24]   ;;  %s247_s7 = smov 48  ;;  %v223_v44 = vsel %vm6_vm0, %v385_v39, %v384_v38  ;;  %v388_v45 = vld [vmem:[%s736_s0 + $0x5] ss:$16 sm:%s239_s29]   ;;  %s107_s12 = smov 3 }
  0x12   :  { %v389_v46 = vld [vmem:[%s736_s0 + $0x5] ss:$16 sm:%s242_s4]   ;;  %s110_s13 = smov 12  ;;  %s427_s14 = smov 72   ;;  %v387_v48 = vld [vmem:[%s736_s0 + $0x6] ss:$16 sm:%s230_s3]   ;;  %v228_v52 = vsel %vm10_vm1, %v386_v43, %v223_v44 }
  0x13   :  { %v364_v49 = vld [vmem:[%s736_s0 + $0xb] ss:$16 sm:%s107_s12]   ;;  %s115_s19 = smov 48  ;;  %s120_s20 = smov 192  ;;  %v245_v53 = vsel %vm6_vm0, %v389_v46, %v388_v45  ;;  %v390_v54 = vld [vmem:[%s736_s0 + $0x5] ss:$16 sm:%s247_s7]   ;;  %v233_v61 = vsel %vm14_vm2, %v387_v48, %v228_v52 }
  0x14   :  { %s252_s21 = smov 192  ;;  %v365_v50 = vld [vmem:[%s736_s0 + $0xb] ss:$16 sm:%s110_s13]   ;;  %s283_s26 = smov 3  ;;  %v250_v62 = vsel %vm10_vm1, %v390_v54, %v245_v53 }
  0x15   :  { %v366_v51 = vld [vmem:[%s736_s0 + $0xb] ss:$16 sm:%s115_s19]   ;;  %v113_v55 = vsel %vm6_vm0, %v365_v50, %v364_v49  ;;  %s286_s2 = smov 12  ;;  %s428_s3 = smov 64   ;;  %v396_v59 = vld [vmem:[%s736_s0 + $0x3] ss:$16 sm:%s283_s26]  }
  0x16   :  { %168 = vrot.lane.b32.xlu0 %v167_v40, %s427_s14  ;;  %v367_v56 = vld [vmem:[%s736_s0 + $0xb] ss:$16 sm:%s120_s20]   ;;  %v118_v57 = vsel %vm10_vm1, %v366_v51, %v113_v55  ;;  %s291_s4 = smov 48  ;;  %s305_s9 = smov 3 }
  0x17   :  { %v123_v58 = vsel %vm14_vm2, %v367_v56, %v118_v57  ;;  %v397_v60 = vld [vmem:[%s736_s0 + $0x3] ss:$16 sm:%s286_s2]   ;;  %s308_s10 = smov 12  ;;  %v391_v63 = vld [vmem:[%s736_s0 + $0x5] ss:$16 sm:%s252_s21]   ;;  %s429_s13 = smov 88  }
  0x18   :  { %190 = vrot.lane.b32.xlu1 %v189_v47, %s428_s3  ;;  %124 = vrot.lane.b32.xlu2 %v123_v58, %s429_s13  ;;  %s296_s14 = smov 192  ;;  %s313_s15 = smov 48  ;;  %v398_v0 = vld [vmem:[%s736_s0 + $0x3] ss:$16 sm:%s291_s4]   ;;  %v289_v2 = vsel %vm6_vm0, %v397_v60, %v396_v59  ;;  %v255_v5 = vsel %vm14_vm2, %v391_v63, %v250_v62 }
  0x19   :  { %v400_v1 = vld [vmem:[%s736_s0 + $0x2] ss:$16 sm:%s305_s9]   ;;  %s129_s20 = smov 3  ;;  %s132_s25 = smov 12  ;;  %v399_v6 = vld [vmem:[%s736_s0 + $0x3] ss:$16 sm:%s296_s14]   ;;  %v294_v12 = vsel %vm10_vm1, %v398_v0, %v289_v2 }
  0x1a   :  { %v401_v3 = vld [vmem:[%s736_s0 + $0x2] ss:$16 sm:%s308_s10]   ;;  %v368_v4 = vld [vmem:[%s736_s0 + $0xa] ss:$16 sm:%s129_s20]   ;;  %s137_s26 = smov 48  ;;  %s430_s27 = smov 48   ;;  %v299_v20 = vsel %vm14_vm2, %v399_v6, %v294_v12 }
  0x1b   :  { %v402_v7 = vld [vmem:[%s736_s0 + $0x2] ss:$16 sm:%s313_s15]   ;;  %s318_s3 = smov 192  ;;  %v369_v8 = vld [vmem:[%s736_s0 + $0xa] ss:$16 sm:%s132_s25]   ;;  %s142_s6 = smov 192  ;;  %v311_v13 = vsel %vm6_vm0, %v401_v3, %v400_v1 }
  0x1c   :  { %v135_v9 = vsel %vm6_vm0, %v369_v8, %v368_v4  ;;  %v370_v10 = vld [vmem:[%s736_s0 + $0xa] ss:$16 sm:%s137_s26]   ;;  %s195_s11 = smov 3  ;;  %s198_s12 = smov 12  ;;  %v316_v21 = vsel %vm10_vm1, %v402_v7, %v311_v13  ;;  %v403_v22 = vld [vmem:[%s736_s0 + $0x2] ss:$16 sm:%s318_s3]  }
  0x1d   :  { %v371_v11 = vld [vmem:[%s736_s0 + $0xa] ss:$16 sm:%s142_s6]   ;;  %v140_v14 = vsel %vm10_vm1, %v370_v10, %v135_v9  ;;  %v380_v15 = vld [vmem:[%s736_s0 + $0x7] ss:$16 sm:%s195_s11]   ;;  %s203_s17 = smov 48  ;;  %s431_s18 = smov 40   ;;  %v321_v25 = vsel %vm14_vm2, %v403_v22, %v316_v21 }
  0x1e   :  { %234 = vrot.lane.b32.xlu0 %v233_v61, %s430_s27  ;;  %v381_v16 = vld [vmem:[%s736_s0 + $0x7] ss:$16 sm:%s198_s12]   ;;  %v145_v17 = vsel %vm14_vm2, %v371_v11, %v140_v14  ;;  %s208_s21 = smov 192  ;;  %s432_s24 = smov 80  }
  0x1f   :  { %v201_v18 = vsel %vm6_vm0, %v381_v16, %v380_v15  ;;  %v382_v19 = vld [vmem:[%s736_s0 + $0x7] ss:$16 sm:%s203_s17]   ;;  %s261_s25 = smov 3  ;;  %s264_s26 = smov 12 }
  0x20   :  { %256 = vrot.lane.b32.xlu1 %v255_v5, %s431_s18  ;;  %146 = vrot.lane.b32.xlu2 %v145_v17, %s432_s24  ;;  %v206_v23 = vsel %vm10_vm1, %v382_v19, %v201_v18  ;;  %v383_v24 = vld [vmem:[%s736_s0 + $0x7] ss:$16 sm:%s208_s21]   ;;  %s433_s29 = smov 24   ;;  %s269_s5 = smov 48 }
  0x21   :  { %v392_v26 = vld [vmem:[%s736_s0 + $0x4] ss:$16 sm:%s261_s25]   ;;  %v211_v28 = vsel %vm14_vm2, %v383_v24, %v206_v23  ;;  %s434_s6 = smov 16   ;;  %s274_s9 = smov 192 }
  0x22   :  { %v393_v27 = vld [vmem:[%s736_s0 + $0x4] ss:$16 sm:%s264_s26]   ;;  %s435_s10 = smov 56   ;;  %s327_s11 = smov 3 }
  0x23   :  { %v267_v29 = vsel %vm6_vm0, %v393_v27, %v392_v26  ;;  %v394_v30 = vld [vmem:[%s736_s0 + $0x4] ss:$16 sm:%s269_s5]   ;;  %s330_s12 = smov 12  ;;  %v404_v33 = vld [vmem:[%s736_s0 + $0x1] ss:$16 sm:%s327_s11]   ;;  %s335_s19 = smov 48 }
  0x24   :  { %v272_v31 = vsel %vm10_vm1, %v394_v30, %v267_v29  ;;  %v395_v32 = vld [vmem:[%s736_s0 + $0x4] ss:$16 sm:%s274_s9]   ;;  %v405_v34 = vld [vmem:[%s736_s0 + $0x1] ss:$16 sm:%s330_s12]   ;;  %s340_s22 = smov 192  ;;  %s436_s23 = smov 32  }
  0x25   :  { %v277_v35 = vsel %vm14_vm2, %v395_v32, %v272_v31  ;;  %v333_v36 = vsel %vm6_vm0, %v405_v34, %v404_v33  ;;  %v406_v37 = vld [vmem:[%s736_s0 + $0x1] ss:$16 sm:%s335_s19]   ;;  %s437_s26 = smov 8   ;;  %s2_s27 = smov 3 }
  0x26   :  { %300 = vrot.lane.b32.xlu0 %v299_v20, %s433_s29  ;;  %v338_v38 = vsel %vm10_vm1, %v406_v37, %v333_v36  ;;  %v407_v39 = vld [vmem:[%s736_s0 + $0x1] ss:$16 sm:%s340_s22]   ;;  %s4_s28 = smov 12  ;;  %s8_s29 = smov 48 }
  0x27   :  { %v343_v40 = vsel %vm14_vm2, %v407_v39, %v338_v38  ;;  %s12_s30 = smov 192  ;;  %v3_v41 = vld [vmem:[%s736_s0] ss:$16 sm:%s2_s27]  }
  0x28   :  { %322 = vrot.lane.b32.xlu1 %v321_v25, %s434_s6  ;;  %212 = vrot.lane.b32.xlu2 %v211_v28, %s435_s10  ;;  %v5_v42 = vld [vmem:[%s736_s0] ss:$16 sm:%s4_s28]  }
  0x29   :  { %v7_v43 = vsel %vm6_vm0, %v5_v42, %v3_v41  ;;  %v9_v44 = vld [vmem:[%s736_s0] ss:$16 sm:%s8_s29]   ;;  %vm302_vm0 = vcmask 261312  }
  0x2a   :  { %v11_v45 = vsel %vm10_vm1, %v9_v44, %v7_v43  ;;  %v13_v46 = vld [vmem:[%s736_s0] ss:$16 sm:%s12_s30]   ;;  %vm324_vm1 = vcmask 195712  }
  0x2b   :  { %v15_v47 = vsel %vm14_vm2, %v13_v46, %v11_v45  ;;  %vm346_vm2 = vcmask 130112  }
  0x2c   :  { %17 = vst.msk [vmem:[%s737_s1] sm:$0xff] %vm16_vm3, %v15_v47  }
  0x30   :  { %278 = vrot.lane.b32.xlu2 %v277_v35, %s436_s23 }
  0x38   :  { %344 = vrot.lane.b32.xlu2 %v343_v40, %s437_s26 }
  0x72   :  { %v125_v48 = vpop.permute.xlu2 %124  }
  0x78   :  { %v37_v49 = vpop.permute.xlu0 %36  }
  0x79   :  { %39 = vst.msk [vmem:[%s737_s1] sm:$0xff] %vm38_vm4, %v37_v49  }
  0x7a   :  { %v81_v50 = vpop.permute.xlu1 %80   ;;  %v147_v51 = vpop.permute.xlu2 %146  }
  0x80   :  { %v59_v52 = vpop.permute.xlu0 %58  }
  0x81   :  { %61 = vst.msk [vmem:[%s737_s1] sm:$0xff] %vm60_vm5, %v59_v52  }
  0x82   :  { %83 = vst.msk [vmem:[%s737_s1] sm:$0xff] %vm82_vm6, %v81_v50   ;;  %v103_v53 = vpop.permute.xlu1 %102   ;;  %v213_v54 = vpop.permute.xlu2 %212  }
  0x83   :  { %105 = vst.msk [vmem:[%s737_s1] sm:$0xff] %vm104_vm7, %v103_v53  }
  0x84   :  { %127 = vst.msk [vmem:[%s737_s1] sm:$0xff] %vm126_vm8, %v125_v48  }
  0x85   :  { %149 = vst.msk [vmem:[%s737_s1] sm:$0xff] %vm148_vm9, %v147_v51  }
  0x88   :  { %v169_v55 = vpop.permute.xlu0 %168  }
  0x89   :  { %171 = vst.msk [vmem:[%s737_s1] sm:$0xff] %vm170_vm10, %v169_v55  }
  0x8a   :  { %v191_v56 = vpop.permute.xlu1 %190   ;;  %v279_v57 = vpop.permute.xlu2 %278  }
  0x8b   :  { %193 = vst.msk [vmem:[%s737_s1] sm:$0xff] %vm192_vm11, %v191_v56  }
  0x8c   :  { %215 = vst.msk [vmem:[%s737_s1] sm:$0xff] %vm214_vm12, %v213_v54  }
  0x90   :  { %v235_v58 = vpop.permute.xlu0 %234  }
  0x91   :  { %237 = vst.msk [vmem:[%s737_s1] sm:$0xff] %vm236_vm13, %v235_v58  }
  0x92   :  { %v257_v59 = vpop.permute.xlu1 %256   ;;  %v345_v60 = vpop.permute.xlu2 %344  }
  0x93   :  { %259 = vst.msk [vmem:[%s737_s1] sm:$0xff] %vm258_vm14, %v257_v59  }
  0x94   :  { %281 = vst.msk [vmem:[%s737_s1] sm:$0xff] %vm280_vm15, %v279_v57  }
  0x98   :  { %v301_v61 = vpop.permute.xlu0 %300  }
  0x99   :  { %303 = vst.msk [vmem:[%s737_s1] sm:$0xff] %vm302_vm0, %v301_v61  }
  0x9a   :  { %v323_v62 = vpop.permute.xlu1 %322  }
  0x9b   :  { %325 = vst.msk [vmem:[%s737_s1] sm:$0xff] %vm324_vm1, %v323_v62  }
  0x9c   :  { %347 = vst.msk [vmem:[%s737_s1] sm:$0xff] %vm346_vm2, %v345_v60  }

// kernel: scratch_sam_forward.1
= control target key start
LH: loop header
LB: loop body
LE: loop exit
PB: predicated region body
PF: predicated region fallthrough
CT: control target
= control target key end

     0   :  { %s5359_s3 = smov 4   ;;  %s5360_s7 = smov 5   ;;  %vm192_vm0 = vcmask 392192   ;;  %vm244_vm1 = vcmask 261120   ;;  %v5364_v31 = vmov 32.0   ;;  %vm481_vm15 = vcmask 130048   ;;  %s6728_s0 = inlined_call_operand.smem [shape: u32[44], index: -1, kind: input, shape index: {}] }
   0x1   :  { %s4555_s6 = sld [smem:[%s6728_s0 + %s5359_s3]]   ;;  %s5361_s14 = smov 2   ;;  %5149 = vrcp.f32 %v5364_v31 }
   0x2   :  { %s4556_s10 = sld [smem:[%s6728_s0 + %s5360_s7]]   ;;  %s5362_s18 = smov 14  }
   0x3   :  { %s1_s13 = sld [smem:[%s6728_s0]]   ;;  %s5363_s22 = smov 15  }
   0x4   :  { %s4553_s17 = sld [smem:[%s6728_s0 + %s5361_s14]]   ;;  %s5365_s26 = smov 9  }
   0x5   :  { %s5435_s21 = sld [smem:[%s6728_s0 + %s5362_s18]]   ;;  %s5366_s30 = smov 6  }
   0x6   :  { %s5442_s25 = sld [smem:[%s6728_s0 + %s5363_s22]]   ;;  %s5367_s4 = smov 7  }
   0x7   :  { %v187_v0 = vld [vmem:[%s4555_s6 + $0x28] sm:$0xff]  ;;  %v186_v1 = vld [vmem:[%s4555_s6 + $0x20] sm:$0xff]  ;;  %v185_v2 = vld [vmem:[%s4555_s6 + $0x18] sm:$0xff]  ;;  %v5150_v32 = vpop.eup %5149  ;;  %s5479_s29 = sld [smem:[%s6728_s0 + %s5365_s26]]   ;;  %s5368_s8 = smov 8  }
   0x8   :  { %215 = vmatpush.msra.mxu0 %v187_v0  ;;  %v184_v3 = vld [vmem:[%s4555_s6 + $0x10] sm:$0xff]  ;;  %v183_v4 = vld [vmem:[%s4555_s6 + $0x8] sm:$0xff]  ;;  %v182_v5 = vld [vmem:[%s4555_s6] sm:$0xff]  ;;  %v258_v33 = vmul.f32 32.0, %v5150_v32  ;;  %vm262_vm2 = vweird.f32 %v5150_v32  ;;  %s5484_s3 = sld [smem:[%s6728_s0 + %s5366_s30]]   ;;  %s5369_s12 = smov 10  }
   0x9   :  { %v178_v6 = vld [vmem:[%s1_s13] sm:$0xff]  ;;  %v179_v7 = vld [vmem:[%s1_s13 + $0x8] sm:$0xff]  ;;  %v180_v8 = vld [vmem:[%s1_s13 + $0x10] sm:$0xff]  ;;  %s5489_s7 = sld [smem:[%s6728_s0 + %s5367_s4]]   ;;  %s5370_s16 = smov 11  }
   0xa   :  { %216 = vmatpush.msra.mxu0 %v186_v1  ;;  %v181_v9 = vld [vmem:[%s1_s13 + $0x18] sm:$0xff]  ;;  %v5084_v10 = vld [vmem:[%s4556_s10] ss:$0 sm:$0xff]  ;;  %v235_v17 = vld [vmem:[%s4553_s17 + $0x8] sm:$0xff]  ;;  %v259_v34 = vsub.f32 1.0, %v258_v33  ;;  %s5494_s11 = sld [smem:[%s6728_s0 + %s5368_s8]]   ;;  %s5371_s20 = smov 39  }
   0xb   :  { %v234_v12 = vld [vmem:[%s4553_s17] sm:$0xff]  ;;  %v236_v22 = vld [vmem:[%s4553_s17 + $0x10] sm:$0xff]  ;;  %v237_v27 = vld [vmem:[%s4553_s17 + $0x18] sm:$0xff]  ;;  %s5518_s15 = sld [smem:[%s6728_s0 + %s5369_s12]]   ;;  %s5372_s26 = smov 12  }
   0xc   :  { %217 = vmatpush.msra.mxu0 %v185_v2  ;;  %v260_v35 = vmul.f32 %v5150_v32, %v259_v34  ;;  %v5521_v31 = vld [vmem:[%s5435_s21] ss:$0 sm:$0xff]  ;;  %s5536_s19 = sld [smem:[%s6728_s0 + %s5370_s16]]   ;;  %s5373_s1 = smov 13  }
   0xd   :  { %s4590_s24 = sld [smem:[%s6728_s0 + %s5371_s20]]   ;;  %s5374_s6 = smov 17  }
   0xe   :  { %218 = vmatpush.msra.mxu0 %v184_v3  ;;  %v261_v36 = vadd.f32 %v5150_v32, %v260_v35  ;;  %v361_v58 = vld [vmem:[%s5484_s3 + $0x18] sm:$0xff]  ;;  %v360_v62 = vld [vmem:[%s5484_s3 + $0x10] sm:$0xff]  ;;  %v359_v2 = vld [vmem:[%s5484_s3 + $0x8] sm:$0xff]  ;;  %s5654_s30 = sld [smem:[%s6728_s0 + %s5372_s26]]   ;;  %s5375_s12 = smov 16  }
   0xf   :  { %v410_v59 = vld [vmem:[%s5489_s7 + $0x18] sm:$0xff]  ;;  %390 = vmatpush.msra.mxu1 %v361_v58  ;;  %v409_v63 = vld [vmem:[%s5489_s7 + $0x10] sm:$0xff]  ;;  %v408_v3 = vld [vmem:[%s5489_s7 + $0x8] sm:$0xff]  ;;  %s5688_s5 = sld [smem:[%s6728_s0 + %s5373_s1]]   ;;  %s5376_s17 = smov 18  }
  0x10   :  { %219 = vmatpush.msra.mxu0 %v183_v4  ;;  %v5446_v37 = vsel %vm262_vm2, %v5150_v32, %v261_v36  ;;  %v447_v60 = vld [vmem:[%s5494_s11 + $0x18] sm:$0xff]  ;;  %427 = vmatpush.msra.mxu2 %v410_v59  ;;  %v446_v0 = vld [vmem:[%s5494_s11 + $0x10] sm:$0xff]  ;;  %v445_v4 = vld [vmem:[%s5494_s11 + $0x8] sm:$0xff]  ;;  %s5743_s10 = sld [smem:[%s6728_s0 + %s5374_s6]]   ;;  %s5377_s23 = smov 1  }
  0x11   :  { %v4635_v61 = vld [vmem:[%s5489_s7 + $0x38] sm:$0xff]  ;;  %464 = vmatpush.msra.mxu3 %v447_v60  ;;  %391 = vmatpush.msra.mxu1 %v360_v62  ;;  %v4634_v1 = vld [vmem:[%s5489_s7 + $0x30] sm:$0xff]  ;;  %v5526_v36 = vld [vmem:[%s5442_s25] ss:$0 sm:$0xff]  ;;  %s5748_s16 = sld [smem:[%s6728_s0 + %s5375_s12]]   ;;  %s5378_s28 = smov 19  }
  0x12   :  { %220 = vmatpush.msra.mxu0 %v182_v5  ;;  %428 = vmatpush.msra.mxu2 %v409_v63  ;;  %v4633_v5 = vld [vmem:[%s5489_s7 + $0x28] sm:$0xff]  ;;  %v4626_v34 = vld [vmem:[%s5484_s3 + $0x38] sm:$0xff]  ;;  %v4625_v35 = vld [vmem:[%s5484_s3 + $0x30] sm:$0xff]  ;;  %s5770_s22 = sld [smem:[%s6728_s0 + %s5376_s17]]   ;;  %s5379_s6 = smov 20  }
  0x13   :  { %4595 = vmatmul.msk.f32.vlgmr.msra.gmra.mxu0 %vm192_vm0, %v178_v6  ;;  %465 = vmatpush.msra.mxu3 %v446_v0  ;;  %v358_v6 = vld [vmem:[%s5484_s3] sm:$0xff]  ;;  %s5782_s27 = sld [smem:[%s6728_s0 + %s5377_s23]]   ;;  %s5380_s13 = smov 21  }
  0x14   :  { %691 = vmatpush.msrb.mxu0 %v4635_v61  ;;  %392 = vmatpush.msra.mxu1 %v359_v2  ;;  %s5801_s4 = sld [smem:[%s6728_s0 + %s5378_s28]]   ;;  %s5381_s20 = smov 40  }
  0x15   :  { %429 = vmatpush.msra.mxu2 %v408_v3  ;;  %466 = vmatpush.msra.mxu3 %v445_v4  ;;  %s5808_s12 = sld [smem:[%s6728_s0 + %s5379_s6]]   ;;  %s5382_s28 = smov 22  }
  0x16   :  { %692 = vmatpush.msrb.mxu0 %v4634_v1  ;;  %393 = vmatpush.msra.mxu1 %v358_v6  ;;  %s5827_s18 = sld [smem:[%s6728_s0 + %s5380_s13]]   ;;  %s5383_s8 = smov 3  }
  0x17   :  { %s4591_s26 = sld [smem:[%s6728_s0 + %s5381_s20]]   ;;  %s5384_s14 = smov 41  }
  0x18   :  { %693 = vmatpush.msrb.mxu0 %v4633_v5  ;;  %s5942_s6 = sld [smem:[%s6728_s0 + %s5382_s28]]   ;;  %s5389_s28 = smov 30  }
  0x19   :  { %s5972_s13 = sld [smem:[%s6728_s0 + %s5383_s8]]   ;;  %s5397_s2 = smov 26  }
  0x1a   :  { %s6117_s20 = sld [smem:[%s6728_s0 + %s5384_s14]]   ;;  %s5398_s8 = smov 37  }
  0x1b   :  { %4596 = vmatmul.msk.f32.gmra.mxu0 %vm192_vm0, %v179_v7  ;;  %v407_v7 = vld [vmem:[%s5489_s7] sm:$0xff]  ;;  %s5399_s14 = smov 28  }
  0x1c   :  { %430 = vmatpush.msra.mxu2 %v407_v7 }
  0x23   :  { %4597 = vmatmul.msk.f32.gmra.mxu0 %vm192_vm0, %v180_v8  ;;  %v444_v8 = vld [vmem:[%s5494_s11] sm:$0xff] }
  0x24   :  { %467 = vmatpush.msra.mxu3 %v444_v8 }
  0x26   :  { %652 = vmatpush.msrb.mxu3 %v4626_v34 }
  0x28   :  { %653 = vmatpush.msrb.mxu3 %v4625_v35 }
  0x2b   :  { %4598 = vmatmul.msk.f32.gmra.mxu0 %vm192_vm0, %v181_v9  ;;  %v4632_v9 = vld [vmem:[%s5489_s7 + $0x20] sm:$0xff] }
  0x2c   :  { %694 = vmatpush.msrb.mxu0 %v4632_v9 }
  0x90   :  { %v222_v11 = vpop.f32.mrf.mxu0 }
  0x91   :  { %v223_v13 = vadd.f32 %v5084_v10, %v222_v11 }
  0x93   :  { %v5420_v14 = vadd.f32 %v234_v12, %v223_v13 }
  0x95   :  { %v245_v15 = vsel %vm244_vm1, %v5420_v14, 0.0 }
  0x96   :  { %246 = vadd.xlane.f32.xlu0 %v245_v15 }
  0x98   :  { %v225_v16 = vpop.f32.mrf.mxu0 }
  0x99   :  { %v226_v18 = vadd.f32 %v5084_v10, %v225_v16 }
  0x9b   :  { %v5424_v19 = vadd.f32 %v235_v17, %v226_v18 }
  0x9d   :  { %v248_v20 = vsel %vm244_vm1, %v5424_v19, 0.0 }
  0x9e   :  { %249 = vadd.xlane.f32.xlu0 %v248_v20 }
  0xa0   :  { %v228_v21 = vpop.f32.mrf.mxu0 }
  0xa1   :  { %v229_v23 = vadd.f32 %v5084_v10, %v228_v21 }
  0xa3   :  { %v5428_v24 = vadd.f32 %v236_v22, %v229_v23 }
  0xa5   :  { %v251_v25 = vsel %vm244_vm1, %v5428_v24, 0.0 }
  0xa6   :  { %252 = vadd.xlane.f32.xlu1 %v251_v25 }
  0xa8   :  { %v231_v26 = vpop.f32.mrf.mxu0 }
  0xa9   :  { %v232_v28 = vadd.f32 %v5084_v10, %v231_v26 }
  0xab   :  { %v5437_v29 = vadd.f32 %v237_v27, %v232_v28 }
  0xad   :  { %v254_v30 = vsel %vm244_vm1, %v5437_v29, 0.0 }
  0xae   :  { %255 = vadd.xlane.f32.xlu1 %v254_v30 }
 0x109   :  { %v247_v38 = vpop.xlane.xlu0 %246 }
 0x10a   :  { %v264_v39 = vmul.f32 %v5446_v37, %v247_v38 }
 0x10c   :  { %v5450_v40 = vsub.f32 %v5420_v14, %v264_v39 }
 0x10e   :  { %v272_v41 = vmul.f32 %v5450_v40, %v5450_v40 }
 0x110   :  { %v276_v42 = vsel %vm244_vm1, %v272_v41, 0.0 }
 0x111   :  { %277 = vadd.xlane.f32.xlu2 %v276_v42  ;;  %v250_v43 = vpop.xlane.xlu0 %249  ;;  %v4624_v42 = vld [vmem:[%s5484_s3 + $0x28] sm:$0xff] }
 0x112   :  { %v265_v44 = vmul.f32 %v5446_v37, %v250_v43  ;;  %654 = vmatpush.msrb.mxu3 %v4624_v42  ;;  %v4644_v42 = vld [vmem:[%s5494_s11 + $0x38] sm:$0xff] }
 0x114   :  { %v5457_v45 = vsub.f32 %v5424_v19, %v265_v44 }
 0x116   :  { %v273_v46 = vmul.f32 %v5457_v45, %v5457_v45 }
 0x118   :  { %v279_v47 = vsel %vm244_vm1, %v273_v46, 0.0 }
 0x119   :  { %v253_v48 = vpop.xlane.xlu1 %252  ;;  %280 = vadd.xlane.f32.xlu2 %v279_v47  ;;  %v4623_v47 = vld [vmem:[%s5484_s3 + $0x20] sm:$0xff] }
 0x11a   :  { %v266_v49 = vmul.f32 %v5446_v37, %v253_v48  ;;  %655 = vmatpush.msrb.mxu3 %v4623_v47 }
 0x11c   :  { %v5464_v50 = vsub.f32 %v5428_v24, %v266_v49 }
 0x11e   :  { %v274_v51 = vmul.f32 %v5464_v50, %v5464_v50 }
 0x120   :  { %v282_v52 = vsel %vm244_vm1, %v274_v51, 0.0 }
 0x121   :  { %v256_v53 = vpop.xlane.xlu1 %255  ;;  %283 = vadd.xlane.f32.xlu0 %v282_v52 }
 0x122   :  { %v267_v54 = vmul.f32 %v5446_v37, %v256_v53 }
 0x124   :  { %v5471_v55 = vsub.f32 %v5437_v29, %v267_v54 }
 0x126   :  { %v275_v56 = vmul.f32 %v5471_v55, %v5471_v55 }
 0x128   :  { %v285_v57 = vsel %vm244_vm1, %v275_v56, 0.0 }
 0x129   :  { %286 = vadd.xlane.f32.xlu1 %v285_v57 }
 0x184   :  { %v278_v10 = vpop.xlane.xlu2 %277 }
 0x185   :  { %v288_v11 = vmul.f32 %v278_v10, %v5446_v37 }
 0x187   :  { %v292_v12 = vadd.f32 1e-06, %v288_v11 }
 0x189   :  { %5151 = vrsqrt.f32 %v292_v12  ;;  %vm302_vm4 = vweird.f32 %v292_v12 }
 0x18c   :  { %v281_v13 = vpop.xlane.xlu2 %280 }
 0x18d   :  { %v289_v15 = vmul.f32 %v281_v13, %v5446_v37 }
 0x18f   :  { %v5152_v16 = vpop.eup %5151  ;;  %v293_v17 = vadd.f32 1e-06, %v289_v15 }
 0x190   :  { %v297_v18 = vmul.f32 %v5152_v16, %v292_v12  ;;  %vm303_vm3 = vweird.f32 %v5152_v16 }
 0x191   :  { %5153 = vrsqrt.f32 %v293_v17  ;;  %vm304_vm5 = vmor %vm302_vm4, %vm303_vm3  ;;  %vm312_vm7 = vweird.f32 %v293_v17 }
 0x192   :  { %v298_v20 = vmul.f32 %v5152_v16, %v297_v18 }
 0x194   :  { %v299_v21 = vmul.f32 0.5, %v298_v20  ;;  %v284_v22 = vpop.xlane.xlu0 %283  ;;  %v5089_v20 = vld [vmem:[%s5518_s15] ss:$0 sm:$0xff] }
 0x195   :  { %v290_v23 = vmul.f32 %v284_v22, %v5446_v37  ;;  %v5090_v22 = vld [vmem:[%s5536_s19] ss:$0 sm:$0xff] }
 0x196   :  { %v300_v25 = vsub.f32 1.5, %v299_v21 }
 0x197   :  { %v5154_v26 = vpop.eup %5153  ;;  %v294_v27 = vadd.f32 1e-06, %v290_v23 }
 0x198   :  { %v301_v28 = vmul.f32 %v5152_v16, %v300_v25  ;;  %v307_v30 = vmul.f32 %v5154_v26, %v293_v17  ;;  %vm313_vm6 = vweird.f32 %v5154_v26 }
 0x199   :  { %5155 = vrsqrt.f32 %v294_v27  ;;  %vm314_vm8 = vmor %vm312_vm7, %vm313_vm6  ;;  %vm322_vm10 = vweird.f32 %v294_v27 }
 0x19a   :  { %v305_v32 = vsel %vm304_vm5, %v5152_v16, %v301_v28  ;;  %v308_v33 = vmul.f32 %v5154_v26, %v307_v30 }
 0x19b   :  { %v336_v38 = vmul.f32 %v305_v32, %v5450_v40 }
 0x19c   :  { %v309_v39 = vmul.f32 0.5, %v308_v33  ;;  %v287_v41 = vpop.xlane.xlu1 %286  ;;  %v5088_v33 = vld [vmem:[%s5518_s15 + $0x1] ss:$0 sm:$0xff] }
 0x19d   :  { %v343_v43 = vmul.f32 %v5521_v31, %v336_v38  ;;  %v291_v44 = vmul.f32 %v287_v41, %v5446_v37  ;;  %v5087_v38 = vld [vmem:[%s5479_s29] ss:$0 sm:$0xff] }
 0x19e   :  { %v310_v46 = vsub.f32 1.5, %v309_v39 }
 0x19f   :  { %v5156_v48 = vpop.eup %5155  ;;  %v5539_v40 = vadd.f32 %v5526_v36, %v343_v43  ;;  %v295_v49 = vadd.f32 1e-06, %v291_v44  ;;  %v4643_v44 = vld [vmem:[%s5494_s11 + $0x30] sm:$0xff] }
 0x1a0   :  { %v311_v51 = vmul.f32 %v5154_v26, %v310_v46  ;;  %v317_v52 = vmul.f32 %v5156_v48, %v294_v27  ;;  %vm323_vm9 = vweird.f32 %v5156_v48 }
 0x1a1   :  { %5157 = vrsqrt.f32 %v295_v49  ;;  %4599 = vmatmul.msk.f32.vlgmr.msra.gmra.mxu1 %vm244_vm1, %v5539_v40  ;;  %4603 = vmatmul.msk.f32.vlgmr.msra.gmra.mxu2 %vm244_vm1, %v5539_v40  ;;  %vm324_vm11 = vmor %vm322_vm10, %vm323_vm9  ;;  %vm332_vm13 = vweird.f32 %v295_v49 }
 0x1a2   :  { %v315_v53 = vsel %vm314_vm8, %v5154_v26, %v311_v51  ;;  %v318_v54 = vmul.f32 %v5156_v48, %v317_v52  ;;  %4607 = vmatmul.msk.f32.vlgmr.msra.gmra.mxu3 %vm244_vm1, %v5539_v40  ;;  %4637 = vmatmul.msk.f32.vlgmr.msrb.gmra.mxu0 %vm244_vm1, %v5539_v40 }
 0x1a3   :  { %v337_v56 = vmul.f32 %v315_v53, %v5457_v45 }
 0x1a4   :  { %v319_v57 = vmul.f32 0.5, %v318_v54 }
 0x1a5   :  { %v344_v58 = vmul.f32 %v5521_v31, %v337_v56 }
 0x1a6   :  { %v320_v59 = vsub.f32 1.5, %v319_v57 }
 0x1a7   :  { %v5158_v60 = vpop.eup %5157  ;;  %v5552_v61 = vadd.f32 %v5526_v36, %v344_v58 }
 0x1a8   :  { %v321_v62 = vmul.f32 %v5156_v48, %v320_v59  ;;  %v327_v63 = vmul.f32 %v5158_v60, %v295_v49  ;;  %vm333_vm12 = vweird.f32 %v5158_v60  ;;  %v4641_v49 = vld [vmem:[%s5494_s11 + $0x20] sm:$0xff] }
 0x1a9   :  { %4600 = vmatmul.msk.f32.gmra.mxu1 %vm244_vm1, %v5552_v61  ;;  %4604 = vmatmul.msk.f32.gmra.mxu2 %vm244_vm1, %v5552_v61  ;;  %vm334_vm14 = vmor %vm332_vm13, %vm333_vm12  ;;  %v5627_v59 = vld [vmem:[%s4590_s24] sm:$0xff]  ;;  %vm1193_vm13 = vcmask 523264  }
 0x1aa   :  { %v325_v45 = vsel %vm324_vm11, %v5156_v48, %v321_v62  ;;  %v328_v0 = vmul.f32 %v5158_v60, %v327_v63  ;;  %4608 = vmatmul.msk.f32.gmra.mxu3 %vm244_vm1, %v5552_v61  ;;  %4638 = vmatmul.msk.f32.gmra.mxu0 %vm244_vm1, %v5552_v61  ;;  %v4642_v48 = vld [vmem:[%s5494_s11 + $0x28] sm:$0xff] }
 0x1ab   :  { %v338_v1 = vmul.f32 %v325_v45, %v5464_v50  ;;  %v5631_v63 = vld [vmem:[%s4590_s24 + $0x8] sm:$0xff] }
 0x1ac   :  { %v329_v2 = vmul.f32 0.5, %v328_v0 }
 0x1ad   :  { %v345_v3 = vmul.f32 %v5521_v31, %v338_v1 }
 0x1ae   :  { %v330_v4 = vsub.f32 1.5, %v329_v2 }
 0x1af   :  { %v5565_v5 = vadd.f32 %v5526_v36, %v345_v3  ;;  %v5635_v3 = vld [vmem:[%s4590_s24 + $0x10] sm:$0xff] }
 0x1b0   :  { %v331_v6 = vmul.f32 %v5158_v60, %v330_v4 }
 0x1b1   :  { %4601 = vmatmul.msk.f32.gmra.mxu1 %vm244_vm1, %v5565_v5  ;;  %4605 = vmatmul.msk.f32.gmra.mxu2 %vm244_vm1, %v5565_v5 }
 0x1b2   :  { %v335_v7 = vsel %vm334_vm14, %v5158_v60, %v331_v6  ;;  %4609 = vmatmul.msk.f32.gmra.mxu3 %vm244_vm1, %v5565_v5  ;;  %4639 = vmatmul.msk.f32.gmra.mxu0 %vm244_vm1, %v5565_v5 }
 0x1b3   :  { %v339_v50 = vmul.f32 %v335_v7, %v5471_v55 }
 0x1b5   :  { %v346_v8 = vmul.f32 %v5521_v31, %v339_v50  ;;  %v5639_v50 = vld [vmem:[%s4590_s24 + $0x18] sm:$0xff]  ;;  %s5396_s24 = smov 25  }
 0x1b6   :  { %s6637_s1 = sld [smem:[%s6728_s0 + %s5396_s24]]  }
 0x1b7   :  { %v5578_v9 = vadd.f32 %v5526_v36, %v346_v8 }
 0x1b9   :  { %4602 = vmatmul.msk.f32.gmra.mxu1 %vm244_vm1, %v5578_v9  ;;  %4606 = vmatmul.msk.f32.gmra.mxu2 %vm244_vm1, %v5578_v9 }
 0x1ba   :  { %4610 = vmatmul.msk.f32.gmra.mxu3 %vm244_vm1, %v5578_v9  ;;  %4640 = vmatmul.msk.f32.gmra.mxu0 %vm244_vm1, %v5578_v9 }
 0x1c2   :  { %4628 = vmatmul.msk.f32.vlgmr.msrb.gmra.mxu3 %vm244_vm1, %v5539_v40 }
 0x1ca   :  { %4629 = vmatmul.msk.f32.gmra.mxu3 %vm244_vm1, %v5552_v61 }
 0x1d2   :  { %4630 = vmatmul.msk.f32.gmra.mxu3 %vm244_vm1, %v5565_v5 }
 0x1da   :  { %4631 = vmatmul.msk.f32.gmra.mxu3 %vm244_vm1, %v5578_v9 }
 0x21e   :  { %v395_v32 = vpop.f32.mrf.mxu1 }
 0x21f   :  { %v696_v55 = vpop.f32.mrf.mxu0  ;;  %v396_v43 = vadd.f32 %v5087_v38, %v395_v32 }
 0x220   :  { %v697_v51 = vadd.f32 %v5088_v33, %v696_v55 }
 0x224   :  { %v432_v10 = vpop.f32.mrf.mxu2 }
 0x225   :  { %v469_v11 = vpop.f32.mrf.mxu3  ;;  %v433_v39 = vadd.f32 %v5089_v20, %v432_v10 }
 0x226   :  { %v470_v34 = vadd.f32 %v5090_v22, %v469_v11  ;;  %v398_v46 = vpop.f32.mrf.mxu1 }
 0x227   :  { %v699_v15 = vpop.f32.mrf.mxu0  ;;  %v399_v52 = vadd.f32 %v5087_v38, %v398_v46 }
 0x228   :  { %v700_v47 = vadd.f32 %v5088_v33, %v699_v15 }
 0x22c   :  { %v435_v12 = vpop.f32.mrf.mxu2 }
 0x22d   :  { %v472_v13 = vpop.f32.mrf.mxu3  ;;  %v436_v35 = vadd.f32 %v5089_v20, %v435_v12 }
 0x22e   :  { %v473_v31 = vadd.f32 %v5090_v22, %v472_v13  ;;  %v401_v53 = vpop.f32.mrf.mxu1  ;;  %v5092_v13 = vld [vmem:[%s5536_s19 + $0x1] ss:$0 sm:$0xff] }
 0x22f   :  { %v702_v18 = vpop.f32.mrf.mxu0  ;;  %v402_v54 = vadd.f32 %v5087_v38, %v401_v53 }
 0x230   :  { %v703_v41 = vadd.f32 %v5088_v33, %v702_v18 }
 0x234   :  { %v438_v16 = vpop.f32.mrf.mxu2 }
 0x235   :  { %v475_v17 = vpop.f32.mrf.mxu3  ;;  %v439_v28 = vadd.f32 %v5089_v20, %v438_v16 }
 0x236   :  { %v476_v27 = vadd.f32 %v5090_v22, %v475_v17  ;;  %v404_v56 = vpop.f32.mrf.mxu1 }
 0x237   :  { %v705_v30 = vpop.f32.mrf.mxu0  ;;  %v405_v57 = vadd.f32 %v5087_v38, %v404_v56 }
 0x238   :  { %v706_v36 = vadd.f32 %v5088_v33, %v705_v30 }
 0x23c   :  { %v441_v21 = vpop.f32.mrf.mxu2 }
 0x23d   :  { %v442_v23 = vadd.f32 %v5089_v20, %v441_v21  ;;  %v478_v25 = vpop.f32.mrf.mxu3 }
 0x23e   :  { %v479_v26 = vadd.f32 %v5090_v22, %v478_v25 }
 0x23f   :  { %4611 = vmatpush.xpose.msk.msrb.mxu1 %vm481_vm15, %v442_v23 }
 0x240   :  { %611 = vmatpush.msrb.mxu2 %v479_v26 }
 0x242   :  { %612 = vmatpush.msrb.mxu2 %v476_v27 }
 0x243   :  { %4612 = vmatpush.xpose.msk.msrb.mxu1 %vm481_vm15, %v439_v28 }
 0x244   :  { %613 = vmatpush.msrb.mxu2 %v473_v31 }
 0x246   :  { %614 = vmatpush.msrb.mxu2 %v470_v34 }
 0x247   :  { %4613 = vmatpush.xpose.msk.msrb.mxu1 %vm481_vm15, %v436_v35 }
 0x248   :  { %4650 = vmatpush.xpose.msk.msra.mxu2 %vm481_vm15, %v706_v36 }
 0x24b   :  { %4614 = vmatpush.xpose.msk.msrb.mxu1 %vm481_vm15, %v433_v39 }
 0x24c   :  { %4651 = vmatpush.xpose.msk.msra.mxu2 %vm481_vm15, %v703_v41 }
 0x24e   :  { %4615 = vmatmul.msk.f32.vlgmr.msrb.gmra.mxu1 %vm481_vm15, %v396_v43 }
 0x24f   :  { %730 = vmatpush.msra.mxu1 %v4644_v42 }
 0x250   :  { %4652 = vmatpush.xpose.msk.msra.mxu2 %vm481_vm15, %v700_v47 }
 0x251   :  { %731 = vmatpush.msra.mxu1 %v4643_v44 }
 0x253   :  { %732 = vmatpush.msra.mxu1 %v4642_v48 }
 0x254   :  { %4653 = vmatpush.xpose.msk.msra.mxu2 %vm481_vm15, %v697_v51 }
 0x255   :  { %733 = vmatpush.msra.mxu1 %v4641_v49 }
 0x256   :  { %4616 = vmatmul.msk.f32.gmra.mxu1 %vm481_vm15, %v399_v52 }
 0x25e   :  { %4617 = vmatmul.msk.f32.gmra.mxu1 %vm481_vm15, %v402_v54 }
 0x266   :  { %4618 = vmatmul.msk.f32.gmra.mxu1 %vm481_vm15, %v405_v57 }
 0x26e   :  { %4646 = vmatmul.msk.f32.vlgmr.msra.gmra.mxu1 %vm244_vm1, %v5539_v40 }
 0x276   :  { %4647 = vmatmul.msk.f32.gmra.mxu1 %vm244_vm1, %v5552_v61 }
 0x27e   :  { %4648 = vmatmul.msk.f32.gmra.mxu1 %vm244_vm1, %v5565_v5 }
 0x286   :  { %4649 = vmatmul.msk.f32.gmra.mxu1 %vm244_vm1, %v5578_v9 }
 0x2cb   :  { %v523_v58 = vpop.f32.mrf.mxu1 }
 0x2cc   :  { %v535_v60 = vmul.f32 0.25, %v523_v58 }
 0x2ce   :  { %v539_v40 = vadd.f32 %v535_v60, %v5627_v59  ;;  %v657_v60 = vpop.f32.mrf.mxu3 }
 0x2d0   :  { %v543_v62 = vsel %vm244_vm1, %v539_v40, -inf }
 0x2d1   :  { %544 = vmax.xlane.f32.xlu2 %v543_v62  ;;  %v629_v62 = vld [vmem:[%s5654_s30 + $0x8] sm:$0xff] }
 0x2d2   :  { %963 = vmatpush.msrb.mxu1 %v629_v62 }
 0x2d3   :  { %v526_v61 = vpop.f32.mrf.mxu1 }
 0x2d4   :  { %v536_v45 = vmul.f32 0.25, %v526_v61  ;;  %v5091_v61 = vld [vmem:[%s5479_s29 + $0x1] ss:$0 sm:$0xff] }
 0x2d6   :  { %v540_v0 = vadd.f32 %v536_v45, %v5631_v63  ;;  %v658_v45 = vadd.f32 %v5091_v61, %v657_v60 }
 0x2d8   :  { %v546_v1 = vsel %vm244_vm1, %v540_v0, -inf }
 0x2d9   :  { %547 = vmax.xlane.f32.xlu0 %v546_v1 }
 0x2db   :  { %v529_v2 = vpop.f32.mrf.mxu1 }
 0x2dc   :  { %v537_v4 = vmul.f32 0.25, %v529_v2 }
 0x2de   :  { %v541_v5 = vadd.f32 %v537_v4, %v5635_v3 }
 0x2e0   :  { %v549_v6 = vsel %vm244_vm1, %v541_v5, -inf }
 0x2e1   :  { %550 = vmax.xlane.f32.xlu1 %v549_v6 }
 0x2e3   :  { %v532_v7 = vpop.f32.mrf.mxu1 }
 0x2e4   :  { %v538_v8 = vmul.f32 0.25, %v532_v7  ;;  %v628_v7 = vld [vmem:[%s5654_s30] sm:$0xff] }
 0x2e5   :  { %964 = vmatpush.msrb.mxu1 %v628_v7 }
 0x2e6   :  { %v542_v9 = vadd.f32 %v538_v8, %v5639_v50 }
 0x2e8   :  { %v552_v55 = vsel %vm244_vm1, %v542_v9, -inf }
 0x2e9   :  { %553 = vmax.xlane.f32.xlu2 %v552_v55 }
 0x2eb   :  { %v735_v10 = vpop.f32.mrf.mxu1 }
 0x2ec   :  { %v736_v20 = vadd.f32 %v5092_v13, %v735_v10 }
 0x2f3   :  { %v738_v11 = vpop.f32.mrf.mxu1 }
 0x2f4   :  { %v739_v18 = vadd.f32 %v5092_v13, %v738_v11 }
 0x2fb   :  { %v741_v12 = vpop.f32.mrf.mxu1 }
 0x2fc   :  { %v742_v17 = vadd.f32 %v5092_v13, %v741_v12 }
 0x303   :  { %v744_v15 = vpop.f32.mrf.mxu1 }
 0x304   :  { %v745_v16 = vadd.f32 %v5092_v13, %v744_v15 }
 0x306   :  { %876 = vmatpush.msra.mxu3 %v745_v16 }
 0x308   :  { %877 = vmatpush.msra.mxu3 %v742_v17 }
 0x30a   :  { %878 = vmatpush.msra.mxu3 %v739_v18 }
 0x30c   :  { %879 = vmatpush.msra.mxu3 %v736_v20 }
 0x344   :  { %v545_v21 = vpop.xlane.xlu2 %544 }
 0x345   :  { %v555_v22 = vsub.f32 %v539_v40, %v545_v21 }
 0x347   :  { %v559_v23 = vmul.f32 1.442695, %v555_v22 }
 0x349   :  { %5159 = vpow2.f32 %v559_v23 }
 0x34c   :  { %v548_v25 = vpop.xlane.xlu0 %547 }
 0x34d   :  { %v556_v26 = vsub.f32 %v540_v0, %v548_v25  ;;  %v660_v0 = vpop.f32.mrf.mxu3 }
 0x34e   :  { %v661_v1 = vadd.f32 %v5091_v61, %v660_v0 }
 0x34f   :  { %v5160_v27 = vpop.eup %5159  ;;  %v561_v28 = vmul.f32 1.442695, %v556_v26 }
 0x350   :  { %v567_v30 = vsel %vm244_vm1, %v5160_v27, 0.0 }
 0x351   :  { %5161 = vpow2.f32 %v561_v28  ;;  %568 = vadd.xlane.f32.xlu0 %v567_v30 }
 0x354   :  { %v551_v31 = vpop.xlane.xlu1 %550 }
 0x355   :  { %v557_v32 = vsub.f32 %v541_v5, %v551_v31  ;;  %v663_v2 = vpop.f32.mrf.mxu3 }
 0x356   :  { %v664_v4 = vadd.f32 %v5091_v61, %v663_v2 }
 0x357   :  { %v5162_v33 = vpop.eup %5161  ;;  %v563_v34 = vmul.f32 1.442695, %v557_v32 }
 0x358   :  { %v570_v35 = vsel %vm244_vm1, %v5162_v33, 0.0 }
 0x359   :  { %5163 = vpow2.f32 %v563_v34  ;;  %571 = vadd.xlane.f32.xlu1 %v570_v35 }
 0x35c   :  { %v554_v36 = vpop.xlane.xlu2 %553 }
 0x35d   :  { %v558_v38 = vsub.f32 %v542_v9, %v554_v36  ;;  %v666_v5 = vpop.f32.mrf.mxu3 }
 0x35e   :  { %v667_v6 = vadd.f32 %v5091_v61, %v666_v5 }
 0x35f   :  { %v5164_v39 = vpop.eup %5163  ;;  %v565_v41 = vmul.f32 1.442695, %v558_v38 }
 0x360   :  { %v573_v42 = vsel %vm244_vm1, %v5164_v39, 0.0 }
 0x361   :  { %5165 = vpow2.f32 %v565_v41  ;;  %574 = vadd.xlane.f32.xlu2 %v573_v42 }
 0x367   :  { %v5166_v43 = vpop.eup %5165 }
 0x368   :  { %v576_v44 = vsel %vm244_vm1, %v5166_v43, 0.0 }
 0x369   :  { %577 = vadd.xlane.f32.xlu0 %v576_v44 }
 0x3c4   :  { %v569_v46 = vpop.xlane.xlu0 %568 }
 0x3c5   :  { %5167 = vrcp.f32 %v569_v46 }
 0x3cb   :  { %v5168_v47 = vpop.eup %5167 }
 0x3cc   :  { %v572_v48 = vpop.xlane.xlu1 %571  ;;  %v583_v49 = vmul.f32 %v5168_v47, %v5160_v27 }
 0x3cd   :  { %5169 = vrcp.f32 %v572_v48 }
 0x3ce   :  { %4619 = vmatmul.msk.f32.vlgmr.msrb.gmra.mxu2 %vm244_vm1, %v583_v49 }
 0x3d3   :  { %v5170_v51 = vpop.eup %5169 }
 0x3d4   :  { %v575_v52 = vpop.xlane.xlu2 %574  ;;  %v584_v53 = vmul.f32 %v5170_v51, %v5162_v33 }
 0x3d5   :  { %5171 = vrcp.f32 %v575_v52  ;;  %v4663_v52 = vld [vmem:[%s5654_s30 + $0x18] sm:$0xff] }
 0x3d6   :  { %4620 = vmatmul.msk.f32.gmra.mxu2 %vm244_vm1, %v584_v53  ;;  %922 = vmatpush.msra.mxu0 %v4663_v52  ;;  %v1098_v52 = vld [vmem:[%s5748_s16 + $0x10] sm:$0xff] }
 0x3db   :  { %v5172_v54 = vpop.eup %5171 }
 0x3dc   :  { %v578_v56 = vpop.xlane.xlu0 %577  ;;  %v585_v57 = vmul.f32 %v5172_v54, %v5164_v39 }
 0x3dd   :  { %5173 = vrcp.f32 %v578_v56 }
 0x3de   :  { %4621 = vmatmul.msk.f32.gmra.mxu2 %vm244_vm1, %v585_v57 }
 0x3e3   :  { %v5174_v58 = vpop.eup %5173 }
 0x3e4   :  { %v586_v40 = vmul.f32 %v5174_v58, %v5166_v43 }
 0x3e6   :  { %4622 = vmatmul.msk.f32.gmra.mxu2 %vm244_vm1, %v586_v40 }
 0x3ee   :  { %4654 = vmatmul.msk.f32.vlgmr.msra.gmra.mxu2 %vm481_vm15, %v658_v45 }
 0x3f6   :  { %4655 = vmatmul.msk.f32.gmra.mxu2 %vm481_vm15, %v661_v1  ;;  %v4662_v1 = vld [vmem:[%s5654_s30 + $0x10] sm:$0xff] }
 0x3f7   :  { %923 = vmatpush.msra.mxu0 %v4662_v1 }
 0x3fe   :  { %4656 = vmatmul.msk.f32.gmra.mxu2 %vm481_vm15, %v664_v4 }
 0x406   :  { %4657 = vmatmul.msk.f32.gmra.mxu2 %vm481_vm15, %v667_v6 }
 0x451   :  { %v616_v8 = vpop.f32.mrf.mxu2 }
 0x452   :  { %4668 = vmatmul.msk.f32.vlgmr.msrb.gmra.mxu1 %vm481_vm15, %v616_v8  ;;  %v5093_v8 = vld [vmem:[%s5688_s5] ss:$0 sm:$0xff] }
 0x459   :  { %v619_v9 = vpop.f32.mrf.mxu2 }
 0x45a   :  { %4669 = vmatmul.msk.f32.gmra.mxu1 %vm481_vm15, %v619_v9 }
 0x461   :  { %v622_v55 = vpop.f32.mrf.mxu2 }
 0x462   :  { %4670 = vmatmul.msk.f32.gmra.mxu1 %vm481_vm15, %v622_v55 }
 0x469   :  { %v625_v10 = vpop.f32.mrf.mxu2 }
 0x46a   :  { %4671 = vmatmul.msk.f32.gmra.mxu1 %vm481_vm15, %v625_v10 }
 0x471   :  { %v788_v11 = vpop.f32.mrf.mxu2 }
 0x472   :  { %v800_v12 = vmul.f32 0.25, %v788_v11 }
 0x474   :  { %v804_v13 = vadd.f32 %v800_v12, %v5627_v59 }
 0x476   :  { %v808_v15 = vsel %vm244_vm1, %v804_v13, -inf }
 0x477   :  { %809 = vmax.xlane.f32.xlu1 %v808_v15 }
 0x479   :  { %v791_v16 = vpop.f32.mrf.mxu2 }
 0x47a   :  { %v801_v17 = vmul.f32 0.25, %v791_v16 }
 0x47c   :  { %v805_v18 = vadd.f32 %v801_v17, %v5631_v63 }
 0x47e   :  { %v811_v20 = vsel %vm244_vm1, %v805_v18, -inf }
 0x47f   :  { %812 = vmax.xlane.f32.xlu2 %v811_v20 }
 0x481   :  { %v794_v21 = vpop.f32.mrf.mxu2 }
 0x482   :  { %v802_v22 = vmul.f32 0.25, %v794_v21 }
 0x484   :  { %v806_v23 = vadd.f32 %v802_v22, %v5635_v3 }
 0x486   :  { %v814_v25 = vsel %vm244_vm1, %v806_v23, -inf }
 0x487   :  { %815 = vmax.xlane.f32.xlu0 %v814_v25 }
 0x489   :  { %v797_v26 = vpop.f32.mrf.mxu2 }
 0x48a   :  { %v803_v27 = vmul.f32 0.25, %v797_v26 }
 0x48c   :  { %v807_v59 = vadd.f32 %v803_v27, %v5639_v50 }
 0x48e   :  { %v817_v28 = vsel %vm244_vm1, %v807_v59, -inf }
 0x48f   :  { %818 = vmax.xlane.f32.xlu1 %v817_v28 }
 0x4cf   :  { %v966_v7 = vpop.f32.mrf.mxu1 }
 0x4d7   :  { %v969_v11 = vpop.f32.mrf.mxu1 }
 0x4df   :  { %v972_v20 = vpop.f32.mrf.mxu1 }
 0x4e7   :  { %v975_v27 = vpop.f32.mrf.mxu1 }
 0x4ea   :  { %v810_v30 = vpop.xlane.xlu1 %809 }
 0x4eb   :  { %v820_v31 = vsub.f32 %v804_v13, %v810_v30 }
 0x4ed   :  { %v824_v63 = vmul.f32 1.442695, %v820_v31 }
 0x4ef   :  { %5175 = vpow2.f32 %v824_v63 }
 0x4f2   :  { %v813_v32 = vpop.xlane.xlu2 %812 }
 0x4f3   :  { %v821_v33 = vsub.f32 %v805_v18, %v813_v32 }
 0x4f5   :  { %v5176_v34 = vpop.eup %5175  ;;  %v826_v35 = vmul.f32 1.442695, %v821_v33 }
 0x4f6   :  { %v832_v3 = vsel %vm244_vm1, %v5176_v34, 0.0 }
 0x4f7   :  { %5177 = vpow2.f32 %v826_v35  ;;  %833 = vadd.xlane.f32.xlu2 %v832_v3 }
 0x4fa   :  { %v816_v36 = vpop.xlane.xlu0 %815 }
 0x4fb   :  { %v822_v38 = vsub.f32 %v806_v23, %v816_v36 }
 0x4fd   :  { %v5178_v39 = vpop.eup %5177  ;;  %v828_v41 = vmul.f32 1.442695, %v822_v38 }
 0x4fe   :  { %v835_v50 = vsel %vm244_vm1, %v5178_v39, 0.0 }
 0x4ff   :  { %5179 = vpow2.f32 %v828_v41  ;;  %836 = vadd.xlane.f32.xlu0 %v835_v50 }
 0x502   :  { %v819_v42 = vpop.xlane.xlu1 %818 }
 0x503   :  { %v823_v43 = vsub.f32 %v807_v59, %v819_v42 }
 0x505   :  { %v5180_v44 = vpop.eup %5179  ;;  %v830_v46 = vmul.f32 1.442695, %v823_v43 }
 0x506   :  { %v838_v47 = vsel %vm244_vm1, %v5180_v44, 0.0 }
 0x507   :  { %5181 = vpow2.f32 %v830_v46  ;;  %839 = vadd.xlane.f32.xlu1 %v838_v47 }
 0x50d   :  { %v5182_v48 = vpop.eup %5181 }
 0x50e   :  { %v841_v49 = vsel %vm244_vm1, %v5182_v48, 0.0 }
 0x50f   :  { %842 = vadd.xlane.f32.xlu2 %v841_v49 }
 0x56a   :  { %v834_v51 = vpop.xlane.xlu2 %833 }
 0x56b   :  { %5183 = vrcp.f32 %v834_v51  ;;  %v1099_v51 = vld [vmem:[%s5748_s16 + $0x18] sm:$0xff] }
 0x56c   :  { %1128 = vmatpush.msrb.mxu2 %v1099_v51 }
 0x56e   :  { %1129 = vmatpush.msrb.mxu2 %v1098_v52  ;;  %v1186_v52 = vld [vmem:[%s5770_s22 + $0x28] sm:$0xff] }
 0x571   :  { %v5184_v53 = vpop.eup %5183 }
 0x572   :  { %v848_v54 = vmul.f32 %v5184_v53, %v5176_v34  ;;  %v837_v56 = vpop.xlane.xlu0 %836  ;;  %v1097_v53 = vld [vmem:[%s5748_s16 + $0x8] sm:$0xff] }
 0x573   :  { %5185 = vrcp.f32 %v837_v56  ;;  %1130 = vmatpush.msrb.mxu2 %v1097_v53  ;;  %v1185_v53 = vld [vmem:[%s5770_s22 + $0x20] sm:$0xff] }
 0x574   :  { %4658 = vmatmul.msk.f32.vlgmr.msra.gmra.mxu3 %vm244_vm1, %v848_v54  ;;  %v1096_v54 = vld [vmem:[%s5748_s16] sm:$0xff] }
 0x575   :  { %1131 = vmatpush.msrb.mxu2 %v1096_v54  ;;  %v1184_v54 = vld [vmem:[%s5770_s22 + $0x18] sm:$0xff] }
 0x579   :  { %v5186_v57 = vpop.eup %5185 }
 0x57a   :  { %v840_v58 = vpop.xlane.xlu1 %839  ;;  %v849_v60 = vmul.f32 %v5186_v57, %v5178_v39 }
 0x57b   :  { %5187 = vrcp.f32 %v840_v58 }
 0x57c   :  { %4659 = vmatmul.msk.f32.gmra.mxu3 %vm244_vm1, %v849_v60 }
 0x581   :  { %v5188_v40 = vpop.eup %5187 }
 0x582   :  { %v843_v62 = vpop.xlane.xlu2 %842  ;;  %v850_v61 = vmul.f32 %v5188_v40, %v5180_v44 }
 0x583   :  { %5189 = vrcp.f32 %v843_v62 }
 0x584   :  { %4660 = vmatmul.msk.f32.gmra.mxu3 %vm244_vm1, %v850_v61 }
 0x589   :  { %v5190_v45 = vpop.eup %5189 }
 0x58a   :  { %v851_v0 = vmul.f32 %v5190_v45, %v5182_v48 }
 0x58c   :  { %4661 = vmatmul.msk.f32.gmra.mxu3 %vm244_vm1, %v851_v0 }
 0x5f7   :  { %v881_v2 = vpop.f32.mrf.mxu3 }
 0x5f8   :  { %4664 = vmatmul.msk.f32.vlgmr.msra.gmra.mxu0 %vm481_vm15, %v881_v2 }
 0x5ff   :  { %v884_v4 = vpop.f32.mrf.mxu3 }
 0x600   :  { %4665 = vmatmul.msk.f32.gmra.mxu0 %vm481_vm15, %v884_v4 }
 0x607   :  { %v887_v5 = vpop.f32.mrf.mxu3 }
 0x608   :  { %4666 = vmatmul.msk.f32.gmra.mxu0 %vm481_vm15, %v887_v5 }
 0x60f   :  { %v890_v6 = vpop.f32.mrf.mxu3 }
 0x610   :  { %4667 = vmatmul.msk.f32.gmra.mxu0 %vm481_vm15, %v890_v6 }
 0x675   :  { %v925_v9 = vpop.f32.mrf.mxu0 }
 0x676   :  { %v967_v55 = vadd.f32 %v966_v7, %v925_v9 }
 0x678   :  { %v982_v10 = vadd.f32 %v5093_v8, %v967_v55  ;;  %v5094_v55 = vld [vmem:[%s5435_s21 + $0x1] ss:$0 sm:$0xff] }
 0x67a   :  { %v5697_v12 = vadd.f32 %v982_v10, %v5420_v14 }
 0x67c   :  { %v994_v13 = vsel %vm244_vm1, %v5697_v12, 0.0 }
 0x67d   :  { %995 = vadd.xlane.f32.xlu0 %v994_v13  ;;  %v928_v15 = vpop.f32.mrf.mxu0 }
 0x67e   :  { %v970_v16 = vadd.f32 %v969_v11, %v928_v15  ;;  %v5095_v15 = vld [vmem:[%s5442_s25 + $0x1] ss:$0 sm:$0xff] }
 0x680   :  { %v983_v17 = vadd.f32 %v5093_v8, %v970_v16 }
 0x682   :  { %v5702_v18 = vadd.f32 %v983_v17, %v5424_v19 }
 0x684   :  { %v997_v21 = vsel %vm244_vm1, %v5702_v18, 0.0 }
 0x685   :  { %998 = vadd.xlane.f32.xlu1 %v997_v21  ;;  %v931_v22 = vpop.f32.mrf.mxu0 }
 0x686   :  { %v973_v23 = vadd.f32 %v972_v20, %v931_v22 }
 0x688   :  { %v984_v25 = vadd.f32 %v5093_v8, %v973_v23 }
 0x68a   :  { %v5707_v14 = vadd.f32 %v984_v25, %v5428_v24 }
 0x68c   :  { %v1000_v26 = vsel %vm244_vm1, %v5707_v14, 0.0 }
 0x68d   :  { %1001 = vadd.xlane.f32.xlu2 %v1000_v26  ;;  %v934_v59 = vpop.f32.mrf.mxu0 }
 0x68e   :  { %v976_v28 = vadd.f32 %v975_v27, %v934_v59 }
 0x690   :  { %v985_v19 = vadd.f32 %v5093_v8, %v976_v28 }
 0x692   :  { %v5712_v30 = vadd.f32 %v985_v19, %v5437_v29 }
 0x694   :  { %v1003_v31 = vsel %vm244_vm1, %v5712_v30, 0.0 }
 0x695   :  { %1004 = vadd.xlane.f32.xlu0 %v1003_v31 }
 0x6f0   :  { %v996_v63 = vpop.xlane.xlu0 %995 }
 0x6f1   :  { %v1006_v32 = vmul.f32 %v996_v63, %v5446_v37 }
 0x6f3   :  { %v1010_v24 = vsub.f32 %v5697_v12, %v1006_v32 }
 0x6f5   :  { %v1014_v33 = vmul.f32 %v1010_v24, %v1010_v24 }
 0x6f7   :  { %v1018_v34 = vsel %vm244_vm1, %v1014_v33, 0.0 }
 0x6f8   :  { %1019 = vadd.xlane.f32.xlu1 %v1018_v34  ;;  %v999_v35 = vpop.xlane.xlu1 %998 }
 0x6f9   :  { %v1007_v3 = vmul.f32 %v999_v35, %v5446_v37 }
 0x6fb   :  { %v5721_v36 = vsub.f32 %v5702_v18, %v1007_v3 }
 0x6fd   :  { %v1015_v29 = vmul.f32 %v5721_v36, %v5721_v36 }
 0x6ff   :  { %v1021_v38 = vsel %vm244_vm1, %v1015_v29, 0.0 }
 0x700   :  { %v1002_v39 = vpop.xlane.xlu2 %1001  ;;  %1022 = vadd.xlane.f32.xlu2 %v1021_v38 }
 0x701   :  { %v1008_v41 = vmul.f32 %v1002_v39, %v5446_v37 }
 0x703   :  { %v5728_v50 = vsub.f32 %v5707_v14, %v1008_v41 }
 0x705   :  { %v1016_v42 = vmul.f32 %v5728_v50, %v5728_v50 }
 0x707   :  { %v1024_v43 = vsel %vm244_vm1, %v1016_v42, 0.0 }
 0x708   :  { %1025 = vadd.xlane.f32.xlu0 %v1024_v43  ;;  %v1005_v44 = vpop.xlane.xlu0 %1004 }
 0x709   :  { %v1009_v46 = vmul.f32 %v1005_v44, %v5446_v37 }
 0x70b   :  { %v5735_v47 = vsub.f32 %v5712_v30, %v1009_v46 }
 0x70d   :  { %v1017_v48 = vmul.f32 %v5735_v47, %v5735_v47 }
 0x70f   :  { %v1027_v49 = vsel %vm244_vm1, %v1017_v48, 0.0 }
 0x710   :  { %1028 = vadd.xlane.f32.xlu1 %v1027_v49 }
 0x76b   :  { %v1020_v56 = vpop.xlane.xlu1 %1019 }
 0x76c   :  { %v1030_v57 = vmul.f32 %v1020_v56, %v5446_v37  ;;  %v1183_v56 = vld [vmem:[%s5770_s22 + $0x10] sm:$0xff] }
 0x76e   :  { %v1034_v58 = vadd.f32 1e-06, %v1030_v57  ;;  %v1182_v57 = vld [vmem:[%s5770_s22 + $0x8] sm:$0xff] }
 0x770   :  { %5191 = vrsqrt.f32 %v1034_v58  ;;  %vm1044_vm2 = vweird.f32 %v1034_v58 }
 0x773   :  { %v1023_v60 = vpop.xlane.xlu2 %1022 }
 0x774   :  { %v1031_v40 = vmul.f32 %v1023_v60, %v5446_v37  ;;  %v4697_v60 = vld [vmem:[%s5489_s7 + $0x50] sm:$0xff] }
 0x776   :  { %v5192_v62 = vpop.eup %5191  ;;  %v1035_v61 = vadd.f32 1e-06, %v1031_v40  ;;  %v1181_v40 = vld [vmem:[%s5770_s22] sm:$0xff] }
 0x777   :  { %v1039_v45 = vmul.f32 %v5192_v62, %v1034_v58  ;;  %vm1045_vm0 = vweird.f32 %v5192_v62  ;;  %v4698_v58 = vld [vmem:[%s5489_s7 + $0x58] sm:$0xff] }
 0x778   :  { %5193 = vrsqrt.f32 %v1035_v61  ;;  %vm1046_vm3 = vmor %vm1044_vm2, %vm1045_vm0  ;;  %vm1054_vm5 = vweird.f32 %v1035_v61  ;;  %1471 = vmatpush.msra.mxu2 %v4698_v58  ;;  %v1239_v58 = vld [vmem:[%s5808_s12] sm:$0xff] }
 0x779   :  { %v1040_v0 = vmul.f32 %v5192_v62, %v1039_v45  ;;  %v4695_v45 = vld [vmem:[%s5489_s7 + $0x40] sm:$0xff] }
 0x77a   :  { %1472 = vmatpush.msra.mxu2 %v4697_v60 }
 0x77b   :  { %v1041_v1 = vmul.f32 0.5, %v1040_v0  ;;  %v1026_v2 = vpop.xlane.xlu0 %1025  ;;  %v5791_v0 = vld [vmem:[%s5782_s27] sm:$0xff] }
 0x77c   :  { %v1032_v4 = vmul.f32 %v1026_v2, %v5446_v37 }
 0x77d   :  { %v1042_v5 = vsub.f32 1.5, %v1041_v1 }
 0x77e   :  { %v5194_v6 = vpop.eup %5193  ;;  %v1036_v7 = vadd.f32 1e-06, %v1032_v4 }
 0x77f   :  { %v1043_v8 = vmul.f32 %v5192_v62, %v1042_v5  ;;  %v1049_v9 = vmul.f32 %v5194_v6, %v1035_v61  ;;  %vm1055_vm4 = vweird.f32 %v5194_v6  ;;  %v5096_v61 = vld [vmem:[%s5743_s10] ss:$0 sm:$0xff] }
 0x780   :  { %5195 = vrsqrt.f32 %v1036_v7  ;;  %vm1056_vm6 = vmor %vm1054_vm5, %vm1055_vm4  ;;  %vm1064_vm8 = vweird.f32 %v1036_v7 }
 0x781   :  { %v1047_v10 = vsel %vm1046_vm3, %v5192_v62, %v1043_v8  ;;  %v1050_v11 = vmul.f32 %v5194_v6, %v1049_v9  ;;  %v4696_v62 = vld [vmem:[%s5489_s7 + $0x48] sm:$0xff] }
 0x782   :  { %v1078_v13 = vmul.f32 %v1047_v10, %v1010_v24  ;;  %1473 = vmatpush.msra.mxu2 %v4696_v62 }
 0x783   :  { %v1051_v16 = vmul.f32 0.5, %v1050_v11  ;;  %v1029_v17 = vpop.xlane.xlu1 %1028 }
 0x784   :  { %v1085_v20 = vmul.f32 %v5094_v55, %v1078_v13  ;;  %v1033_v21 = vmul.f32 %v1029_v17, %v5446_v37  ;;  %1474 = vmatpush.msra.mxu2 %v4695_v45 }
 0x785   :  { %v1052_v22 = vsub.f32 1.5, %v1051_v16 }
 0x786   :  { %v5196_v23 = vpop.eup %5195  ;;  %v1037_v25 = vadd.f32 1e-06, %v1033_v21  ;;  %v1092_v26 = vadd.f32 %v5095_v15, %v1085_v20  ;;  %v4691_v21 = vld [vmem:[%s5484_s3 + $0x58] sm:$0xff] }
 0x787   :  { %v1053_v27 = vmul.f32 %v5194_v6, %v1052_v22  ;;  %v1059_v59 = vmul.f32 %v5196_v23, %v1036_v7  ;;  %vm1065_vm7 = vweird.f32 %v5196_v23  ;;  %v4690_v22 = vld [vmem:[%s5484_s3 + $0x50] sm:$0xff]  ;;  %1438 = vmatpush.msra.mxu1 %v4691_v21 }
 0x788   :  { %5197 = vrsqrt.f32 %v1037_v25  ;;  %4674 = vmatmul.msk.f32.vlgmr.msrb.gmra.mxu2 %vm244_vm1, %v1092_v26  ;;  %vm1066_vm9 = vmor %vm1064_vm8, %vm1065_vm7  ;;  %vm1074_vm11 = vweird.f32 %v1037_v25 }
 0x789   :  { %v1057_v28 = vsel %vm1056_vm6, %v5194_v6, %v1053_v27  ;;  %v1060_v19 = vmul.f32 %v5196_v23, %v1059_v59  ;;  %v5796_v6 = vld [vmem:[%s5782_s27 + $0x8] sm:$0xff]  ;;  %v1242_v27 = vld [vmem:[%s5808_s12 + $0x18] sm:$0xff]  ;;  %v1241_v59 = vld [vmem:[%s5808_s12 + $0x10] sm:$0xff]  ;;  %1439 = vmatpush.msra.mxu1 %v4690_v22 }
 0x78a   :  { %v1079_v31 = vmul.f32 %v1057_v28, %v5721_v36  ;;  %1271 = vmatpush.msrb.mxu0 %v1242_v27  ;;  %v4702_v27 = vld [vmem:[%s5494_s11 + $0x40] sm:$0xff] }
 0x78b   :  { %v1061_v63 = vmul.f32 0.5, %v1060_v19  ;;  %v4689_v19 = vld [vmem:[%s5484_s3 + $0x48] sm:$0xff] }
 0x78c   :  { %v1086_v32 = vmul.f32 %v5094_v55, %v1079_v31  ;;  %1272 = vmatpush.msrb.mxu0 %v1241_v59  ;;  %1440 = vmatpush.msra.mxu1 %v4689_v19  ;;  %v4727_v59 = vld [vmem:[%s5489_s7 + $0x78] sm:$0xff] }
 0x78d   :  { %v1062_v24 = vsub.f32 1.5, %v1061_v63 }
 0x78e   :  { %v5198_v33 = vpop.eup %5197  ;;  %v1093_v34 = vadd.f32 %v5095_v15, %v1086_v32  ;;  %v4688_v32 = vld [vmem:[%s5484_s3 + $0x40] sm:$0xff] }
 0x78f   :  { %v1063_v35 = vmul.f32 %v5196_v23, %v1062_v24  ;;  %v1069_v3 = vmul.f32 %v5198_v33, %v1037_v25  ;;  %vm1075_vm10 = vweird.f32 %v5198_v33  ;;  %1441 = vmatpush.msra.mxu1 %v4688_v32 }
 0x790   :  { %4675 = vmatmul.msk.f32.gmra.mxu2 %vm244_vm1, %v1093_v34  ;;  %vm1076_vm12 = vmor %vm1074_vm11, %vm1075_vm10  ;;  %4693 = vmatmul.msk.f32.vlgmr.msra.gmra.mxu1 %vm244_vm1, %v5791_v0 }
 0x791   :  { %v1067_v29 = vsel %vm1066_vm9, %v5196_v23, %v1063_v35  ;;  %v1070_v38 = vmul.f32 %v5198_v33, %v1069_v3 }
 0x792   :  { %v1080_v39 = vmul.f32 %v1067_v29, %v5728_v50  ;;  %v1188_v50 = vld [vmem:[%s5770_s22 + $0x38] sm:$0xff] }
 0x793   :  { %v1071_v41 = vmul.f32 0.5, %v1070_v38  ;;  %1214 = vmatpush.msrb.mxu3 %v1188_v50 }
 0x794   :  { %v1087_v42 = vmul.f32 %v5094_v55, %v1080_v39 }
 0x795   :  { %v1072_v43 = vsub.f32 1.5, %v1071_v41 }
 0x796   :  { %v1094_v36 = vadd.f32 %v5095_v15, %v1087_v42 }
 0x797   :  { %v1073_v44 = vmul.f32 %v5198_v33, %v1072_v43 }
 0x798   :  { %4676 = vmatmul.msk.f32.gmra.mxu2 %vm244_vm1, %v1094_v36  ;;  %4694 = vmatmul.msk.f32.gmra.mxu1 %vm244_vm1, %v5796_v6 }
 0x799   :  { %v1077_v46 = vsel %vm1076_vm12, %v5198_v33, %v1073_v44 }
 0x79a   :  { %v1081_v48 = vmul.f32 %v1077_v46, %v5735_v47  ;;  %v1187_v47 = vld [vmem:[%s5770_s22 + $0x30] sm:$0xff] }
 0x79b   :  { %1215 = vmatpush.msrb.mxu3 %v1187_v47 }
 0x79c   :  { %v1088_v49 = vmul.f32 %v5094_v55, %v1081_v48 }
 0x79d   :  { %1216 = vmatpush.msrb.mxu3 %v1186_v52 }
 0x79e   :  { %v1095_v51 = vadd.f32 %v5095_v15, %v1088_v49 }
 0x79f   :  { %1217 = vmatpush.msrb.mxu3 %v1185_v53 }
 0x7a0   :  { %4677 = vmatmul.msk.f32.gmra.mxu2 %vm244_vm1, %v1095_v51 }
 0x7a1   :  { %1218 = vmatpush.msrb.mxu3 %v1184_v54 }
 0x7a3   :  { %1219 = vmatpush.msrb.mxu3 %v1183_v56 }
 0x7a5   :  { %1220 = vmatpush.msrb.mxu3 %v1182_v57  ;;  %v1240_v57 = vld [vmem:[%s5808_s12 + $0x8] sm:$0xff]  ;;  %s5391_s12 = smov 31  }
 0x7a6   :  { %1273 = vmatpush.msrb.mxu0 %v1240_v57  ;;  %s6586_s17 = sld [smem:[%s6728_s0 + %s5391_s12]]  }
 0x7a7   :  { %1221 = vmatpush.msrb.mxu3 %v1181_v40  ;;  %v5097_v40 = vld [vmem:[%s5518_s15 + $0x2] ss:$0 sm:$0xff] }
 0x7a8   :  { %4700 = vmatmul.msk.f32.vlgmr.msra.gmra.mxu2 %vm244_vm1, %v5791_v0  ;;  %1274 = vmatpush.msrb.mxu0 %v1239_v58 }
 0x7b0   :  { %4701 = vmatmul.msk.f32.gmra.mxu2 %vm244_vm1, %v5796_v6 }
 0x80b   :  { %v1133_v1 = vpop.f32.mrf.mxu2 }
 0x80c   :  { %v1134_v2 = vadd.f32 %v5096_v61, %v1133_v1  ;;  %v5098_v1 = vld [vmem:[%s5801_s4] ss:$0 sm:$0xff] }
 0x80e   :  { %v1145_v4 = vmul.f32 %v1134_v2, %v1134_v2 }
 0x810   :  { %v1149_v5 = vmul.f32 %v1145_v4, %v1134_v2 }
 0x812   :  { %v1153_v7 = vmul.f32 0.044715, %v1149_v5 }
 0x813   :  { %v1136_v8 = vpop.f32.mrf.mxu2 }
 0x814   :  { %v1157_v9 = vadd.f32 %v1153_v7, %v1134_v2  ;;  %v1137_v55 = vadd.f32 %v5096_v61, %v1136_v8 }
 0x816   :  { %v1161_v10 = vmul.f32 0.7978846, %v1157_v9  ;;  %v1146_v11 = vmul.f32 %v1137_v55, %v1137_v55 }
 0x818   :  { %5199 = vtanh.f32 %v1161_v10  ;;  %v1150_v13 = vmul.f32 %v1146_v11, %v1137_v55 }
 0x81a   :  { %v1154_v15 = vmul.f32 0.044715, %v1150_v13 }
 0x81b   :  { %v1139_v16 = vpop.f32.mrf.mxu2 }
 0x81c   :  { %v1140_v17 = vadd.f32 %v5096_v61, %v1139_v16  ;;  %v1158_v20 = vadd.f32 %v1154_v15, %v1137_v55  ;;  %v5099_v16 = vld [vmem:[%s5479_s29 + $0x2] ss:$0 sm:$0xff] }
 0x81e   :  { %v5200_v23 = vpop.eup %5199  ;;  %v1147_v25 = vmul.f32 %v1140_v17, %v1140_v17  ;;  %v1162_v26 = vmul.f32 0.7978846, %v1158_v20 }
 0x81f   :  { %v1169_v28 = vadd.f32 1.0, %v5200_v23  ;;  %v4704_v23 = vld [vmem:[%s5494_s11 + $0x50] sm:$0xff] }
 0x820   :  { %v1151_v31 = vmul.f32 %v1147_v25, %v1140_v17  ;;  %5201 = vtanh.f32 %v1162_v26  ;;  %v4703_v26 = vld [vmem:[%s5494_s11 + $0x48] sm:$0xff] }
 0x821   :  { %v1173_v63 = vmul.f32 0.5, %v1169_v28  ;;  %v4726_v28 = vld [vmem:[%s5489_s7 + $0x70] sm:$0xff] }
 0x822   :  { %v1155_v24 = vmul.f32 0.044715, %v1151_v31  ;;  %v4725_v31 = vld [vmem:[%s5489_s7 + $0x68] sm:$0xff] }
 0x823   :  { %v1177_v33 = vmul.f32 %v1173_v63, %v1134_v2  ;;  %v1142_v34 = vpop.f32.mrf.mxu2  ;;  %v4724_v63 = vld [vmem:[%s5489_s7 + $0x60] sm:$0xff] }
 0x824   :  { %v1143_v35 = vadd.f32 %v5096_v61, %v1142_v34  ;;  %v1159_v3 = vadd.f32 %v1155_v24, %v1140_v17  ;;  %v5881_v24 = vld [vmem:[%s4591_s26] sm:$0xff] }
 0x825   :  { %4678 = vmatmul.msk.f32.vlgmr.msrb.gmra.mxu3 %vm1193_vm13, %v1177_v33 }
 0x826   :  { %v5202_v29 = vpop.eup %5201  ;;  %v1148_v38 = vmul.f32 %v1143_v35, %v1143_v35  ;;  %v1163_v39 = vmul.f32 0.7978846, %v1159_v3 }
 0x827   :  { %v1170_v41 = vadd.f32 1.0, %v5202_v29  ;;  %v5887_v29 = vld [vmem:[%s4591_s26 + $0x8] sm:$0xff] }
 0x828   :  { %v1152_v42 = vmul.f32 %v1148_v38, %v1143_v35  ;;  %5203 = vtanh.f32 %v1163_v39 }
 0x829   :  { %v1174_v43 = vmul.f32 0.5, %v1170_v41 }
 0x82a   :  { %v1156_v36 = vmul.f32 0.044715, %v1152_v42  ;;  %v4720_v42 = vld [vmem:[%s5484_s3 + $0x78] sm:$0xff] }
 0x82b   :  { %v1178_v44 = vmul.f32 %v1174_v43, %v1137_v55  ;;  %v1476_v60 = vpop.f32.mrf.mxu2  ;;  %v4719_v43 = vld [vmem:[%s5484_s3 + $0x70] sm:$0xff]  ;;  %1630 = vmatpush.msrb.mxu2 %v4720_v42 }
 0x82c   :  { %v1160_v46 = vadd.f32 %v1156_v36, %v1143_v35  ;;  %v1477_v45 = vadd.f32 %v5097_v40, %v1476_v60  ;;  %v4718_v36 = vld [vmem:[%s5484_s3 + $0x68] sm:$0xff] }
 0x82d   :  { %4679 = vmatmul.msk.f32.gmra.mxu3 %vm1193_vm13, %v1178_v44  ;;  %1631 = vmatpush.msrb.mxu2 %v4719_v43  ;;  %v4717_v44 = vld [vmem:[%s5484_s3 + $0x60] sm:$0xff] }
 0x82e   :  { %v5204_v48 = vpop.eup %5203  ;;  %v1164_v49 = vmul.f32 0.7978846, %v1160_v46 }
 0x82f   :  { %v1171_v51 = vadd.f32 1.0, %v5204_v48  ;;  %1632 = vmatpush.msrb.mxu2 %v4718_v36 }
 0x830   :  { %5205 = vtanh.f32 %v1164_v49 }
 0x831   :  { %v1175_v50 = vmul.f32 0.5, %v1171_v51  ;;  %1633 = vmatpush.msrb.mxu2 %v4717_v44 }
 0x832   :  { %4722 = vmatmul.msk.f32.vlgmr.msrb.gmra.mxu2 %vm244_vm1, %v5791_v0 }
 0x833   :  { %v1179_v47 = vmul.f32 %v1175_v50, %v1140_v17  ;;  %v1479_v62 = vpop.f32.mrf.mxu2  ;;  %v5101_v50 = vld [vmem:[%s5536_s19 + $0x2] ss:$0 sm:$0xff] }
 0x834   :  { %v1480_v61 = vadd.f32 %v5097_v40, %v1479_v62 }
 0x835   :  { %4680 = vmatmul.msk.f32.gmra.mxu3 %vm1193_vm13, %v1179_v47 }
 0x836   :  { %v5206_v52 = vpop.eup %5205  ;;  %4709 = vmatpush.xpose.msk.msra.mxu0 %vm481_vm15, %v1480_v61 }
 0x837   :  { %v1172_v53 = vadd.f32 1.0, %v5206_v52 }
 0x839   :  { %v1176_v54 = vmul.f32 0.5, %v1172_v53 }
 0x83a   :  { %4710 = vmatpush.xpose.msk.msra.mxu0 %vm481_vm15, %v1477_v45  ;;  %4723 = vmatmul.msk.f32.gmra.mxu2 %vm244_vm1, %v5796_v6  ;;  %v5102_v45 = vld [vmem:[%s5518_s15 + $0x3] ss:$0 sm:$0xff] }
 0x83b   :  { %v1180_v56 = vmul.f32 %v1176_v54, %v1143_v35 }
 0x83d   :  { %4681 = vmatmul.msk.f32.gmra.mxu3 %vm1193_vm13, %v1180_v56 }
 0x8a8   :  { %v1223_v2 = vpop.f32.mrf.mxu3 }
 0x8a9   :  { %v1224_v4 = vadd.f32 %v5098_v1, %v1223_v2 }
 0x8ab   :  { %v5836_v5 = vadd.f32 %v1224_v4, %v5697_v12 }
 0x8ad   :  { %4682 = vmatmul.msk.f32.vlgmr.msrb.gmra.mxu0 %vm244_vm1, %v5836_v5 }
 0x8b0   :  { %v1226_v7 = vpop.f32.mrf.mxu3 }
 0x8b1   :  { %v1227_v8 = vadd.f32 %v5098_v1, %v1226_v7 }
 0x8b3   :  { %v5841_v9 = vadd.f32 %v1227_v8, %v5702_v18  ;;  %v1443_v18 = vpop.f32.mrf.mxu1  ;;  %v4734_v8 = vld [vmem:[%s5494_s11 + $0x78] sm:$0xff] }
 0x8b4   :  { %v1444_v17 = vadd.f32 %v5099_v16, %v1443_v18  ;;  %1696 = vmatpush.msrb.mxu0 %v4734_v8 }
 0x8b5   :  { %4683 = vmatmul.msk.f32.gmra.mxu0 %vm244_vm1, %v5841_v9 }
 0x8b8   :  { %v1229_v55 = vpop.f32.mrf.mxu3 }
 0x8b9   :  { %v1230_v10 = vadd.f32 %v5098_v1, %v1229_v55  ;;  %v4733_v55 = vld [vmem:[%s5494_s11 + $0x70] sm:$0xff] }
 0x8ba   :  { %1697 = vmatpush.msrb.mxu0 %v4733_v55 }
 0x8bb   :  { %v5846_v11 = vadd.f32 %v1230_v10, %v5707_v14  ;;  %v1446_v14 = vpop.f32.mrf.mxu1  ;;  %v4732_v10 = vld [vmem:[%s5494_s11 + $0x68] sm:$0xff] }
 0x8bc   :  { %v1447_v20 = vadd.f32 %v5099_v16, %v1446_v14  ;;  %1698 = vmatpush.msrb.mxu0 %v4732_v10 }
 0x8bd   :  { %4684 = vmatmul.msk.f32.gmra.mxu0 %vm244_vm1, %v5846_v11 }
 0x8c0   :  { %v1232_v12 = vpop.f32.mrf.mxu3 }
 0x8c1   :  { %v1233_v13 = vadd.f32 %v5098_v1, %v1232_v12  ;;  %v4731_v12 = vld [vmem:[%s5494_s11 + $0x60] sm:$0xff] }
 0x8c2   :  { %1699 = vmatpush.msrb.mxu0 %v4731_v12 }
 0x8c3   :  { %v5851_v15 = vadd.f32 %v1233_v13, %v5712_v30  ;;  %v4705_v30 = vld [vmem:[%s5494_s11 + $0x58] sm:$0xff] }
 0x8c4   :  { %1504 = vmatpush.msra.mxu3 %v4705_v30  ;;  %v1635_v30 = vpop.f32.mrf.mxu2 }
 0x8c5   :  { %4685 = vmatmul.msk.f32.gmra.mxu0 %vm244_vm1, %v5851_v15 }
 0x8c6   :  { %1505 = vmatpush.msra.mxu3 %v4704_v23  ;;  %v5103_v23 = vld [vmem:[%s5479_s29 + $0x3] ss:$0 sm:$0xff] }
 0x8c8   :  { %1506 = vmatpush.msra.mxu3 %v4703_v26  ;;  %v1636_v26 = vadd.f32 %v5103_v23, %v1635_v30  ;;  %v4761_v30 = vld [vmem:[%s5489_s7 + $0x88] sm:$0xff] }
 0x8ca   :  { %1507 = vmatpush.msra.mxu3 %v4702_v27 }
 0x8cb   :  { %4707 = vmatmul.msk.f32.vlgmr.msra.gmra.mxu3 %vm244_vm1, %v5791_v0 }
 0x8cc   :  { %1663 = vmatpush.msrb.mxu3 %v4727_v59  ;;  %v1638_v27 = vpop.f32.mrf.mxu2 }
 0x8cd   :  { %4711 = vmatmul.msk.f32.vlgmr.msra.gmra.mxu0 %vm481_vm15, %v1444_v17  ;;  %v4716_v17 = vld [vmem:[%s5654_s30 + $0x28] sm:$0xff]  ;;  %v1639_v59 = vadd.f32 %v5103_v23, %v1638_v27  ;;  %v4760_v23 = vld [vmem:[%s5489_s7 + $0x80] sm:$0xff] }
 0x8ce   :  { %1664 = vmatpush.msrb.mxu3 %v4726_v28  ;;  %1849 = vmatpush.msra.mxu0 %v4716_v17  ;;  %v4715_v28 = vld [vmem:[%s5654_s30 + $0x20] sm:$0xff] }
 0x8d0   :  { %1665 = vmatpush.msrb.mxu3 %v4725_v31  ;;  %1850 = vmatpush.msra.mxu0 %v4715_v28 }
 0x8d2   :  { %1666 = vmatpush.msrb.mxu3 %v4724_v63 }
 0x8d3   :  { %4708 = vmatmul.msk.f32.gmra.mxu3 %vm244_vm1, %v5796_v6 }
 0x8d5   :  { %4712 = vmatmul.msk.f32.gmra.mxu0 %vm481_vm15, %v1447_v20 }
 0x8db   :  { %4729 = vmatmul.msk.f32.vlgmr.msrb.gmra.mxu3 %vm244_vm1, %v5791_v0 }
 0x8dd   :  { %4736 = vmatmul.msk.f32.vlgmr.msrb.gmra.mxu0 %vm244_vm1, %v5791_v0 }
 0x8e3   :  { %4730 = vmatmul.msk.f32.gmra.mxu3 %vm244_vm1, %v5796_v6 }
 0x8e5   :  { %4737 = vmatmul.msk.f32.gmra.mxu0 %vm244_vm1, %v5796_v6 }
 0x92a   :  { %v5858_v21 = vpop.f32.mrf.mxu0 }
 0x932   :  { %v5860_v22 = vpop.f32.mrf.mxu0 }
 0x93a   :  { %v5864_v25 = vpop.f32.mrf.mxu0 }
 0x942   :  { %v5872_v19 = vpop.f32.mrf.mxu0 }
 0x94a   :  { %v1544_v32 = vpop.f32.mrf.mxu0 }
 0x94b   :  { %v1550_v33 = vmul.f32 0.25, %v1544_v32 }
 0x94d   :  { %v1552_v34 = vadd.f32 %v1550_v33, %v5881_v24 }
 0x94e   :  { %v1509_v48 = vpop.f32.mrf.mxu3 }
 0x94f   :  { %v1554_v35 = vsel %vm481_vm15, %v1552_v34, -inf  ;;  %v1510_v54 = vadd.f32 %v5101_v50, %v1509_v48 }
 0x950   :  { %1555 = vmax.xlane.f32.xlu2 %v1554_v35 }
 0x952   :  { %v1547_v3 = vpop.f32.mrf.mxu0 }
 0x953   :  { %v1551_v38 = vmul.f32 0.25, %v1547_v3  ;;  %v5104_v3 = vld [vmem:[%s5536_s19 + $0x3] ss:$0 sm:$0xff] }
 0x955   :  { %v1553_v39 = vadd.f32 %v1551_v38, %v5887_v29 }
 0x956   :  { %v1512_v52 = vpop.f32.mrf.mxu3 }
 0x957   :  { %v1557_v41 = vsel %vm481_vm15, %v1553_v39, -inf  ;;  %v1513_v56 = vadd.f32 %v5101_v50, %v1512_v52 }
 0x958   :  { %1558 = vmax.xlane.f32.xlu0 %v1557_v41 }
 0x959   :  { %1596 = vmatpush.msrb.mxu1 %v1513_v56 }
 0x95a   :  { %v1701_v32 = vpop.f32.mrf.mxu0 }
 0x95b   :  { %1597 = vmatpush.msrb.mxu1 %v1510_v54  ;;  %v1702_v41 = vadd.f32 %v5104_v3, %v1701_v32 }
 0x95e   :  { %v1668_v61 = vpop.f32.mrf.mxu3 }
 0x95f   :  { %v1669_v4 = vadd.f32 %v5102_v45, %v1668_v61 }
 0x966   :  { %v1671_v1 = vpop.f32.mrf.mxu3 }
 0x967   :  { %v1672_v2 = vadd.f32 %v5102_v45, %v1671_v1 }
 0x969   :  { %4738 = vmatpush.xpose.msk.msra.mxu1 %vm481_vm15, %v1672_v2 }
 0x96d   :  { %4739 = vmatpush.xpose.msk.msra.mxu1 %vm481_vm15, %v1669_v4 }
 0x9c3   :  { %v1556_v46 = vpop.xlane.xlu2 %1555 }
 0x9c4   :  { %v1560_v49 = vsub.f32 %v1552_v34, %v1556_v46  ;;  %v5100_v46 = vld [vmem:[%s5827_s18] ss:$0 sm:$0xff]  ;;  %s5392_s18 = smov 35  }
 0x9c5   :  { %v5945_v1 = vadd.f32 %v5100_v46, %v5864_v25 }
 0x9c6   :  { %v1562_v51 = vmul.f32 1.442695, %v1560_v49  ;;  %v1277_v49 = vadd.f32 %v5100_v46, %v5858_v21  ;;  %v1280_v21 = vadd.f32 %v5100_v46, %v5860_v22 }
 0x9c7   :  { %v1298_v2 = vsel %vm244_vm1, %v5945_v1, 0.0 }
 0x9c8   :  { %5207 = vpow2.f32 %v1562_v51  ;;  %v1286_v51 = vadd.f32 %v5100_v46, %v5872_v19  ;;  %v1295_v61 = vsel %vm244_vm1, %v1280_v21, 0.0 }
 0x9ca   :  { %v1301_v50 = vsel %vm244_vm1, %v1286_v51, 0.0 }
 0x9cb   :  { %v1559_v47 = vpop.xlane.xlu0 %1558 }
 0x9cc   :  { %v1561_v53 = vsub.f32 %v1553_v39, %v1559_v47  ;;  %v1704_v39 = vpop.f32.mrf.mxu0 }
 0x9cd   :  { %v1705_v42 = vadd.f32 %v5104_v3, %v1704_v39 }
 0x9ce   :  { %v5208_v57 = vpop.eup %5207  ;;  %v1564_v58 = vmul.f32 1.442695, %v1561_v53 }
 0x9cf   :  { %v1566_v60 = vsel %vm481_vm15, %v5208_v57, 0.0  ;;  %1788 = vmatpush.msra.mxu2 %v1705_v42 }
 0x9d0   :  { %5209 = vpow2.f32 %v1564_v58  ;;  %1567 = vadd.xlane.f32.xlu1 %v1566_v60 }
 0x9d1   :  { %1789 = vmatpush.msra.mxu2 %v1702_v41 }
 0x9d6   :  { %v5210_v40 = vpop.eup %5209 }
 0x9d7   :  { %v1569_v62 = vsel %vm481_vm15, %v5210_v40, 0.0 }
 0x9d8   :  { %1570 = vadd.xlane.f32.xlu2 %v1569_v62 }
 0xa43   :  { %v1568_v7 = vpop.xlane.xlu1 %1567 }
 0xa44   :  { %5211 = vrcp.f32 %v1568_v7 }
 0xa4a   :  { %v5212_v13 = vpop.eup %5211 }
 0xa4b   :  { %v1574_v18 = vmul.f32 %v5212_v13, %v5208_v57  ;;  %v1571_v16 = vpop.xlane.xlu2 %1570 }
 0xa4c   :  { %5213 = vrcp.f32 %v1571_v16 }
 0xa4d   :  { %4713 = vmatmul.msk.f32.vlgmr.msrb.gmra.mxu1 %vm481_vm15, %v1574_v18  ;;  %v4763_v18 = vld [vmem:[%s5489_s7 + $0x98] sm:$0xff] }
 0xa4e   :  { %2004 = vmatpush.msrb.mxu2 %v4763_v18 }
 0xa52   :  { %v5214_v14 = vpop.eup %5213 }
 0xa53   :  { %v1575_v20 = vmul.f32 %v5214_v14, %v5210_v40  ;;  %v4762_v14 = vld [vmem:[%s5489_s7 + $0x90] sm:$0xff] }
 0xa54   :  { %2005 = vmatpush.msrb.mxu2 %v4762_v14 }
 0xa55   :  { %4714 = vmatmul.msk.f32.gmra.mxu1 %vm481_vm15, %v1575_v20 }
 0xa56   :  { %2006 = vmatpush.msrb.mxu2 %v4761_v30 }
 0xa58   :  { %2007 = vmatpush.msrb.mxu2 %v4760_v23 }
 0xa5d   :  { %4740 = vmatmul.msk.f32.vlgmr.msra.gmra.mxu1 %vm481_vm15, %v1636_v26 }
 0xa65   :  { %4741 = vmatmul.msk.f32.gmra.mxu1 %vm481_vm15, %v1639_v59 }
 0xaca   :  { %v1599_v31 = vpop.f32.mrf.mxu1 }
 0xacb   :  { %4748 = vmatmul.msk.f32.vlgmr.msra.gmra.mxu0 %vm481_vm15, %v1599_v31 }
 0xad2   :  { %v1602_v63 = vpop.f32.mrf.mxu1 }
 0xad3   :  { %4749 = vmatmul.msk.f32.gmra.mxu0 %vm481_vm15, %v1602_v63 }
 0xada   :  { %v1736_v33 = vpop.f32.mrf.mxu1 }
 0xadb   :  { %v1742_v34 = vmul.f32 0.25, %v1736_v33 }
 0xadd   :  { %v1744_v35 = vadd.f32 %v1742_v34, %v5881_v24  ;;  %v1292_v24 = vsel %vm244_vm1, %v1277_v49, 0.0 }
 0xadf   :  { %v1746_v38 = vsel %vm481_vm15, %v1744_v35, -inf }
 0xae0   :  { %1747 = vmax.xlane.f32.xlu0 %v1746_v38 }
 0xae2   :  { %v1739_v43 = vpop.f32.mrf.mxu1 }
 0xae3   :  { %v1743_v36 = vmul.f32 0.25, %v1739_v43  ;;  %v5975_v43 = vld [vmem:[%s5435_s21 + $0x2] ss:$0 sm:$0xff] }
 0xae5   :  { %v1745_v44 = vadd.f32 %v1743_v36, %v5887_v29 }
 0xae7   :  { %v1749_v48 = vsel %vm481_vm15, %v1745_v44, -inf }
 0xae8   :  { %1750 = vmax.xlane.f32.xlu1 %v1749_v48  ;;  %v5981_v48 = vld [vmem:[%s5942_s6] ss:$0 sm:$0xff]  ;;  %s6642_s6 = sld [smem:[%s6728_s0 + %s5397_s2]]  }
 0xaf0   :  { %1293 = vadd.xlane.f32.xlu1 %v1292_v24 }
 0xaf8   :  { %1302 = vadd.xlane.f32.xlu1 %v1301_v50 }
 0xb48   :  { %v1852_v18 = vpop.f32.mrf.mxu0 }
 0xb53   :  { %v1748_v47 = vpop.xlane.xlu0 %1747 }
 0xb54   :  { %v1752_v52 = vsub.f32 %v1744_v35, %v1748_v47 }
 0xb56   :  { %v1754_v53 = vmul.f32 1.442695, %v1752_v52  ;;  %v4745_v52 = vld [vmem:[%s5654_s30 + $0x38] sm:$0xff] }
 0xb57   :  { %1820 = vmatpush.msra.mxu3 %v4745_v52 }
 0xb58   :  { %5215 = vpow2.f32 %v1754_v53  ;;  %v4744_v53 = vld [vmem:[%s5654_s30 + $0x30] sm:$0xff] }
 0xb59   :  { %1821 = vmatpush.msra.mxu3 %v4744_v53 }
 0xb5b   :  { %v1751_v29 = vpop.xlane.xlu1 %1750 }
 0xb5c   :  { %v1753_v54 = vsub.f32 %v1745_v44, %v1751_v29  ;;  %v5978_v44 = vld [vmem:[%s5442_s25 + $0x2] ss:$0 sm:$0xff]  ;;  %v4772_v29 = vld [vmem:[%s5494_s11 + $0x98] sm:$0xff] }
 0xb5d   :  { %2055 = vmatpush.msrb.mxu3 %v4772_v29 }
 0xb5e   :  { %v5216_v56 = vpop.eup %5215  ;;  %v1756_v57 = vmul.f32 1.442695, %v1753_v54  ;;  %v4771_v54 = vld [vmem:[%s5494_s11 + $0x90] sm:$0xff] }
 0xb5f   :  { %v1758_v58 = vsel %vm481_vm15, %v5216_v56, 0.0  ;;  %2056 = vmatpush.msrb.mxu3 %v4771_v54 }
 0xb60   :  { %5217 = vpow2.f32 %v1756_v57  ;;  %1759 = vadd.xlane.f32.xlu2 %v1758_v58  ;;  %v4769_v57 = vld [vmem:[%s5494_s11 + $0x80] sm:$0xff] }
 0xb63   :  { %v1294_v60 = vpop.xlane.xlu1 %1293 }
 0xb64   :  { %v1304_v19 = vmul.f32 %v1294_v60, %v5446_v37 }
 0xb66   :  { %v5218_v40 = vpop.eup %5217  ;;  %v1308_v62 = vsub.f32 %v1277_v49, %v1304_v19 }
 0xb67   :  { %v1761_v45 = vsel %vm481_vm15, %v5218_v40, 0.0 }
 0xb68   :  { %1296 = vadd.xlane.f32.xlu2 %v1295_v61  ;;  %1762 = vadd.xlane.f32.xlu0 %v1761_v45  ;;  %v1312_v22 = vmul.f32 %v1308_v62, %v1308_v62 }
 0xb6a   :  { %v1316_v4 = vsel %vm244_vm1, %v1312_v22, 0.0 }
 0xb6b   :  { %v1303_v55 = vpop.xlane.xlu1 %1302 }
 0xb6c   :  { %v1307_v16 = vmul.f32 %v1303_v55, %v5446_v37 }
 0xb6e   :  { %v5961_v27 = vsub.f32 %v1286_v51, %v1307_v16  ;;  %v1402_v51 = vld [vmem:[%s5972_s13] sm:$0xff] }
 0xb70   :  { %1299 = vadd.xlane.f32.xlu0 %v1298_v2  ;;  %1317 = vadd.xlane.f32.xlu2 %v1316_v4  ;;  %v1315_v33 = vmul.f32 %v5961_v27, %v5961_v27 }
 0xb72   :  { %v1325_v34 = vsel %vm244_vm1, %v1315_v33, 0.0 }
 0xbd3   :  { %v1760_v7 = vpop.xlane.xlu2 %1759 }
 0xbd4   :  { %5219 = vrcp.f32 %v1760_v7 }
 0xbda   :  { %v5220_v8 = vpop.eup %5219 }
 0xbdb   :  { %v1766_v10 = vmul.f32 %v5220_v8, %v5216_v56  ;;  %v1297_v12 = vpop.xlane.xlu2 %1296  ;;  %v1763_v25 = vpop.xlane.xlu0 %1762  ;;  %v4770_v56 = vld [vmem:[%s5494_s11 + $0x88] sm:$0xff] }
 0xbdc   :  { %v1305_v13 = vmul.f32 %v1297_v12, %v5446_v37  ;;  %5221 = vrcp.f32 %v1763_v25  ;;  %2057 = vmatpush.msrb.mxu3 %v4770_v56  ;;  %v1403_v12 = vld [vmem:[%s5972_s13 + $0x8] sm:$0xff] }
 0xbdd   :  { %4742 = vmatmul.msk.f32.vlgmr.msra.gmra.mxu2 %vm481_vm15, %v1766_v10 }
 0xbde   :  { %v5954_v17 = vsub.f32 %v1280_v21, %v1305_v13  ;;  %2058 = vmatpush.msrb.mxu3 %v4769_v57 }
 0xbe0   :  { %v1313_v20 = vmul.f32 %v5954_v17, %v5954_v17 }
 0xbe2   :  { %v5222_v26 = vpop.eup %5221  ;;  %v1319_v59 = vsel %vm244_vm1, %v1313_v20, 0.0 }
 0xbe3   :  { %v1318_v28 = vpop.xlane.xlu2 %1317  ;;  %1320 = vadd.xlane.f32.xlu1 %v1319_v59  ;;  %v1767_v31 = vmul.f32 %v5222_v26, %v5218_v40  ;;  %v1300_v16 = vpop.xlane.xlu0 %1299 }
 0xbe4   :  { %v1328_v63 = vmul.f32 %v1318_v28, %v5446_v37  ;;  %v1306_v20 = vmul.f32 %v1300_v16, %v5446_v37  ;;  %v1855_v28 = vpop.f32.mrf.mxu0 }
 0xbe5   :  { %4743 = vmatmul.msk.f32.gmra.mxu2 %vm481_vm15, %v1767_v31 }
 0xbe6   :  { %v1332_v32 = vadd.f32 1e-06, %v1328_v63  ;;  %v1310_v26 = vsub.f32 %v5945_v1, %v1306_v20 }
 0xbe8   :  { %5223 = vrsqrt.f32 %v1332_v32  ;;  %vm1342_vm0 = vweird.f32 %v1332_v32 }
 0xbeb   :  { %1326 = vadd.xlane.f32.xlu1 %v1325_v34 }
 0xbee   :  { %v5224_v35 = vpop.eup %5223 }
 0xbef   :  { %v1337_v3 = vmul.f32 %v5224_v35, %v1332_v32  ;;  %vm1343_vm14 = vweird.f32 %v5224_v35  ;;  %v1314_v32 = vmul.f32 %v1310_v26, %v1310_v26 }
 0xbf0   :  { %vm1344_vm2 = vmor %vm1342_vm0, %vm1343_vm14 }
 0xbf1   :  { %v1338_v38 = vmul.f32 %v5224_v35, %v1337_v3  ;;  %v1322_v34 = vsel %vm244_vm1, %v1314_v32, 0.0  ;;  %v4753_v32 = vld [vmem:[%s5484_s3 + $0x80] sm:$0xff] }
 0xbf3   :  { %v1339_v39 = vmul.f32 0.5, %v1338_v38 }
 0xbf5   :  { %v1340_v41 = vsub.f32 1.5, %v1339_v39 }
 0xbf7   :  { %v1341_v42 = vmul.f32 %v5224_v35, %v1340_v41 }
 0xbf9   :  { %v1345_v36 = vsel %vm1344_vm2, %v5224_v35, %v1341_v42 }
 0xbfa   :  { %v1376_v46 = vmul.f32 %v1345_v36, %v1308_v62 }
 0xbfc   :  { %v1383_v49 = vmul.f32 %v5975_v43, %v1376_v46 }
 0xbfe   :  { %v1390_v24 = vadd.f32 %v5978_v44, %v1383_v49 }
 0xc00   :  { %v5987_v50 = vadd.f32 %v5981_v48, %v1390_v24 }
 0xc02   :  { %v5990_v47 = vadd.f32 %v1402_v51, %v5987_v50 }
 0xc04   :  { %4765 = vmatmul.msk.f32.vlgmr.msrb.gmra.mxu2 %vm244_vm1, %v5990_v47 }
 0xc56   :  { %v1321_v58 = vpop.xlane.xlu1 %1320 }
 0xc57   :  { %v1329_v21 = vmul.f32 %v1321_v58, %v5446_v37 }
 0xc59   :  { %v1333_v60 = vadd.f32 1e-06, %v1329_v21 }
 0xc5b   :  { %5225 = vrsqrt.f32 %v1333_v60  ;;  %vm1352_vm4 = vweird.f32 %v1333_v60 }
 0xc5e   :  { %v1327_v3 = vpop.xlane.xlu1 %1326 }
 0xc5f   :  { %v1331_v38 = vmul.f32 %v1327_v3, %v5446_v37 }
 0xc60   :  { %v1791_v19 = vpop.f32.mrf.mxu2 }
 0xc61   :  { %v5226_v40 = vpop.eup %5225  ;;  %4746 = vmatmul.msk.f32.vlgmr.msra.gmra.mxu3 %vm481_vm15, %v1791_v19  ;;  %v1335_v39 = vadd.f32 1e-06, %v1331_v38  ;;  %v4807_v19 = vld [vmem:[%s5494_s11 + $0xb8] sm:$0xff] }
 0xc62   :  { %v1347_v62 = vmul.f32 %v5226_v40, %v1333_v60  ;;  %vm1353_vm3 = vweird.f32 %v5226_v40  ;;  %2265 = vmatpush.msra.mxu2 %v4807_v19 }
 0xc63   :  { %vm1354_vm5 = vmor %vm1352_vm4, %vm1353_vm3  ;;  %5227 = vrsqrt.f32 %v1335_v39  ;;  %vm1372_vm7 = vweird.f32 %v1335_v39 }
 0xc64   :  { %v1348_v61 = vmul.f32 %v5226_v40, %v1347_v62 }
 0xc66   :  { %v1349_v45 = vmul.f32 0.5, %v1348_v61  ;;  %v4805_v61 = vld [vmem:[%s5494_s11 + $0xa8] sm:$0xff] }
 0xc68   :  { %v1350_v22 = vsub.f32 1.5, %v1349_v45  ;;  %v1794_v2 = vpop.f32.mrf.mxu2 }
 0xc69   :  { %4747 = vmatmul.msk.f32.gmra.mxu3 %vm481_vm15, %v1794_v2  ;;  %v5228_v36 = vpop.eup %5227  ;;  %v4804_v2 = vld [vmem:[%s5494_s11 + $0xa0] sm:$0xff] }
 0xc6a   :  { %v1351_v4 = vmul.f32 %v5226_v40, %v1350_v22  ;;  %v1367_v24 = vmul.f32 %v5228_v36, %v1335_v39  ;;  %vm1373_vm6 = vweird.f32 %v5228_v36 }
 0xc6b   :  { %vm1374_vm9 = vmor %vm1372_vm7, %vm1373_vm6 }
 0xc6c   :  { %v1355_v7 = vsel %vm1354_vm5, %v5226_v40, %v1351_v4  ;;  %v1368_v57 = vmul.f32 %v5228_v36, %v1367_v24  ;;  %v4806_v40 = vld [vmem:[%s5494_s11 + $0xb0] sm:$0xff] }
 0xc6d   :  { %v1377_v8 = vmul.f32 %v1355_v7, %v5954_v17  ;;  %v5109_v17 = vld [vmem:[%s5688_s5 + $0x1] ss:$0 sm:$0xff]  ;;  %2266 = vmatpush.msra.mxu2 %v4806_v40 }
 0xc6e   :  { %v1369_v60 = vmul.f32 0.5, %v1368_v57  ;;  %v5112_v57 = vld [vmem:[%s5442_s25 + $0x3] ss:$0 sm:$0xff] }
 0xc6f   :  { %v1384_v55 = vmul.f32 %v5975_v43, %v1377_v8  ;;  %2267 = vmatpush.msra.mxu2 %v4805_v61 }
 0xc70   :  { %v1370_v45 = vsub.f32 1.5, %v1369_v60 }
 0xc71   :  { %v1391_v10 = vadd.f32 %v5978_v44, %v1384_v55  ;;  %4774 = vmatmul.msk.f32.vlgmr.msrb.gmra.mxu3 %vm244_vm1, %v5987_v50  ;;  %2268 = vmatpush.msra.mxu2 %v4804_v2 }
 0xc72   :  { %v1371_v7 = vmul.f32 %v5228_v36, %v1370_v45 }
 0xc73   :  { %v6010_v25 = vadd.f32 %v5981_v48, %v1391_v10 }
 0xc74   :  { %v1375_v10 = vsel %vm1374_vm9, %v5228_v36, %v1371_v7 }
 0xc75   :  { %v6013_v13 = vadd.f32 %v1403_v12, %v6010_v25  ;;  %v1379_v16 = vmul.f32 %v1375_v10, %v5961_v27 }
 0xc77   :  { %4766 = vmatmul.msk.f32.gmra.mxu2 %vm244_vm1, %v6013_v13 }
 0xc79   :  { %4775 = vmatmul.msk.f32.gmra.mxu3 %vm244_vm1, %v6010_v25 }
 0xce4   :  { %v1823_v14 = vpop.f32.mrf.mxu3 }
 0xce5   :  { %v1853_v30 = vadd.f32 %v1852_v18, %v1823_v14 }
 0xce7   :  { %v1863_v23 = vadd.f32 %v5109_v17, %v1853_v30  ;;  %v1386_v30 = vmul.f32 %v5975_v43, %v1379_v16  ;;  %v5110_v16 = vld [vmem:[%s5536_s19 + $0x4] ss:$0 sm:$0xff] }
 0xce9   :  { %v1869_v59 = vsel %vm244_vm1, %v1863_v23, 0.0  ;;  %v1393_v27 = vadd.f32 %v5978_v44, %v1386_v30 }
 0xcea   :  { %1870 = vadd.xlane.f32.xlu0 %v1869_v59 }
 0xcec   :  { %v1826_v31 = vpop.f32.mrf.mxu3 }
 0xced   :  { %v1856_v63 = vadd.f32 %v1855_v28, %v1826_v31 }
 0xcef   :  { %v1864_v33 = vadd.f32 %v5109_v17, %v1856_v63  ;;  %v4754_v63 = vld [vmem:[%s5484_s3 + $0x88] sm:$0xff] }
 0xcf1   :  { %v1872_v35 = vsel %vm244_vm1, %v1864_v33, 0.0 }
 0xcf2   :  { %1323 = vadd.xlane.f32.xlu0 %v1322_v34  ;;  %1873 = vadd.xlane.f32.xlu2 %v1872_v35 }
 0xcf4   :  { %v2060_v61 = vpop.f32.mrf.mxu3 }
 0xd5d   :  { %v1871_v1 = vpop.xlane.xlu0 %1870 }
 0xd5e   :  { %v1875_v41 = vmul.f32 %v1871_v1, %v5446_v37 }
 0xd60   :  { %v6027_v42 = vsub.f32 %v1863_v23, %v1875_v41  ;;  %v1404_v23 = vld [vmem:[%s5972_s13 + $0x10] sm:$0xff] }
 0xd62   :  { %v1879_v46 = vmul.f32 %v6027_v42, %v6027_v42 }
 0xd64   :  { %v1881_v49 = vsel %vm244_vm1, %v1879_v46, 0.0 }
 0xd65   :  { %v1324_v51 = vpop.xlane.xlu0 %1323  ;;  %1882 = vadd.xlane.f32.xlu2 %v1881_v49  ;;  %v1874_v52 = vpop.xlane.xlu2 %1873 }
 0xd66   :  { %v1330_v53 = vmul.f32 %v1324_v51, %v5446_v37  ;;  %v1876_v29 = vmul.f32 %v1874_v52, %v5446_v37 }
 0xd68   :  { %v1334_v54 = vadd.f32 1e-06, %v1330_v53  ;;  %v6034_v56 = vsub.f32 %v1864_v33, %v1876_v29  ;;  %v5111_v53 = vld [vmem:[%s5435_s21 + $0x3] ss:$0 sm:$0xff] }
 0xd6a   :  { %5229 = vrsqrt.f32 %v1334_v54  ;;  %v1880_v58 = vmul.f32 %v6034_v56, %v6034_v56  ;;  %vm1362_vm10 = vweird.f32 %v1334_v54 }
 0xd6c   :  { %v1884_v21 = vsel %vm244_vm1, %v1880_v58, 0.0 }
 0xd6d   :  { %1885 = vadd.xlane.f32.xlu0 %v1884_v21 }
 0xd70   :  { %v5230_v62 = vpop.eup %5229 }
 0xd71   :  { %v1357_v22 = vmul.f32 %v5230_v62, %v1334_v54  ;;  %vm1363_vm8 = vweird.f32 %v5230_v62 }
 0xd72   :  { %vm1364_vm11 = vmor %vm1362_vm10, %vm1363_vm8 }
 0xd73   :  { %v1358_v4 = vmul.f32 %v5230_v62, %v1357_v22 }
 0xd75   :  { %v1359_v8 = vmul.f32 0.5, %v1358_v4 }
 0xd77   :  { %v1360_v55 = vsub.f32 1.5, %v1359_v8 }
 0xd79   :  { %v1361_v12 = vmul.f32 %v5230_v62, %v1360_v55  ;;  %v2063_v55 = vpop.f32.mrf.mxu3 }
 0xd7b   :  { %v1365_v18 = vsel %vm1364_vm11, %v5230_v62, %v1361_v12 }
 0xd7c   :  { %v1378_v17 = vmul.f32 %v1365_v18, %v1310_v26  ;;  %v1405_v26 = vld [vmem:[%s5972_s13 + $0x18] sm:$0xff] }
 0xd7e   :  { %v1385_v14 = vmul.f32 %v5975_v43, %v1378_v17  ;;  %v6060_v43 = vadd.f32 %v5981_v48, %v1393_v27  ;;  %v5108_v17 = vld [vmem:[%s5518_s15 + $0x4] ss:$0 sm:$0xff] }
 0xd80   :  { %v1392_v20 = vadd.f32 %v5978_v44, %v1385_v14  ;;  %v6066_v31 = vadd.f32 %v1405_v26, %v6060_v43  ;;  %v4756_v44 = vld [vmem:[%s5484_s3 + $0x98] sm:$0xff] }
 0xd81   :  { %1959 = vmatpush.msrb.mxu1 %v4756_v44 }
 0xd82   :  { %v6049_v59 = vadd.f32 %v5981_v48, %v1392_v20  ;;  %v4755_v48 = vld [vmem:[%s5484_s3 + $0x90] sm:$0xff] }
 0xd83   :  { %1960 = vmatpush.msrb.mxu1 %v4755_v48  ;;  %v4791_v48 = vld [vmem:[%s5484_s3 + $0xb8] sm:$0xff] }
 0xd84   :  { %4776 = vmatmul.msk.f32.gmra.mxu3 %vm244_vm1, %v6049_v59  ;;  %v6054_v28 = vadd.f32 %v1404_v23, %v6049_v59  ;;  %v2064_v23 = vadd.f32 %v5110_v16, %v2063_v55 }
 0xd85   :  { %1961 = vmatpush.msrb.mxu1 %v4754_v63  ;;  %v4790_v63 = vld [vmem:[%s5484_s3 + $0xb0] sm:$0xff] }
 0xd86   :  { %4767 = vmatmul.msk.f32.gmra.mxu2 %vm244_vm1, %v6054_v28 }
 0xd87   :  { %1962 = vmatpush.msrb.mxu1 %v4753_v32  ;;  %v4789_v32 = vld [vmem:[%s5484_s3 + $0xa8] sm:$0xff] }
 0xd8c   :  { %4777 = vmatmul.msk.f32.gmra.mxu3 %vm244_vm1, %v6060_v43 }
 0xd8e   :  { %4768 = vmatmul.msk.f32.gmra.mxu2 %vm244_vm1, %v6066_v31 }
 0xd96   :  { %4809 = vmatmul.msk.f32.vlgmr.msra.gmra.mxu2 %vm244_vm1, %v5987_v50 }
 0xd9e   :  { %4810 = vmatmul.msk.f32.gmra.mxu2 %vm244_vm1, %v6010_v25 }
 0xda6   :  { %4811 = vmatmul.msk.f32.gmra.mxu2 %vm244_vm1, %v6049_v59 }
 0xdae   :  { %4812 = vmatmul.msk.f32.gmra.mxu2 %vm244_vm1, %v6060_v43 }
 0xdd8   :  { %v1883_v33 = vpop.xlane.xlu2 %1882 }
 0xdd9   :  { %v1887_v34 = vmul.f32 %v1883_v33, %v5446_v37 }
 0xddb   :  { %v1889_v35 = vadd.f32 1e-06, %v1887_v34  ;;  %v4788_v34 = vld [vmem:[%s5484_s3 + $0xa0] sm:$0xff] }
 0xddd   :  { %5231 = vrsqrt.f32 %v1889_v35  ;;  %vm1897_vm14 = vweird.f32 %v1889_v35 }
 0xde0   :  { %v1886_v3 = vpop.xlane.xlu0 %1885 }
 0xde1   :  { %v1888_v38 = vmul.f32 %v1886_v3, %v5446_v37 }
 0xde3   :  { %v5232_v39 = vpop.eup %5231  ;;  %v1890_v1 = vadd.f32 1e-06, %v1888_v38  ;;  %v5114_v38 = vld [vmem:[%s5479_s29 + $0x4] ss:$0 sm:$0xff] }
 0xde4   :  { %v1892_v41 = vmul.f32 %v5232_v39, %v1889_v35  ;;  %vm1898_vm12 = vweird.f32 %v5232_v39 }
 0xde5   :  { %5233 = vrsqrt.f32 %v1890_v1  ;;  %vm1899_vm0 = vmor %vm1897_vm14, %vm1898_vm12  ;;  %vm1907_vm3 = vweird.f32 %v1890_v1 }
 0xde6   :  { %v1893_v36 = vmul.f32 %v5232_v39, %v1892_v41 }
 0xde8   :  { %v1894_v46 = vmul.f32 0.5, %v1893_v36 }
 0xdea   :  { %v1895_v49 = vsub.f32 1.5, %v1894_v46 }
 0xdeb   :  { %v5234_v24 = vpop.eup %5233 }
 0xdec   :  { %v1896_v51 = vmul.f32 %v5232_v39, %v1895_v49  ;;  %v1902_v52 = vmul.f32 %v5234_v24, %v1890_v1  ;;  %vm1908_vm2 = vweird.f32 %v5234_v24  ;;  %v5113_v1 = vld [vmem:[%s5536_s19 + $0x5] ss:$0 sm:$0xff] }
 0xded   :  { %vm1909_vm4 = vmor %vm1907_vm3, %vm1908_vm2 }
 0xdee   :  { %v1900_v29 = vsel %vm1899_vm0, %v5232_v39, %v1896_v51  ;;  %v1903_v54 = vmul.f32 %v5234_v24, %v1902_v52 }
 0xdef   :  { %v1911_v58 = vmul.f32 %v1900_v29, %v6027_v42  ;;  %v2009_v42 = vpop.f32.mrf.mxu2 }
 0xdf0   :  { %v1904_v21 = vmul.f32 0.5, %v1903_v54  ;;  %v2010_v44 = vadd.f32 %v5108_v17, %v2009_v42  ;;  %v6120_v54 = vld [vmem:[%s6117_s20] sm:$0xff] }
 0xdf1   :  { %v1916_v60 = vmul.f32 %v5111_v53, %v1911_v58 }
 0xdf2   :  { %v1905_v19 = vsub.f32 1.5, %v1904_v21 }
 0xdf3   :  { %v6087_v40 = vadd.f32 %v5112_v57, %v1916_v60 }
 0xdf4   :  { %v1906_v62 = vmul.f32 %v5234_v24, %v1905_v19  ;;  %v6125_v19 = vld [vmem:[%s6117_s20 + $0x8] sm:$0xff] }
 0xdf5   :  { %v1923_v45 = vadd.f32 %v6087_v40, %v5791_v0 }
 0xdf6   :  { %v1910_v22 = vsel %vm1909_vm4, %v5234_v24, %v1906_v62 }
 0xdf7   :  { %v1912_v2 = vmul.f32 %v1910_v22, %v6034_v56  ;;  %4758 = vmatmul.msk.f32.vlgmr.msrb.gmra.mxu1 %vm244_vm1, %v1923_v45  ;;  %v2012_v10 = vpop.f32.mrf.mxu2 }
 0xdf8   :  { %v2013_v26 = vadd.f32 %v5108_v17, %v2012_v10 }
 0xdf9   :  { %v1917_v4 = vmul.f32 %v5111_v53, %v1912_v2 }
 0xdfb   :  { %v6093_v7 = vadd.f32 %v5112_v57, %v1917_v4 }
 0xdfd   :  { %v1924_v8 = vadd.f32 %v6093_v7, %v5796_v6  ;;  %v2061_v6 = vadd.f32 %v5110_v16, %v2060_v61 }
 0xdff   :  { %4759 = vmatmul.msk.f32.gmra.mxu1 %vm244_vm1, %v1924_v8 }
 0xe07   :  { %v2066_v12 = vpop.f32.mrf.mxu3 }
 0xe08   :  { %v2067_v20 = vadd.f32 %v5110_v16, %v2066_v12 }
 0xe09   :  { %v2015_v18 = vpop.f32.mrf.mxu2 }
 0xe0a   :  { %v2016_v27 = vadd.f32 %v5108_v17, %v2015_v18 }
 0xe0f   :  { %v2069_v0 = vpop.f32.mrf.mxu3 }
 0xe10   :  { %v2070_v14 = vadd.f32 %v5110_v16, %v2069_v0  ;;  %v4798_v0 = vld [vmem:[%s5489_s7 + $0xb8] sm:$0xff] }
 0xe11   :  { %v2018_v56 = vpop.f32.mrf.mxu2 }
 0xe12   :  { %v2019_v30 = vadd.f32 %v5108_v17, %v2018_v56  ;;  %2157 = vmatpush.msra.mxu1 %v2070_v14  ;;  %v4797_v17 = vld [vmem:[%s5489_s7 + $0xb0] sm:$0xff]  ;;  %v4796_v14 = vld [vmem:[%s5489_s7 + $0xa8] sm:$0xff]  ;;  %v4795_v56 = vld [vmem:[%s5489_s7 + $0xa0] sm:$0xff] }
 0xe14   :  { %4778 = vmatpush.xpose.msk.msrb.mxu0 %vm481_vm15, %v2019_v30  ;;  %2158 = vmatpush.msra.mxu1 %v2067_v20 }
 0xe16   :  { %2159 = vmatpush.msra.mxu1 %v2064_v23 }
 0xe18   :  { %4779 = vmatpush.xpose.msk.msrb.mxu0 %vm481_vm15, %v2016_v27  ;;  %2160 = vmatpush.msra.mxu1 %v2061_v6 }
 0xe19   :  { %v2270_v33 = vpop.f32.mrf.mxu2 }
 0xe1a   :  { %v2271_v51 = vadd.f32 %v5113_v1, %v2270_v33  ;;  %2226 = vmatpush.msrb.mxu1 %v4798_v0 }
 0xe1c   :  { %4780 = vmatpush.xpose.msk.msrb.mxu0 %vm481_vm15, %v2013_v26  ;;  %2227 = vmatpush.msrb.mxu1 %v4797_v17 }
 0xe1e   :  { %2228 = vmatpush.msrb.mxu1 %v4796_v14 }
 0xe20   :  { %4781 = vmatpush.xpose.msk.msrb.mxu0 %vm481_vm15, %v2010_v44  ;;  %2229 = vmatpush.msrb.mxu1 %v4795_v56 }
 0xe21   :  { %v2273_v35 = vpop.f32.mrf.mxu2 }
 0xe22   :  { %v2274_v24 = vadd.f32 %v5113_v1, %v2273_v35 }
 0xe24   :  { %2193 = vmatpush.msra.mxu0 %v4791_v48 }
 0xe26   :  { %2194 = vmatpush.msra.mxu0 %v4790_v63 }
 0xe28   :  { %2195 = vmatpush.msra.mxu0 %v4789_v32 }
 0xe29   :  { %v2276_v3 = vpop.f32.mrf.mxu2 }
 0xe2a   :  { %2196 = vmatpush.msra.mxu0 %v4788_v34  ;;  %v2277_v49 = vadd.f32 %v5113_v1, %v2276_v3  ;;  %v5116_v34 = vld [vmem:[%s5518_s15 + $0x5] ss:$0 sm:$0xff] }
 0xe31   :  { %v2279_v39 = vpop.f32.mrf.mxu2 }
 0xe32   :  { %v2280_v46 = vadd.f32 %v5113_v1, %v2279_v39 }
 0xe74   :  { %v1964_v41 = vpop.f32.mrf.mxu1 }
 0xe75   :  { %v1965_v36 = vadd.f32 %v5114_v38, %v1964_v41  ;;  %v5115_v41 = vld [vmem:[%s5479_s29 + $0x5] ss:$0 sm:$0xff] }
 0xe77   :  { %4782 = vmatmul.msk.f32.vlgmr.msrb.gmra.mxu0 %vm481_vm15, %v1965_v36 }
 0xe78   :  { %2367 = vmatpush.msrb.mxu0 %v2280_v46 }
 0xe7a   :  { %2368 = vmatpush.msrb.mxu0 %v2277_v49 }
 0xe7c   :  { %2369 = vmatpush.msrb.mxu0 %v2274_v24  ;;  %v1967_v52 = vpop.f32.mrf.mxu1 }
 0xe7d   :  { %v1968_v53 = vadd.f32 %v5114_v38, %v1967_v52 }
 0xe7e   :  { %2370 = vmatpush.msrb.mxu0 %v2271_v51 }
 0xe7f   :  { %4783 = vmatmul.msk.f32.gmra.mxu0 %vm481_vm15, %v1968_v53 }
 0xe87   :  { %4793 = vmatmul.msk.f32.vlgmr.msra.gmra.mxu0 %vm244_vm1, %v1923_v45 }
 0xe8f   :  { %4794 = vmatmul.msk.f32.gmra.mxu0 %vm244_vm1, %v1924_v8 }
 0xef4   :  { %v2107_v29 = vpop.f32.mrf.mxu0 }
 0xef5   :  { %v2113_v57 = vmul.f32 0.25, %v2107_v29 }
 0xef7   :  { %v2115_v58 = vadd.f32 %v2113_v57, %v6120_v54 }
 0xef9   :  { %v2117_v21 = vsel %vm244_vm1, %v2115_v58, -inf }
 0xefa   :  { %2118 = vmax.xlane.f32.xlu1 %v2117_v21 }
 0xefc   :  { %v2110_v60 = vpop.f32.mrf.mxu0 }
 0xefd   :  { %v2114_v62 = vmul.f32 0.25, %v2110_v60 }
 0xeff   :  { %v2116_v61 = vadd.f32 %v2114_v62, %v6125_v19 }
 0xf01   :  { %v2120_v45 = vsel %vm244_vm1, %v2116_v61, -inf }
 0xf02   :  { %2121 = vmax.xlane.f32.xlu2 %v2120_v45 }
 0xf04   :  { %v2198_v1 = vpop.f32.mrf.mxu0 }
 0xf05   :  { %v2199_v46 = vadd.f32 %v5115_v41, %v2198_v1 }
 0xf0c   :  { %v2201_v49 = vpop.f32.mrf.mxu0 }
 0xf0d   :  { %v2202_v24 = vadd.f32 %v5115_v41, %v2201_v49 }
 0xf6d   :  { %v2119_v22 = vpop.xlane.xlu1 %2118 }
 0xf6e   :  { %v2123_v2 = vsub.f32 %v2115_v58, %v2119_v22 }
 0xf70   :  { %v2125_v42 = vmul.f32 1.442695, %v2123_v2 }
 0xf72   :  { %5235 = vpow2.f32 %v2125_v42 }
 0xf75   :  { %v2122_v4 = vpop.xlane.xlu2 %2121 }
 0xf76   :  { %v2124_v8 = vsub.f32 %v2116_v61, %v2122_v4 }
 0xf78   :  { %v5236_v55 = vpop.eup %5235  ;;  %v2127_v10 = vmul.f32 1.442695, %v2124_v8 }
 0xf79   :  { %v2129_v12 = vsel %vm244_vm1, %v5236_v55, 0.0 }
 0xf7a   :  { %5237 = vpow2.f32 %v2127_v10  ;;  %2130 = vadd.xlane.f32.xlu0 %v2129_v12  ;;  %v4786_v10 = vld [vmem:[%s5654_s30 + $0x40] sm:$0xff] }
 0xf80   :  { %v5238_v18 = vpop.eup %5237 }
 0xf81   :  { %v2132_v16 = vsel %vm244_vm1, %v5238_v18, 0.0 }
 0xf82   :  { %2133 = vadd.xlane.f32.xlu1 %v2132_v16 }
 0xfed   :  { %v2131_v20 = vpop.xlane.xlu0 %2130 }
 0xfee   :  { %5239 = vrcp.f32 %v2131_v20  ;;  %v4821_v20 = vld [vmem:[%s5654_s30 + $0x50] sm:$0xff] }
 0xff4   :  { %v5240_v30 = vpop.eup %5239 }
 0xff5   :  { %v2137_v23 = vmul.f32 %v5240_v30, %v5236_v55  ;;  %v2134_v6 = vpop.xlane.xlu1 %2133  ;;  %v4787_v55 = vld [vmem:[%s5654_s30 + $0x48] sm:$0xff]  ;;  %v4853_v30 = vld [vmem:[%s5484_s3 + $0xd8] sm:$0xff] }
 0xff6   :  { %5241 = vrcp.f32 %v2134_v6  ;;  %2430 = vmatpush.msra.mxu0 %v4787_v55  ;;  %v4851_v6 = vld [vmem:[%s5484_s3 + $0xc8] sm:$0xff] }
 0xff7   :  { %4784 = vmatmul.msk.f32.vlgmr.msra.gmra.mxu1 %vm244_vm1, %v2137_v23  ;;  %v4852_v23 = vld [vmem:[%s5484_s3 + $0xd0] sm:$0xff] }
 0xff8   :  { %2431 = vmatpush.msra.mxu0 %v4786_v10 }
 0xffc   :  { %v5242_v27 = vpop.eup %5241 }
 0xffd   :  { %v2138_v26 = vmul.f32 %v5242_v27, %v5238_v18  ;;  %v4822_v18 = vld [vmem:[%s5654_s30 + $0x58] sm:$0xff]  ;;  %v4850_v27 = vld [vmem:[%s5484_s3 + $0xc0] sm:$0xff] }
 0xfff   :  { %4785 = vmatmul.msk.f32.gmra.mxu1 %vm244_vm1, %v2138_v26 }
0x1007   :  { %4800 = vmatmul.msk.f32.vlgmr.msrb.gmra.mxu1 %vm244_vm1, %v5990_v47 }
0x100f   :  { %4801 = vmatmul.msk.f32.gmra.mxu1 %vm244_vm1, %v6013_v13 }
0x1017   :  { %4802 = vmatmul.msk.f32.gmra.mxu1 %vm244_vm1, %v6054_v28 }
0x101f   :  { %4803 = vmatmul.msk.f32.gmra.mxu1 %vm244_vm1, %v6066_v31 }
0x1074   :  { %v2162_v44 = vpop.f32.mrf.mxu1 }
0x107c   :  { %v2165_v48 = vpop.f32.mrf.mxu1 }
0x1084   :  { %v2231_v63 = vpop.f32.mrf.mxu1 }
0x1085   :  { %v2232_v36 = vadd.f32 %v5116_v34, %v2231_v63 }
0x108c   :  { %v2234_v32 = vpop.f32.mrf.mxu1 }
0x108d   :  { %v2235_v39 = vadd.f32 %v5116_v34, %v2234_v32 }
0x1094   :  { %v2237_v33 = vpop.f32.mrf.mxu1 }
0x1095   :  { %v2238_v38 = vadd.f32 %v5116_v34, %v2237_v33 }
0x109c   :  { %v2240_v35 = vpop.f32.mrf.mxu1 }
0x109d   :  { %v2241_v3 = vadd.f32 %v5116_v34, %v2240_v35 }
0x109f   :  { %4813 = vmatpush.xpose.msk.msra.mxu3 %vm481_vm15, %v2241_v3 }
0x10a3   :  { %4814 = vmatpush.xpose.msk.msra.mxu3 %vm481_vm15, %v2238_v38 }
0x10a7   :  { %4815 = vmatpush.xpose.msk.msra.mxu3 %vm481_vm15, %v2235_v39 }
0x10ab   :  { %4816 = vmatpush.xpose.msk.msra.mxu3 %vm481_vm15, %v2232_v36 }
0x10ae   :  { %4817 = vmatmul.msk.f32.vlgmr.msra.gmra.mxu3 %vm481_vm15, %v2199_v46 }
0x10af   :  { %2401 = vmatpush.msrb.mxu3 %v4822_v18 }
0x10b1   :  { %2402 = vmatpush.msrb.mxu3 %v4821_v20  ;;  %v5120_v20 = vld [vmem:[%s5442_s25 + $0x4] ss:$0 sm:$0xff] }
0x10b3   :  { %2694 = vmatpush.msra.mxu3 %v4853_v30 }
0x10b5   :  { %2695 = vmatpush.msra.mxu3 %v4852_v23 }
0x10b6   :  { %4818 = vmatmul.msk.f32.gmra.mxu3 %vm481_vm15, %v2202_v24 }
0x10b7   :  { %2696 = vmatpush.msra.mxu3 %v4851_v6 }
0x10b9   :  { %2697 = vmatpush.msra.mxu3 %v4850_v27 }
0x1131   :  { %v2317_v51 = vpop.f32.mrf.mxu3 }
0x1132   :  { %v2323_v52 = vmul.f32 0.25, %v2317_v51 }
0x1134   :  { %v2325_v53 = vadd.f32 %v2323_v52, %v6120_v54 }
0x1136   :  { %v2327_v29 = vsel %vm244_vm1, %v2325_v53, -inf }
0x1137   :  { %2328 = vmax.xlane.f32.xlu2 %v2327_v29 }
0x1139   :  { %v2320_v57 = vpop.f32.mrf.mxu3 }
0x113a   :  { %v2324_v58 = vmul.f32 0.25, %v2320_v57 }
0x113c   :  { %v2326_v21 = vadd.f32 %v2324_v58, %v6125_v19 }
0x113e   :  { %v2330_v60 = vsel %vm244_vm1, %v2326_v21, -inf }
0x113f   :  { %2331 = vmax.xlane.f32.xlu0 %v2330_v60  ;;  %v4832_v60 = vld [vmem:[%s5748_s16 + $0x30] sm:$0xff] }
0x11aa   :  { %v2329_v62 = vpop.xlane.xlu2 %2328 }
0x11ab   :  { %v2333_v61 = vsub.f32 %v2325_v53, %v2329_v62  ;;  %v4831_v62 = vld [vmem:[%s5748_s16 + $0x28] sm:$0xff] }
0x11ad   :  { %v2335_v45 = vmul.f32 1.442695, %v2333_v61  ;;  %v4830_v61 = vld [vmem:[%s5748_s16 + $0x20] sm:$0xff] }
0x11af   :  { %5243 = vpow2.f32 %v2335_v45 }
0x11b2   :  { %v2332_v22 = vpop.xlane.xlu0 %2331 }
0x11b3   :  { %v2334_v2 = vsub.f32 %v2326_v21, %v2332_v22  ;;  %v4833_v21 = vld [vmem:[%s5748_s16 + $0x38] sm:$0xff]  ;;  %s6599_s16 = sld [smem:[%s6728_s0 + %s5392_s18]]  }
0x11b4   :  { %2534 = vmatpush.msra.mxu1 %v4833_v21 }
0x11b5   :  { %v5244_v54 = vpop.eup %5243  ;;  %v2337_v42 = vmul.f32 1.442695, %v2334_v2 }
0x11b6   :  { %v2339_v4 = vsel %vm244_vm1, %v5244_v54, 0.0  ;;  %2535 = vmatpush.msra.mxu1 %v4832_v60 }
0x11b7   :  { %5245 = vpow2.f32 %v2337_v42  ;;  %2340 = vadd.xlane.f32.xlu1 %v2339_v4 }
0x11b8   :  { %2536 = vmatpush.msra.mxu1 %v4831_v62 }
0x11ba   :  { %2537 = vmatpush.msra.mxu1 %v4830_v61 }
0x11bd   :  { %v5246_v8 = vpop.eup %5245 }
0x11be   :  { %v2342_v19 = vsel %vm244_vm1, %v5246_v8, 0.0 }
0x11bf   :  { %2343 = vadd.xlane.f32.xlu2 %v2342_v19 }
0x122a   :  { %v2341_v12 = vpop.xlane.xlu1 %2340 }
0x122b   :  { %5247 = vrcp.f32 %v2341_v12 }
0x1231   :  { %v5248_v16 = vpop.eup %5247 }
0x1232   :  { %v2347_v0 = vmul.f32 %v5248_v16, %v5244_v54  ;;  %v2344_v17 = vpop.xlane.xlu2 %2343 }
0x1233   :  { %5249 = vrcp.f32 %v2344_v17  ;;  %v5119_v17 = vld [vmem:[%s5435_s21 + $0x4] ss:$0 sm:$0xff] }
0x1234   :  { %4819 = vmatmul.msk.f32.vlgmr.msrb.gmra.mxu0 %vm244_vm1, %v2347_v0 }
0x1239   :  { %v5250_v14 = vpop.eup %5249 }
0x123a   :  { %v2348_v56 = vmul.f32 %v5250_v14, %v5246_v8 }
0x123c   :  { %4820 = vmatmul.msk.f32.gmra.mxu0 %vm244_vm1, %v2348_v56 }
0x1244   :  { %4825 = vmatmul.msk.f32.vlgmr.msra.gmra.mxu0 %vm481_vm15, %v2162_v44 }
0x124c   :  { %4826 = vmatmul.msk.f32.gmra.mxu0 %vm481_vm15, %v2165_v48  ;;  %v5117_v48 = vld [vmem:[%s5688_s5 + $0x2] ss:$0 sm:$0xff] }
0x12b1   :  { %v2372_v26 = vpop.f32.mrf.mxu0 }
0x12b2   :  { %4823 = vmatmul.msk.f32.vlgmr.msrb.gmra.mxu3 %vm481_vm15, %v2372_v26 }
0x12b9   :  { %v2375_v63 = vpop.f32.mrf.mxu0 }
0x12ba   :  { %4824 = vmatmul.msk.f32.gmra.mxu3 %vm481_vm15, %v2375_v63 }
0x12c1   :  { %v2433_v44 = vpop.f32.mrf.mxu0 }
0x12c2   :  { %4855 = vmatmul.msk.f32.vlgmr.msra.gmra.mxu3 %vm244_vm1, %v5990_v47 }
0x12c9   :  { %v2436_v38 = vpop.f32.mrf.mxu0 }
0x12ca   :  { %4856 = vmatmul.msk.f32.gmra.mxu3 %vm244_vm1, %v6013_v13 }
0x12d2   :  { %4857 = vmatmul.msk.f32.gmra.mxu3 %vm244_vm1, %v6054_v28 }
0x12da   :  { %4858 = vmatmul.msk.f32.gmra.mxu3 %vm244_vm1, %v6066_v31 }
0x1335   :  { %v2404_v32 = vpop.f32.mrf.mxu3 }
0x1336   :  { %v2434_v33 = vadd.f32 %v2433_v44, %v2404_v32 }
0x1338   :  { %v2444_v34 = vadd.f32 %v5117_v48, %v2434_v33 }
0x133a   :  { %v2446_v35 = vadd.f32 %v2444_v34, %v6087_v40  ;;  %v4844_v34 = vld [vmem:[%s5770_s22 + $0x78] sm:$0xff] }
0x133b   :  { %2591 = vmatpush.msrb.mxu2 %v4844_v34  ;;  %v4862_v34 = vld [vmem:[%s5489_s7 + $0xd8] sm:$0xff] }
0x133c   :  { %v2452_v3 = vsel %vm244_vm1, %v2446_v35, 0.0  ;;  %2739 = vmatpush.msrb.mxu0 %v4862_v34 }
0x133d   :  { %2453 = vadd.xlane.f32.xlu0 %v2452_v3  ;;  %v2407_v39 = vpop.f32.mrf.mxu3  ;;  %v4842_v3 = vld [vmem:[%s5770_s22 + $0x68] sm:$0xff] }
0x133e   :  { %v2437_v1 = vadd.f32 %v2436_v38, %v2407_v39  ;;  %v4841_v38 = vld [vmem:[%s5770_s22 + $0x60] sm:$0xff]  ;;  %v4840_v39 = vld [vmem:[%s5770_s22 + $0x58] sm:$0xff] }
0x1340   :  { %v2445_v41 = vadd.f32 %v5117_v48, %v2437_v1  ;;  %v4839_v1 = vld [vmem:[%s5770_s22 + $0x50] sm:$0xff] }
0x1342   :  { %v2447_v36 = vadd.f32 %v2445_v41, %v6093_v7  ;;  %v4838_v41 = vld [vmem:[%s5770_s22 + $0x48] sm:$0xff] }
0x1344   :  { %v2455_v46 = vsel %vm244_vm1, %v2447_v36, 0.0 }
0x1345   :  { %2456 = vadd.xlane.f32.xlu1 %v2455_v46  ;;  %v5121_v46 = vld [vmem:[%s5743_s10 + $0x1] ss:$0 sm:$0xff]  ;;  %s5385_s10 = smov 42  }
0x13b0   :  { %v2454_v49 = vpop.xlane.xlu0 %2453 }
0x13b1   :  { %v2458_v24 = vmul.f32 %v2454_v49, %v5446_v37 }
0x13b3   :  { %v2460_v51 = vsub.f32 %v2446_v35, %v2458_v24  ;;  %v4843_v35 = vld [vmem:[%s5770_s22 + $0x70] sm:$0xff] }
0x13b4   :  { %2592 = vmatpush.msrb.mxu2 %v4843_v35  ;;  %v4868_v35 = vld [vmem:[%s5494_s11 + $0xd0] sm:$0xff] }
0x13b5   :  { %v2462_v40 = vmul.f32 %v2460_v51, %v2460_v51 }
0x13b6   :  { %2593 = vmatpush.msrb.mxu2 %v4842_v3  ;;  %v4897_v3 = vld [vmem:[%s5489_s7 + $0xf8] sm:$0xff] }
0x13b7   :  { %v2464_v52 = vsel %vm244_vm1, %v2462_v40, 0.0  ;;  %2993 = vmatpush.msrb.mxu3 %v4897_v3  ;;  %v5125_v3 = vld [vmem:[%s5536_s19 + $0x6] ss:$0 sm:$0xff] }
0x13b8   :  { %2465 = vadd.xlane.f32.xlu2 %v2464_v52  ;;  %v2457_v53 = vpop.xlane.xlu1 %2456  ;;  %2594 = vmatpush.msrb.mxu2 %v4841_v38  ;;  %v4861_v38 = vld [vmem:[%s5489_s7 + $0xd0] sm:$0xff] }
0x13b9   :  { %v2459_v29 = vmul.f32 %v2457_v53, %v5446_v37  ;;  %2740 = vmatpush.msrb.mxu0 %v4861_v38 }
0x13ba   :  { %2595 = vmatpush.msrb.mxu2 %v4840_v39  ;;  %v4867_v39 = vld [vmem:[%s5494_s11 + $0xc8] sm:$0xff] }
0x13bb   :  { %v2461_v57 = vsub.f32 %v2447_v36, %v2459_v29  ;;  %v4837_v36 = vld [vmem:[%s5770_s22 + $0x40] sm:$0xff]  ;;  %s5393_s22 = smov 34  }
0x13bc   :  { %2596 = vmatpush.msrb.mxu2 %v4839_v1  ;;  %v4896_v1 = vld [vmem:[%s5489_s7 + $0xf0] sm:$0xff] }
0x13bd   :  { %v2463_v58 = vmul.f32 %v2461_v57, %v2461_v57  ;;  %2994 = vmatpush.msrb.mxu3 %v4896_v1 }
0x13be   :  { %2597 = vmatpush.msrb.mxu2 %v4838_v41  ;;  %v4860_v41 = vld [vmem:[%s5489_s7 + $0xc8] sm:$0xff] }
0x13bf   :  { %v2467_v7 = vsel %vm244_vm1, %v2463_v58, 0.0  ;;  %2741 = vmatpush.msrb.mxu0 %v4860_v41 }
0x13c0   :  { %2468 = vadd.xlane.f32.xlu0 %v2467_v7  ;;  %2598 = vmatpush.msrb.mxu2 %v4837_v36  ;;  %v4866_v36 = vld [vmem:[%s5494_s11 + $0xc0] sm:$0xff] }
0x142b   :  { %v2466_v45 = vpop.xlane.xlu2 %2465 }
0x142c   :  { %v2470_v22 = vmul.f32 %v2466_v45, %v5446_v37 }
0x142e   :  { %v2472_v2 = vadd.f32 1e-06, %v2470_v22 }
0x1430   :  { %5251 = vrsqrt.f32 %v2472_v2  ;;  %vm2480_vm6 = vweird.f32 %v2472_v2 }
0x1433   :  { %v2469_v54 = vpop.xlane.xlu0 %2468 }
0x1434   :  { %v2471_v42 = vmul.f32 %v2469_v54, %v5446_v37 }
0x1436   :  { %v5252_v4 = vpop.eup %5251  ;;  %v2473_v8 = vadd.f32 1e-06, %v2471_v42 }
0x1437   :  { %v2475_v19 = vmul.f32 %v5252_v4, %v2472_v2  ;;  %vm2481_vm5 = vweird.f32 %v5252_v4 }
0x1438   :  { %5253 = vrsqrt.f32 %v2473_v8  ;;  %vm2482_vm7 = vmor %vm2480_vm6, %vm2481_vm5  ;;  %vm2490_vm9 = vweird.f32 %v2473_v8 }
0x1439   :  { %v2476_v55 = vmul.f32 %v5252_v4, %v2475_v19 }
0x143b   :  { %v2477_v10 = vmul.f32 0.5, %v2476_v55  ;;  %v5122_v55 = vld [vmem:[%s5801_s4 + $0x1] ss:$0 sm:$0xff]  ;;  %s5388_s4 = smov 23  }
0x143c   :  { %s4574_s26 = sld [smem:[%s6728_s0 + %s5388_s4]]  }
0x143d   :  { %v2478_v12 = vsub.f32 1.5, %v2477_v10 }
0x143e   :  { %v5254_v18 = vpop.eup %5253 }
0x143f   :  { %v2479_v16 = vmul.f32 %v5252_v4, %v2478_v12  ;;  %v2485_v0 = vmul.f32 %v5254_v18, %v2473_v8  ;;  %vm2491_vm8 = vweird.f32 %v5254_v18 }
0x1440   :  { %vm2492_vm10 = vmor %vm2490_vm9, %vm2491_vm8 }
0x1441   :  { %v2483_v14 = vsel %vm2482_vm7, %v5252_v4, %v2479_v16  ;;  %v2486_v56 = vmul.f32 %v5254_v18, %v2485_v0 }
0x1442   :  { %v2494_v30 = vmul.f32 %v2483_v14, %v2460_v51 }
0x1443   :  { %v2487_v23 = vmul.f32 0.5, %v2486_v56 }
0x1444   :  { %v2499_v6 = vmul.f32 %v5119_v17, %v2494_v30 }
0x1445   :  { %v2488_v27 = vsub.f32 1.5, %v2487_v23 }
0x1446   :  { %v2504_v26 = vadd.f32 %v5120_v20, %v2499_v6 }
0x1447   :  { %v2489_v63 = vmul.f32 %v5254_v18, %v2488_v27 }
0x1448   :  { %4835 = vmatmul.msk.f32.vlgmr.msra.gmra.mxu1 %vm244_vm1, %v2504_v26 }
0x1449   :  { %v2493_v44 = vsel %vm2492_vm10, %v5254_v18, %v2489_v63 }
0x144a   :  { %v2495_v48 = vmul.f32 %v2493_v44, %v2461_v57 }
0x144c   :  { %v2500_v32 = vmul.f32 %v5119_v17, %v2495_v48 }
0x144e   :  { %v2505_v33 = vadd.f32 %v5120_v20, %v2500_v32 }
0x1450   :  { %4836 = vmatmul.msk.f32.gmra.mxu1 %vm244_vm1, %v2505_v33 }
0x14c5   :  { %v2539_v49 = vpop.f32.mrf.mxu1 }
0x14c6   :  { %v2540_v24 = vadd.f32 %v5121_v46, %v2539_v49  ;;  %v4859_v49 = vld [vmem:[%s5489_s7 + $0xc0] sm:$0xff] }
0x14c7   :  { %2742 = vmatpush.msrb.mxu0 %v4859_v49  ;;  %v4904_v49 = vld [vmem:[%s5494_s11 + $0xf8] sm:$0xff] }
0x14c8   :  { %v2545_v51 = vmul.f32 %v2540_v24, %v2540_v24 }
0x14ca   :  { %v2547_v40 = vmul.f32 %v2545_v51, %v2540_v24 }
0x14cc   :  { %v2549_v52 = vmul.f32 0.044715, %v2547_v40 }
0x14cd   :  { %v2542_v53 = vpop.f32.mrf.mxu1 }
0x14ce   :  { %v2551_v29 = vadd.f32 %v2549_v52, %v2540_v24  ;;  %v2543_v57 = vadd.f32 %v5121_v46, %v2542_v53  ;;  %v4895_v46 = vld [vmem:[%s5489_s7 + $0xe8] sm:$0xff]  ;;  %v4888_v53 = vld [vmem:[%s5484_s3 + $0xf8] sm:$0xff] }
0x14cf   :  { %2995 = vmatpush.msrb.mxu3 %v4895_v46  ;;  %v5127_v46 = vld [vmem:[%s5518_s15 + $0x7] ss:$0 sm:$0xff] }
0x14d0   :  { %v2553_v58 = vmul.f32 0.7978846, %v2551_v29  ;;  %v2546_v7 = vmul.f32 %v2543_v57, %v2543_v57  ;;  %v4887_v29 = vld [vmem:[%s5484_s3 + $0xf0] sm:$0xff] }
0x14d2   :  { %5255 = vtanh.f32 %v2553_v58  ;;  %v2548_v21 = vmul.f32 %v2546_v7, %v2543_v57 }
0x14d4   :  { %v2550_v60 = vmul.f32 0.044715, %v2548_v21  ;;  %v4885_v21 = vld [vmem:[%s5484_s3 + $0xe0] sm:$0xff] }
0x14d6   :  { %v2552_v62 = vadd.f32 %v2550_v60, %v2543_v57 }
0x14d8   :  { %v5256_v61 = vpop.eup %5255  ;;  %v2554_v45 = vmul.f32 0.7978846, %v2552_v62 }
0x14d9   :  { %v2557_v22 = vadd.f32 1.0, %v5256_v61 }
0x14da   :  { %5257 = vtanh.f32 %v2554_v45 }
0x14db   :  { %v2559_v2 = vmul.f32 0.5, %v2557_v22 }
0x14dd   :  { %v2561_v54 = vmul.f32 %v2559_v2, %v2540_v24  ;;  %v4894_v24 = vld [vmem:[%s5489_s7 + $0xe0] sm:$0xff] }
0x14de   :  { %2996 = vmatpush.msrb.mxu3 %v4894_v24 }
0x14df   :  { %4846 = vmatmul.msk.f32.vlgmr.msrb.gmra.mxu2 %vm1193_vm13, %v2561_v54 }
0x14e0   :  { %v5258_v42 = vpop.eup %5257 }
0x14e1   :  { %v2558_v4 = vadd.f32 1.0, %v5258_v42 }
0x14e3   :  { %v2560_v8 = vmul.f32 0.5, %v2558_v4 }
0x14e5   :  { %v2562_v19 = vmul.f32 %v2560_v8, %v2543_v57  ;;  %v4886_v57 = vld [vmem:[%s5484_s3 + $0xe8] sm:$0xff]  ;;  %v5123_v8 = vld [vmem:[%s5435_s21 + $0x5] ss:$0 sm:$0xff] }
0x14e7   :  { %4847 = vmatmul.msk.f32.gmra.mxu2 %vm1193_vm13, %v2562_v19 }
0x1562   :  { %v2600_v10 = vpop.f32.mrf.mxu2 }
0x1563   :  { %v2601_v12 = vadd.f32 %v5122_v55, %v2600_v10  ;;  %v5124_v10 = vld [vmem:[%s5442_s25 + $0x5] ss:$0 sm:$0xff] }
0x1565   :  { %v2606_v18 = vadd.f32 %v2601_v12, %v2504_v26 }
0x1567   :  { %v2612_v16 = vsel %vm244_vm1, %v2606_v18, 0.0 }
0x1568   :  { %2613 = vadd.xlane.f32.xlu1 %v2612_v16 }
0x156a   :  { %v2603_v0 = vpop.f32.mrf.mxu2 }
0x156b   :  { %v2604_v17 = vadd.f32 %v5122_v55, %v2603_v0 }
0x156d   :  { %v2607_v14 = vadd.f32 %v2604_v17, %v2505_v33  ;;  %v4869_v33 = vld [vmem:[%s5494_s11 + $0xd8] sm:$0xff] }
0x156e   :  { %2778 = vmatpush.msrb.mxu1 %v4869_v33 }
0x156f   :  { %v2615_v56 = vsel %vm244_vm1, %v2607_v14, 0.0 }
0x1570   :  { %2616 = vadd.xlane.f32.xlu2 %v2615_v56  ;;  %2779 = vmatpush.msrb.mxu1 %v4868_v35  ;;  %v5351_v56 = vld [vmem:[%s5782_s27] sm:$0xff] }
0x1572   :  { %2780 = vmatpush.msrb.mxu1 %v4867_v39  ;;  %v5126_v39 = vld [vmem:[%s5518_s15 + $0x6] ss:$0 sm:$0xff] }
0x1574   :  { %2781 = vmatpush.msrb.mxu1 %v4866_v36 }
0x1576   :  { %2954 = vmatpush.msra.mxu1 %v4888_v53  ;;  %v4903_v53 = vld [vmem:[%s5494_s11 + $0xf0] sm:$0xff] }
0x1578   :  { %2955 = vmatpush.msra.mxu1 %v4887_v29  ;;  %v5128_v29 = vld [vmem:[%s5479_s29 + $0x7] ss:$0 sm:$0xff] }
0x157a   :  { %2956 = vmatpush.msra.mxu1 %v4886_v57  ;;  %v4902_v57 = vld [vmem:[%s5494_s11 + $0xe8] sm:$0xff] }
0x157c   :  { %2957 = vmatpush.msra.mxu1 %v4885_v21  ;;  %v4901_v21 = vld [vmem:[%s5494_s11 + $0xe0] sm:$0xff] }
0x15db   :  { %v2614_v20 = vpop.xlane.xlu1 %2613 }
0x15dc   :  { %v2618_v30 = vmul.f32 %v2614_v20, %v5446_v37 }
0x15de   :  { %v6215_v23 = vsub.f32 %v2606_v18, %v2618_v30 }
0x15e0   :  { %v2622_v6 = vmul.f32 %v6215_v23, %v6215_v23 }
0x15e2   :  { %v2624_v27 = vsel %vm244_vm1, %v2622_v6, 0.0 }
0x15e3   :  { %v2617_v26 = vpop.xlane.xlu2 %2616  ;;  %2625 = vadd.xlane.f32.xlu0 %v2624_v27 }
0x15e4   :  { %v2619_v63 = vmul.f32 %v2617_v26, %v5446_v37  ;;  %v5352_v26 = vld [vmem:[%s5782_s27 + $0x8] sm:$0xff]  ;;  %s4593_s27 = sld [smem:[%s6728_s0 + %s5385_s10]]  }
0x15e5   :  { %s4579_s10 = sld [smem:[%s6728_s0 + %s5399_s14]]  }
0x15e6   :  { %v6221_v44 = vsub.f32 %v2607_v14, %v2619_v63 }
0x15e8   :  { %v2623_v48 = vmul.f32 %v6221_v44, %v6221_v44 }
0x15ea   :  { %v2627_v32 = vsel %vm244_vm1, %v2623_v48, 0.0 }
0x15eb   :  { %2628 = vadd.xlane.f32.xlu1 %v2627_v32 }
0x1656   :  { %v2626_v51 = vpop.xlane.xlu0 %2625 }
0x1657   :  { %v2630_v40 = vmul.f32 %v2626_v51, %v5446_v37 }
0x1659   :  { %v2632_v52 = vadd.f32 1e-06, %v2630_v40 }
0x165b   :  { %5259 = vrsqrt.f32 %v2632_v52  ;;  %vm2640_vm12 = vweird.f32 %v2632_v52 }
0x165e   :  { %v2629_v58 = vpop.xlane.xlu1 %2628 }
0x165f   :  { %v2631_v7 = vmul.f32 %v2629_v58, %v5446_v37 }
0x1661   :  { %v5260_v60 = vpop.eup %5259  ;;  %v2633_v62 = vadd.f32 1e-06, %v2631_v7  ;;  %v4934_v7 = vld [vmem:[%s5484_s3 + $0x118] sm:$0xff] }
0x1662   :  { %v2635_v61 = vmul.f32 %v5260_v60, %v2632_v52  ;;  %vm2641_vm11 = vweird.f32 %v5260_v60 }
0x1663   :  { %5261 = vrsqrt.f32 %v2633_v62  ;;  %vm2642_vm14 = vmor %vm2640_vm12, %vm2641_vm11  ;;  %vm2650_vm2 = vweird.f32 %v2633_v62 }
0x1664   :  { %v2636_v45 = vmul.f32 %v5260_v60, %v2635_v61 }
0x1666   :  { %v2637_v22 = vmul.f32 0.5, %v2636_v45 }
0x1668   :  { %v2638_v2 = vsub.f32 1.5, %v2637_v22  ;;  %v4932_v22 = vld [vmem:[%s5484_s3 + $0x108] sm:$0xff] }
0x1669   :  { %v5262_v54 = vpop.eup %5261 }
0x166a   :  { %v2639_v42 = vmul.f32 %v5260_v60, %v2638_v2  ;;  %v2645_v4 = vmul.f32 %v5262_v54, %v2633_v62  ;;  %vm2651_vm0 = vweird.f32 %v5262_v54  ;;  %v4933_v62 = vld [vmem:[%s5484_s3 + $0x110] sm:$0xff]  ;;  %v4931_v2 = vld [vmem:[%s5484_s3 + $0x100] sm:$0xff] }
0x166b   :  { %vm2652_vm3 = vmor %vm2650_vm2, %vm2651_vm0 }
0x166c   :  { %v2643_v19 = vsel %vm2642_vm14, %v5260_v60, %v2639_v42  ;;  %v2646_v55 = vmul.f32 %v5262_v54, %v2645_v4 }
0x166d   :  { %v2654_v12 = vmul.f32 %v2643_v19, %v6215_v23 }
0x166e   :  { %v2647_v18 = vmul.f32 0.5, %v2646_v55 }
0x166f   :  { %v2659_v16 = vmul.f32 %v5123_v8, %v2654_v12 }
0x1670   :  { %v2648_v0 = vsub.f32 1.5, %v2647_v18  ;;  %v2668_v18 = vld [vmem:[%s4593_s27] sm:$0xff] }
0x1671   :  { %v6247_v17 = vadd.f32 %v5124_v10, %v2659_v16 }
0x1672   :  { %v2649_v14 = vmul.f32 %v5262_v54, %v2648_v0 }
0x1673   :  { %4871 = vmatmul.msk.f32.vlgmr.msrb.gmra.mxu1 %vm244_vm1, %v6247_v17  ;;  %v6253_v20 = vadd.f32 %v5351_v56, %v6247_v17 }
0x1674   :  { %v2653_v30 = vsel %vm2652_vm3, %v5262_v54, %v2649_v14 }
0x1675   :  { %v2655_v23 = vmul.f32 %v2653_v30, %v6221_v44  ;;  %4864 = vmatmul.msk.f32.vlgmr.msrb.gmra.mxu0 %vm244_vm1, %v6253_v20  ;;  %4899 = vmatmul.msk.f32.vlgmr.msrb.gmra.mxu3 %vm244_vm1, %v6253_v20  ;;  %v2699_v44 = vpop.f32.mrf.mxu3 }
0x1677   :  { %v2660_v6 = vmul.f32 %v5123_v8, %v2655_v23  ;;  %v2669_v23 = vld [vmem:[%s4593_s27 + $0x8] sm:$0xff] }
0x1679   :  { %v6260_v27 = vadd.f32 %v5124_v10, %v2660_v6 }
0x167b   :  { %4872 = vmatmul.msk.f32.gmra.mxu1 %vm244_vm1, %v6260_v27  ;;  %v6266_v63 = vadd.f32 %v5352_v26, %v6260_v27 }
0x167d   :  { %4865 = vmatmul.msk.f32.gmra.mxu0 %vm244_vm1, %v6266_v63  ;;  %4900 = vmatmul.msk.f32.gmra.mxu3 %vm244_vm1, %v6266_v63  ;;  %v2702_v48 = vpop.f32.mrf.mxu3 }
0x1683   :  { %4890 = vmatmul.msk.f32.vlgmr.msra.gmra.mxu1 %vm244_vm1, %v5990_v47 }
0x1685   :  { %v2705_v32 = vpop.f32.mrf.mxu3 }
0x168b   :  { %4891 = vmatmul.msk.f32.gmra.mxu1 %vm244_vm1, %v6013_v13 }
0x168d   :  { %v2708_v33 = vpop.f32.mrf.mxu3 }
0x1693   :  { %4892 = vmatmul.msk.f32.gmra.mxu1 %vm244_vm1, %v6054_v28 }
0x169b   :  { %4893 = vmatmul.msk.f32.gmra.mxu1 %vm244_vm1, %v6066_v31  ;;  %v5118_v31 = vld [vmem:[%s5479_s29 + $0x6] ss:$0 sm:$0xff] }
0x169c   :  { %v2700_v52 = vadd.f32 %v5118_v31, %v2699_v44  ;;  %v2703_v45 = vadd.f32 %v5118_v31, %v2702_v48  ;;  %v2706_v42 = vadd.f32 %v5118_v31, %v2705_v32  ;;  %v2709_v19 = vadd.f32 %v5118_v31, %v2708_v33 }
0x16f0   :  { %v2783_v34 = vpop.f32.mrf.mxu1 }
0x16f1   :  { %v2784_v28 = vadd.f32 %v5125_v3, %v2783_v34  ;;  %v2670_v34 = vld [vmem:[%s4593_s27 + $0x10] sm:$0xff] }
0x16f2   :  { %v2744_v35 = vpop.f32.mrf.mxu0 }
0x16f3   :  { %v2745_v36 = vadd.f32 %v5126_v39, %v2744_v35 }
0x16f8   :  { %v2786_v47 = vpop.f32.mrf.mxu1  ;;  %v2998_v38 = vpop.f32.mrf.mxu3 }
0x16f9   :  { %v2787_v13 = vadd.f32 %v5125_v3, %v2786_v47  ;;  %v2999_v58 = vadd.f32 %v5127_v46, %v2998_v38 }
0x16fa   :  { %v2747_v1 = vpop.f32.mrf.mxu0 }
0x16fb   :  { %v2748_v41 = vadd.f32 %v5126_v39, %v2747_v1  ;;  %2914 = vmatpush.msra.mxu0 %v2787_v13 }
0x16fd   :  { %4873 = vmatpush.xpose.msk.msra.mxu2 %vm481_vm15, %v2748_v41  ;;  %2915 = vmatpush.msra.mxu0 %v2784_v28  ;;  %v2671_v41 = vld [vmem:[%s4593_s27 + $0x18] sm:$0xff] }
0x1700   :  { %v2959_v24 = vpop.f32.mrf.mxu1  ;;  %v3001_v51 = vpop.f32.mrf.mxu3 }
0x1701   :  { %v3002_v40 = vadd.f32 %v5127_v46, %v3001_v51  ;;  %4874 = vmatpush.xpose.msk.msra.mxu2 %vm481_vm15, %v2745_v36  ;;  %v2960_v60 = vadd.f32 %v5128_v29, %v2959_v24 }
0x1703   :  { %4908 = vmatpush.xpose.msk.msra.mxu3 %vm481_vm15, %v3002_v40 }
0x1704   :  { %4875 = vmatmul.msk.f32.vlgmr.msra.gmra.mxu2 %vm481_vm15, %v2700_v52 }
0x1705   :  { %3026 = vmatpush.msrb.mxu2 %v4904_v49 }
0x1707   :  { %3027 = vmatpush.msrb.mxu2 %v4903_v53  ;;  %4909 = vmatpush.xpose.msk.msra.mxu3 %vm481_vm15, %v2999_v58 }
0x1708   :  { %v2962_v61 = vpop.f32.mrf.mxu1 }
0x1709   :  { %3028 = vmatpush.msrb.mxu2 %v4902_v57  ;;  %v2963_v54 = vadd.f32 %v5128_v29, %v2962_v61 }
0x170a   :  { %4910 = vmatmul.msk.f32.vlgmr.msra.gmra.mxu3 %vm481_vm15, %v2960_v60 }
0x170b   :  { %3407 = vmatpush.msrb.mxu3 %v4934_v7  ;;  %3029 = vmatpush.msrb.mxu2 %v4901_v21  ;;  %v5129_v21 = vld [vmem:[%s5536_s19 + $0x7] ss:$0 sm:$0xff] }
0x170c   :  { %4876 = vmatmul.msk.f32.gmra.mxu2 %vm481_vm15, %v2703_v45 }
0x170d   :  { %3408 = vmatpush.msrb.mxu3 %v4933_v62 }
0x170f   :  { %3409 = vmatpush.msrb.mxu3 %v4932_v22 }
0x1710   :  { %v2965_v4 = vpop.f32.mrf.mxu1 }
0x1711   :  { %3410 = vmatpush.msrb.mxu3 %v4931_v2  ;;  %v2966_v8 = vadd.f32 %v5128_v29, %v2965_v4 }
0x1712   :  { %4911 = vmatmul.msk.f32.gmra.mxu3 %vm481_vm15, %v2963_v54 }
0x1714   :  { %4877 = vmatmul.msk.f32.gmra.mxu2 %vm481_vm15, %v2706_v42 }
0x1718   :  { %v2968_v55 = vpop.f32.mrf.mxu1 }
0x1719   :  { %v2969_v10 = vadd.f32 %v5128_v29, %v2968_v55 }
0x171a   :  { %4912 = vmatmul.msk.f32.gmra.mxu3 %vm481_vm15, %v2966_v8 }
0x171c   :  { %4878 = vmatmul.msk.f32.gmra.mxu2 %vm481_vm15, %v2709_v19 }
0x1722   :  { %4913 = vmatmul.msk.f32.gmra.mxu3 %vm481_vm15, %v2969_v10 }
0x1724   :  { %4906 = vmatmul.msk.f32.vlgmr.msrb.gmra.mxu2 %vm244_vm1, %v6247_v17 }
0x172a   :  { %4936 = vmatmul.msk.f32.vlgmr.msrb.gmra.mxu3 %vm244_vm1, %v6253_v20 }
0x172c   :  { %4907 = vmatmul.msk.f32.gmra.mxu2 %vm244_vm1, %v6260_v27 }
0x1732   :  { %4937 = vmatmul.msk.f32.gmra.mxu3 %vm244_vm1, %v6266_v63 }
0x1787   :  { %v2824_v12 = vpop.f32.mrf.mxu2 }
0x1788   :  { %v2836_v16 = vmul.f32 0.25, %v2824_v12 }
0x178a   :  { %v2840_v0 = vadd.f32 %v2836_v16, %v2668_v18 }
0x178c   :  { %v2844_v14 = vsel %vm481_vm15, %v2840_v0, -inf }
0x178d   :  { %v3072_v56 = vpop.f32.mrf.mxu3  ;;  %2845 = vmax.xlane.f32.xlu2 %v2844_v14 }
0x178e   :  { %v3084_v44 = vmul.f32 0.25, %v3072_v56 }
0x178f   :  { %v2827_v30 = vpop.f32.mrf.mxu2 }
0x1790   :  { %v2837_v6 = vmul.f32 0.25, %v2827_v30  ;;  %v3088_v3 = vadd.f32 %v3084_v44, %v2668_v18 }
0x1792   :  { %v2841_v26 = vadd.f32 %v2837_v6, %v2669_v23  ;;  %v3092_v39 = vsel %vm481_vm15, %v3088_v3, -inf }
0x1794   :  { %v2847_v48 = vsel %vm481_vm15, %v2841_v26, -inf }
0x1795   :  { %v3075_v32 = vpop.f32.mrf.mxu3  ;;  %2848 = vmax.xlane.f32.xlu0 %v2847_v48 }
0x1796   :  { %v3085_v38 = vmul.f32 0.25, %v3075_v32 }
0x1797   :  { %v2830_v33 = vpop.f32.mrf.mxu2 }
0x1798   :  { %v2838_v35 = vmul.f32 0.25, %v2830_v33  ;;  %v3089_v36 = vadd.f32 %v3085_v38, %v2669_v23 }
0x179a   :  { %v2842_v47 = vadd.f32 %v2838_v35, %v2670_v34  ;;  %v3095_v24 = vsel %vm481_vm15, %v3089_v36, -inf }
0x179c   :  { %v2850_v13 = vsel %vm481_vm15, %v2842_v47, -inf }
0x179d   :  { %v3078_v1 = vpop.f32.mrf.mxu3  ;;  %3093 = vmax.xlane.f32.xlu0 %v3092_v39  ;;  %2851 = vmax.xlane.f32.xlu1 %v2850_v13 }
0x179e   :  { %v3086_v49 = vmul.f32 0.25, %v3078_v1 }
0x179f   :  { %v2833_v28 = vpop.f32.mrf.mxu2 }
0x17a0   :  { %v2839_v31 = vmul.f32 0.25, %v2833_v28  ;;  %v3090_v57 = vadd.f32 %v3086_v49, %v2670_v34 }
0x17a2   :  { %v2843_v46 = vadd.f32 %v2839_v31, %v2671_v41  ;;  %v3098_v7 = vsel %vm481_vm15, %v3090_v57, -inf }
0x17a4   :  { %v2853_v51 = vsel %vm481_vm15, %v2843_v46, -inf }
0x17a5   :  { %v3081_v40 = vpop.f32.mrf.mxu3  ;;  %3096 = vmax.xlane.f32.xlu1 %v3095_v24  ;;  %2854 = vmax.xlane.f32.xlu2 %v2853_v51 }
0x17a6   :  { %v3087_v52 = vmul.f32 0.25, %v3081_v40 }
0x17a7   :  { %v3031_v53 = vpop.f32.mrf.mxu2 }
0x17a8   :  { %v3091_v29 = vadd.f32 %v3087_v52, %v2671_v41  ;;  %v3032_v61 = vadd.f32 %v5129_v21, %v3031_v53 }
0x17aa   :  { %v3101_v58 = vsel %vm481_vm15, %v3091_v29, -inf }
0x17ad   :  { %3102 = vmax.xlane.f32.xlu1 %v3101_v58  ;;  %3099 = vmax.xlane.f32.xlu2 %v3098_v7 }
0x17af   :  { %v3034_v60 = vpop.f32.mrf.mxu2 }
0x17b0   :  { %v3035_v62 = vadd.f32 %v5129_v21, %v3034_v60 }
0x17b2   :  { %3162 = vmatpush.msrb.mxu0 %v3035_v62 }
0x17b4   :  { %3163 = vmatpush.msrb.mxu0 %v3032_v61 }
0x1800   :  { %v2846_v45 = vpop.xlane.xlu2 %2845 }
0x1801   :  { %v2856_v22 = vsub.f32 %v2840_v0, %v2846_v45 }
0x1803   :  { %v2860_v2 = vmul.f32 1.442695, %v2856_v22 }
0x1805   :  { %5263 = vpow2.f32 %v2860_v2  ;;  %v4884_v2 = vld [vmem:[%s5654_s30 + $0x68] sm:$0xff] }
0x1806   :  { %3247 = vmatpush.msra.mxu2 %v4884_v2 }
0x1808   :  { %v2849_v54 = vpop.xlane.xlu0 %2848 }
0x1809   :  { %v2857_v42 = vsub.f32 %v2841_v26, %v2849_v54 }
0x180b   :  { %v5264_v4 = vpop.eup %5263  ;;  %v2862_v8 = vmul.f32 1.442695, %v2857_v42 }
0x180c   :  { %v2868_v19 = vsel %vm481_vm15, %v5264_v4, 0.0 }
0x180d   :  { %5265 = vpow2.f32 %v2862_v8  ;;  %2869 = vadd.xlane.f32.xlu0 %v2868_v19 }
0x1810   :  { %v3094_v55 = vpop.xlane.xlu0 %3093  ;;  %v2852_v10 = vpop.xlane.xlu1 %2851 }
0x1811   :  { %v3104_v12 = vsub.f32 %v3088_v3, %v3094_v55  ;;  %v2858_v18 = vsub.f32 %v2842_v47, %v2852_v10 }
0x1813   :  { %v5266_v16 = vpop.eup %5265  ;;  %v3108_v14 = vmul.f32 1.442695, %v3104_v12  ;;  %v2864_v56 = vmul.f32 1.442695, %v2858_v18 }
0x1814   :  { %v2871_v30 = vsel %vm481_vm15, %v5266_v16, 0.0 }
0x1815   :  { %5267 = vpow2.f32 %v3108_v14  ;;  %2872 = vadd.xlane.f32.xlu2 %v2871_v30  ;;  %v4919_v30 = vld [vmem:[%s5654_s30 + $0x78] sm:$0xff] }
0x1816   :  { %5269 = vpow2.f32 %v2864_v56  ;;  %v4883_v56 = vld [vmem:[%s5654_s30 + $0x60] sm:$0xff]  ;;  %3206 = vmatpush.msrb.mxu1 %v4919_v30  ;;  %v4950_v30 = vld [vmem:[%s5494_s11 + $0x118] sm:$0xff] }
0x1817   :  { %3248 = vmatpush.msra.mxu2 %v4883_v56 }
0x1818   :  { %v3097_v0 = vpop.xlane.xlu1 %3096  ;;  %v2855_v23 = vpop.xlane.xlu2 %2854 }
0x1819   :  { %v3105_v6 = vsub.f32 %v3089_v36, %v3097_v0  ;;  %v2859_v26 = vsub.f32 %v2843_v46, %v2855_v23  ;;  %v4918_v23 = vld [vmem:[%s5654_s30 + $0x70] sm:$0xff] }
0x181a   :  { %3207 = vmatpush.msrb.mxu1 %v4918_v23  ;;  %v4949_v23 = vld [vmem:[%s5494_s11 + $0x110] sm:$0xff] }
0x181b   :  { %v5268_v44 = vpop.eup %5267  ;;  %v3110_v48 = vmul.f32 1.442695, %v3105_v6  ;;  %v2866_v32 = vmul.f32 1.442695, %v2859_v26 }
0x181c   :  { %v5270_v33 = vpop.eup %5269  ;;  %v3116_v34 = vsel %vm481_vm15, %v5268_v44, 0.0  ;;  %3503 = vmatpush.msra.mxu1 %v4950_v30 }
0x181d   :  { %5271 = vpow2.f32 %v3110_v48  ;;  %v2874_v35 = vsel %vm481_vm15, %v5270_v33, 0.0  ;;  %3117 = vadd.xlane.f32.xlu2 %v3116_v34 }
0x181e   :  { %5273 = vpow2.f32 %v2866_v32  ;;  %2875 = vadd.xlane.f32.xlu0 %v2874_v35  ;;  %3504 = vmatpush.msra.mxu1 %v4949_v23 }
0x1820   :  { %v3103_v3 = vpop.xlane.xlu1 %3102  ;;  %v3100_v47 = vpop.xlane.xlu2 %3099 }
0x1821   :  { %v3107_v38 = vsub.f32 %v3091_v29, %v3103_v3  ;;  %v3106_v39 = vsub.f32 %v3090_v57, %v3100_v47  ;;  %v5131_v3 = vld [vmem:[%s5688_s5 + $0x3] ss:$0 sm:$0xff] }
0x1823   :  { %v5272_v13 = vpop.eup %5271  ;;  %v3114_v1 = vmul.f32 1.442695, %v3107_v38  ;;  %v3112_v28 = vmul.f32 1.442695, %v3106_v39 }
0x1824   :  { %v5274_v41 = vpop.eup %5273  ;;  %v3119_v31 = vsel %vm481_vm15, %v5272_v13, 0.0 }
0x1825   :  { %5275 = vpow2.f32 %v3114_v1  ;;  %v2877_v36 = vsel %vm481_vm15, %v5274_v41, 0.0 }
0x1826   :  { %5277 = vpow2.f32 %v3112_v28  ;;  %3120 = vadd.xlane.f32.xlu0 %v3119_v31  ;;  %2878 = vadd.xlane.f32.xlu1 %v2877_v36 }
0x182b   :  { %v5276_v46 = vpop.eup %5275 }
0x182c   :  { %v5278_v49 = vpop.eup %5277  ;;  %v3125_v24 = vsel %vm481_vm15, %v5276_v46, 0.0 }
0x182d   :  { %3126 = vadd.xlane.f32.xlu2 %v3125_v24  ;;  %v3122_v51 = vsel %vm481_vm15, %v5278_v49, 0.0 }
0x182e   :  { %3123 = vadd.xlane.f32.xlu1 %v3122_v51 }
0x1880   :  { %v2870_v40 = vpop.xlane.xlu0 %2869 }
0x1881   :  { %5279 = vrcp.f32 %v2870_v40 }
0x1887   :  { %v5280_v52 = vpop.eup %5279 }
0x1888   :  { %v2884_v53 = vmul.f32 %v5280_v52, %v5264_v4  ;;  %v2873_v29 = vpop.xlane.xlu2 %2872 }
0x1889   :  { %5281 = vrcp.f32 %v2873_v29 }
0x188a   :  { %4879 = vmatmul.msk.f32.vlgmr.msra.gmra.mxu0 %vm481_vm15, %v2884_v53 }
0x188f   :  { %v5282_v57 = vpop.eup %5281 }
0x1890   :  { %v2885_v58 = vmul.f32 %v5282_v57, %v5266_v16  ;;  %v3118_v61 = vpop.xlane.xlu2 %3117 }
0x1891   :  { %v2876_v7 = vpop.xlane.xlu0 %2875 }
0x1892   :  { %5283 = vrcp.f32 %v2876_v7  ;;  %4880 = vmatmul.msk.f32.gmra.mxu0 %vm481_vm15, %v2885_v58 }
0x1898   :  { %v5284_v21 = vpop.eup %5283 }
0x1899   :  { %v2879_v60 = vpop.xlane.xlu1 %2878  ;;  %v2886_v62 = vmul.f32 %v5284_v21, %v5270_v33  ;;  %v3121_v54 = vpop.xlane.xlu0 %3120 }
0x189a   :  { %5285 = vrcp.f32 %v2879_v60 }
0x189b   :  { %4881 = vmatmul.msk.f32.gmra.mxu0 %vm481_vm15, %v2886_v62  ;;  %5287 = vrcp.f32 %v3118_v61 }
0x189c   :  { %5289 = vrcp.f32 %v3121_v54 }
0x18a0   :  { %v5286_v45 = vpop.eup %5285  ;;  %v3127_v10 = vpop.xlane.xlu2 %3126 }
0x18a1   :  { %v2887_v22 = vmul.f32 %v5286_v45, %v5274_v41  ;;  %v5288_v42 = vpop.eup %5287  ;;  %v3124_v8 = vpop.xlane.xlu1 %3123 }
0x18a2   :  { %v3132_v4 = vmul.f32 %v5288_v42, %v5268_v44  ;;  %v5290_v19 = vpop.eup %5289  ;;  %5291 = vrcp.f32 %v3124_v8 }
0x18a3   :  { %4882 = vmatmul.msk.f32.gmra.mxu0 %vm481_vm15, %v2887_v22  ;;  %v3133_v55 = vmul.f32 %v5290_v19, %v5272_v13  ;;  %5293 = vrcp.f32 %v3127_v10 }
0x18a8   :  { %v5292_v12 = vpop.eup %5291 }
0x18a9   :  { %v3134_v18 = vmul.f32 %v5292_v12, %v5278_v49  ;;  %v5294_v16 = vpop.eup %5293 }
0x18aa   :  { %v3135_v14 = vmul.f32 %v5294_v16, %v5276_v46 }
0x18ab   :  { %4914 = vmatmul.msk.f32.vlgmr.msrb.gmra.mxu0 %vm481_vm15, %v3132_v4 }
0x18b3   :  { %4915 = vmatmul.msk.f32.gmra.mxu0 %vm481_vm15, %v3133_v55 }
0x18bb   :  { %4916 = vmatmul.msk.f32.gmra.mxu0 %vm481_vm15, %v3134_v18 }
0x18c3   :  { %4917 = vmatmul.msk.f32.gmra.mxu0 %vm481_vm15, %v3135_v14 }
0x1907   :  { %v2917_v0 = vpop.f32.mrf.mxu0 }
0x1908   :  { %4924 = vmatmul.msk.f32.vlgmr.msra.gmra.mxu2 %vm481_vm15, %v2917_v0  ;;  %v4941_v0 = vld [vmem:[%s5489_s7 + $0x118] sm:$0xff] }
0x1909   :  { %3452 = vmatpush.msra.mxu0 %v4941_v0 }
0x190f   :  { %v2920_v6 = vpop.f32.mrf.mxu0 }
0x1910   :  { %4925 = vmatmul.msk.f32.gmra.mxu2 %vm481_vm15, %v2920_v6  ;;  %v4940_v6 = vld [vmem:[%s5489_s7 + $0x110] sm:$0xff] }
0x1911   :  { %3453 = vmatpush.msra.mxu0 %v4940_v6 }
0x1918   :  { %v2923_v26 = vpop.f32.mrf.mxu0 }
0x1919   :  { %4926 = vmatmul.msk.f32.gmra.mxu2 %vm481_vm15, %v2923_v26  ;;  %v4948_v26 = vld [vmem:[%s5494_s11 + $0x108] sm:$0xff] }
0x191a   :  { %3505 = vmatpush.msra.mxu1 %v4948_v26 }
0x1920   :  { %v2926_v44 = vpop.f32.mrf.mxu0 }
0x1921   :  { %4927 = vmatmul.msk.f32.gmra.mxu2 %vm481_vm15, %v2926_v44  ;;  %v4939_v44 = vld [vmem:[%s5489_s7 + $0x108] sm:$0xff] }
0x1922   :  { %3454 = vmatpush.msra.mxu0 %v4939_v44 }
0x1928   :  { %v3165_v48 = vpop.f32.mrf.mxu0 }
0x1929   :  { %4920 = vmatmul.msk.f32.vlgmr.msrb.gmra.mxu1 %vm481_vm15, %v3165_v48  ;;  %v4947_v48 = vld [vmem:[%s5494_s11 + $0x100] sm:$0xff] }
0x192a   :  { %3506 = vmatpush.msra.mxu1 %v4947_v48 }
0x1930   :  { %v3168_v32 = vpop.f32.mrf.mxu0 }
0x1931   :  { %4921 = vmatmul.msk.f32.gmra.mxu1 %vm481_vm15, %v3168_v32  ;;  %v4938_v32 = vld [vmem:[%s5489_s7 + $0x100] sm:$0xff] }
0x1932   :  { %3455 = vmatpush.msra.mxu0 %v4938_v32 }
0x1938   :  { %v3171_v33 = vpop.f32.mrf.mxu0 }
0x1939   :  { %4922 = vmatmul.msk.f32.gmra.mxu1 %vm481_vm15, %v3171_v33 }
0x1940   :  { %v3174_v34 = vpop.f32.mrf.mxu0 }
0x1941   :  { %4923 = vmatmul.msk.f32.gmra.mxu1 %vm481_vm15, %v3174_v34 }
0x198b   :  { %v3250_v35 = vpop.f32.mrf.mxu2 }
0x1993   :  { %v3253_v13 = vpop.f32.mrf.mxu2 }
0x199c   :  { %v3256_v49 = vpop.f32.mrf.mxu2 }
0x19a6   :  { %v3209_v47 = vpop.f32.mrf.mxu1 }
0x19a7   :  { %v3251_v38 = vadd.f32 %v3250_v35, %v3209_v47 }
0x19a9   :  { %v3267_v39 = vadd.f32 %v5131_v3, %v3251_v38 }
0x19ab   :  { %v3271_v1 = vadd.f32 %v3267_v39, %v5987_v50  ;;  %v3259_v50 = vpop.f32.mrf.mxu2 }
0x19ad   :  { %v3279_v28 = vsel %vm244_vm1, %v3271_v1, 0.0 }
0x19ae   :  { %3280 = vadd.xlane.f32.xlu0 %v3279_v28  ;;  %v3212_v41 = vpop.f32.mrf.mxu1 }
0x19af   :  { %v3254_v31 = vadd.f32 %v3253_v13, %v3212_v41 }
0x19b1   :  { %v3268_v36 = vadd.f32 %v5131_v3, %v3254_v31 }
0x19b3   :  { %v3272_v46 = vadd.f32 %v3268_v36, %v6010_v25 }
0x19b5   :  { %v3282_v24 = vsel %vm244_vm1, %v3272_v46, 0.0 }
0x19b6   :  { %3283 = vadd.xlane.f32.xlu1 %v3282_v24  ;;  %v3215_v51 = vpop.f32.mrf.mxu1 }
0x19b7   :  { %v3257_v40 = vadd.f32 %v3256_v49, %v3215_v51 }
0x19b9   :  { %v3269_v52 = vadd.f32 %v5131_v3, %v3257_v40  ;;  %v6398_v40 = vld [vmem:[%s5435_s21 + $0x6] ss:$0 sm:$0xff] }
0x19bb   :  { %v3273_v53 = vadd.f32 %v3269_v52, %v6049_v59 }
0x19bd   :  { %v3285_v29 = vsel %vm244_vm1, %v3273_v53, 0.0 }
0x19be   :  { %3286 = vadd.xlane.f32.xlu2 %v3285_v29  ;;  %v3218_v57 = vpop.f32.mrf.mxu1  ;;  %v6401_v29 = vld [vmem:[%s5442_s25 + $0x6] ss:$0 sm:$0xff] }
0x19bf   :  { %v3260_v58 = vadd.f32 %v3259_v50, %v3218_v57  ;;  %v4985_v57 = vld [vmem:[%s5494_s11 + $0x138] sm:$0xff] }
0x19c0   :  { %3713 = vmatpush.msrb.mxu0 %v4985_v57 }
0x19c1   :  { %v3270_v7 = vadd.f32 %v5131_v3, %v3260_v58  ;;  %v4984_v58 = vld [vmem:[%s5494_s11 + $0x130] sm:$0xff] }
0x19c2   :  { %3714 = vmatpush.msrb.mxu0 %v4984_v58 }
0x19c3   :  { %v3274_v21 = vadd.f32 %v3270_v7, %v6060_v43 }
0x19c5   :  { %v3288_v25 = vsel %vm244_vm1, %v3274_v21, 0.0 }
0x19c6   :  { %3289 = vadd.xlane.f32.xlu0 %v3288_v25 }
0x1a21   :  { %v3281_v60 = vpop.xlane.xlu0 %3280 }
0x1a22   :  { %v3291_v62 = vmul.f32 %v3281_v60, %v5446_v37 }
0x1a24   :  { %v6363_v61 = vsub.f32 %v3271_v1, %v3291_v62  ;;  %v4983_v62 = vld [vmem:[%s5494_s11 + $0x128] sm:$0xff] }
0x1a25   :  { %3715 = vmatpush.msrb.mxu0 %v4983_v62 }
0x1a26   :  { %v3299_v59 = vmul.f32 %v6363_v61, %v6363_v61 }
0x1a28   :  { %v3303_v45 = vsel %vm244_vm1, %v3299_v59, 0.0 }
0x1a29   :  { %3304 = vadd.xlane.f32.xlu1 %v3303_v45  ;;  %v3284_v22 = vpop.xlane.xlu1 %3283 }
0x1a2a   :  { %v3292_v2 = vmul.f32 %v3284_v22, %v5446_v37 }
0x1a2c   :  { %v6369_v54 = vsub.f32 %v3272_v46, %v3292_v2 }
0x1a2e   :  { %v3300_v43 = vmul.f32 %v6369_v54, %v6369_v54 }
0x1a30   :  { %v3306_v42 = vsel %vm244_vm1, %v3300_v43, 0.0 }
0x1a31   :  { %3307 = vadd.xlane.f32.xlu2 %v3306_v42  ;;  %v3287_v4 = vpop.xlane.xlu2 %3286 }
0x1a32   :  { %v3293_v8 = vmul.f32 %v3287_v4, %v5446_v37  ;;  %v5353_v4 = vld [vmem:[%s5972_s13] sm:$0xff] }
0x1a34   :  { %v6375_v19 = vsub.f32 %v3273_v53, %v3293_v8 }
0x1a36   :  { %v3301_v55 = vmul.f32 %v6375_v19, %v6375_v19 }
0x1a38   :  { %v3309_v10 = vsel %vm244_vm1, %v3301_v55, 0.0 }
0x1a39   :  { %v3290_v12 = vpop.xlane.xlu0 %3289  ;;  %3310 = vadd.xlane.f32.xlu0 %v3309_v10 }
0x1a3a   :  { %v3294_v18 = vmul.f32 %v3290_v12, %v5446_v37 }
0x1a3c   :  { %v6381_v16 = vsub.f32 %v3274_v21, %v3294_v18 }
0x1a3e   :  { %v3302_v14 = vmul.f32 %v6381_v16, %v6381_v16 }
0x1a40   :  { %v3312_v56 = vsel %vm244_vm1, %v3302_v14, 0.0 }
0x1a41   :  { %3313 = vadd.xlane.f32.xlu1 %v3312_v56 }
0x1a9c   :  { %v3305_v33 = vpop.xlane.xlu1 %3304 }
0x1a9d   :  { %v3315_v34 = vmul.f32 %v3305_v33, %v5446_v37 }
0x1a9f   :  { %v3319_v35 = vadd.f32 1e-06, %v3315_v34 }
0x1aa1   :  { %5295 = vrsqrt.f32 %v3319_v35  ;;  %vm3329_vm5 = vweird.f32 %v3319_v35 }
0x1aa4   :  { %v3308_v3 = vpop.xlane.xlu2 %3307 }
0x1aa5   :  { %v3316_v47 = vmul.f32 %v3308_v3, %v5446_v37 }
0x1aa7   :  { %v5296_v38 = vpop.eup %5295  ;;  %v3320_v39 = vadd.f32 1e-06, %v3316_v47 }
0x1aa8   :  { %v3324_v13 = vmul.f32 %v5296_v38, %v3319_v35  ;;  %vm3330_vm4 = vweird.f32 %v5296_v38 }
0x1aa9   :  { %5297 = vrsqrt.f32 %v3320_v39  ;;  %vm3331_vm6 = vmor %vm3329_vm5, %vm3330_vm4  ;;  %vm3339_vm8 = vweird.f32 %v3320_v39 }
0x1aaa   :  { %v3325_v1 = vmul.f32 %v5296_v38, %v3324_v13 }
0x1aac   :  { %v3326_v28 = vmul.f32 0.5, %v3325_v1  ;;  %v3311_v41 = vpop.xlane.xlu0 %3310 }
0x1aad   :  { %v3317_v31 = vmul.f32 %v3311_v41, %v5446_v37  ;;  %v5356_v41 = vld [vmem:[%s5972_s13 + $0x18] sm:$0xff] }
0x1aae   :  { %v3327_v36 = vsub.f32 1.5, %v3326_v28 }
0x1aaf   :  { %v5298_v46 = vpop.eup %5297  ;;  %v3321_v49 = vadd.f32 1e-06, %v3317_v31 }
0x1ab0   :  { %v3328_v24 = vmul.f32 %v5296_v38, %v3327_v36  ;;  %v3334_v51 = vmul.f32 %v5298_v46, %v3320_v39  ;;  %vm3340_vm7 = vweird.f32 %v5298_v46 }
0x1ab1   :  { %5299 = vrsqrt.f32 %v3321_v49  ;;  %vm3341_vm9 = vmor %vm3339_vm8, %vm3340_vm7  ;;  %vm3349_vm11 = vweird.f32 %v3321_v49 }
0x1ab2   :  { %v3332_v52 = vsel %vm3331_vm6, %v5296_v38, %v3328_v24  ;;  %v3335_v53 = vmul.f32 %v5298_v46, %v3334_v51  ;;  %v5355_v38 = vld [vmem:[%s5972_s13 + $0x10] sm:$0xff] }
0x1ab3   :  { %v3363_v50 = vmul.f32 %v3332_v52, %v6363_v61  ;;  %v4982_v61 = vld [vmem:[%s5494_s11 + $0x120] sm:$0xff] }
0x1ab4   :  { %v3336_v7 = vmul.f32 0.5, %v3335_v53  ;;  %v3314_v21 = vpop.xlane.xlu1 %3313  ;;  %3716 = vmatpush.msrb.mxu0 %v4982_v61  ;;  %v5135_v53 = vld [vmem:[%s5518_s15 + $0x8] ss:$0 sm:$0xff]  ;;  %v4969_v61 = vld [vmem:[%s5484_s3 + $0x138] sm:$0xff] }
0x1ab5   :  { %v3370_v25 = vmul.f32 %v6398_v40, %v3363_v50  ;;  %v3318_v60 = vmul.f32 %v3314_v21, %v5446_v37 }
0x1ab6   :  { %v3337_v59 = vsub.f32 1.5, %v3336_v7 }
0x1ab7   :  { %v5300_v45 = vpop.eup %5299  ;;  %v6410_v22 = vadd.f32 %v6401_v29, %v3370_v25  ;;  %v3322_v2 = vadd.f32 1e-06, %v3318_v60 }
0x1ab8   :  { %v3338_v43 = vmul.f32 %v5298_v46, %v3337_v59  ;;  %v3344_v42 = vmul.f32 %v5300_v45, %v3321_v49  ;;  %vm3350_vm10 = vweird.f32 %v5300_v45  ;;  %v3412_v59 = vpop.f32.mrf.mxu3 }
0x1ab9   :  { %5301 = vrsqrt.f32 %v3322_v2  ;;  %4952 = vmatmul.msk.f32.vlgmr.msra.gmra.mxu1 %vm244_vm1, %v6410_v22  ;;  %v6417_v8 = vadd.f32 %v5353_v4, %v6410_v22  ;;  %vm3351_vm12 = vmor %vm3349_vm11, %vm3350_vm10  ;;  %vm3359_vm0 = vweird.f32 %v3322_v2  ;;  %v4968_v4 = vld [vmem:[%s5484_s3 + $0x130] sm:$0xff] }
0x1aba   :  { %v3342_v55 = vsel %vm3341_vm9, %v5298_v46, %v3338_v43  ;;  %v3345_v10 = vmul.f32 %v5300_v45, %v3344_v42 }
0x1abb   :  { %v3364_v12 = vmul.f32 %v3342_v55, %v6369_v54  ;;  %4943 = vmatmul.msk.f32.vlgmr.msra.gmra.mxu0 %vm244_vm1, %v6417_v8  ;;  %v5354_v54 = vld [vmem:[%s5972_s13 + $0x8] sm:$0xff]  ;;  %s4588_s13 = sld [smem:[%s6728_s0 + %s5398_s8]]  }
0x1abc   :  { %v3346_v18 = vmul.f32 0.5, %v3345_v10  ;;  %v4967_v55 = vld [vmem:[%s5484_s3 + $0x128] sm:$0xff]  ;;  %v4966_v10 = vld [vmem:[%s5484_s3 + $0x120] sm:$0xff]  ;;  %s4585_s3 = sld [smem:[%s6728_s0 + %s5393_s22]]  }
0x1abd   :  { %v3371_v14 = vmul.f32 %v6398_v40, %v3364_v12 }
0x1abe   :  { %v3347_v56 = vsub.f32 1.5, %v3346_v18 }
0x1abf   :  { %v5302_v30 = vpop.eup %5301  ;;  %v6424_v0 = vadd.f32 %v6401_v29, %v3371_v14 }
0x1ac0   :  { %v3348_v23 = vmul.f32 %v5300_v45, %v3347_v56  ;;  %v3354_v6 = vmul.f32 %v5302_v30, %v3322_v2  ;;  %vm3360_vm14 = vweird.f32 %v5302_v30  ;;  %v3415_v12 = vpop.f32.mrf.mxu3  ;;  %v5136_v56 = vld [vmem:[%s5536_s19 + $0x9] ss:$0 sm:$0xff] }
0x1ac1   :  { %4953 = vmatmul.msk.f32.gmra.mxu1 %vm244_vm1, %v6424_v0  ;;  %v6430_v26 = vadd.f32 %v5354_v54, %v6424_v0  ;;  %vm3361_vm2 = vmor %vm3359_vm0, %vm3360_vm14 }
0x1ac2   :  { %v3352_v44 = vsel %vm3351_vm12, %v5300_v45, %v3348_v23  ;;  %v3355_v48 = vmul.f32 %v5302_v30, %v3354_v6  ;;  %v5130_v45 = vld [vmem:[%s5479_s29 + $0x8] ss:$0 sm:$0xff] }
0x1ac3   :  { %v3365_v32 = vmul.f32 %v3352_v44, %v6375_v19  ;;  %4944 = vmatmul.msk.f32.gmra.mxu0 %vm244_vm1, %v6430_v26  ;;  %v3413_v43 = vadd.f32 %v5130_v45, %v3412_v59  ;;  %v3416_v18 = vadd.f32 %v5130_v45, %v3415_v12 }
0x1ac4   :  { %v3356_v33 = vmul.f32 0.5, %v3355_v48 }
0x1ac5   :  { %v3372_v34 = vmul.f32 %v6398_v40, %v3365_v32 }
0x1ac6   :  { %v3357_v35 = vsub.f32 1.5, %v3356_v33  ;;  %v6487_v33 = vld [vmem:[%s6117_s20] sm:$0xff] }
0x1ac7   :  { %v6437_v3 = vadd.f32 %v6401_v29, %v3372_v34 }
0x1ac8   :  { %v3358_v47 = vmul.f32 %v5302_v30, %v3357_v35 }
0x1ac9   :  { %4954 = vmatmul.msk.f32.gmra.mxu1 %vm244_vm1, %v6437_v3  ;;  %v6443_v19 = vadd.f32 %v5355_v38, %v6437_v3  ;;  %v6492_v38 = vld [vmem:[%s6117_s20 + $0x8] sm:$0xff] }
0x1aca   :  { %v3362_v39 = vsel %vm3361_vm2, %v5302_v30, %v3358_v47 }
0x1acb   :  { %v3366_v13 = vmul.f32 %v3362_v39, %v6381_v16  ;;  %4945 = vmatmul.msk.f32.gmra.mxu0 %vm244_vm1, %v6443_v19 }
0x1acd   :  { %v3373_v1 = vmul.f32 %v6398_v40, %v3366_v13  ;;  %v5134_v40 = vld [vmem:[%s5536_s19 + $0x8] ss:$0 sm:$0xff] }
0x1acf   :  { %v6450_v28 = vadd.f32 %v6401_v29, %v3373_v1 }
0x1ad1   :  { %4955 = vmatmul.msk.f32.gmra.mxu1 %vm244_vm1, %v6450_v28  ;;  %v6456_v31 = vadd.f32 %v5356_v41, %v6450_v28 }
0x1ad3   :  { %4946 = vmatmul.msk.f32.gmra.mxu0 %vm244_vm1, %v6456_v31 }
0x1adb   :  { %4987 = vmatmul.msk.f32.vlgmr.msrb.gmra.mxu0 %vm244_vm1, %v6410_v22 }
0x1ae3   :  { %4988 = vmatmul.msk.f32.gmra.mxu0 %vm244_vm1, %v6424_v0 }
0x1aeb   :  { %4989 = vmatmul.msk.f32.gmra.mxu0 %vm244_vm1, %v6437_v3 }
0x1af3   :  { %4990 = vmatmul.msk.f32.gmra.mxu0 %vm244_vm1, %v6450_v28 }
0x1b36   :  { %v3508_v16 = vpop.f32.mrf.mxu1 }
0x1b37   :  { %v3509_v21 = vadd.f32 %v5134_v40, %v3508_v16 }
0x1b38   :  { %v3457_v36 = vpop.f32.mrf.mxu0 }
0x1b39   :  { %v3458_v2 = vadd.f32 %v5135_v53, %v3457_v36 }
0x1b3e   :  { %v3511_v46 = vpop.f32.mrf.mxu1 }
0x1b3f   :  { %v3512_v7 = vadd.f32 %v5134_v40, %v3511_v46 }
0x1b40   :  { %v3460_v49 = vpop.f32.mrf.mxu0 }
0x1b41   :  { %v3461_v62 = vadd.f32 %v5135_v53, %v3460_v49 }
0x1b46   :  { %v3514_v24 = vpop.f32.mrf.mxu1 }
0x1b47   :  { %v3515_v57 = vadd.f32 %v5134_v40, %v3514_v24 }
0x1b48   :  { %v3463_v51 = vpop.f32.mrf.mxu0 }
0x1b49   :  { %v3464_v25 = vadd.f32 %v5135_v53, %v3463_v51 }
0x1b4e   :  { %v3517_v52 = vpop.f32.mrf.mxu1 }
0x1b4f   :  { %v3518_v29 = vadd.f32 %v5134_v40, %v3517_v52  ;;  %v4976_v52 = vld [vmem:[%s5489_s7 + $0x138] sm:$0xff] }
0x1b50   :  { %v3466_v50 = vpop.f32.mrf.mxu0 }
0x1b51   :  { %v3467_v58 = vadd.f32 %v5135_v53, %v3466_v50  ;;  %3605 = vmatpush.msra.mxu3 %v3518_v29  ;;  %v4975_v53 = vld [vmem:[%s5489_s7 + $0x130] sm:$0xff]  ;;  %v4974_v29 = vld [vmem:[%s5489_s7 + $0x128] sm:$0xff]  ;;  %v4973_v50 = vld [vmem:[%s5489_s7 + $0x120] sm:$0xff]  ;;  %s5394_s7 = smov 27  }
0x1b53   :  { %4956 = vmatpush.xpose.msk.msrb.mxu2 %vm481_vm15, %v3467_v58  ;;  %3606 = vmatpush.msra.mxu3 %v3515_v57 }
0x1b55   :  { %3607 = vmatpush.msra.mxu3 %v3512_v7 }
0x1b57   :  { %4957 = vmatpush.xpose.msk.msrb.mxu2 %vm481_vm15, %v3464_v25  ;;  %3608 = vmatpush.msra.mxu3 %v3509_v21 }
0x1b58   :  { %v3718_v60 = vpop.f32.mrf.mxu0 }
0x1b59   :  { %v3719_v44 = vadd.f32 %v5136_v56, %v3718_v60  ;;  %3674 = vmatpush.msrb.mxu3 %v4976_v52  ;;  %v4999_v52 = vld [vmem:[%s5654_s30 + $0x90] sm:$0xff] }
0x1b5b   :  { %4958 = vmatpush.xpose.msk.msrb.mxu2 %vm481_vm15, %v3461_v62  ;;  %3675 = vmatpush.msrb.mxu3 %v4975_v53 }
0x1b5d   :  { %3676 = vmatpush.msrb.mxu3 %v4974_v29 }
0x1b5f   :  { %4959 = vmatpush.xpose.msk.msrb.mxu2 %vm481_vm15, %v3458_v2  ;;  %3677 = vmatpush.msrb.mxu3 %v4973_v50 }
0x1b60   :  { %v3721_v42 = vpop.f32.mrf.mxu0 }
0x1b61   :  { %v3722_v54 = vadd.f32 %v5136_v56, %v3721_v42 }
0x1b62   :  { %4960 = vmatmul.msk.f32.vlgmr.msrb.gmra.mxu2 %vm481_vm15, %v3413_v43  ;;  %v5138_v43 = vld [vmem:[%s5518_s15 + $0x9] ss:$0 sm:$0xff]  ;;  %s5387_s15 = smov 32  }
0x1b63   :  { %3641 = vmatpush.msra.mxu2 %v4969_v61 }
0x1b65   :  { %3642 = vmatpush.msra.mxu2 %v4968_v4 }
0x1b67   :  { %3643 = vmatpush.msra.mxu2 %v4967_v55 }
0x1b68   :  { %v3724_v14 = vpop.f32.mrf.mxu0 }
0x1b69   :  { %3644 = vmatpush.msra.mxu2 %v4966_v10  ;;  %v3725_v6 = vadd.f32 %v5136_v56, %v3724_v14 }
0x1b6a   :  { %4961 = vmatmul.msk.f32.gmra.mxu2 %vm481_vm15, %v3416_v18 }
0x1b70   :  { %v3727_v30 = vpop.f32.mrf.mxu0 }
0x1b71   :  { %v3728_v23 = vadd.f32 %v5136_v56, %v3727_v30 }
0x1b72   :  { %4971 = vmatmul.msk.f32.vlgmr.msra.gmra.mxu2 %vm244_vm1, %v6253_v20 }
0x1b73   :  { %3815 = vmatpush.msrb.mxu2 %v3728_v23 }
0x1b75   :  { %3816 = vmatpush.msrb.mxu2 %v3725_v6 }
0x1b77   :  { %3817 = vmatpush.msrb.mxu2 %v3722_v54 }
0x1b79   :  { %3818 = vmatpush.msrb.mxu2 %v3719_v44 }
0x1b7a   :  { %4972 = vmatmul.msk.f32.gmra.mxu2 %vm244_vm1, %v6266_v63 }
0x1be5   :  { %v3555_v48 = vpop.f32.mrf.mxu2 }
0x1be6   :  { %v3561_v32 = vmul.f32 0.25, %v3555_v48 }
0x1be8   :  { %v3563_v34 = vadd.f32 %v6487_v33, %v3561_v32 }
0x1bea   :  { %v3565_v35 = vsel %vm244_vm1, %v3563_v34, -inf }
0x1beb   :  { %3566 = vmax.xlane.f32.xlu2 %v3565_v35 }
0x1bed   :  { %v3558_v20 = vpop.f32.mrf.mxu2 }
0x1bee   :  { %v3562_v47 = vmul.f32 0.25, %v3558_v20 }
0x1bf0   :  { %v3564_v39 = vadd.f32 %v6492_v38, %v3562_v47 }
0x1bf2   :  { %v3568_v13 = vsel %vm244_vm1, %v3564_v39, -inf }
0x1bf3   :  { %3569 = vmax.xlane.f32.xlu0 %v3568_v13 }
0x1bf5   :  { %v3646_v55 = vpop.f32.mrf.mxu2 }
0x1bfd   :  { %v3649_v12 = vpop.f32.mrf.mxu2 }
0x1c5e   :  { %v3567_v63 = vpop.xlane.xlu2 %3566 }
0x1c5f   :  { %v3571_v1 = vsub.f32 %v3563_v34, %v3567_v63 }
0x1c61   :  { %v3573_v41 = vmul.f32 1.442695, %v3571_v1  ;;  %v4965_v1 = vld [vmem:[%s5654_s30 + $0x88] sm:$0xff] }
0x1c62   :  { %3878 = vmatpush.msra.mxu2 %v4965_v1 }
0x1c63   :  { %5303 = vpow2.f32 %v3573_v41  ;;  %v4964_v41 = vld [vmem:[%s5654_s30 + $0x80] sm:$0xff] }
0x1c64   :  { %3879 = vmatpush.msra.mxu2 %v4964_v41 }
0x1c66   :  { %v3570_v16 = vpop.xlane.xlu0 %3569 }
0x1c67   :  { %v3572_v36 = vsub.f32 %v3564_v39, %v3570_v16 }
0x1c69   :  { %v5304_v46 = vpop.eup %5303  ;;  %v3575_v49 = vmul.f32 1.442695, %v3572_v36  ;;  %v5000_v36 = vld [vmem:[%s5654_s30 + $0x98] sm:$0xff]  ;;  %s4578_s30 = sld [smem:[%s6728_s0 + %s5394_s7]]  }
0x1c6a   :  { %v3577_v24 = vsel %vm244_vm1, %v5304_v46, 0.0 }
0x1c6b   :  { %5305 = vpow2.f32 %v3575_v49  ;;  %3578 = vadd.xlane.f32.xlu1 %v3577_v24 }
0x1c71   :  { %v5306_v51 = vpop.eup %5305 }
0x1c72   :  { %v3580_v40 = vsel %vm244_vm1, %v5306_v51, 0.0 }
0x1c73   :  { %3581 = vadd.xlane.f32.xlu2 %v3580_v40 }
0x1cde   :  { %v3579_v57 = vpop.xlane.xlu1 %3578 }
0x1cdf   :  { %5307 = vrcp.f32 %v3579_v57  ;;  %v5139_v57 = vld [vmem:[%s5688_s5 + $0x4] ss:$0 sm:$0xff]  ;;  %s4583_s5 = sld [smem:[%s6728_s0 + %s5387_s15]]  }
0x1ce5   :  { %v5308_v58 = vpop.eup %5307 }
0x1ce6   :  { %v3585_v7 = vmul.f32 %v5308_v58, %v5304_v46  ;;  %v3582_v21 = vpop.xlane.xlu2 %3581 }
0x1ce7   :  { %5309 = vrcp.f32 %v3582_v21 }
0x1ce8   :  { %4962 = vmatmul.msk.f32.vlgmr.msra.gmra.mxu3 %vm244_vm1, %v3585_v7 }
0x1ced   :  { %v5310_v25 = vpop.eup %5309 }
0x1cee   :  { %v3586_v60 = vmul.f32 %v5310_v25, %v5306_v51 }
0x1cf0   :  { %4963 = vmatmul.msk.f32.gmra.mxu3 %vm244_vm1, %v3586_v60 }
0x1cf8   :  { %4978 = vmatmul.msk.f32.vlgmr.msrb.gmra.mxu3 %vm244_vm1, %v6417_v8 }
0x1d00   :  { %4979 = vmatmul.msk.f32.gmra.mxu3 %vm244_vm1, %v6430_v26 }
0x1d08   :  { %4980 = vmatmul.msk.f32.gmra.mxu3 %vm244_vm1, %v6443_v19  ;;  %v5137_v19 = vld [vmem:[%s5479_s29 + $0x9] ss:$0 sm:$0xff]  ;;  %s5386_s29 = smov 33  }
0x1d09   :  { %v3650_v18 = vadd.f32 %v5137_v19, %v3649_v12  ;;  %s6552_s11 = sld [smem:[%s6728_s0 + %s5386_s29]]   ;;  %v3957_v12 = vld [vmem:[%s4583_s5 + $0x18] sm:$0xff] }
0x1d0a   :  { %3980 = vmatpush.msra.mxu3 %v3957_v12 }
0x1d10   :  { %4981 = vmatmul.msk.f32.gmra.mxu3 %vm244_vm1, %v6456_v31  ;;  %v3647_v31 = vadd.f32 %v5137_v19, %v3646_v55 }
0x1d6b   :  { %v3610_v62 = vpop.f32.mrf.mxu3 }
0x1d73   :  { %v3613_v59 = vpop.f32.mrf.mxu3 }
0x1d7b   :  { %v3679_v45 = vpop.f32.mrf.mxu3 }
0x1d7c   :  { %v3680_v10 = vadd.f32 %v5138_v43, %v3679_v45 }
0x1d83   :  { %v3682_v2 = vpop.f32.mrf.mxu3 }
0x1d84   :  { %v3683_v26 = vadd.f32 %v5138_v43, %v3682_v2 }
0x1d8b   :  { %v3685_v61 = vpop.f32.mrf.mxu3 }
0x1d8c   :  { %v3686_v8 = vadd.f32 %v5138_v43, %v3685_v61 }
0x1d93   :  { %v3688_v42 = vpop.f32.mrf.mxu3 }
0x1d94   :  { %v3689_v4 = vadd.f32 %v5138_v43, %v3688_v42 }
0x1d96   :  { %4991 = vmatpush.xpose.msk.msrb.mxu1 %vm481_vm15, %v3689_v4 }
0x1d9a   :  { %4992 = vmatpush.xpose.msk.msrb.mxu1 %vm481_vm15, %v3686_v8 }
0x1d9e   :  { %4993 = vmatpush.xpose.msk.msrb.mxu1 %vm481_vm15, %v3683_v26 }
0x1da2   :  { %4994 = vmatpush.xpose.msk.msrb.mxu1 %vm481_vm15, %v3680_v10 }
0x1da5   :  { %4995 = vmatmul.msk.f32.vlgmr.msrb.gmra.mxu1 %vm481_vm15, %v3647_v31 }
0x1da6   :  { %3849 = vmatpush.msra.mxu1 %v5000_v36 }
0x1da8   :  { %3850 = vmatpush.msra.mxu1 %v4999_v52 }
0x1dad   :  { %4996 = vmatmul.msk.f32.gmra.mxu1 %vm481_vm15, %v3650_v18  ;;  %v3956_v18 = vld [vmem:[%s4583_s5 + $0x10] sm:$0xff] }
0x1dae   :  { %3981 = vmatpush.msra.mxu3 %v3956_v18 }
0x1e22   :  { %v3765_v14 = vpop.f32.mrf.mxu1 }
0x1e23   :  { %v3771_v56 = vmul.f32 0.25, %v3765_v14  ;;  %v3955_v14 = vld [vmem:[%s4583_s5 + $0x8] sm:$0xff] }
0x1e24   :  { %3982 = vmatpush.msra.mxu3 %v3955_v14 }
0x1e25   :  { %v3773_v30 = vadd.f32 %v6487_v33, %v3771_v56  ;;  %v3954_v56 = vld [vmem:[%s4583_s5] sm:$0xff] }
0x1e26   :  { %3983 = vmatpush.msra.mxu3 %v3954_v56 }
0x1e27   :  { %v3775_v23 = vsel %vm244_vm1, %v3773_v30, -inf }
0x1e28   :  { %3776 = vmax.xlane.f32.xlu0 %v3775_v23 }
0x1e2a   :  { %v3768_v6 = vpop.f32.mrf.mxu1 }
0x1e2b   :  { %v3772_v54 = vmul.f32 0.25, %v3768_v6 }
0x1e2d   :  { %v3774_v44 = vadd.f32 %v6492_v38, %v3772_v54  ;;  %v4137_v54 = vld [vmem:[%s4574_s26 + $0x18] sm:$0xff] }
0x1e2e   :  { %4154 = vmatpush.msrb.mxu3 %v4137_v54 }
0x1e2f   :  { %v3778_v48 = vsel %vm244_vm1, %v3774_v44, -inf }
0x1e30   :  { %3779 = vmax.xlane.f32.xlu1 %v3778_v48  ;;  %v4135_v48 = vld [vmem:[%s4574_s26 + $0x8] sm:$0xff] }
0x1e9b   :  { %v3777_v32 = vpop.xlane.xlu0 %3776 }
0x1e9c   :  { %v3781_v34 = vsub.f32 %v3773_v30, %v3777_v32 }
0x1e9e   :  { %v3783_v35 = vmul.f32 1.442695, %v3781_v34 }
0x1ea0   :  { %5311 = vpow2.f32 %v3783_v35  ;;  %v4134_v35 = vld [vmem:[%s4574_s26] sm:$0xff] }
0x1ea3   :  { %v3780_v20 = vpop.xlane.xlu1 %3779 }
0x1ea4   :  { %v3782_v47 = vsub.f32 %v3774_v44, %v3780_v20  ;;  %v4136_v44 = vld [vmem:[%s4574_s26 + $0x10] sm:$0xff] }
0x1ea5   :  { %4155 = vmatpush.msrb.mxu3 %v4136_v44 }
0x1ea6   :  { %v5312_v33 = vpop.eup %5311  ;;  %v3785_v39 = vmul.f32 1.442695, %v3782_v47 }
0x1ea7   :  { %v3787_v13 = vsel %vm244_vm1, %v5312_v33, 0.0  ;;  %4156 = vmatpush.msrb.mxu3 %v4135_v48 }
0x1ea8   :  { %5313 = vpow2.f32 %v3785_v39  ;;  %3788 = vadd.xlane.f32.xlu2 %v3787_v13 }
0x1ea9   :  { %4157 = vmatpush.msrb.mxu3 %v4134_v35 }
0x1eae   :  { %v5314_v63 = vpop.eup %5313 }
0x1eaf   :  { %v3790_v38 = vsel %vm244_vm1, %v5314_v63, 0.0 }
0x1eb0   :  { %3791 = vadd.xlane.f32.xlu0 %v3790_v38 }
0x1f1b   :  { %v3789_v16 = vpop.xlane.xlu2 %3788 }
0x1f1c   :  { %5315 = vrcp.f32 %v3789_v16  ;;  %v5140_v16 = vld [vmem:[%s5435_s21 + $0x7] ss:$0 sm:$0xff]  ;;  %s4581_s21 = sld [smem:[%s6728_s0 + %s5389_s28]]  }
0x1f22   :  { %v5316_v46 = vpop.eup %5315 }
0x1f23   :  { %v3795_v49 = vmul.f32 %v5316_v46, %v5312_v33  ;;  %v3792_v24 = vpop.xlane.xlu0 %3791  ;;  %v5141_v46 = vld [vmem:[%s5442_s25 + $0x7] ss:$0 sm:$0xff]  ;;  %s5390_s25 = smov 24  }
0x1f24   :  { %5317 = vrcp.f32 %v3792_v24  ;;  %s6573_s9 = sld [smem:[%s6728_s0 + %s5390_s25]]  }
0x1f25   :  { %4997 = vmatmul.msk.f32.vlgmr.msrb.gmra.mxu2 %vm244_vm1, %v3795_v49 }
0x1f2a   :  { %v5318_v51 = vpop.eup %5317  ;;  %v5143_v35 = vld [vmem:[%s6573_s9] ss:$0 sm:$0xff] }
0x1f2b   :  { %v3796_v40 = vmul.f32 %v5318_v51, %v5314_v63 }
0x1f2d   :  { %4998 = vmatmul.msk.f32.gmra.mxu2 %vm244_vm1, %v3796_v40 }
0x1f35   :  { %5003 = vmatmul.msk.f32.vlgmr.msra.gmra.mxu2 %vm481_vm15, %v3610_v62 }
0x1f3d   :  { %5004 = vmatmul.msk.f32.gmra.mxu2 %vm481_vm15, %v3613_v59 }
0x1fa8   :  { %v3820_v53 = vpop.f32.mrf.mxu2 }
0x1fa9   :  { %5001 = vmatmul.msk.f32.vlgmr.msra.gmra.mxu1 %vm481_vm15, %v3820_v53 }
0x1fb0   :  { %v3823_v29 = vpop.f32.mrf.mxu2 }
0x1fb1   :  { %5002 = vmatmul.msk.f32.gmra.mxu1 %vm481_vm15, %v3823_v29 }
0x1fb8   :  { %v3881_v50 = vpop.f32.mrf.mxu2 }
0x1fc0   :  { %v3884_v62 = vpop.f32.mrf.mxu2 }
0x2026   :  { %v3852_v58 = vpop.f32.mrf.mxu1 }
0x2027   :  { %v3882_v7 = vadd.f32 %v3881_v50, %v3852_v58 }
0x2029   :  { %v3892_v21 = vadd.f32 %v5139_v57, %v3882_v7  ;;  %v4457_v7 = vld [vmem:[%s4581_s21 + $0x18] sm:$0xff] }
0x202b   :  { %v3894_v25 = vadd.f32 %v3892_v21, %v6247_v17  ;;  %v4456_v21 = vld [vmem:[%s4581_s21 + $0x10] sm:$0xff] }
0x202d   :  { %v3900_v60 = vsel %vm244_vm1, %v3894_v25, 0.0 }
0x202e   :  { %3901 = vadd.xlane.f32.xlu1 %v3900_v60  ;;  %v3855_v59 = vpop.f32.mrf.mxu1  ;;  %v4454_v60 = vld [vmem:[%s4581_s21] sm:$0xff] }
0x202f   :  { %v3885_v45 = vadd.f32 %v3884_v62, %v3855_v59  ;;  %v4175_v59 = vld [vmem:[%s4578_s30 + $0x20] sm:$0xff] }
0x2031   :  { %v3893_v2 = vadd.f32 %v5139_v57, %v3885_v45 }
0x2033   :  { %v3895_v61 = vadd.f32 %v3893_v2, %v6260_v27  ;;  %v4174_v2 = vld [vmem:[%s4578_s30 + $0x18] sm:$0xff] }
0x2035   :  { %v3903_v43 = vsel %vm244_vm1, %v3895_v61, 0.0 }
0x2036   :  { %3904 = vadd.xlane.f32.xlu2 %v3903_v43 }
0x20a1   :  { %v3902_v42 = vpop.xlane.xlu1 %3901 }
0x20a2   :  { %v3906_v4 = vmul.f32 %v3902_v42, %v5446_v37  ;;  %v4172_v42 = vld [vmem:[%s4578_s30 + $0x8] sm:$0xff] }
0x20a4   :  { %v3908_v8 = vsub.f32 %v3894_v25, %v3906_v4  ;;  %v4455_v25 = vld [vmem:[%s4581_s21 + $0x8] sm:$0xff] }
0x20a6   :  { %v3910_v26 = vmul.f32 %v3908_v8, %v3908_v8 }
0x20a8   :  { %v3912_v55 = vsel %vm244_vm1, %v3910_v26, 0.0 }
0x20a9   :  { %3913 = vadd.xlane.f32.xlu0 %v3912_v55  ;;  %v3905_v17 = vpop.xlane.xlu2 %3904  ;;  %v4171_v55 = vld [vmem:[%s4578_s30] sm:$0xff] }
0x20aa   :  { %v3907_v19 = vmul.f32 %v3905_v17, %v5446_v37 }
0x20ac   :  { %v6544_v10 = vsub.f32 %v3895_v61, %v3907_v19  ;;  %v4173_v61 = vld [vmem:[%s4578_s30 + $0x10] sm:$0xff] }
0x20ae   :  { %v3911_v31 = vmul.f32 %v6544_v10, %v6544_v10 }
0x20b0   :  { %v3915_v27 = vsel %vm244_vm1, %v3911_v31, 0.0 }
0x20b1   :  { %3916 = vadd.xlane.f32.xlu1 %v3915_v27 }
0x211c   :  { %v3914_v30 = vpop.xlane.xlu0 %3913 }
0x211d   :  { %v3918_v23 = vmul.f32 %v3914_v30, %v5446_v37 }
0x211f   :  { %v3920_v6 = vadd.f32 1e-06, %v3918_v23 }
0x2121   :  { %5319 = vrsqrt.f32 %v3920_v6  ;;  %vm3928_vm4 = vweird.f32 %v3920_v6 }
0x2124   :  { %v3917_v32 = vpop.xlane.xlu1 %3916 }
0x2125   :  { %v3919_v34 = vmul.f32 %v3917_v32, %v5446_v37 }
0x2127   :  { %v5320_v20 = vpop.eup %5319  ;;  %v3921_v47 = vadd.f32 1e-06, %v3919_v34 }
0x2128   :  { %v3923_v33 = vmul.f32 %v5320_v20, %v3920_v6  ;;  %vm3929_vm3 = vweird.f32 %v5320_v20 }
0x2129   :  { %5321 = vrsqrt.f32 %v3921_v47  ;;  %vm3930_vm5 = vmor %vm3928_vm4, %vm3929_vm3  ;;  %vm3938_vm7 = vweird.f32 %v3921_v47 }
0x212a   :  { %v3924_v39 = vmul.f32 %v5320_v20, %v3923_v33 }
0x212c   :  { %v3925_v13 = vmul.f32 0.5, %v3924_v39 }
0x212e   :  { %v3926_v63 = vsub.f32 1.5, %v3925_v13 }
0x212f   :  { %v5322_v38 = vpop.eup %5321 }
0x2130   :  { %v3927_v1 = vmul.f32 %v5320_v20, %v3926_v63  ;;  %v3933_v41 = vmul.f32 %v5322_v38, %v3921_v47  ;;  %vm3939_vm6 = vweird.f32 %v5322_v38 }
0x2131   :  { %vm3940_vm8 = vmor %vm3938_vm7, %vm3939_vm6 }
0x2132   :  { %v3931_v37 = vsel %vm3930_vm5, %v5320_v20, %v3927_v1  ;;  %v3934_v36 = vmul.f32 %v5322_v38, %v3933_v41  ;;  %v5145_v41 = vld [vmem:[%s6599_s16] ss:$0 sm:$0xff]  ;;  %s5400_s16 = smov 29  }
0x2133   :  { %v3942_v49 = vmul.f32 %v3931_v37, %v3908_v8  ;;  %s6674_s29 = sld [smem:[%s6728_s0 + %s5400_s16]]  }
0x2134   :  { %v3935_v24 = vmul.f32 0.5, %v3934_v36 }
0x2135   :  { %v3947_v51 = vmul.f32 %v5140_v16, %v3942_v49 }
0x2136   :  { %v3936_v40 = vsub.f32 1.5, %v3935_v24 }
0x2137   :  { %v3952_v52 = vadd.f32 %v5141_v46, %v3947_v51 }
0x2138   :  { %v3937_v53 = vmul.f32 %v5322_v38, %v3936_v40 }
0x2139   :  { %5008 = vmatmul.msk.f32.vlgmr.msra.gmra.mxu3 %vm244_vm1, %v3952_v52 }
0x213a   :  { %v3941_v29 = vsel %vm3940_vm8, %v5322_v38, %v3937_v53  ;;  %4474 = vmatpush.msra.mxu3 %v4457_v7 }
0x213b   :  { %v3943_v50 = vmul.f32 %v3941_v29, %v6544_v10 }
0x213c   :  { %4475 = vmatpush.msra.mxu3 %v4456_v21 }
0x213d   :  { %v3948_v57 = vmul.f32 %v5140_v16, %v3943_v50 }
0x213e   :  { %4476 = vmatpush.msra.mxu3 %v4455_v25 }
0x213f   :  { %v3953_v58 = vadd.f32 %v5141_v46, %v3948_v57 }
0x2140   :  { %4477 = vmatpush.msra.mxu3 %v4454_v60 }
0x2141   :  { %5009 = vmatmul.msk.f32.gmra.mxu3 %vm244_vm1, %v3953_v58 }
0x2149   :  { %5020 = vmatmul.msk.f32.vlgmr.msrb.gmra.mxu3 %vm244_vm1, %v6410_v22  ;;  %v6607_v22 = vld [vmem:[%s4578_s30 + $0x38] sm:$0xff] }
0x2151   :  { %5021 = vmatmul.msk.f32.gmra.mxu3 %vm244_vm1, %v6424_v0  ;;  %v6609_v0 = vld [vmem:[%s4578_s30 + $0x30] sm:$0xff] }
0x2159   :  { %5022 = vmatmul.msk.f32.gmra.mxu3 %vm244_vm1, %v6437_v3  ;;  %v6612_v3 = vld [vmem:[%s4578_s30 + $0x28] sm:$0xff] }
0x2161   :  { %5023 = vmatmul.msk.f32.gmra.mxu3 %vm244_vm1, %v6450_v28  ;;  %v5142_v28 = vld [vmem:[%s6552_s11] ss:$0 sm:$0xff]  ;;  %s5395_s11 = smov 36  }
0x2162   :  { %s4587_s23 = sld [smem:[%s6728_s0 + %s5395_s11]]  }
0x2168   :  { %v4046_v46 = vld [vmem:[%s4587_s23] sm:$0xff]  ;;  %v4047_v49 = vld [vmem:[%s4587_s23 + $0x8] sm:$0xff]  ;;  %v4048_v24 = vld [vmem:[%s4587_s23 + $0x10] sm:$0xff] }
0x2169   :  { %5036 = vmatmul.msk.f32.vlgmr.msra.gmra.mxu3 %vm244_vm1, %v5836_v5  ;;  %v4012_v5 = vld [vmem:[%s4585_s3 + $0x18] sm:$0xff] }
0x216a   :  { %4035 = vmatpush.msra.mxu0 %v4012_v5  ;;  %v4049_v40 = vld [vmem:[%s4587_s23 + $0x18] sm:$0xff] }
0x2171   :  { %5037 = vmatmul.msk.f32.gmra.mxu3 %vm244_vm1, %v5841_v9  ;;  %v4011_v9 = vld [vmem:[%s4585_s3 + $0x10] sm:$0xff] }
0x2172   :  { %4036 = vmatpush.msra.mxu0 %v4011_v9  ;;  %v4091_v9 = vld [vmem:[%s4588_s13] sm:$0xff] }
0x2173   :  { %4120 = vmatpush.msrb.mxu2 %v4091_v9 }
0x2179   :  { %5038 = vmatmul.msk.f32.gmra.mxu3 %vm244_vm1, %v5846_v11  ;;  %v4010_v11 = vld [vmem:[%s4585_s3 + $0x8] sm:$0xff] }
0x217a   :  { %4037 = vmatpush.msra.mxu0 %v4010_v11 }
0x2181   :  { %5039 = vmatmul.msk.f32.gmra.mxu3 %vm244_vm1, %v5851_v15  ;;  %v4009_v15 = vld [vmem:[%s4585_s3] sm:$0xff]  ;;  %s5401_s3 = smov 38  }
0x2182   :  { %4038 = vmatpush.msra.mxu0 %v4009_v15  ;;  %s6689_s19 = sld [smem:[%s6728_s0 + %s5401_s3]]  }
0x2184   :  { %4199 = vmatpush.msrb.mxu0 %v6607_v22 }
0x2186   :  { %4200 = vmatpush.msrb.mxu0 %v6609_v0 }
0x2188   :  { %4201 = vmatpush.msrb.mxu0 %v6612_v3 }
0x218a   :  { %4202 = vmatpush.msrb.mxu0 %v4175_v59 }
0x218c   :  { %4203 = vmatpush.msrb.mxu0 %v4174_v2 }
0x218e   :  { %4204 = vmatpush.msrb.mxu0 %v4173_v61 }
0x2190   :  { %4205 = vmatpush.msrb.mxu0 %v4172_v42 }
0x2192   :  { %4206 = vmatpush.msrb.mxu0 %v4171_v55 }
0x21bc   :  { %v3985_v62 = vpop.f32.mrf.mxu3 }
0x21bd   :  { %v3986_v45 = vadd.f32 %v5142_v28, %v3985_v62  ;;  %v4372_v62 = vld [vmem:[%s4579_s10 + $0x38] sm:$0xff] }
0x21be   :  { %4397 = vmatpush.msra.mxu2 %v4372_v62 }
0x21bf   :  { %v3991_v43 = vmul.f32 %v3986_v45, %v3986_v45 }
0x21c1   :  { %v3993_v4 = vmul.f32 %v3991_v43, %v3986_v45 }
0x21c3   :  { %v3995_v8 = vmul.f32 0.044715, %v3993_v4 }
0x21c4   :  { %v3988_v26 = vpop.f32.mrf.mxu3 }
0x21c5   :  { %v3997_v17 = vadd.f32 %v3995_v8, %v3986_v45  ;;  %v3989_v19 = vadd.f32 %v5142_v28, %v3988_v26  ;;  %v4368_v8 = vld [vmem:[%s4579_s10 + $0x18] sm:$0xff] }
0x21c7   :  { %v3999_v10 = vmul.f32 0.7978846, %v3997_v17  ;;  %v3992_v31 = vmul.f32 %v3989_v19, %v3989_v19 }
0x21c9   :  { %5323 = vtanh.f32 %v3999_v10  ;;  %v3994_v27 = vmul.f32 %v3992_v31, %v3989_v19 }
0x21cb   :  { %v3996_v12 = vmul.f32 0.044715, %v3994_v27  ;;  %v4365_v27 = vld [vmem:[%s4579_s10] sm:$0xff] }
0x21cc   :  { %v4159_v32 = vpop.f32.mrf.mxu3 }
0x21cd   :  { %v3998_v18 = vadd.f32 %v3996_v12, %v3989_v19  ;;  %v4160_v20 = vadd.f32 %v5143_v35, %v4159_v32 }
0x21cf   :  { %v5324_v14 = vpop.eup %5323  ;;  %v4000_v56 = vmul.f32 0.7978846, %v3998_v18 }
0x21d0   :  { %v4003_v30 = vadd.f32 1.0, %v5324_v14 }
0x21d1   :  { %5325 = vtanh.f32 %v4000_v56 }
0x21d2   :  { %v4005_v23 = vmul.f32 0.5, %v4003_v30  ;;  %v5146_v30 = vld [vmem:[%s6637_s1] ss:$0 sm:$0xff] }
0x21d4   :  { %v4007_v6 = vmul.f32 %v4005_v23, %v3986_v45  ;;  %v4162_v47 = vpop.f32.mrf.mxu3  ;;  %v4370_v45 = vld [vmem:[%s4579_s10 + $0x28] sm:$0xff] }
0x21d5   :  { %v4163_v33 = vadd.f32 %v5143_v35, %v4162_v47 }
0x21d6   :  { %5010 = vmatmul.msk.f32.vlgmr.msra.gmra.mxu0 %vm244_vm1, %v4007_v6 }
0x21d7   :  { %v5326_v54 = vpop.eup %5325 }
0x21d8   :  { %v4004_v44 = vadd.f32 1.0, %v5326_v54 }
0x21da   :  { %v4006_v48 = vmul.f32 0.5, %v4004_v44  ;;  %v5147_v44 = vld [vmem:[%s6642_s6] ss:$0 sm:$0xff] }
0x21dc   :  { %v4008_v34 = vmul.f32 %v4006_v48, %v3989_v19  ;;  %v4165_v39 = vpop.f32.mrf.mxu3  ;;  %v4366_v19 = vld [vmem:[%s4579_s10 + $0x8] sm:$0xff] }
0x21dd   :  { %v4166_v13 = vadd.f32 %v5143_v35, %v4165_v39 }
0x21de   :  { %5011 = vmatmul.msk.f32.gmra.mxu0 %vm244_vm1, %v4008_v34  ;;  %vm4092_vm1 = vcmask 64512  }
0x21e4   :  { %v4168_v63 = vpop.f32.mrf.mxu3 }
0x21e5   :  { %v4169_v38 = vadd.f32 %v5143_v35, %v4168_v63 }
0x21e6   :  { %5024 = vmatmul.msk.f32.vlgmr.msrb.gmra.mxu0 %vm1193_vm13, %v4160_v20 }
0x21ee   :  { %5025 = vmatmul.msk.f32.gmra.mxu0 %vm1193_vm13, %v4163_v33 }
0x21f6   :  { %5026 = vmatmul.msk.f32.gmra.mxu0 %vm1193_vm13, %v4166_v13 }
0x21fe   :  { %5027 = vmatmul.msk.f32.gmra.mxu0 %vm1193_vm13, %v4169_v38 }
0x2253   :  { %v4040_v1 = vpop.f32.mrf.mxu0 }
0x2254   :  { %v4041_v36 = vadd.f32 %v5145_v41, %v4040_v1 }
0x225b   :  { %v4043_v16 = vpop.f32.mrf.mxu0 }
0x225c   :  { %v4044_v37 = vadd.f32 %v5145_v41, %v4043_v16 }
0x225e   :  { %4076 = vmatpush.msrb.mxu1 %v4044_v37 }
0x2260   :  { %4077 = vmatpush.msrb.mxu1 %v4041_v36 }
0x2261   :  { %5012 = vmatmul.msk.f32.vlgmr.msrb.gmra.mxu1 %vm481_vm15, %v4046_v46 }
0x2262   :  { %4248 = vmatpush.msra.mxu1 %v6607_v22 }
0x2263   :  { %v4208_v51 = vpop.f32.mrf.mxu0 }
0x2264   :  { %4249 = vmatpush.msra.mxu1 %v6609_v0  ;;  %v6645_v52 = vsub.f32 %v4160_v20, %v4208_v51 }
0x2266   :  { %4250 = vmatpush.msra.mxu1 %v6612_v3  ;;  %v4224_v29 = vmul.f32 %v6645_v52, %v6645_v52 }
0x2268   :  { %4251 = vmatpush.msra.mxu1 %v4175_v59  ;;  %v4371_v59 = vld [vmem:[%s4579_s10 + $0x30] sm:$0xff] }
0x2269   :  { %5013 = vmatmul.msk.f32.gmra.mxu1 %vm481_vm15, %v4047_v49  ;;  %4398 = vmatpush.msra.mxu2 %v4371_v59 }
0x226a   :  { %4252 = vmatpush.msra.mxu1 %v4174_v2 }
0x226b   :  { %v4211_v53 = vpop.f32.mrf.mxu0  ;;  %4399 = vmatpush.msra.mxu2 %v4370_v45 }
0x226c   :  { %4253 = vmatpush.msra.mxu1 %v4173_v61  ;;  %v6650_v50 = vsub.f32 %v4163_v33, %v4211_v53  ;;  %v4369_v61 = vld [vmem:[%s4579_s10 + $0x20] sm:$0xff] }
0x226d   :  { %4400 = vmatpush.msra.mxu2 %v4369_v61 }
0x226e   :  { %4254 = vmatpush.msra.mxu1 %v4172_v42  ;;  %v4225_v58 = vmul.f32 %v6650_v50, %v6650_v50 }
0x226f   :  { %4401 = vmatpush.msra.mxu2 %v4368_v8 }
0x2270   :  { %4255 = vmatpush.msra.mxu1 %v4171_v55  ;;  %v4367_v55 = vld [vmem:[%s4579_s10 + $0x10] sm:$0xff] }
0x2271   :  { %5014 = vmatmul.msk.f32.gmra.mxu1 %vm481_vm15, %v4048_v24  ;;  %4402 = vmatpush.msra.mxu2 %v4367_v55 }
0x2273   :  { %v4214_v57 = vpop.f32.mrf.mxu0  ;;  %4403 = vmatpush.msra.mxu2 %v4366_v19 }
0x2274   :  { %v6655_v7 = vsub.f32 %v4166_v13, %v4214_v57 }
0x2275   :  { %4404 = vmatpush.msra.mxu2 %v4365_v27 }
0x2276   :  { %v4226_v21 = vmul.f32 %v6655_v7, %v6655_v7 }
0x2279   :  { %5015 = vmatmul.msk.f32.gmra.mxu1 %vm481_vm15, %v4049_v40 }
0x227b   :  { %v4217_v25 = vpop.f32.mrf.mxu0 }
0x227c   :  { %v6660_v60 = vsub.f32 %v4169_v38, %v4217_v25 }
0x227e   :  { %v4227_v5 = vmul.f32 %v6660_v60, %v6660_v60 }
0x2281   :  { %5028 = vmatmul.msk.f32.vlgmr.msra.gmra.mxu1 %vm1193_vm13, %v4224_v29 }
0x2289   :  { %5029 = vmatmul.msk.f32.gmra.mxu1 %vm1193_vm13, %v4225_v58 }
0x2291   :  { %5030 = vmatmul.msk.f32.gmra.mxu1 %vm1193_vm13, %v4226_v21 }
0x2299   :  { %5031 = vmatmul.msk.f32.gmra.mxu1 %vm1193_vm13, %v4227_v5 }
0x22de   :  { %v4079_v11 = vpop.f32.mrf.mxu1 }
0x22df   :  { %5016 = vmatmul.msk.f32.vlgmr.msrb.gmra.mxu2 %vm4092_vm1, %v4079_v11 }
0x22e6   :  { %v4082_v15 = vpop.f32.mrf.mxu1 }
0x22e7   :  { %5017 = vmatmul.msk.f32.gmra.mxu2 %vm4092_vm1, %v4082_v15 }
0x22ee   :  { %v4085_v22 = vpop.f32.mrf.mxu1 }
0x22ef   :  { %5018 = vmatmul.msk.f32.gmra.mxu2 %vm4092_vm1, %v4085_v22 }
0x22f6   :  { %v4088_v0 = vpop.f32.mrf.mxu1 }
0x22f7   :  { %5019 = vmatmul.msk.f32.gmra.mxu2 %vm4092_vm1, %v4088_v0 }
0x22fe   :  { %v4257_v3 = vpop.f32.mrf.mxu1 }
0x22ff   :  { %v4258_v28 = vadd.f32 1e-06, %v4257_v3 }
0x2301   :  { %5327 = vrsqrt.f32 %v4258_v28  ;;  %vm4275_vm10 = vweird.f32 %v4258_v28 }
0x2306   :  { %v4260_v2 = vpop.f32.mrf.mxu1 }
0x2307   :  { %v5328_v43 = vpop.eup %5327  ;;  %v4261_v42 = vadd.f32 1e-06, %v4260_v2 }
0x2308   :  { %v4270_v4 = vmul.f32 %v5328_v43, %v4258_v28  ;;  %vm4276_vm9 = vweird.f32 %v5328_v43 }
0x2309   :  { %5329 = vrsqrt.f32 %v4261_v42  ;;  %vm4277_vm11 = vmor %vm4275_vm10, %vm4276_vm9  ;;  %vm4285_vm14 = vweird.f32 %v4261_v42 }
0x230a   :  { %v4271_v26 = vmul.f32 %v5328_v43, %v4270_v4 }
0x230c   :  { %v4272_v17 = vmul.f32 0.5, %v4271_v26 }
0x230e   :  { %v4273_v10 = vsub.f32 1.5, %v4272_v17  ;;  %v4263_v31 = vpop.f32.mrf.mxu1 }
0x230f   :  { %v5330_v12 = vpop.eup %5329  ;;  %v4264_v18 = vadd.f32 1e-06, %v4263_v31 }
0x2310   :  { %v4274_v14 = vmul.f32 %v5328_v43, %v4273_v10  ;;  %v4280_v56 = vmul.f32 %v5330_v12, %v4261_v42  ;;  %vm4286_vm12 = vweird.f32 %v5330_v12 }
0x2311   :  { %5331 = vrsqrt.f32 %v4264_v18  ;;  %vm4287_vm0 = vmor %vm4285_vm14, %vm4286_vm12  ;;  %vm4295_vm3 = vweird.f32 %v4264_v18 }
0x2312   :  { %v4278_v23 = vsel %vm4277_vm11, %v5328_v43, %v4274_v14  ;;  %v4281_v6 = vmul.f32 %v5330_v12, %v4280_v56 }
0x2313   :  { %v4309_v54 = vmul.f32 %v4278_v23, %v6645_v52 }
0x2314   :  { %v4282_v48 = vmul.f32 0.5, %v4281_v6 }
0x2315   :  { %v4317_v32 = vmul.f32 %v5146_v30, %v4309_v54 }
0x2316   :  { %v4283_v34 = vsub.f32 1.5, %v4282_v48  ;;  %v4266_v35 = vpop.f32.mrf.mxu1 }
0x2317   :  { %v5332_v20 = vpop.eup %5331  ;;  %v4325_v47 = vadd.f32 %v5147_v44, %v4317_v32  ;;  %v4267_v33 = vadd.f32 1e-06, %v4266_v35  ;;  %v4514_v35 = vld [vmem:[%s6689_s19 + $0x78] sm:$0xff] }
0x2318   :  { %v4284_v39 = vmul.f32 %v5330_v12, %v4283_v34  ;;  %v4290_v13 = vmul.f32 %v5332_v20, %v4264_v18  ;;  %vm4296_vm2 = vweird.f32 %v5332_v20  ;;  %4515 = vmatpush.msra.mxu0 %v4514_v35 }
0x2319   :  { %v4329_v63 = vmul.f32 %v4325_v47, %v4325_v47  ;;  %5333 = vrsqrt.f32 %v4267_v33  ;;  %vm4297_vm4 = vmor %vm4295_vm3, %vm4296_vm2  ;;  %vm4305_vm6 = vweird.f32 %v4267_v33 }
0x231a   :  { %v4288_v38 = vsel %vm4287_vm0, %v5330_v12, %v4284_v39  ;;  %v4291_v1 = vmul.f32 %v5332_v20, %v4290_v13  ;;  %v4511_v13 = vld [vmem:[%s6689_s19 + $0x60] sm:$0xff] }
0x231b   :  { %v4333_v41 = vmul.f32 %v4329_v63, %v4325_v47  ;;  %v4310_v16 = vmul.f32 %v4288_v38, %v6650_v50  ;;  %v4510_v63 = vld [vmem:[%s6689_s19 + $0x58] sm:$0xff]  ;;  %v4509_v38 = vld [vmem:[%s6689_s19 + $0x50] sm:$0xff] }
0x231c   :  { %v4292_v37 = vmul.f32 0.5, %v4291_v1  ;;  %v4508_v1 = vld [vmem:[%s6689_s19 + $0x48] sm:$0xff] }
0x231d   :  { %v4337_v36 = vmul.f32 0.044715, %v4333_v41  ;;  %v4318_v46 = vmul.f32 %v5146_v30, %v4310_v16  ;;  %v4507_v41 = vld [vmem:[%s6689_s19 + $0x40] sm:$0xff] }
0x231e   :  { %v4293_v49 = vsub.f32 1.5, %v4292_v37  ;;  %v4506_v37 = vld [vmem:[%s6689_s19 + $0x38] sm:$0xff] }
0x231f   :  { %v5334_v24 = vpop.eup %5333  ;;  %v4341_v51 = vadd.f32 %v4337_v36, %v4325_v47  ;;  %v4326_v40 = vadd.f32 %v5147_v44, %v4318_v46  ;;  %v4505_v36 = vld [vmem:[%s6689_s19 + $0x30] sm:$0xff]  ;;  %v4504_v46 = vld [vmem:[%s6689_s19 + $0x28] sm:$0xff] }
0x2320   :  { %v4294_v52 = vmul.f32 %v5332_v20, %v4293_v49  ;;  %v4300_v53 = vmul.f32 %v5334_v24, %v4267_v33  ;;  %vm4306_vm5 = vweird.f32 %v5334_v24  ;;  %v4512_v33 = vld [vmem:[%s6689_s19 + $0x68] sm:$0xff]  ;;  %v4503_v49 = vld [vmem:[%s6689_s19 + $0x20] sm:$0xff] }
0x2321   :  { %v4345_v29 = vmul.f32 0.7978846, %v4341_v51  ;;  %v4330_v57 = vmul.f32 %v4326_v40, %v4326_v40  ;;  %vm4307_vm7 = vmor %vm4305_vm6, %vm4306_vm5 }
0x2322   :  { %v4298_v58 = vsel %vm4297_vm4, %v5332_v20, %v4294_v52  ;;  %v4301_v21 = vmul.f32 %v5334_v24, %v4300_v53  ;;  %v4500_v52 = vld [vmem:[%s6689_s19 + $0x8] sm:$0xff]  ;;  %v4499_v53 = vld [vmem:[%s6689_s19] sm:$0xff] }
0x2323   :  { %v4311_v25 = vmul.f32 %v4298_v58, %v6655_v7  ;;  %5335 = vtanh.f32 %v4345_v29  ;;  %v4334_v50 = vmul.f32 %v4330_v57, %v4326_v40  ;;  %v5148_v29 = vld [vmem:[%s6674_s29] ss:$0 sm:$0xff] }
0x2324   :  { %v4302_v5 = vmul.f32 0.5, %v4301_v21 }
0x2325   :  { %v4319_v9 = vmul.f32 %v5146_v30, %v4311_v25  ;;  %v4338_v11 = vmul.f32 0.044715, %v4334_v50 }
0x2326   :  { %v4303_v15 = vsub.f32 1.5, %v4302_v5 }
0x2327   :  { %v4327_v22 = vadd.f32 %v5147_v44, %v4319_v9  ;;  %v4342_v0 = vadd.f32 %v4338_v11, %v4326_v40 }
0x2328   :  { %v4304_v3 = vmul.f32 %v5334_v24, %v4303_v15 }
0x2329   :  { %v5336_v28 = vpop.eup %5335  ;;  %v4346_v62 = vmul.f32 0.7978846, %v4342_v0  ;;  %v4331_v59 = vmul.f32 %v4327_v22, %v4327_v22 }
0x232a   :  { %v4308_v45 = vsel %vm4307_vm7, %v5334_v24, %v4304_v3  ;;  %v4353_v2 = vadd.f32 1.0, %v5336_v28  ;;  %v4502_v24 = vld [vmem:[%s6689_s19 + $0x18] sm:$0xff]  ;;  %v4479_v3 = vpop.f32.mrf.mxu3 }
0x232b   :  { %v4312_v61 = vmul.f32 %v4308_v45, %v6660_v60  ;;  %5337 = vtanh.f32 %v4346_v62  ;;  %v4335_v7 = vmul.f32 %v4331_v59, %v4327_v22 }
0x232c   :  { %v4357_v43 = vmul.f32 0.5, %v4353_v2 }
0x232d   :  { %v4320_v42 = vmul.f32 %v5146_v30, %v4312_v61  ;;  %v4339_v4 = vmul.f32 0.044715, %v4335_v7 }
0x232e   :  { %v4361_v8 = vmul.f32 %v4357_v43, %v4325_v47  ;;  %v4513_v47 = vld [vmem:[%s6689_s19 + $0x70] sm:$0xff]  ;;  %v5144_v43 = vld [vmem:[%s6586_s17] ss:$0 sm:$0xff]  ;;  %s5402_s17 = smov 43  }
0x232f   :  { %v4328_v26 = vadd.f32 %v5147_v44, %v4320_v42  ;;  %v4343_v55 = vadd.f32 %v4339_v4, %v4327_v22  ;;  %4516 = vmatpush.msra.mxu0 %v4513_v47  ;;  %s4594_s5 = sld [smem:[%s6728_s0 + %s5402_s17]]  }
0x2330   :  { %5032 = vmatmul.msk.f32.vlgmr.msra.gmra.mxu2 %vm1193_vm13, %v4361_v8 }
0x2331   :  { %v5338_v17 = vpop.eup %5337  ;;  %v4347_v19 = vmul.f32 0.7978846, %v4343_v55  ;;  %v4332_v10 = vmul.f32 %v4328_v26, %v4328_v26  ;;  %4517 = vmatpush.msra.mxu0 %v4512_v33  ;;  %v4480_v55 = vadd.f32 %v5144_v43, %v4479_v3 }
0x2332   :  { %v4354_v31 = vadd.f32 1.0, %v5338_v17 }
0x2333   :  { %5339 = vtanh.f32 %v4347_v19  ;;  %v4336_v27 = vmul.f32 %v4332_v10, %v4328_v26  ;;  %4518 = vmatpush.msra.mxu0 %v4511_v13  ;;  %v4482_v10 = vpop.f32.mrf.mxu3 }
0x2334   :  { %v4358_v12 = vmul.f32 0.5, %v4354_v31 }
0x2335   :  { %v4340_v18 = vmul.f32 0.044715, %v4336_v27  ;;  %4519 = vmatpush.msra.mxu0 %v4510_v63 }
0x2336   :  { %v4362_v14 = vmul.f32 %v4358_v12, %v4326_v40  ;;  %v4501_v40 = vld [vmem:[%s6689_s19 + $0x10] sm:$0xff] }
0x2337   :  { %v4344_v60 = vadd.f32 %v4340_v18, %v4328_v26  ;;  %4520 = vmatpush.msra.mxu0 %v4509_v38 }
0x2338   :  { %5033 = vmatmul.msk.f32.gmra.mxu2 %vm1193_vm13, %v4362_v14 }
0x2339   :  { %v5340_v56 = vpop.eup %5339  ;;  %v4348_v30 = vmul.f32 0.7978846, %v4344_v60  ;;  %4521 = vmatpush.msra.mxu0 %v4508_v1 }
0x233a   :  { %v4355_v23 = vadd.f32 1.0, %v5340_v56 }
0x233b   :  { %5341 = vtanh.f32 %v4348_v30  ;;  %4522 = vmatpush.msra.mxu0 %v4507_v41  ;;  %v4485_v47 = vpop.f32.mrf.mxu3 }
0x233c   :  { %v4359_v6 = vmul.f32 0.5, %v4355_v23 }
0x233d   :  { %4523 = vmatpush.msra.mxu0 %v4506_v37 }
0x233e   :  { %v4363_v54 = vmul.f32 %v4359_v6, %v4327_v22 }
0x233f   :  { %4524 = vmatpush.msra.mxu0 %v4505_v36 }
0x2340   :  { %5034 = vmatmul.msk.f32.gmra.mxu2 %vm1193_vm13, %v4363_v54 }
0x2341   :  { %v5342_v44 = vpop.eup %5341  ;;  %4525 = vmatpush.msra.mxu0 %v4504_v46 }
0x2342   :  { %v4356_v48 = vadd.f32 1.0, %v5342_v44  ;;  %v4483_v44 = vadd.f32 %v5144_v43, %v4482_v10 }
0x2343   :  { %4526 = vmatpush.msra.mxu0 %v4503_v49  ;;  %v4488_v49 = vpop.f32.mrf.mxu3 }
0x2344   :  { %v4360_v32 = vmul.f32 0.5, %v4356_v48 }
0x2345   :  { %4527 = vmatpush.msra.mxu0 %v4502_v24 }
0x2346   :  { %v4364_v34 = vmul.f32 %v4360_v32, %v4328_v26 }
0x2347   :  { %4528 = vmatpush.msra.mxu0 %v4501_v40  ;;  %v4489_v40 = vadd.f32 %v5144_v43, %v4488_v49 }
0x2348   :  { %5035 = vmatmul.msk.f32.gmra.mxu2 %vm1193_vm13, %v4364_v34 }
0x2349   :  { %4529 = vmatpush.msra.mxu0 %v4500_v52 }
0x234b   :  { %4530 = vmatpush.msra.mxu0 %v4499_v53 }
0x2362   :  { %v6692_v20 = vpop.f32.mrf.mxu2 }
0x236a   :  { %v6696_v39 = vpop.f32.mrf.mxu2 }
0x2372   :  { %v6703_v16 = vpop.f32.mrf.mxu2 }
0x237a   :  { %v6710_v51 = vpop.f32.mrf.mxu2 }
0x23b3   :  { %v4406_v57 = vpop.f32.mrf.mxu2 }
0x23b4   :  { %v4407_v58 = vadd.f32 %v5148_v29, %v4406_v57 }
0x23b6   :  { %v4418_v21 = vmul.f32 %v4407_v58, %v4407_v58 }
0x23b8   :  { %v4422_v25 = vmul.f32 %v4418_v21, %v4407_v58 }
0x23ba   :  { %v4426_v50 = vmul.f32 0.044715, %v4422_v25 }
0x23bb   :  { %v4409_v5 = vpop.f32.mrf.mxu2 }
0x23bc   :  { %v4430_v9 = vadd.f32 %v4426_v50, %v4407_v58  ;;  %v4410_v11 = vadd.f32 %v5148_v29, %v4409_v5 }
0x23be   :  { %v4434_v15 = vmul.f32 0.7978846, %v4430_v9  ;;  %v4419_v22 = vmul.f32 %v4410_v11, %v4410_v11 }
0x23c0   :  { %5343 = vtanh.f32 %v4434_v15  ;;  %v4423_v0 = vmul.f32 %v4419_v22, %v4410_v11 }
0x23c2   :  { %v4427_v28 = vmul.f32 0.044715, %v4423_v0 }
0x23c3   :  { %v4412_v62 = vpop.f32.mrf.mxu2 }
0x23c4   :  { %v4431_v59 = vadd.f32 %v4427_v28, %v4410_v11  ;;  %v4413_v45 = vadd.f32 %v5148_v29, %v4412_v62 }
0x23c6   :  { %v5344_v2 = vpop.eup %5343  ;;  %v4435_v61 = vmul.f32 0.7978846, %v4431_v59  ;;  %v4420_v7 = vmul.f32 %v4413_v45, %v4413_v45 }
0x23c7   :  { %v4442_v42 = vadd.f32 1.0, %v5344_v2 }
0x23c8   :  { %5345 = vtanh.f32 %v4435_v61  ;;  %v4424_v4 = vmul.f32 %v4420_v7, %v4413_v45 }
0x23c9   :  { %v4446_v8 = vmul.f32 0.5, %v4442_v42 }
0x23ca   :  { %v4428_v26 = vmul.f32 0.044715, %v4424_v4 }
0x23cb   :  { %v4450_v17 = vmul.f32 %v4446_v8, %v4407_v58  ;;  %v4415_v19 = vpop.f32.mrf.mxu2 }
0x23cc   :  { %v4432_v31 = vadd.f32 %v4428_v26, %v4413_v45  ;;  %v4416_v27 = vadd.f32 %v5148_v29, %v4415_v19 }
0x23cd   :  { %v4491_v12 = vadd.f32 %v4480_v55, %v4450_v17 }
0x23ce   :  { %v5346_v18 = vpop.eup %5345  ;;  %v4436_v14 = vmul.f32 0.7978846, %v4432_v31  ;;  %v4421_v60 = vmul.f32 %v4416_v27, %v4416_v27 }
0x23cf   :  { %v4495_v56 = vmul.f32 %v4491_v12, %v6692_v20  ;;  %v4443_v30 = vadd.f32 1.0, %v5346_v18  ;;  %v4486_v20 = vadd.f32 %v5144_v43, %v4485_v47 }
0x23d0   :  { %5347 = vtanh.f32 %v4436_v14  ;;  %v4425_v23 = vmul.f32 %v4421_v60, %v4416_v27 }
0x23d1   :  { %4531 = vmatmul.f32.vlgmr.msra.gmra.mxu0 %v4495_v56  ;;  %v4447_v6 = vmul.f32 0.5, %v4443_v30 }
0x23d2   :  { %v4429_v54 = vmul.f32 0.044715, %v4425_v23 }
0x23d3   :  { %v4451_v48 = vmul.f32 %v4447_v6, %v4410_v11 }
0x23d4   :  { %v4433_v32 = vadd.f32 %v4429_v54, %v4416_v27 }
0x23d5   :  { %v4492_v34 = vadd.f32 %v4483_v44, %v4451_v48 }
0x23d6   :  { %v5348_v35 = vpop.eup %5347  ;;  %v4437_v33 = vmul.f32 0.7978846, %v4433_v32 }
0x23d7   :  { %v4496_v13 = vmul.f32 %v4492_v34, %v6696_v39  ;;  %v4444_v63 = vadd.f32 1.0, %v5348_v35 }
0x23d8   :  { %5349 = vtanh.f32 %v4437_v33 }
0x23d9   :  { %4534 = vmatmul.f32.gmra.mxu0 %v4496_v13  ;;  %v4448_v38 = vmul.f32 0.5, %v4444_v63 }
0x23db   :  { %v4452_v1 = vmul.f32 %v4448_v38, %v4413_v45 }
0x23dd   :  { %v4493_v41 = vadd.f32 %v4486_v20, %v4452_v1 }
0x23de   :  { %v5350_v37 = vpop.eup %5349 }
0x23df   :  { %v4497_v36 = vmul.f32 %v4493_v41, %v6703_v16  ;;  %v4445_v46 = vadd.f32 1.0, %v5350_v37 }
0x23e1   :  { %4537 = vmatmul.f32.gmra.mxu0 %v4497_v36  ;;  %v4449_v24 = vmul.f32 0.5, %v4445_v46 }
0x23e3   :  { %v4453_v52 = vmul.f32 %v4449_v24, %v4416_v27 }
0x23e5   :  { %v4494_v53 = vadd.f32 %v4489_v40, %v4453_v52 }
0x23e7   :  { %v4498_v29 = vmul.f32 %v4494_v53, %v6710_v51 }
0x23e9   :  { %4540 = vmatmul.f32.gmra.mxu0 %v4498_v29 }
0x244e   :  { %v4532_v39 = vpop.f32.mrf.mxu0 }
0x244f   :  { %4544 = vst.msk [vmem:[%s4594_s5] sm:$0xff] %vm481_vm15, %v4532_v39 }
0x2456   :  { %v4535_v57 = vpop.f32.mrf.mxu0 }
0x2457   :  { %4545 = vst.msk [vmem:[%s4594_s5 + $0x8] sm:$0xff] %vm481_vm15, %v4535_v57 }
0x245e   :  { %v4538_v16 = vpop.f32.mrf.mxu0 }
0x245f   :  { %4546 = vst.msk [vmem:[%s4594_s5 + $0x10] sm:$0xff] %vm481_vm15, %v4538_v16 }
0x2466   :  { %v4541_v58 = vpop.f32.mrf.mxu0 }
0x2467   :  { %4547 = vst.msk [vmem:[%s4594_s5 + $0x18] sm:$0xff] %vm481_vm15, %v4541_v58 }

</bundles_post_ra>
